<compile_context>
chip_gen: v7x
topology: tpu7x:2x2x1
jax: 0.10.0
libtpu: 0.0.40
codegen_flags: <defaults>
</compile_context>

<pallas_src>
import functools
from collections import namedtuple

import jax
import jax.numpy as jnp
from jax.experimental import pallas as pl
from jax.experimental.pallas import tpu as pltpu

Genotype = namedtuple("Genotype", "normal normal_concat reduce reduce_concat")

# Concrete genotype chosen for this synthetic kernel (normal cell only).
GENO = Genotype(
    normal=[("sep_conv_3x3", 0), ("max_pool_3x3", 1),
            ("skip_connect", 0), ("sep_conv_3x3", 1),
            ("avg_pool_3x3", 2), ("skip_connect", 1),
            ("sep_conv_3x3", 3), ("max_pool_3x3", 2)],
    normal_concat=[2, 3, 4, 5],
    reduce=[], reduce_concat=[2, 3, 4, 5],
)
BN_EPS = 1e-5


def _build_plan(genotype):
    """Static per-op plan: (op_name, src_state_idx, slots).

    slots for sep_conv_3x3 = (dw1, dw2, pw1, pw2) indices into the packed
    depthwise / pointwise weight stacks; the BN-shift slot for pointwise k is
    k + 2 (slots 0 and 1 are preprocess0 / preprocess1).
    """
    plan = []
    n_sep = 0
    for name, idx in genotype.normal:
        if name == "sep_conv_3x3":
            slots = (2 * n_sep, 2 * n_sep + 1, 2 * n_sep, 2 * n_sep + 1)
            n_sep += 1
        else:
            slots = None
        plan.append((name, idx, slots))
    return tuple(plan)


# ------------------------------ fused kernel --------------------------------

def _cell_kernel(s0_ref, s1_ref, wpre0_ref, wpre1_ref, wpw_ref, dwt_ref,
                 sh_ref, rc_ref, o_ref, *, H, W, C, nb, plan, concat):
    WC = W * C
    Hn = nb * H                       # stacked image rows in this block
    f32 = jnp.float32
    bf16 = jnp.bfloat16

    # ---- combined halo-validity masks (built once per grid step) ----------
    lane = jax.lax.broadcasted_iota(jnp.int32, (Hn, WC), 1)
    row = jax.lax.broadcasted_iota(jnp.int32, (Hn, WC), 0) % H   # row in image
    col_m = {-1: lane >= C, 0: None, 1: lane < (W - 1) * C}
    row_m = {-1: row >= 1, 0: None, 1: row < (H - 1)}
    tap_mask = {}
    for dy in (-1, 0, 1):
        for dx in (-1, 0, 1):
            mr, mc = row_m[dy], col_m[dx]
            if mr is None:
                tap_mask[(dy, dx)] = mc
            elif mc is None:
                tap_mask[(dy, dx)] = mr
            else:
                tap_mask[(dy, dx)] = jnp.logical_and(mr, mc)

    def neighborhood(x):
        # Factored 3x3 shifts: 2 column rolls + 6 row rolls (XLU slot).
        # taps[(dy, dx)][i, j*C + c] == x[i + dy, (j + dx)*C + c] (pre-mask).
        cols = {0: x,
                -1: pltpu.roll(x, shift=C, axis=1),
                1: pltpu.roll(x, shift=WC - C, axis=1)}
        taps = {}
        for dx, xc in cols.items():
            taps[(0, dx)] = xc
            taps[(-1, dx)] = pltpu.roll(xc, shift=1, axis=0)
            taps[(1, dx)] = pltpu.roll(xc, shift=Hn - 1, axis=0)
        return taps

    def dw3x3(x, dw_slot):
        # depthwise 3x3, stride 1, zero padding 1 (masked fill == zero pad).
        taps = neighborhood(x)
        acc = taps[(0, 0)] * dwt_ref[dw_slot, 4]
        for dy in (-1, 0, 1):
            for dx in (-1, 0, 1):
                if dy == 0 and dx == 0:
                    continue
                k = (dy + 1) * 3 + (dx + 1)
                v = jnp.where(tap_mask[(dy, dx)], taps[(dy, dx)], 0.0)
                acc = acc + v * dwt_ref[dw_slot, k]
        return acc

    def sep_half(x, dw_slot, pw_slot):
        # ReLU -> depthwise 3x3 -> pointwise 1x1 (block-diag bf16 MXU matmul,
        # BN scale pre-folded into the weight) -> BN shift.
        h = dw3x3(jnp.maximum(x, 0.0), dw_slot)
        h = jnp.dot(h.astype(bf16), wpw_ref[pw_slot],
                    preferred_element_type=f32)
        return h + sh_ref[pw_slot + 2]

    # ---- preprocess0 / preprocess1 : ReLU -> 1x1 conv (bf16 MXU) -> BN ----
    x0 = jnp.maximum(s0_ref[...], 0.0).astype(bf16)
    s0 = jnp.dot(x0, wpre0_ref[...], preferred_element_type=f32) + sh_ref[0]
    x1 = jnp.maximum(s1_ref[...], 0.0).astype(bf16)
    s1 = jnp.dot(x1, wpre1_ref[...], preferred_element_type=f32) + sh_ref[1]

    states = [s0, s1]
    pool_taps = {}        # shared rolled neighborhoods, keyed by state index

    def get_pool_taps(idx):
        if idx not in pool_taps:
            pool_taps[idx] = neighborhood(states[idx])
        return pool_taps[idx]

    def max_pool(idx):
        taps = get_pool_taps(idx)
        out = taps[(0, 0)]
        for dy in (-1, 0, 1):
            for dx in (-1, 0, 1):
                if dy == 0 and dx == 0:
                    continue
                out = jnp.maximum(
                    out, jnp.where(tap_mask[(dy, dx)], taps[(dy, dx)], -jnp.inf))
        return out

    def avg_pool(idx):
        taps = get_pool_taps(idx)
        acc = taps[(0, 0)]
        for dy in (-1, 0, 1):
            for dx in (-1, 0, 1):
                if dy == 0 and dx == 0:
                    continue
                acc = acc + jnp.where(tap_mask[(dy, dx)], taps[(dy, dx)], 0.0)
        return acc * rc_ref[...]       # count_include_pad=False divisor

    def apply_op(name, idx, slots):
        if name == "sep_conv_3x3":
            dw1, dw2, pw1, pw2 = slots
            h = sep_half(states[idx], dw1, pw1)
            return sep_half(h, dw2, pw2)
        if name == "skip_connect":
            return states[idx]         # Identity (stride 1 in a normal cell)
        if name == "max_pool_3x3":
            return max_pool(idx)
        if name == "avg_pool_3x3":
            return avg_pool(idx)
        raise ValueError(name)

    for i in range(len(plan) // 2):
        n1, i1, sl1 = plan[2 * i]
        n2, i2, sl2 = plan[2 * i + 1]
        states.append(apply_op(n1, i1, sl1) + apply_op(n2, i2, sl2))

    # channel concat: one lane-dense (Hn, WC) slab per concatenated state
    for q, idx in enumerate(concat):
        o_ref[q] = states[idx]


# --------------------------- parameter packing -------------------------------

def _pack_params(params, W, C):
    f32, bf16 = jnp.float32, jnp.bfloat16
    eye_w = jnp.eye(W, dtype=f32)

    def blockdiag(w, scale):
        # Fold the BN scale into the output columns, then kron(I_W, w); bf16.
        wf = w.astype(f32) * scale.astype(f32)[None, :]
        return jnp.kron(eye_w, wf).astype(bf16)     # (W*Cin, W*Cout)

    def tile_vec(v):             # (C,) -> (1, W*C), per-pixel channel tiling
        return jnp.tile(v.astype(f32), W).reshape(1, W * C)

    pre0_w, pre0_s, pre0_b = params["pre0"]
    pre1_w, pre1_s, pre1_b = params["pre1"]
    wpre0 = blockdiag(pre0_w, pre0_s)
    wpre1 = blockdiag(pre1_w, pre1_s)
    sh = [tile_vec(pre0_b), tile_vec(pre1_b)]
    wpw, dwt = [], []
    for p in params["ops"]:
        if p is None:
            continue
        for dk, pk, sk, bk in (("dw1", "pw1", "s1", "b1"),
                               ("dw2", "pw2", "s2", "b2")):
            dwt.append(jnp.tile(p[dk].astype(f32).reshape(9, C), (1, W))
                       .reshape(9, 1, W * C))
            wpw.append(blockdiag(p[pk], p[sk]))
            sh.append(tile_vec(p[bk]))
    return wpre0, wpre1, jnp.stack(wpw), jnp.stack(dwt), jnp.stack(sh)


# ------------------------------ Cell forward ---------------------------------

def _cell_forward_lane_dense(s0_ld, s1_ld, params, *, H, W,
                             images_per_step=None):
    """Lane-dense entry point (chaining-friendly, no NCHW round trip).

    s0_ld / s1_ld: (N, H, W*Cin) activations.
    Returns (nc, N*H, W*C): one lane-dense slab per concatenated state.
    """
    N = s0_ld.shape[0]
    WC_pp = s0_ld.shape[2]
    WC_p = s1_ld.shape[2]
    C = params["pre0"][0].shape[1]
    nc = len(GENO.normal_concat)
    WC = W * C

    # NOTE(v7x): pick images_per_step <= N // 2 to keep >= 2 parallel grid
    # steps (2 TensorCores); default batches everything (best on v5e/v6e).
    nb = images_per_step if images_per_step is not None else min(N, 8)
    assert N % nb == 0, "batch must be divisible by images_per_step"
    assert ((nb * H) % 8 == 0 and WC % 128 == 0 and WC_pp % 128 == 0
            and WC_p % 128 == 0), "lane-dense layout needs (8,128) alignment"

    s0f = s0_ld.reshape(N * H, WC_pp)
    s1f = s1_ld.reshape(N * H, WC_p)
    wpre0, wpre1, wpw, dwt, sh = _pack_params(params, W, C)

    # avg-pool (count_include_pad=False) reciprocal valid-count map.
    ih = jnp.arange(H)
    iw = jnp.arange(W)
    rows = jnp.minimum(ih + 1, H - 1) - jnp.maximum(ih - 1, 0) + 1
    cols = jnp.minimum(iw + 1, W - 1) - jnp.maximum(iw - 1, 0) + 1
    rc = 1.0 / (rows[:, None] * cols[None, :]).astype(jnp.float32)   # (H, W)
    rc = jnp.repeat(rc, C, axis=1)                                   # (H, WC)
    rc = jnp.tile(rc, (nb, 1))                                       # (nb*H, WC)

    plan = _build_plan(GENO)
    kernel = functools.partial(_cell_kernel, H=H, W=W, C=C, nb=nb, plan=plan,
                               concat=tuple(GENO.normal_concat))

    out = pl.pallas_call(
        kernel,
        out_shape=jax.ShapeDtypeStruct((nc, N * H, WC), jnp.float32),
        grid=(N // nb,),
        in_specs=[
            pl.BlockSpec((nb * H, WC_pp), lambda n: (n, 0)),
            pl.BlockSpec((nb * H, WC_p), lambda n: (n, 0)),
            pl.BlockSpec(wpre0.shape, lambda n: (0, 0)),
            pl.BlockSpec(wpre1.shape, lambda n: (0, 0)),
            pl.BlockSpec(wpw.shape, lambda n: (0, 0, 0)),
            pl.BlockSpec(dwt.shape, lambda n: (0, 0, 0, 0)),
            pl.BlockSpec(sh.shape, lambda n: (0, 0, 0)),
            pl.BlockSpec(rc.shape, lambda n: (0, 0)),
        ],
        out_specs=pl.BlockSpec((nc, nb * H, WC), lambda n: (0, n, 0)),
        compiler_params=pltpu.CompilerParams(
            dimension_semantics=("parallel",),
            vmem_limit_bytes=32 * 1024 * 1024),
    )(s0f, s1f, wpre0, wpre1, wpw, dwt, sh, rc)
    return out


def cell_forward(s0_nchw, s1_nchw, params, *, images_per_step=None):
    N, C_pp, H, W = s0_nchw.shape
    C_p = s1_nchw.shape[1]
    C = params["pre0"][0].shape[1]
    nc = len(GENO.normal_concat)

    # NCHW -> lane-dense (N, H, W*Cin).  TODO(synk): when chaining cells, feed
    # _cell_forward_lane_dense directly and skip these HBM round trips.
    s0 = jnp.transpose(s0_nchw, (0, 2, 3, 1)).reshape(N, H, W * C_pp)
    s1 = jnp.transpose(s1_nchw, (0, 2, 3, 1)).reshape(N, H, W * C_p)

    out = _cell_forward_lane_dense(s0, s1, params, H=H, W=W,
                                   images_per_step=images_per_step)

    # (nc, N*H, W*C) -> NCHW (N, nc*C, H, W); channel order == concat order.
    out = out.reshape(nc, N, H, W, C)
    out = jnp.transpose(out, (1, 0, 4, 2, 3)).reshape(N, nc * C, H, W)
    return out


# --------------------------- deterministic params ----------------------------

def bn_scale_shift(key, c):
    k1, k2 = jax.random.split(key)
    gamma = 1.0 + 0.1 * jax.random.normal(k1, (c,), jnp.float32)
    beta = 0.1 * jax.random.normal(k2, (c,), jnp.float32)
    # eval-mode BN folded with PyTorch-init running stats (mean=0, var=1)
    return gamma / jnp.sqrt(1.0 + BN_EPS), beta


def init_params(key, c_pp, c_p, c):
    keys = jax.random.split(key, 32)
    ki = iter(keys)
    pre0_w = 0.1 * jax.random.normal(next(ki), (c_pp, c), jnp.float32)
    pre0_s, pre0_b = bn_scale_shift(next(ki), c)
    pre1_w = 0.1 * jax.random.normal(next(ki), (c_p, c), jnp.float32)
    pre1_s, pre1_b = bn_scale_shift(next(ki), c)
    ops = []
    for name, _ in GENO.normal:
        if name == "sep_conv_3x3":
            dw1 = 0.3 * jax.random.normal(next(ki), (3, 3, c), jnp.float32)
            pw1 = 0.3 * jax.random.normal(next(ki), (c, c), jnp.float32)
            s1, b1 = bn_scale_shift(next(ki), c)
            dw2 = 0.3 * jax.random.normal(next(ki), (3, 3, c), jnp.float32)
            pw2 = 0.3 * jax.random.normal(next(ki), (c, c), jnp.float32)
            s2, b2 = bn_scale_shift(next(ki), c)
            ops.append(dict(dw1=dw1, pw1=pw1, s1=s1, b1=b1,
                            dw2=dw2, pw2=pw2, s2=s2, b2=b2))
        else:
            ops.append(None)
    return dict(pre0=(pre0_w, pre0_s, pre0_b),
                pre1=(pre1_w, pre1_s, pre1_b),
                ops=ops)


if __name__ == "__main__":
    N, C_pp, C_p, C, H, W = 2, 16, 16, 16, 16, 16
    key = jax.random.PRNGKey(0)
    k0, k1, kp = jax.random.split(key, 3)
    s0 = jax.random.normal(k0, (N, C_pp, H, W), jnp.float32)   # NCHW
    s1 = jax.random.normal(k1, (N, C_p, H, W), jnp.float32)    # NCHW
    params = init_params(kp, C_pp, C_p, C)

    fwd = jax.jit(functools.partial(cell_forward, params=params))
    out = jax.block_until_ready(fwd(s0, s1))

    assert out.shape == (N, len(GENO.normal_concat) * C, H, W), out.shape
    assert bool(jnp.all(jnp.isfinite(out)))
    print("KERNEL_OK")
</pallas_src>

<mosaic_0001>
module attributes {stable_mosaic.version = 11 : i64} {
  func.func @_cell_kernel(%arg0: i32, %arg1: memref<32x256xf32, #tpu.memory_space<vmem>>, %arg2: memref<32x256xf32, #tpu.memory_space<vmem>>, %arg3: memref<256x256xbf16, #tpu.memory_space<vmem>>, %arg4: memref<256x256xbf16, #tpu.memory_space<vmem>>, %arg5: memref<6x256x256xbf16, #tpu.memory_space<vmem>>, %arg6: memref<6x9x1x256xf32, #tpu.memory_space<vmem>>, %arg7: memref<8x1x256xf32, #tpu.memory_space<vmem>>, %arg8: memref<32x256xf32, #tpu.memory_space<vmem>>, %arg9: memref<4x32x256xf32, #tpu.memory_space<vmem>>) attributes {dimension_semantics = [#tpu.dimension_semantics<parallel>], iteration_bounds = array<i64: 1>, scalar_prefetch = 0 : i64, scratch_operands = 0 : i64, tpu.core_type = #tpu.core_type<tc>, window_params = [{transform_indices = @transform_0, window_bounds = array<i64: 32, 256>}, {transform_indices = @transform_1, window_bounds = array<i64: 32, 256>}, {pipeline_mode = #tpu.pipeline_mode<synchronous>, transform_indices = @transform_2, window_bounds = array<i64: 256, 256>}, {pipeline_mode = #tpu.pipeline_mode<synchronous>, transform_indices = @transform_3, window_bounds = array<i64: 256, 256>}, {pipeline_mode = #tpu.pipeline_mode<synchronous>, transform_indices = @transform_4, window_bounds = array<i64: 6, 256, 256>}, {pipeline_mode = #tpu.pipeline_mode<synchronous>, transform_indices = @transform_5, window_bounds = array<i64: 6, 9, 1, 256>}, {pipeline_mode = #tpu.pipeline_mode<synchronous>, transform_indices = @transform_6, window_bounds = array<i64: 8, 1, 256>}, {pipeline_mode = #tpu.pipeline_mode<synchronous>, transform_indices = @transform_7, window_bounds = array<i64: 32, 256>}, {transform_indices = @transform_8, window_bounds = array<i64: 4, 32, 256>}]} {
    %0 = tpu.iota {dimensions = array<i32: 1>} : vector<32x256xi32>
    %1 = tpu.iota {dimensions = array<i32: 0>} : vector<32x256xi32>
    %c16_i32 = arith.constant 16 : i32
    %c0_i32 = arith.constant 0 : i32
    %2 = arith.cmpi eq, %c16_i32, %c0_i32 : i32
    %c1_i32 = arith.constant 1 : i32
    %3 = arith.select %2, %c1_i32, %c16_i32 : i32
    %4 = vector.broadcast %3 : i32 to vector<32x256xi32>
    %5 = arith.remsi %1, %4 : vector<32x256xi32>
    %c0_i32_0 = arith.constant 0 : i32
    %6 = vector.broadcast %c0_i32_0 : i32 to vector<32x256xi32>
    %7 = arith.cmpi ne, %5, %6 : vector<32x256xi32>
    %c0_i32_1 = arith.constant 0 : i32
    %8 = vector.broadcast %c0_i32_1 : i32 to vector<32x256xi32>
    %9 = arith.cmpi slt, %5, %8 : vector<32x256xi32>
    %c0_i32_2 = arith.constant 0 : i32
    %10 = arith.cmpi slt, %3, %c0_i32_2 : i32
    %11 = vector.broadcast %10 : i1 to vector<32x256xi1>
    %12 = vector.broadcast %11 : vector<32x256xi1> to vector<32x256xi1>
    %13 = arith.xori %9, %12 : vector<32x256xi1>
    %14 = arith.andi %13, %7 : vector<32x256xi1>
    %15 = vector.broadcast %3 : i32 to vector<32x256xi32>
    %16 = arith.addi %5, %15 : vector<32x256xi32>
    %17 = arith.select %14, %16, %5 : vector<32x256xi1>, vector<32x256xi32>
    %c16_i32_3 = arith.constant 16 : i32
    %18 = vector.broadcast %c16_i32_3 : i32 to vector<32x256xi32>
    %19 = arith.cmpi sge, %0, %18 : vector<32x256xi32>
    %c240_i32 = arith.constant 240 : i32
    %20 = vector.broadcast %c240_i32 : i32 to vector<32x256xi32>
    %21 = arith.cmpi slt, %0, %20 : vector<32x256xi32>
    %c1_i32_4 = arith.constant 1 : i32
    %22 = vector.broadcast %c1_i32_4 : i32 to vector<32x256xi32>
    %23 = arith.cmpi sge, %17, %22 : vector<32x256xi32>
    %c15_i32 = arith.constant 15 : i32
    %24 = vector.broadcast %c15_i32 : i32 to vector<32x256xi32>
    %25 = arith.cmpi slt, %17, %24 : vector<32x256xi32>
    %26 = arith.andi %23, %19 : vector<32x256xi1>
    %27 = arith.andi %23, %21 : vector<32x256xi1>
    %28 = arith.andi %25, %19 : vector<32x256xi1>
    %29 = arith.andi %25, %21 : vector<32x256xi1>
    %c0 = arith.constant 0 : index
    %c0_5 = arith.constant 0 : index
    %30 = vector.load %arg1[%c0, %c0_5] : memref<32x256xf32, #tpu.memory_space<vmem>>, vector<32x256xf32>
    %cst = arith.constant 0.000000e+00 : f32
    %31 = vector.broadcast %cst : f32 to vector<32x256xf32>
    %32 = arith.maximumf %30, %31 : vector<32x256xf32>
    %33 = arith.truncf %32 : vector<32x256xf32> to vector<32x256xbf16>
    %c0_6 = arith.constant 0 : index
    %c0_7 = arith.constant 0 : index
    %34 = vector.load %arg3[%c0_6, %c0_7] : memref<256x256xbf16, #tpu.memory_space<vmem>>, vector<256x256xbf16>
    %cst_8 = arith.constant dense<0.000000e+00> : vector<32x256xf32>
    %35 = tpu.matmul %33, %34, %cst_8 {dimension_numbers = #tpu.dot_dimension_numbers<[1], [0], [0], [1], [0, 0, 1, 1], [], []>} : vector<32x256xbf16>, vector<256x256xbf16>, vector<32x256xf32> -> vector<32x256xf32>
    %c0_9 = arith.constant 0 : index
    %c0_10 = arith.constant 0 : index
    %c0_11 = arith.constant 0 : index
    %36 = vector.load %arg7[%c0_9, %c0_10, %c0_11] : memref<8x1x256xf32, #tpu.memory_space<vmem>>, vector<1x1x256xf32>
    %37 = vector.shape_cast %36 : vector<1x1x256xf32> to vector<1x256xf32>
    %38 = vector.broadcast %37 : vector<1x256xf32> to vector<32x256xf32>
    %39 = arith.addf %35, %38 : vector<32x256xf32>
    %c0_12 = arith.constant 0 : index
    %c0_13 = arith.constant 0 : index
    %40 = vector.load %arg2[%c0_12, %c0_13] : memref<32x256xf32, #tpu.memory_space<vmem>>, vector<32x256xf32>
    %cst_14 = arith.constant 0.000000e+00 : f32
    %41 = vector.broadcast %cst_14 : f32 to vector<32x256xf32>
    %42 = arith.maximumf %40, %41 : vector<32x256xf32>
    %43 = arith.truncf %42 : vector<32x256xf32> to vector<32x256xbf16>
    %c0_15 = arith.constant 0 : index
    %c0_16 = arith.constant 0 : index
    %44 = vector.load %arg4[%c0_15, %c0_16] : memref<256x256xbf16, #tpu.memory_space<vmem>>, vector<256x256xbf16>
    %cst_17 = arith.constant dense<0.000000e+00> : vector<32x256xf32>
    %45 = tpu.matmul %43, %44, %cst_17 {dimension_numbers = #tpu.dot_dimension_numbers<[1], [0], [0], [1], [0, 0, 1, 1], [], []>} : vector<32x256xbf16>, vector<256x256xbf16>, vector<32x256xf32> -> vector<32x256xf32>
    %c1 = arith.constant 1 : index
    %c0_18 = arith.constant 0 : index
    %c0_19 = arith.constant 0 : index
    %46 = vector.load %arg7[%c1, %c0_18, %c0_19] : memref<8x1x256xf32, #tpu.memory_space<vmem>>, vector<1x1x256xf32>
    %47 = vector.shape_cast %46 : vector<1x1x256xf32> to vector<1x256xf32>
    %48 = vector.broadcast %47 : vector<1x256xf32> to vector<32x256xf32>
    %49 = arith.addf %45, %48 : vector<32x256xf32>
    %cst_20 = arith.constant 0.000000e+00 : f32
    %50 = vector.broadcast %cst_20 : f32 to vector<32x256xf32>
    %51 = arith.maximumf %39, %50 : vector<32x256xf32>
    %c16_i32_21 = arith.constant 16 : i32
    %52 = tpu.dynamic_rotate %51 by %c16_i32_21 dim 1 : vector<32x256xf32>, i32 -> vector<32x256xf32>
    %c240_i32_22 = arith.constant 240 : i32
    %53 = tpu.dynamic_rotate %51 by %c240_i32_22 dim 1 : vector<32x256xf32>, i32 -> vector<32x256xf32>
    %c1_i32_23 = arith.constant 1 : i32
    %54 = tpu.dynamic_rotate %51 by %c1_i32_23 dim 0 : vector<32x256xf32>, i32 -> vector<32x256xf32>
    %c31_i32 = arith.constant 31 : i32
    %55 = tpu.dynamic_rotate %51 by %c31_i32 dim 0 : vector<32x256xf32>, i32 -> vector<32x256xf32>
    %c1_i32_24 = arith.constant 1 : i32
    %56 = tpu.dynamic_rotate %52 by %c1_i32_24 dim 0 : vector<32x256xf32>, i32 -> vector<32x256xf32>
    %c31_i32_25 = arith.constant 31 : i32
    %57 = tpu.dynamic_rotate %52 by %c31_i32_25 dim 0 : vector<32x256xf32>, i32 -> vector<32x256xf32>
    %c1_i32_26 = arith.constant 1 : i32
    %58 = tpu.dynamic_rotate %53 by %c1_i32_26 dim 0 : vector<32x256xf32>, i32 -> vector<32x256xf32>
    %c31_i32_27 = arith.constant 31 : i32
    %59 = tpu.dynamic_rotate %53 by %c31_i32_27 dim 0 : vector<32x256xf32>, i32 -> vector<32x256xf32>
    %c0_28 = arith.constant 0 : index
    %c4 = arith.constant 4 : index
    %c0_29 = arith.constant 0 : index
    %c0_30 = arith.constant 0 : index
    %60 = vector.load %arg6[%c0_28, %c4, %c0_29, %c0_30] : memref<6x9x1x256xf32, #tpu.memory_space<vmem>>, vector<1x1x1x256xf32>
    %61 = vector.shape_cast %60 : vector<1x1x1x256xf32> to vector<1x256xf32>
    %62 = vector.broadcast %61 : vector<1x256xf32> to vector<32x256xf32>
    %63 = arith.mulf %51, %62 : vector<32x256xf32>
    %cst_31 = arith.constant 0.000000e+00 : f32
    %64 = vector.broadcast %cst_31 : f32 to vector<32x256xf32>
    %65 = arith.select %26, %56, %64 : vector<32x256xi1>, vector<32x256xf32>
    %c0_32 = arith.constant 0 : index
    %c0_33 = arith.constant 0 : index
    %c0_34 = arith.constant 0 : index
    %c0_35 = arith.constant 0 : index
    %66 = vector.load %arg6[%c0_32, %c0_33, %c0_34, %c0_35] : memref<6x9x1x256xf32, #tpu.memory_space<vmem>>, vector<1x1x1x256xf32>
    %67 = vector.shape_cast %66 : vector<1x1x1x256xf32> to vector<1x256xf32>
    %68 = vector.broadcast %67 : vector<1x256xf32> to vector<32x256xf32>
    %69 = arith.mulf %65, %68 : vector<32x256xf32>
    %70 = arith.addf %63, %69 : vector<32x256xf32>
    %cst_36 = arith.constant 0.000000e+00 : f32
    %71 = vector.broadcast %cst_36 : f32 to vector<32x256xf32>
    %72 = arith.select %23, %54, %71 : vector<32x256xi1>, vector<32x256xf32>
    %c0_37 = arith.constant 0 : index
    %c1_38 = arith.constant 1 : index
    %c0_39 = arith.constant 0 : index
    %c0_40 = arith.constant 0 : index
    %73 = vector.load %arg6[%c0_37, %c1_38, %c0_39, %c0_40] : memref<6x9x1x256xf32, #tpu.memory_space<vmem>>, vector<1x1x1x256xf32>
    %74 = vector.shape_cast %73 : vector<1x1x1x256xf32> to vector<1x256xf32>
    %75 = vector.broadcast %74 : vector<1x256xf32> to vector<32x256xf32>
    %76 = arith.mulf %72, %75 : vector<32x256xf32>
    %77 = arith.addf %70, %76 : vector<32x256xf32>
    %cst_41 = arith.constant 0.000000e+00 : f32
    %78 = vector.broadcast %cst_41 : f32 to vector<32x256xf32>
    %79 = arith.select %27, %58, %78 : vector<32x256xi1>, vector<32x256xf32>
    %c0_42 = arith.constant 0 : index
    %c2 = arith.constant 2 : index
    %c0_43 = arith.constant 0 : index
    %c0_44 = arith.constant 0 : index
    %80 = vector.load %arg6[%c0_42, %c2, %c0_43, %c0_44] : memref<6x9x1x256xf32, #tpu.memory_space<vmem>>, vector<1x1x1x256xf32>
    %81 = vector.shape_cast %80 : vector<1x1x1x256xf32> to vector<1x256xf32>
    %82 = vector.broadcast %81 : vector<1x256xf32> to vector<32x256xf32>
    %83 = arith.mulf %79, %82 : vector<32x256xf32>
    %84 = arith.addf %77, %83 : vector<32x256xf32>
    %cst_45 = arith.constant 0.000000e+00 : f32
    %85 = vector.broadcast %cst_45 : f32 to vector<32x256xf32>
    %86 = arith.select %19, %52, %85 : vector<32x256xi1>, vector<32x256xf32>
    %c0_46 = arith.constant 0 : index
    %c3 = arith.constant 3 : index
    %c0_47 = arith.constant 0 : index
    %c0_48 = arith.constant 0 : index
    %87 = vector.load %arg6[%c0_46, %c3, %c0_47, %c0_48] : memref<6x9x1x256xf32, #tpu.memory_space<vmem>>, vector<1x1x1x256xf32>
    %88 = vector.shape_cast %87 : vector<1x1x1x256xf32> to vector<1x256xf32>
    %89 = vector.broadcast %88 : vector<1x256xf32> to vector<32x256xf32>
    %90 = arith.mulf %86, %89 : vector<32x256xf32>
    %91 = arith.addf %84, %90 : vector<32x256xf32>
    %cst_49 = arith.constant 0.000000e+00 : f32
    %92 = vector.broadcast %cst_49 : f32 to vector<32x256xf32>
    %93 = arith.select %21, %53, %92 : vector<32x256xi1>, vector<32x256xf32>
    %c0_50 = arith.constant 0 : index
    %c5 = arith.constant 5 : index
    %c0_51 = arith.constant 0 : index
    %c0_52 = arith.constant 0 : index
    %94 = vector.load %arg6[%c0_50, %c5, %c0_51, %c0_52] : memref<6x9x1x256xf32, #tpu.memory_space<vmem>>, vector<1x1x1x256xf32>
    %95 = vector.shape_cast %94 : vector<1x1x1x256xf32> to vector<1x256xf32>
    %96 = vector.broadcast %95 : vector<1x256xf32> to vector<32x256xf32>
    %97 = arith.mulf %93, %96 : vector<32x256xf32>
    %98 = arith.addf %91, %97 : vector<32x256xf32>
    %cst_53 = arith.constant 0.000000e+00 : f32
    %99 = vector.broadcast %cst_53 : f32 to vector<32x256xf32>
    %100 = arith.select %28, %57, %99 : vector<32x256xi1>, vector<32x256xf32>
    %c0_54 = arith.constant 0 : index
    %c6 = arith.constant 6 : index
    %c0_55 = arith.constant 0 : index
    %c0_56 = arith.constant 0 : index
    %101 = vector.load %arg6[%c0_54, %c6, %c0_55, %c0_56] : memref<6x9x1x256xf32, #tpu.memory_space<vmem>>, vector<1x1x1x256xf32>
    %102 = vector.shape_cast %101 : vector<1x1x1x256xf32> to vector<1x256xf32>
    %103 = vector.broadcast %102 : vector<1x256xf32> to vector<32x256xf32>
    %104 = arith.mulf %100, %103 : vector<32x256xf32>
    %105 = arith.addf %98, %104 : vector<32x256xf32>
    %cst_57 = arith.constant 0.000000e+00 : f32
    %106 = vector.broadcast %cst_57 : f32 to vector<32x256xf32>
    %107 = arith.select %25, %55, %106 : vector<32x256xi1>, vector<32x256xf32>
    %c0_58 = arith.constant 0 : index
    %c7 = arith.constant 7 : index
    %c0_59 = arith.constant 0 : index
    %c0_60 = arith.constant 0 : index
    %108 = vector.load %arg6[%c0_58, %c7, %c0_59, %c0_60] : memref<6x9x1x256xf32, #tpu.memory_space<vmem>>, vector<1x1x1x256xf32>
    %109 = vector.shape_cast %108 : vector<1x1x1x256xf32> to vector<1x256xf32>
    %110 = vector.broadcast %109 : vector<1x256xf32> to vector<32x256xf32>
    %111 = arith.mulf %107, %110 : vector<32x256xf32>
    %112 = arith.addf %105, %111 : vector<32x256xf32>
    %cst_61 = arith.constant 0.000000e+00 : f32
    %113 = vector.broadcast %cst_61 : f32 to vector<32x256xf32>
    %114 = arith.select %29, %59, %113 : vector<32x256xi1>, vector<32x256xf32>
    %c0_62 = arith.constant 0 : index
    %c8 = arith.constant 8 : index
    %c0_63 = arith.constant 0 : index
    %c0_64 = arith.constant 0 : index
    %115 = vector.load %arg6[%c0_62, %c8, %c0_63, %c0_64] : memref<6x9x1x256xf32, #tpu.memory_space<vmem>>, vector<1x1x1x256xf32>
    %116 = vector.shape_cast %115 : vector<1x1x1x256xf32> to vector<1x256xf32>
    %117 = vector.broadcast %116 : vector<1x256xf32> to vector<32x256xf32>
    %118 = arith.mulf %114, %117 : vector<32x256xf32>
    %119 = arith.addf %112, %118 : vector<32x256xf32>
    %120 = arith.truncf %119 : vector<32x256xf32> to vector<32x256xbf16>
    %c0_65 = arith.constant 0 : index
    %c0_66 = arith.constant 0 : index
    %c0_67 = arith.constant 0 : index
    %121 = vector.load %arg5[%c0_65, %c0_66, %c0_67] : memref<6x256x256xbf16, #tpu.memory_space<vmem>>, vector<1x256x256xbf16>
    %122 = vector.shape_cast %121 : vector<1x256x256xbf16> to vector<256x256xbf16>
    %cst_68 = arith.constant dense<0.000000e+00> : vector<32x256xf32>
    %123 = tpu.matmul %120, %122, %cst_68 {dimension_numbers = #tpu.dot_dimension_numbers<[1], [0], [0], [1], [0, 0, 1, 1], [], []>} : vector<32x256xbf16>, vector<256x256xbf16>, vector<32x256xf32> -> vector<32x256xf32>
    %c2_69 = arith.constant 2 : index
    %c0_70 = arith.constant 0 : index
    %c0_71 = arith.constant 0 : index
    %124 = vector.load %arg7[%c2_69, %c0_70, %c0_71] : memref<8x1x256xf32, #tpu.memory_space<vmem>>, vector<1x1x256xf32>
    %125 = vector.shape_cast %124 : vector<1x1x256xf32> to vector<1x256xf32>
    %126 = vector.broadcast %125 : vector<1x256xf32> to vector<32x256xf32>
    %127 = arith.addf %123, %126 : vector<32x256xf32>
    %cst_72 = arith.constant 0.000000e+00 : f32
    %128 = vector.broadcast %cst_72 : f32 to vector<32x256xf32>
    %129 = arith.maximumf %127, %128 : vector<32x256xf32>
    %c16_i32_73 = arith.constant 16 : i32
    %130 = tpu.dynamic_rotate %129 by %c16_i32_73 dim 1 : vector<32x256xf32>, i32 -> vector<32x256xf32>
    %c240_i32_74 = arith.constant 240 : i32
    %131 = tpu.dynamic_rotate %129 by %c240_i32_74 dim 1 : vector<32x256xf32>, i32 -> vector<32x256xf32>
    %c1_i32_75 = arith.constant 1 : i32
    %132 = tpu.dynamic_rotate %129 by %c1_i32_75 dim 0 : vector<32x256xf32>, i32 -> vector<32x256xf32>
    %c31_i32_76 = arith.constant 31 : i32
    %133 = tpu.dynamic_rotate %129 by %c31_i32_76 dim 0 : vector<32x256xf32>, i32 -> vector<32x256xf32>
    %c1_i32_77 = arith.constant 1 : i32
    %134 = tpu.dynamic_rotate %130 by %c1_i32_77 dim 0 : vector<32x256xf32>, i32 -> vector<32x256xf32>
    %c31_i32_78 = arith.constant 31 : i32
    %135 = tpu.dynamic_rotate %130 by %c31_i32_78 dim 0 : vector<32x256xf32>, i32 -> vector<32x256xf32>
    %c1_i32_79 = arith.constant 1 : i32
    %136 = tpu.dynamic_rotate %131 by %c1_i32_79 dim 0 : vector<32x256xf32>, i32 -> vector<32x256xf32>
    %c31_i32_80 = arith.constant 31 : i32
    %137 = tpu.dynamic_rotate %131 by %c31_i32_80 dim 0 : vector<32x256xf32>, i32 -> vector<32x256xf32>
    %c1_81 = arith.constant 1 : index
    %c4_82 = arith.constant 4 : index
    %c0_83 = arith.constant 0 : index
    %c0_84 = arith.constant 0 : index
    %138 = vector.load %arg6[%c1_81, %c4_82, %c0_83, %c0_84] : memref<6x9x1x256xf32, #tpu.memory_space<vmem>>, vector<1x1x1x256xf32>
    %139 = vector.shape_cast %138 : vector<1x1x1x256xf32> to vector<1x256xf32>
    %140 = vector.broadcast %139 : vector<1x256xf32> to vector<32x256xf32>
    %141 = arith.mulf %129, %140 : vector<32x256xf32>
    %cst_85 = arith.constant 0.000000e+00 : f32
    %142 = vector.broadcast %cst_85 : f32 to vector<32x256xf32>
    %143 = arith.select %26, %134, %142 : vector<32x256xi1>, vector<32x256xf32>
    %c1_86 = arith.constant 1 : index
    %c0_87 = arith.constant 0 : index
    %c0_88 = arith.constant 0 : index
    %c0_89 = arith.constant 0 : index
    %144 = vector.load %arg6[%c1_86, %c0_87, %c0_88, %c0_89] : memref<6x9x1x256xf32, #tpu.memory_space<vmem>>, vector<1x1x1x256xf32>
    %145 = vector.shape_cast %144 : vector<1x1x1x256xf32> to vector<1x256xf32>
    %146 = vector.broadcast %145 : vector<1x256xf32> to vector<32x256xf32>
    %147 = arith.mulf %143, %146 : vector<32x256xf32>
    %148 = arith.addf %141, %147 : vector<32x256xf32>
    %cst_90 = arith.constant 0.000000e+00 : f32
    %149 = vector.broadcast %cst_90 : f32 to vector<32x256xf32>
    %150 = arith.select %23, %132, %149 : vector<32x256xi1>, vector<32x256xf32>
    %c1_91 = arith.constant 1 : index
    %c1_92 = arith.constant 1 : index
    %c0_93 = arith.constant 0 : index
    %c0_94 = arith.constant 0 : index
    %151 = vector.load %arg6[%c1_91, %c1_92, %c0_93, %c0_94] : memref<6x9x1x256xf32, #tpu.memory_space<vmem>>, vector<1x1x1x256xf32>
    %152 = vector.shape_cast %151 : vector<1x1x1x256xf32> to vector<1x256xf32>
    %153 = vector.broadcast %152 : vector<1x256xf32> to vector<32x256xf32>
    %154 = arith.mulf %150, %153 : vector<32x256xf32>
    %155 = arith.addf %148, %154 : vector<32x256xf32>
    %cst_95 = arith.constant 0.000000e+00 : f32
    %156 = vector.broadcast %cst_95 : f32 to vector<32x256xf32>
    %157 = arith.select %27, %136, %156 : vector<32x256xi1>, vector<32x256xf32>
    %c1_96 = arith.constant 1 : index
    %c2_97 = arith.constant 2 : index
    %c0_98 = arith.constant 0 : index
    %c0_99 = arith.constant 0 : index
    %158 = vector.load %arg6[%c1_96, %c2_97, %c0_98, %c0_99] : memref<6x9x1x256xf32, #tpu.memory_space<vmem>>, vector<1x1x1x256xf32>
    %159 = vector.shape_cast %158 : vector<1x1x1x256xf32> to vector<1x256xf32>
    %160 = vector.broadcast %159 : vector<1x256xf32> to vector<32x256xf32>
    %161 = arith.mulf %157, %160 : vector<32x256xf32>
    %162 = arith.addf %155, %161 : vector<32x256xf32>
    %cst_100 = arith.constant 0.000000e+00 : f32
    %163 = vector.broadcast %cst_100 : f32 to vector<32x256xf32>
    %164 = arith.select %19, %130, %163 : vector<32x256xi1>, vector<32x256xf32>
    %c1_101 = arith.constant 1 : index
    %c3_102 = arith.constant 3 : index
    %c0_103 = arith.constant 0 : index
    %c0_104 = arith.constant 0 : index
    %165 = vector.load %arg6[%c1_101, %c3_102, %c0_103, %c0_104] : memref<6x9x1x256xf32, #tpu.memory_space<vmem>>, vector<1x1x1x256xf32>
    %166 = vector.shape_cast %165 : vector<1x1x1x256xf32> to vector<1x256xf32>
    %167 = vector.broadcast %166 : vector<1x256xf32> to vector<32x256xf32>
    %168 = arith.mulf %164, %167 : vector<32x256xf32>
    %169 = arith.addf %162, %168 : vector<32x256xf32>
    %cst_105 = arith.constant 0.000000e+00 : f32
    %170 = vector.broadcast %cst_105 : f32 to vector<32x256xf32>
    %171 = arith.select %21, %131, %170 : vector<32x256xi1>, vector<32x256xf32>
    %c1_106 = arith.constant 1 : index
    %c5_107 = arith.constant 5 : index
    %c0_108 = arith.constant 0 : index
    %c0_109 = arith.constant 0 : index
    %172 = vector.load %arg6[%c1_106, %c5_107, %c0_108, %c0_109] : memref<6x9x1x256xf32, #tpu.memory_space<vmem>>, vector<1x1x1x256xf32>
    %173 = vector.shape_cast %172 : vector<1x1x1x256xf32> to vector<1x256xf32>
    %174 = vector.broadcast %173 : vector<1x256xf32> to vector<32x256xf32>
    %175 = arith.mulf %171, %174 : vector<32x256xf32>
    %176 = arith.addf %169, %175 : vector<32x256xf32>
    %cst_110 = arith.constant 0.000000e+00 : f32
    %177 = vector.broadcast %cst_110 : f32 to vector<32x256xf32>
    %178 = arith.select %28, %135, %177 : vector<32x256xi1>, vector<32x256xf32>
    %c1_111 = arith.constant 1 : index
    %c6_112 = arith.constant 6 : index
    %c0_113 = arith.constant 0 : index
    %c0_114 = arith.constant 0 : index
    %179 = vector.load %arg6[%c1_111, %c6_112, %c0_113, %c0_114] : memref<6x9x1x256xf32, #tpu.memory_space<vmem>>, vector<1x1x1x256xf32>
    %180 = vector.shape_cast %179 : vector<1x1x1x256xf32> to vector<1x256xf32>
    %181 = vector.broadcast %180 : vector<1x256xf32> to vector<32x256xf32>
    %182 = arith.mulf %178, %181 : vector<32x256xf32>
    %183 = arith.addf %176, %182 : vector<32x256xf32>
    %cst_115 = arith.constant 0.000000e+00 : f32
    %184 = vector.broadcast %cst_115 : f32 to vector<32x256xf32>
    %185 = arith.select %25, %133, %184 : vector<32x256xi1>, vector<32x256xf32>
    %c1_116 = arith.constant 1 : index
    %c7_117 = arith.constant 7 : index
    %c0_118 = arith.constant 0 : index
    %c0_119 = arith.constant 0 : index
    %186 = vector.load %arg6[%c1_116, %c7_117, %c0_118, %c0_119] : memref<6x9x1x256xf32, #tpu.memory_space<vmem>>, vector<1x1x1x256xf32>
    %187 = vector.shape_cast %186 : vector<1x1x1x256xf32> to vector<1x256xf32>
    %188 = vector.broadcast %187 : vector<1x256xf32> to vector<32x256xf32>
    %189 = arith.mulf %185, %188 : vector<32x256xf32>
    %190 = arith.addf %183, %189 : vector<32x256xf32>
    %cst_120 = arith.constant 0.000000e+00 : f32
    %191 = vector.broadcast %cst_120 : f32 to vector<32x256xf32>
    %192 = arith.select %29, %137, %191 : vector<32x256xi1>, vector<32x256xf32>
    %c1_121 = arith.constant 1 : index
    %c8_122 = arith.constant 8 : index
    %c0_123 = arith.constant 0 : index
    %c0_124 = arith.constant 0 : index
    %193 = vector.load %arg6[%c1_121, %c8_122, %c0_123, %c0_124] : memref<6x9x1x256xf32, #tpu.memory_space<vmem>>, vector<1x1x1x256xf32>
    %194 = vector.shape_cast %193 : vector<1x1x1x256xf32> to vector<1x256xf32>
    %195 = vector.broadcast %194 : vector<1x256xf32> to vector<32x256xf32>
    %196 = arith.mulf %192, %195 : vector<32x256xf32>
    %197 = arith.addf %190, %196 : vector<32x256xf32>
    %198 = arith.truncf %197 : vector<32x256xf32> to vector<32x256xbf16>
    %c1_125 = arith.constant 1 : index
    %c0_126 = arith.constant 0 : index
    %c0_127 = arith.constant 0 : index
    %199 = vector.load %arg5[%c1_125, %c0_126, %c0_127] : memref<6x256x256xbf16, #tpu.memory_space<vmem>>, vector<1x256x256xbf16>
    %200 = vector.shape_cast %199 : vector<1x256x256xbf16> to vector<256x256xbf16>
    %cst_128 = arith.constant dense<0.000000e+00> : vector<32x256xf32>
    %201 = tpu.matmul %198, %200, %cst_128 {dimension_numbers = #tpu.dot_dimension_numbers<[1], [0], [0], [1], [0, 0, 1, 1], [], []>} : vector<32x256xbf16>, vector<256x256xbf16>, vector<32x256xf32> -> vector<32x256xf32>
    %c3_129 = arith.constant 3 : index
    %c0_130 = arith.constant 0 : index
    %c0_131 = arith.constant 0 : index
    %202 = vector.load %arg7[%c3_129, %c0_130, %c0_131] : memref<8x1x256xf32, #tpu.memory_space<vmem>>, vector<1x1x256xf32>
    %203 = vector.shape_cast %202 : vector<1x1x256xf32> to vector<1x256xf32>
    %204 = vector.broadcast %203 : vector<1x256xf32> to vector<32x256xf32>
    %205 = arith.addf %201, %204 : vector<32x256xf32>
    %c16_i32_132 = arith.constant 16 : i32
    %206 = tpu.dynamic_rotate %49 by %c16_i32_132 dim 1 : vector<32x256xf32>, i32 -> vector<32x256xf32>
    %c240_i32_133 = arith.constant 240 : i32
    %207 = tpu.dynamic_rotate %49 by %c240_i32_133 dim 1 : vector<32x256xf32>, i32 -> vector<32x256xf32>
    %c1_i32_134 = arith.constant 1 : i32
    %208 = tpu.dynamic_rotate %49 by %c1_i32_134 dim 0 : vector<32x256xf32>, i32 -> vector<32x256xf32>
    %c31_i32_135 = arith.constant 31 : i32
    %209 = tpu.dynamic_rotate %49 by %c31_i32_135 dim 0 : vector<32x256xf32>, i32 -> vector<32x256xf32>
    %c1_i32_136 = arith.constant 1 : i32
    %210 = tpu.dynamic_rotate %206 by %c1_i32_136 dim 0 : vector<32x256xf32>, i32 -> vector<32x256xf32>
    %c31_i32_137 = arith.constant 31 : i32
    %211 = tpu.dynamic_rotate %206 by %c31_i32_137 dim 0 : vector<32x256xf32>, i32 -> vector<32x256xf32>
    %c1_i32_138 = arith.constant 1 : i32
    %212 = tpu.dynamic_rotate %207 by %c1_i32_138 dim 0 : vector<32x256xf32>, i32 -> vector<32x256xf32>
    %c31_i32_139 = arith.constant 31 : i32
    %213 = tpu.dynamic_rotate %207 by %c31_i32_139 dim 0 : vector<32x256xf32>, i32 -> vector<32x256xf32>
    %cst_140 = arith.constant 0xFF800000 : f32
    %214 = vector.broadcast %cst_140 : f32 to vector<32x256xf32>
    %215 = arith.select %26, %210, %214 : vector<32x256xi1>, vector<32x256xf32>
    %216 = arith.maximumf %49, %215 : vector<32x256xf32>
    %cst_141 = arith.constant 0xFF800000 : f32
    %217 = vector.broadcast %cst_141 : f32 to vector<32x256xf32>
    %218 = arith.select %23, %208, %217 : vector<32x256xi1>, vector<32x256xf32>
    %219 = arith.maximumf %216, %218 : vector<32x256xf32>
    %cst_142 = arith.constant 0xFF800000 : f32
    %220 = vector.broadcast %cst_142 : f32 to vector<32x256xf32>
    %221 = arith.select %27, %212, %220 : vector<32x256xi1>, vector<32x256xf32>
    %222 = arith.maximumf %219, %221 : vector<32x256xf32>
    %cst_143 = arith.constant 0xFF800000 : f32
    %223 = vector.broadcast %cst_143 : f32 to vector<32x256xf32>
    %224 = arith.select %19, %206, %223 : vector<32x256xi1>, vector<32x256xf32>
    %225 = arith.maximumf %222, %224 : vector<32x256xf32>
    %cst_144 = arith.constant 0xFF800000 : f32
    %226 = vector.broadcast %cst_144 : f32 to vector<32x256xf32>
    %227 = arith.select %21, %207, %226 : vector<32x256xi1>, vector<32x256xf32>
    %228 = arith.maximumf %225, %227 : vector<32x256xf32>
    %cst_145 = arith.constant 0xFF800000 : f32
    %229 = vector.broadcast %cst_145 : f32 to vector<32x256xf32>
    %230 = arith.select %28, %211, %229 : vector<32x256xi1>, vector<32x256xf32>
    %231 = arith.maximumf %228, %230 : vector<32x256xf32>
    %cst_146 = arith.constant 0xFF800000 : f32
    %232 = vector.broadcast %cst_146 : f32 to vector<32x256xf32>
    %233 = arith.select %25, %209, %232 : vector<32x256xi1>, vector<32x256xf32>
    %234 = arith.maximumf %231, %233 : vector<32x256xf32>
    %cst_147 = arith.constant 0xFF800000 : f32
    %235 = vector.broadcast %cst_147 : f32 to vector<32x256xf32>
    %236 = arith.select %29, %213, %235 : vector<32x256xi1>, vector<32x256xf32>
    %237 = arith.maximumf %234, %236 : vector<32x256xf32>
    %238 = arith.addf %205, %237 : vector<32x256xf32>
    %cst_148 = arith.constant 0.000000e+00 : f32
    %239 = vector.broadcast %cst_148 : f32 to vector<32x256xf32>
    %240 = arith.maximumf %49, %239 : vector<32x256xf32>
    %c16_i32_149 = arith.constant 16 : i32
    %241 = tpu.dynamic_rotate %240 by %c16_i32_149 dim 1 : vector<32x256xf32>, i32 -> vector<32x256xf32>
    %c240_i32_150 = arith.constant 240 : i32
    %242 = tpu.dynamic_rotate %240 by %c240_i32_150 dim 1 : vector<32x256xf32>, i32 -> vector<32x256xf32>
    %c1_i32_151 = arith.constant 1 : i32
    %243 = tpu.dynamic_rotate %240 by %c1_i32_151 dim 0 : vector<32x256xf32>, i32 -> vector<32x256xf32>
    %c31_i32_152 = arith.constant 31 : i32
    %244 = tpu.dynamic_rotate %240 by %c31_i32_152 dim 0 : vector<32x256xf32>, i32 -> vector<32x256xf32>
    %c1_i32_153 = arith.constant 1 : i32
    %245 = tpu.dynamic_rotate %241 by %c1_i32_153 dim 0 : vector<32x256xf32>, i32 -> vector<32x256xf32>
    %c31_i32_154 = arith.constant 31 : i32
    %246 = tpu.dynamic_rotate %241 by %c31_i32_154 dim 0 : vector<32x256xf32>, i32 -> vector<32x256xf32>
    %c1_i32_155 = arith.constant 1 : i32
    %247 = tpu.dynamic_rotate %242 by %c1_i32_155 dim 0 : vector<32x256xf32>, i32 -> vector<32x256xf32>
    %c31_i32_156 = arith.constant 31 : i32
    %248 = tpu.dynamic_rotate %242 by %c31_i32_156 dim 0 : vector<32x256xf32>, i32 -> vector<32x256xf32>
    %c2_157 = arith.constant 2 : index
    %c4_158 = arith.constant 4 : index
    %c0_159 = arith.constant 0 : index
    %c0_160 = arith.constant 0 : index
    %249 = vector.load %arg6[%c2_157, %c4_158, %c0_159, %c0_160] : memref<6x9x1x256xf32, #tpu.memory_space<vmem>>, vector<1x1x1x256xf32>
    %250 = vector.shape_cast %249 : vector<1x1x1x256xf32> to vector<1x256xf32>
    %251 = vector.broadcast %250 : vector<1x256xf32> to vector<32x256xf32>
    %252 = arith.mulf %240, %251 : vector<32x256xf32>
    %cst_161 = arith.constant 0.000000e+00 : f32
    %253 = vector.broadcast %cst_161 : f32 to vector<32x256xf32>
    %254 = arith.select %26, %245, %253 : vector<32x256xi1>, vector<32x256xf32>
    %c2_162 = arith.constant 2 : index
    %c0_163 = arith.constant 0 : index
    %c0_164 = arith.constant 0 : index
    %c0_165 = arith.constant 0 : index
    %255 = vector.load %arg6[%c2_162, %c0_163, %c0_164, %c0_165] : memref<6x9x1x256xf32, #tpu.memory_space<vmem>>, vector<1x1x1x256xf32>
    %256 = vector.shape_cast %255 : vector<1x1x1x256xf32> to vector<1x256xf32>
    %257 = vector.broadcast %256 : vector<1x256xf32> to vector<32x256xf32>
    %258 = arith.mulf %254, %257 : vector<32x256xf32>
    %259 = arith.addf %252, %258 : vector<32x256xf32>
    %cst_166 = arith.constant 0.000000e+00 : f32
    %260 = vector.broadcast %cst_166 : f32 to vector<32x256xf32>
    %261 = arith.select %23, %243, %260 : vector<32x256xi1>, vector<32x256xf32>
    %c2_167 = arith.constant 2 : index
    %c1_168 = arith.constant 1 : index
    %c0_169 = arith.constant 0 : index
    %c0_170 = arith.constant 0 : index
    %262 = vector.load %arg6[%c2_167, %c1_168, %c0_169, %c0_170] : memref<6x9x1x256xf32, #tpu.memory_space<vmem>>, vector<1x1x1x256xf32>
    %263 = vector.shape_cast %262 : vector<1x1x1x256xf32> to vector<1x256xf32>
    %264 = vector.broadcast %263 : vector<1x256xf32> to vector<32x256xf32>
    %265 = arith.mulf %261, %264 : vector<32x256xf32>
    %266 = arith.addf %259, %265 : vector<32x256xf32>
    %cst_171 = arith.constant 0.000000e+00 : f32
    %267 = vector.broadcast %cst_171 : f32 to vector<32x256xf32>
    %268 = arith.select %27, %247, %267 : vector<32x256xi1>, vector<32x256xf32>
    %c2_172 = arith.constant 2 : index
    %c2_173 = arith.constant 2 : index
    %c0_174 = arith.constant 0 : index
    %c0_175 = arith.constant 0 : index
    %269 = vector.load %arg6[%c2_172, %c2_173, %c0_174, %c0_175] : memref<6x9x1x256xf32, #tpu.memory_space<vmem>>, vector<1x1x1x256xf32>
    %270 = vector.shape_cast %269 : vector<1x1x1x256xf32> to vector<1x256xf32>
    %271 = vector.broadcast %270 : vector<1x256xf32> to vector<32x256xf32>
    %272 = arith.mulf %268, %271 : vector<32x256xf32>
    %273 = arith.addf %266, %272 : vector<32x256xf32>
    %cst_176 = arith.constant 0.000000e+00 : f32
    %274 = vector.broadcast %cst_176 : f32 to vector<32x256xf32>
    %275 = arith.select %19, %241, %274 : vector<32x256xi1>, vector<32x256xf32>
    %c2_177 = arith.constant 2 : index
    %c3_178 = arith.constant 3 : index
    %c0_179 = arith.constant 0 : index
    %c0_180 = arith.constant 0 : index
    %276 = vector.load %arg6[%c2_177, %c3_178, %c0_179, %c0_180] : memref<6x9x1x256xf32, #tpu.memory_space<vmem>>, vector<1x1x1x256xf32>
    %277 = vector.shape_cast %276 : vector<1x1x1x256xf32> to vector<1x256xf32>
    %278 = vector.broadcast %277 : vector<1x256xf32> to vector<32x256xf32>
    %279 = arith.mulf %275, %278 : vector<32x256xf32>
    %280 = arith.addf %273, %279 : vector<32x256xf32>
    %cst_181 = arith.constant 0.000000e+00 : f32
    %281 = vector.broadcast %cst_181 : f32 to vector<32x256xf32>
    %282 = arith.select %21, %242, %281 : vector<32x256xi1>, vector<32x256xf32>
    %c2_182 = arith.constant 2 : index
    %c5_183 = arith.constant 5 : index
    %c0_184 = arith.constant 0 : index
    %c0_185 = arith.constant 0 : index
    %283 = vector.load %arg6[%c2_182, %c5_183, %c0_184, %c0_185] : memref<6x9x1x256xf32, #tpu.memory_space<vmem>>, vector<1x1x1x256xf32>
    %284 = vector.shape_cast %283 : vector<1x1x1x256xf32> to vector<1x256xf32>
    %285 = vector.broadcast %284 : vector<1x256xf32> to vector<32x256xf32>
    %286 = arith.mulf %282, %285 : vector<32x256xf32>
    %287 = arith.addf %280, %286 : vector<32x256xf32>
    %cst_186 = arith.constant 0.000000e+00 : f32
    %288 = vector.broadcast %cst_186 : f32 to vector<32x256xf32>
    %289 = arith.select %28, %246, %288 : vector<32x256xi1>, vector<32x256xf32>
    %c2_187 = arith.constant 2 : index
    %c6_188 = arith.constant 6 : index
    %c0_189 = arith.constant 0 : index
    %c0_190 = arith.constant 0 : index
    %290 = vector.load %arg6[%c2_187, %c6_188, %c0_189, %c0_190] : memref<6x9x1x256xf32, #tpu.memory_space<vmem>>, vector<1x1x1x256xf32>
    %291 = vector.shape_cast %290 : vector<1x1x1x256xf32> to vector<1x256xf32>
    %292 = vector.broadcast %291 : vector<1x256xf32> to vector<32x256xf32>
    %293 = arith.mulf %289, %292 : vector<32x256xf32>
    %294 = arith.addf %287, %293 : vector<32x256xf32>
    %cst_191 = arith.constant 0.000000e+00 : f32
    %295 = vector.broadcast %cst_191 : f32 to vector<32x256xf32>
    %296 = arith.select %25, %244, %295 : vector<32x256xi1>, vector<32x256xf32>
    %c2_192 = arith.constant 2 : index
    %c7_193 = arith.constant 7 : index
    %c0_194 = arith.constant 0 : index
    %c0_195 = arith.constant 0 : index
    %297 = vector.load %arg6[%c2_192, %c7_193, %c0_194, %c0_195] : memref<6x9x1x256xf32, #tpu.memory_space<vmem>>, vector<1x1x1x256xf32>
    %298 = vector.shape_cast %297 : vector<1x1x1x256xf32> to vector<1x256xf32>
    %299 = vector.broadcast %298 : vector<1x256xf32> to vector<32x256xf32>
    %300 = arith.mulf %296, %299 : vector<32x256xf32>
    %301 = arith.addf %294, %300 : vector<32x256xf32>
    %cst_196 = arith.constant 0.000000e+00 : f32
    %302 = vector.broadcast %cst_196 : f32 to vector<32x256xf32>
    %303 = arith.select %29, %248, %302 : vector<32x256xi1>, vector<32x256xf32>
    %c2_197 = arith.constant 2 : index
    %c8_198 = arith.constant 8 : index
    %c0_199 = arith.constant 0 : index
    %c0_200 = arith.constant 0 : index
    %304 = vector.load %arg6[%c2_197, %c8_198, %c0_199, %c0_200] : memref<6x9x1x256xf32, #tpu.memory_space<vmem>>, vector<1x1x1x256xf32>
    %305 = vector.shape_cast %304 : vector<1x1x1x256xf32> to vector<1x256xf32>
    %306 = vector.broadcast %305 : vector<1x256xf32> to vector<32x256xf32>
    %307 = arith.mulf %303, %306 : vector<32x256xf32>
    %308 = arith.addf %301, %307 : vector<32x256xf32>
    %309 = arith.truncf %308 : vector<32x256xf32> to vector<32x256xbf16>
    %c2_201 = arith.constant 2 : index
    %c0_202 = arith.constant 0 : index
    %c0_203 = arith.constant 0 : index
    %310 = vector.load %arg5[%c2_201, %c0_202, %c0_203] : memref<6x256x256xbf16, #tpu.memory_space<vmem>>, vector<1x256x256xbf16>
    %311 = vector.shape_cast %310 : vector<1x256x256xbf16> to vector<256x256xbf16>
    %cst_204 = arith.constant dense<0.000000e+00> : vector<32x256xf32>
    %312 = tpu.matmul %309, %311, %cst_204 {dimension_numbers = #tpu.dot_dimension_numbers<[1], [0], [0], [1], [0, 0, 1, 1], [], []>} : vector<32x256xbf16>, vector<256x256xbf16>, vector<32x256xf32> -> vector<32x256xf32>
    %c4_205 = arith.constant 4 : index
    %c0_206 = arith.constant 0 : index
    %c0_207 = arith.constant 0 : index
    %313 = vector.load %arg7[%c4_205, %c0_206, %c0_207] : memref<8x1x256xf32, #tpu.memory_space<vmem>>, vector<1x1x256xf32>
    %314 = vector.shape_cast %313 : vector<1x1x256xf32> to vector<1x256xf32>
    %315 = vector.broadcast %314 : vector<1x256xf32> to vector<32x256xf32>
    %316 = arith.addf %312, %315 : vector<32x256xf32>
    %cst_208 = arith.constant 0.000000e+00 : f32
    %317 = vector.broadcast %cst_208 : f32 to vector<32x256xf32>
    %318 = arith.maximumf %316, %317 : vector<32x256xf32>
    %c16_i32_209 = arith.constant 16 : i32
    %319 = tpu.dynamic_rotate %318 by %c16_i32_209 dim 1 : vector<32x256xf32>, i32 -> vector<32x256xf32>
    %c240_i32_210 = arith.constant 240 : i32
    %320 = tpu.dynamic_rotate %318 by %c240_i32_210 dim 1 : vector<32x256xf32>, i32 -> vector<32x256xf32>
    %c1_i32_211 = arith.constant 1 : i32
    %321 = tpu.dynamic_rotate %318 by %c1_i32_211 dim 0 : vector<32x256xf32>, i32 -> vector<32x256xf32>
    %c31_i32_212 = arith.constant 31 : i32
    %322 = tpu.dynamic_rotate %318 by %c31_i32_212 dim 0 : vector<32x256xf32>, i32 -> vector<32x256xf32>
    %c1_i32_213 = arith.constant 1 : i32
    %323 = tpu.dynamic_rotate %319 by %c1_i32_213 dim 0 : vector<32x256xf32>, i32 -> vector<32x256xf32>
    %c31_i32_214 = arith.constant 31 : i32
    %324 = tpu.dynamic_rotate %319 by %c31_i32_214 dim 0 : vector<32x256xf32>, i32 -> vector<32x256xf32>
    %c1_i32_215 = arith.constant 1 : i32
    %325 = tpu.dynamic_rotate %320 by %c1_i32_215 dim 0 : vector<32x256xf32>, i32 -> vector<32x256xf32>
    %c31_i32_216 = arith.constant 31 : i32
    %326 = tpu.dynamic_rotate %320 by %c31_i32_216 dim 0 : vector<32x256xf32>, i32 -> vector<32x256xf32>
    %c3_217 = arith.constant 3 : index
    %c4_218 = arith.constant 4 : index
    %c0_219 = arith.constant 0 : index
    %c0_220 = arith.constant 0 : index
    %327 = vector.load %arg6[%c3_217, %c4_218, %c0_219, %c0_220] : memref<6x9x1x256xf32, #tpu.memory_space<vmem>>, vector<1x1x1x256xf32>
    %328 = vector.shape_cast %327 : vector<1x1x1x256xf32> to vector<1x256xf32>
    %329 = vector.broadcast %328 : vector<1x256xf32> to vector<32x256xf32>
    %330 = arith.mulf %318, %329 : vector<32x256xf32>
    %cst_221 = arith.constant 0.000000e+00 : f32
    %331 = vector.broadcast %cst_221 : f32 to vector<32x256xf32>
    %332 = arith.select %26, %323, %331 : vector<32x256xi1>, vector<32x256xf32>
    %c3_222 = arith.constant 3 : index
    %c0_223 = arith.constant 0 : index
    %c0_224 = arith.constant 0 : index
    %c0_225 = arith.constant 0 : index
    %333 = vector.load %arg6[%c3_222, %c0_223, %c0_224, %c0_225] : memref<6x9x1x256xf32, #tpu.memory_space<vmem>>, vector<1x1x1x256xf32>
    %334 = vector.shape_cast %333 : vector<1x1x1x256xf32> to vector<1x256xf32>
    %335 = vector.broadcast %334 : vector<1x256xf32> to vector<32x256xf32>
    %336 = arith.mulf %332, %335 : vector<32x256xf32>
    %337 = arith.addf %330, %336 : vector<32x256xf32>
    %cst_226 = arith.constant 0.000000e+00 : f32
    %338 = vector.broadcast %cst_226 : f32 to vector<32x256xf32>
    %339 = arith.select %23, %321, %338 : vector<32x256xi1>, vector<32x256xf32>
    %c3_227 = arith.constant 3 : index
    %c1_228 = arith.constant 1 : index
    %c0_229 = arith.constant 0 : index
    %c0_230 = arith.constant 0 : index
    %340 = vector.load %arg6[%c3_227, %c1_228, %c0_229, %c0_230] : memref<6x9x1x256xf32, #tpu.memory_space<vmem>>, vector<1x1x1x256xf32>
    %341 = vector.shape_cast %340 : vector<1x1x1x256xf32> to vector<1x256xf32>
    %342 = vector.broadcast %341 : vector<1x256xf32> to vector<32x256xf32>
    %343 = arith.mulf %339, %342 : vector<32x256xf32>
    %344 = arith.addf %337, %343 : vector<32x256xf32>
    %cst_231 = arith.constant 0.000000e+00 : f32
    %345 = vector.broadcast %cst_231 : f32 to vector<32x256xf32>
    %346 = arith.select %27, %325, %345 : vector<32x256xi1>, vector<32x256xf32>
    %c3_232 = arith.constant 3 : index
    %c2_233 = arith.constant 2 : index
    %c0_234 = arith.constant 0 : index
    %c0_235 = arith.constant 0 : index
    %347 = vector.load %arg6[%c3_232, %c2_233, %c0_234, %c0_235] : memref<6x9x1x256xf32, #tpu.memory_space<vmem>>, vector<1x1x1x256xf32>
    %348 = vector.shape_cast %347 : vector<1x1x1x256xf32> to vector<1x256xf32>
    %349 = vector.broadcast %348 : vector<1x256xf32> to vector<32x256xf32>
    %350 = arith.mulf %346, %349 : vector<32x256xf32>
    %351 = arith.addf %344, %350 : vector<32x256xf32>
    %cst_236 = arith.constant 0.000000e+00 : f32
    %352 = vector.broadcast %cst_236 : f32 to vector<32x256xf32>
    %353 = arith.select %19, %319, %352 : vector<32x256xi1>, vector<32x256xf32>
    %c3_237 = arith.constant 3 : index
    %c3_238 = arith.constant 3 : index
    %c0_239 = arith.constant 0 : index
    %c0_240 = arith.constant 0 : index
    %354 = vector.load %arg6[%c3_237, %c3_238, %c0_239, %c0_240] : memref<6x9x1x256xf32, #tpu.memory_space<vmem>>, vector<1x1x1x256xf32>
    %355 = vector.shape_cast %354 : vector<1x1x1x256xf32> to vector<1x256xf32>
    %356 = vector.broadcast %355 : vector<1x256xf32> to vector<32x256xf32>
    %357 = arith.mulf %353, %356 : vector<32x256xf32>
    %358 = arith.addf %351, %357 : vector<32x256xf32>
    %cst_241 = arith.constant 0.000000e+00 : f32
    %359 = vector.broadcast %cst_241 : f32 to vector<32x256xf32>
    %360 = arith.select %21, %320, %359 : vector<32x256xi1>, vector<32x256xf32>
    %c3_242 = arith.constant 3 : index
    %c5_243 = arith.constant 5 : index
    %c0_244 = arith.constant 0 : index
    %c0_245 = arith.constant 0 : index
    %361 = vector.load %arg6[%c3_242, %c5_243, %c0_244, %c0_245] : memref<6x9x1x256xf32, #tpu.memory_space<vmem>>, vector<1x1x1x256xf32>
    %362 = vector.shape_cast %361 : vector<1x1x1x256xf32> to vector<1x256xf32>
    %363 = vector.broadcast %362 : vector<1x256xf32> to vector<32x256xf32>
    %364 = arith.mulf %360, %363 : vector<32x256xf32>
    %365 = arith.addf %358, %364 : vector<32x256xf32>
    %cst_246 = arith.constant 0.000000e+00 : f32
    %366 = vector.broadcast %cst_246 : f32 to vector<32x256xf32>
    %367 = arith.select %28, %324, %366 : vector<32x256xi1>, vector<32x256xf32>
    %c3_247 = arith.constant 3 : index
    %c6_248 = arith.constant 6 : index
    %c0_249 = arith.constant 0 : index
    %c0_250 = arith.constant 0 : index
    %368 = vector.load %arg6[%c3_247, %c6_248, %c0_249, %c0_250] : memref<6x9x1x256xf32, #tpu.memory_space<vmem>>, vector<1x1x1x256xf32>
    %369 = vector.shape_cast %368 : vector<1x1x1x256xf32> to vector<1x256xf32>
    %370 = vector.broadcast %369 : vector<1x256xf32> to vector<32x256xf32>
    %371 = arith.mulf %367, %370 : vector<32x256xf32>
    %372 = arith.addf %365, %371 : vector<32x256xf32>
    %cst_251 = arith.constant 0.000000e+00 : f32
    %373 = vector.broadcast %cst_251 : f32 to vector<32x256xf32>
    %374 = arith.select %25, %322, %373 : vector<32x256xi1>, vector<32x256xf32>
    %c3_252 = arith.constant 3 : index
    %c7_253 = arith.constant 7 : index
    %c0_254 = arith.constant 0 : index
    %c0_255 = arith.constant 0 : index
    %375 = vector.load %arg6[%c3_252, %c7_253, %c0_254, %c0_255] : memref<6x9x1x256xf32, #tpu.memory_space<vmem>>, vector<1x1x1x256xf32>
    %376 = vector.shape_cast %375 : vector<1x1x1x256xf32> to vector<1x256xf32>
    %377 = vector.broadcast %376 : vector<1x256xf32> to vector<32x256xf32>
    %378 = arith.mulf %374, %377 : vector<32x256xf32>
    %379 = arith.addf %372, %378 : vector<32x256xf32>
    %cst_256 = arith.constant 0.000000e+00 : f32
    %380 = vector.broadcast %cst_256 : f32 to vector<32x256xf32>
    %381 = arith.select %29, %326, %380 : vector<32x256xi1>, vector<32x256xf32>
    %c3_257 = arith.constant 3 : index
    %c8_258 = arith.constant 8 : index
    %c0_259 = arith.constant 0 : index
    %c0_260 = arith.constant 0 : index
    %382 = vector.load %arg6[%c3_257, %c8_258, %c0_259, %c0_260] : memref<6x9x1x256xf32, #tpu.memory_space<vmem>>, vector<1x1x1x256xf32>
    %383 = vector.shape_cast %382 : vector<1x1x1x256xf32> to vector<1x256xf32>
    %384 = vector.broadcast %383 : vector<1x256xf32> to vector<32x256xf32>
    %385 = arith.mulf %381, %384 : vector<32x256xf32>
    %386 = arith.addf %379, %385 : vector<32x256xf32>
    %387 = arith.truncf %386 : vector<32x256xf32> to vector<32x256xbf16>
    %c3_261 = arith.constant 3 : index
    %c0_262 = arith.constant 0 : index
    %c0_263 = arith.constant 0 : index
    %388 = vector.load %arg5[%c3_261, %c0_262, %c0_263] : memref<6x256x256xbf16, #tpu.memory_space<vmem>>, vector<1x256x256xbf16>
    %389 = vector.shape_cast %388 : vector<1x256x256xbf16> to vector<256x256xbf16>
    %cst_264 = arith.constant dense<0.000000e+00> : vector<32x256xf32>
    %390 = tpu.matmul %387, %389, %cst_264 {dimension_numbers = #tpu.dot_dimension_numbers<[1], [0], [0], [1], [0, 0, 1, 1], [], []>} : vector<32x256xbf16>, vector<256x256xbf16>, vector<32x256xf32> -> vector<32x256xf32>
    %c5_265 = arith.constant 5 : index
    %c0_266 = arith.constant 0 : index
    %c0_267 = arith.constant 0 : index
    %391 = vector.load %arg7[%c5_265, %c0_266, %c0_267] : memref<8x1x256xf32, #tpu.memory_space<vmem>>, vector<1x1x256xf32>
    %392 = vector.shape_cast %391 : vector<1x1x256xf32> to vector<1x256xf32>
    %393 = vector.broadcast %392 : vector<1x256xf32> to vector<32x256xf32>
    %394 = arith.addf %390, %393 : vector<32x256xf32>
    %395 = arith.addf %39, %394 : vector<32x256xf32>
    %c16_i32_268 = arith.constant 16 : i32
    %396 = tpu.dynamic_rotate %238 by %c16_i32_268 dim 1 : vector<32x256xf32>, i32 -> vector<32x256xf32>
    %c240_i32_269 = arith.constant 240 : i32
    %397 = tpu.dynamic_rotate %238 by %c240_i32_269 dim 1 : vector<32x256xf32>, i32 -> vector<32x256xf32>
    %c1_i32_270 = arith.constant 1 : i32
    %398 = tpu.dynamic_rotate %238 by %c1_i32_270 dim 0 : vector<32x256xf32>, i32 -> vector<32x256xf32>
    %c31_i32_271 = arith.constant 31 : i32
    %399 = tpu.dynamic_rotate %238 by %c31_i32_271 dim 0 : vector<32x256xf32>, i32 -> vector<32x256xf32>
    %c1_i32_272 = arith.constant 1 : i32
    %400 = tpu.dynamic_rotate %396 by %c1_i32_272 dim 0 : vector<32x256xf32>, i32 -> vector<32x256xf32>
    %c31_i32_273 = arith.constant 31 : i32
    %401 = tpu.dynamic_rotate %396 by %c31_i32_273 dim 0 : vector<32x256xf32>, i32 -> vector<32x256xf32>
    %c1_i32_274 = arith.constant 1 : i32
    %402 = tpu.dynamic_rotate %397 by %c1_i32_274 dim 0 : vector<32x256xf32>, i32 -> vector<32x256xf32>
    %c31_i32_275 = arith.constant 31 : i32
    %403 = tpu.dynamic_rotate %397 by %c31_i32_275 dim 0 : vector<32x256xf32>, i32 -> vector<32x256xf32>
    %cst_276 = arith.constant 0.000000e+00 : f32
    %404 = vector.broadcast %cst_276 : f32 to vector<32x256xf32>
    %405 = arith.select %26, %400, %404 : vector<32x256xi1>, vector<32x256xf32>
    %406 = arith.addf %238, %405 : vector<32x256xf32>
    %cst_277 = arith.constant 0.000000e+00 : f32
    %407 = vector.broadcast %cst_277 : f32 to vector<32x256xf32>
    %408 = arith.select %23, %398, %407 : vector<32x256xi1>, vector<32x256xf32>
    %409 = arith.addf %406, %408 : vector<32x256xf32>
    %cst_278 = arith.constant 0.000000e+00 : f32
    %410 = vector.broadcast %cst_278 : f32 to vector<32x256xf32>
    %411 = arith.select %27, %402, %410 : vector<32x256xi1>, vector<32x256xf32>
    %412 = arith.addf %409, %411 : vector<32x256xf32>
    %cst_279 = arith.constant 0.000000e+00 : f32
    %413 = vector.broadcast %cst_279 : f32 to vector<32x256xf32>
    %414 = arith.select %19, %396, %413 : vector<32x256xi1>, vector<32x256xf32>
    %415 = arith.addf %412, %414 : vector<32x256xf32>
    %cst_280 = arith.constant 0.000000e+00 : f32
    %416 = vector.broadcast %cst_280 : f32 to vector<32x256xf32>
    %417 = arith.select %21, %397, %416 : vector<32x256xi1>, vector<32x256xf32>
    %418 = arith.addf %415, %417 : vector<32x256xf32>
    %cst_281 = arith.constant 0.000000e+00 : f32
    %419 = vector.broadcast %cst_281 : f32 to vector<32x256xf32>
    %420 = arith.select %28, %401, %419 : vector<32x256xi1>, vector<32x256xf32>
    %421 = arith.addf %418, %420 : vector<32x256xf32>
    %cst_282 = arith.constant 0.000000e+00 : f32
    %422 = vector.broadcast %cst_282 : f32 to vector<32x256xf32>
    %423 = arith.select %25, %399, %422 : vector<32x256xi1>, vector<32x256xf32>
    %424 = arith.addf %421, %423 : vector<32x256xf32>
    %cst_283 = arith.constant 0.000000e+00 : f32
    %425 = vector.broadcast %cst_283 : f32 to vector<32x256xf32>
    %426 = arith.select %29, %403, %425 : vector<32x256xi1>, vector<32x256xf32>
    %427 = arith.addf %424, %426 : vector<32x256xf32>
    %c0_284 = arith.constant 0 : index
    %c0_285 = arith.constant 0 : index
    %428 = vector.load %arg8[%c0_284, %c0_285] : memref<32x256xf32, #tpu.memory_space<vmem>>, vector<32x256xf32>
    %429 = arith.mulf %427, %428 : vector<32x256xf32>
    %430 = arith.addf %429, %49 : vector<32x256xf32>
    %cst_286 = arith.constant 0.000000e+00 : f32
    %431 = vector.broadcast %cst_286 : f32 to vector<32x256xf32>
    %432 = arith.maximumf %395, %431 : vector<32x256xf32>
    %c16_i32_287 = arith.constant 16 : i32
    %433 = tpu.dynamic_rotate %432 by %c16_i32_287 dim 1 : vector<32x256xf32>, i32 -> vector<32x256xf32>
    %c240_i32_288 = arith.constant 240 : i32
    %434 = tpu.dynamic_rotate %432 by %c240_i32_288 dim 1 : vector<32x256xf32>, i32 -> vector<32x256xf32>
    %c1_i32_289 = arith.constant 1 : i32
    %435 = tpu.dynamic_rotate %432 by %c1_i32_289 dim 0 : vector<32x256xf32>, i32 -> vector<32x256xf32>
    %c31_i32_290 = arith.constant 31 : i32
    %436 = tpu.dynamic_rotate %432 by %c31_i32_290 dim 0 : vector<32x256xf32>, i32 -> vector<32x256xf32>
    %c1_i32_291 = arith.constant 1 : i32
    %437 = tpu.dynamic_rotate %433 by %c1_i32_291 dim 0 : vector<32x256xf32>, i32 -> vector<32x256xf32>
    %c31_i32_292 = arith.constant 31 : i32
    %438 = tpu.dynamic_rotate %433 by %c31_i32_292 dim 0 : vector<32x256xf32>, i32 -> vector<32x256xf32>
    %c1_i32_293 = arith.constant 1 : i32
    %439 = tpu.dynamic_rotate %434 by %c1_i32_293 dim 0 : vector<32x256xf32>, i32 -> vector<32x256xf32>
    %c31_i32_294 = arith.constant 31 : i32
    %440 = tpu.dynamic_rotate %434 by %c31_i32_294 dim 0 : vector<32x256xf32>, i32 -> vector<32x256xf32>
    %c4_295 = arith.constant 4 : index
    %c4_296 = arith.constant 4 : index
    %c0_297 = arith.constant 0 : index
    %c0_298 = arith.constant 0 : index
    %441 = vector.load %arg6[%c4_295, %c4_296, %c0_297, %c0_298] : memref<6x9x1x256xf32, #tpu.memory_space<vmem>>, vector<1x1x1x256xf32>
    %442 = vector.shape_cast %441 : vector<1x1x1x256xf32> to vector<1x256xf32>
    %443 = vector.broadcast %442 : vector<1x256xf32> to vector<32x256xf32>
    %444 = arith.mulf %432, %443 : vector<32x256xf32>
    %cst_299 = arith.constant 0.000000e+00 : f32
    %445 = vector.broadcast %cst_299 : f32 to vector<32x256xf32>
    %446 = arith.select %26, %437, %445 : vector<32x256xi1>, vector<32x256xf32>
    %c4_300 = arith.constant 4 : index
    %c0_301 = arith.constant 0 : index
    %c0_302 = arith.constant 0 : index
    %c0_303 = arith.constant 0 : index
    %447 = vector.load %arg6[%c4_300, %c0_301, %c0_302, %c0_303] : memref<6x9x1x256xf32, #tpu.memory_space<vmem>>, vector<1x1x1x256xf32>
    %448 = vector.shape_cast %447 : vector<1x1x1x256xf32> to vector<1x256xf32>
    %449 = vector.broadcast %448 : vector<1x256xf32> to vector<32x256xf32>
    %450 = arith.mulf %446, %449 : vector<32x256xf32>
    %451 = arith.addf %444, %450 : vector<32x256xf32>
    %cst_304 = arith.constant 0.000000e+00 : f32
    %452 = vector.broadcast %cst_304 : f32 to vector<32x256xf32>
    %453 = arith.select %23, %435, %452 : vector<32x256xi1>, vector<32x256xf32>
    %c4_305 = arith.constant 4 : index
    %c1_306 = arith.constant 1 : index
    %c0_307 = arith.constant 0 : index
    %c0_308 = arith.constant 0 : index
    %454 = vector.load %arg6[%c4_305, %c1_306, %c0_307, %c0_308] : memref<6x9x1x256xf32, #tpu.memory_space<vmem>>, vector<1x1x1x256xf32>
    %455 = vector.shape_cast %454 : vector<1x1x1x256xf32> to vector<1x256xf32>
    %456 = vector.broadcast %455 : vector<1x256xf32> to vector<32x256xf32>
    %457 = arith.mulf %453, %456 : vector<32x256xf32>
    %458 = arith.addf %451, %457 : vector<32x256xf32>
    %cst_309 = arith.constant 0.000000e+00 : f32
    %459 = vector.broadcast %cst_309 : f32 to vector<32x256xf32>
    %460 = arith.select %27, %439, %459 : vector<32x256xi1>, vector<32x256xf32>
    %c4_310 = arith.constant 4 : index
    %c2_311 = arith.constant 2 : index
    %c0_312 = arith.constant 0 : index
    %c0_313 = arith.constant 0 : index
    %461 = vector.load %arg6[%c4_310, %c2_311, %c0_312, %c0_313] : memref<6x9x1x256xf32, #tpu.memory_space<vmem>>, vector<1x1x1x256xf32>
    %462 = vector.shape_cast %461 : vector<1x1x1x256xf32> to vector<1x256xf32>
    %463 = vector.broadcast %462 : vector<1x256xf32> to vector<32x256xf32>
    %464 = arith.mulf %460, %463 : vector<32x256xf32>
    %465 = arith.addf %458, %464 : vector<32x256xf32>
    %cst_314 = arith.constant 0.000000e+00 : f32
    %466 = vector.broadcast %cst_314 : f32 to vector<32x256xf32>
    %467 = arith.select %19, %433, %466 : vector<32x256xi1>, vector<32x256xf32>
    %c4_315 = arith.constant 4 : index
    %c3_316 = arith.constant 3 : index
    %c0_317 = arith.constant 0 : index
    %c0_318 = arith.constant 0 : index
    %468 = vector.load %arg6[%c4_315, %c3_316, %c0_317, %c0_318] : memref<6x9x1x256xf32, #tpu.memory_space<vmem>>, vector<1x1x1x256xf32>
    %469 = vector.shape_cast %468 : vector<1x1x1x256xf32> to vector<1x256xf32>
    %470 = vector.broadcast %469 : vector<1x256xf32> to vector<32x256xf32>
    %471 = arith.mulf %467, %470 : vector<32x256xf32>
    %472 = arith.addf %465, %471 : vector<32x256xf32>
    %cst_319 = arith.constant 0.000000e+00 : f32
    %473 = vector.broadcast %cst_319 : f32 to vector<32x256xf32>
    %474 = arith.select %21, %434, %473 : vector<32x256xi1>, vector<32x256xf32>
    %c4_320 = arith.constant 4 : index
    %c5_321 = arith.constant 5 : index
    %c0_322 = arith.constant 0 : index
    %c0_323 = arith.constant 0 : index
    %475 = vector.load %arg6[%c4_320, %c5_321, %c0_322, %c0_323] : memref<6x9x1x256xf32, #tpu.memory_space<vmem>>, vector<1x1x1x256xf32>
    %476 = vector.shape_cast %475 : vector<1x1x1x256xf32> to vector<1x256xf32>
    %477 = vector.broadcast %476 : vector<1x256xf32> to vector<32x256xf32>
    %478 = arith.mulf %474, %477 : vector<32x256xf32>
    %479 = arith.addf %472, %478 : vector<32x256xf32>
    %cst_324 = arith.constant 0.000000e+00 : f32
    %480 = vector.broadcast %cst_324 : f32 to vector<32x256xf32>
    %481 = arith.select %28, %438, %480 : vector<32x256xi1>, vector<32x256xf32>
    %c4_325 = arith.constant 4 : index
    %c6_326 = arith.constant 6 : index
    %c0_327 = arith.constant 0 : index
    %c0_328 = arith.constant 0 : index
    %482 = vector.load %arg6[%c4_325, %c6_326, %c0_327, %c0_328] : memref<6x9x1x256xf32, #tpu.memory_space<vmem>>, vector<1x1x1x256xf32>
    %483 = vector.shape_cast %482 : vector<1x1x1x256xf32> to vector<1x256xf32>
    %484 = vector.broadcast %483 : vector<1x256xf32> to vector<32x256xf32>
    %485 = arith.mulf %481, %484 : vector<32x256xf32>
    %486 = arith.addf %479, %485 : vector<32x256xf32>
    %cst_329 = arith.constant 0.000000e+00 : f32
    %487 = vector.broadcast %cst_329 : f32 to vector<32x256xf32>
    %488 = arith.select %25, %436, %487 : vector<32x256xi1>, vector<32x256xf32>
    %c4_330 = arith.constant 4 : index
    %c7_331 = arith.constant 7 : index
    %c0_332 = arith.constant 0 : index
    %c0_333 = arith.constant 0 : index
    %489 = vector.load %arg6[%c4_330, %c7_331, %c0_332, %c0_333] : memref<6x9x1x256xf32, #tpu.memory_space<vmem>>, vector<1x1x1x256xf32>
    %490 = vector.shape_cast %489 : vector<1x1x1x256xf32> to vector<1x256xf32>
    %491 = vector.broadcast %490 : vector<1x256xf32> to vector<32x256xf32>
    %492 = arith.mulf %488, %491 : vector<32x256xf32>
    %493 = arith.addf %486, %492 : vector<32x256xf32>
    %cst_334 = arith.constant 0.000000e+00 : f32
    %494 = vector.broadcast %cst_334 : f32 to vector<32x256xf32>
    %495 = arith.select %29, %440, %494 : vector<32x256xi1>, vector<32x256xf32>
    %c4_335 = arith.constant 4 : index
    %c8_336 = arith.constant 8 : index
    %c0_337 = arith.constant 0 : index
    %c0_338 = arith.constant 0 : index
    %496 = vector.load %arg6[%c4_335, %c8_336, %c0_337, %c0_338] : memref<6x9x1x256xf32, #tpu.memory_space<vmem>>, vector<1x1x1x256xf32>
    %497 = vector.shape_cast %496 : vector<1x1x1x256xf32> to vector<1x256xf32>
    %498 = vector.broadcast %497 : vector<1x256xf32> to vector<32x256xf32>
    %499 = arith.mulf %495, %498 : vector<32x256xf32>
    %500 = arith.addf %493, %499 : vector<32x256xf32>
    %501 = arith.truncf %500 : vector<32x256xf32> to vector<32x256xbf16>
    %c4_339 = arith.constant 4 : index
    %c0_340 = arith.constant 0 : index
    %c0_341 = arith.constant 0 : index
    %502 = vector.load %arg5[%c4_339, %c0_340, %c0_341] : memref<6x256x256xbf16, #tpu.memory_space<vmem>>, vector<1x256x256xbf16>
    %503 = vector.shape_cast %502 : vector<1x256x256xbf16> to vector<256x256xbf16>
    %cst_342 = arith.constant dense<0.000000e+00> : vector<32x256xf32>
    %504 = tpu.matmul %501, %503, %cst_342 {dimension_numbers = #tpu.dot_dimension_numbers<[1], [0], [0], [1], [0, 0, 1, 1], [], []>} : vector<32x256xbf16>, vector<256x256xbf16>, vector<32x256xf32> -> vector<32x256xf32>
    %c6_343 = arith.constant 6 : index
    %c0_344 = arith.constant 0 : index
    %c0_345 = arith.constant 0 : index
    %505 = vector.load %arg7[%c6_343, %c0_344, %c0_345] : memref<8x1x256xf32, #tpu.memory_space<vmem>>, vector<1x1x256xf32>
    %506 = vector.shape_cast %505 : vector<1x1x256xf32> to vector<1x256xf32>
    %507 = vector.broadcast %506 : vector<1x256xf32> to vector<32x256xf32>
    %508 = arith.addf %504, %507 : vector<32x256xf32>
    %cst_346 = arith.constant 0.000000e+00 : f32
    %509 = vector.broadcast %cst_346 : f32 to vector<32x256xf32>
    %510 = arith.maximumf %508, %509 : vector<32x256xf32>
    %c16_i32_347 = arith.constant 16 : i32
    %511 = tpu.dynamic_rotate %510 by %c16_i32_347 dim 1 : vector<32x256xf32>, i32 -> vector<32x256xf32>
    %c240_i32_348 = arith.constant 240 : i32
    %512 = tpu.dynamic_rotate %510 by %c240_i32_348 dim 1 : vector<32x256xf32>, i32 -> vector<32x256xf32>
    %c1_i32_349 = arith.constant 1 : i32
    %513 = tpu.dynamic_rotate %510 by %c1_i32_349 dim 0 : vector<32x256xf32>, i32 -> vector<32x256xf32>
    %c31_i32_350 = arith.constant 31 : i32
    %514 = tpu.dynamic_rotate %510 by %c31_i32_350 dim 0 : vector<32x256xf32>, i32 -> vector<32x256xf32>
    %c1_i32_351 = arith.constant 1 : i32
    %515 = tpu.dynamic_rotate %511 by %c1_i32_351 dim 0 : vector<32x256xf32>, i32 -> vector<32x256xf32>
    %c31_i32_352 = arith.constant 31 : i32
    %516 = tpu.dynamic_rotate %511 by %c31_i32_352 dim 0 : vector<32x256xf32>, i32 -> vector<32x256xf32>
    %c1_i32_353 = arith.constant 1 : i32
    %517 = tpu.dynamic_rotate %512 by %c1_i32_353 dim 0 : vector<32x256xf32>, i32 -> vector<32x256xf32>
    %c31_i32_354 = arith.constant 31 : i32
    %518 = tpu.dynamic_rotate %512 by %c31_i32_354 dim 0 : vector<32x256xf32>, i32 -> vector<32x256xf32>
    %c5_355 = arith.constant 5 : index
    %c4_356 = arith.constant 4 : index
    %c0_357 = arith.constant 0 : index
    %c0_358 = arith.constant 0 : index
    %519 = vector.load %arg6[%c5_355, %c4_356, %c0_357, %c0_358] : memref<6x9x1x256xf32, #tpu.memory_space<vmem>>, vector<1x1x1x256xf32>
    %520 = vector.shape_cast %519 : vector<1x1x1x256xf32> to vector<1x256xf32>
    %521 = vector.broadcast %520 : vector<1x256xf32> to vector<32x256xf32>
    %522 = arith.mulf %510, %521 : vector<32x256xf32>
    %cst_359 = arith.constant 0.000000e+00 : f32
    %523 = vector.broadcast %cst_359 : f32 to vector<32x256xf32>
    %524 = arith.select %26, %515, %523 : vector<32x256xi1>, vector<32x256xf32>
    %c5_360 = arith.constant 5 : index
    %c0_361 = arith.constant 0 : index
    %c0_362 = arith.constant 0 : index
    %c0_363 = arith.constant 0 : index
    %525 = vector.load %arg6[%c5_360, %c0_361, %c0_362, %c0_363] : memref<6x9x1x256xf32, #tpu.memory_space<vmem>>, vector<1x1x1x256xf32>
    %526 = vector.shape_cast %525 : vector<1x1x1x256xf32> to vector<1x256xf32>
    %527 = vector.broadcast %526 : vector<1x256xf32> to vector<32x256xf32>
    %528 = arith.mulf %524, %527 : vector<32x256xf32>
    %529 = arith.addf %522, %528 : vector<32x256xf32>
    %cst_364 = arith.constant 0.000000e+00 : f32
    %530 = vector.broadcast %cst_364 : f32 to vector<32x256xf32>
    %531 = arith.select %23, %513, %530 : vector<32x256xi1>, vector<32x256xf32>
    %c5_365 = arith.constant 5 : index
    %c1_366 = arith.constant 1 : index
    %c0_367 = arith.constant 0 : index
    %c0_368 = arith.constant 0 : index
    %532 = vector.load %arg6[%c5_365, %c1_366, %c0_367, %c0_368] : memref<6x9x1x256xf32, #tpu.memory_space<vmem>>, vector<1x1x1x256xf32>
    %533 = vector.shape_cast %532 : vector<1x1x1x256xf32> to vector<1x256xf32>
    %534 = vector.broadcast %533 : vector<1x256xf32> to vector<32x256xf32>
    %535 = arith.mulf %531, %534 : vector<32x256xf32>
    %536 = arith.addf %529, %535 : vector<32x256xf32>
    %cst_369 = arith.constant 0.000000e+00 : f32
    %537 = vector.broadcast %cst_369 : f32 to vector<32x256xf32>
    %538 = arith.select %27, %517, %537 : vector<32x256xi1>, vector<32x256xf32>
    %c5_370 = arith.constant 5 : index
    %c2_371 = arith.constant 2 : index
    %c0_372 = arith.constant 0 : index
    %c0_373 = arith.constant 0 : index
    %539 = vector.load %arg6[%c5_370, %c2_371, %c0_372, %c0_373] : memref<6x9x1x256xf32, #tpu.memory_space<vmem>>, vector<1x1x1x256xf32>
    %540 = vector.shape_cast %539 : vector<1x1x1x256xf32> to vector<1x256xf32>
    %541 = vector.broadcast %540 : vector<1x256xf32> to vector<32x256xf32>
    %542 = arith.mulf %538, %541 : vector<32x256xf32>
    %543 = arith.addf %536, %542 : vector<32x256xf32>
    %cst_374 = arith.constant 0.000000e+00 : f32
    %544 = vector.broadcast %cst_374 : f32 to vector<32x256xf32>
    %545 = arith.select %19, %511, %544 : vector<32x256xi1>, vector<32x256xf32>
    %c5_375 = arith.constant 5 : index
    %c3_376 = arith.constant 3 : index
    %c0_377 = arith.constant 0 : index
    %c0_378 = arith.constant 0 : index
    %546 = vector.load %arg6[%c5_375, %c3_376, %c0_377, %c0_378] : memref<6x9x1x256xf32, #tpu.memory_space<vmem>>, vector<1x1x1x256xf32>
    %547 = vector.shape_cast %546 : vector<1x1x1x256xf32> to vector<1x256xf32>
    %548 = vector.broadcast %547 : vector<1x256xf32> to vector<32x256xf32>
    %549 = arith.mulf %545, %548 : vector<32x256xf32>
    %550 = arith.addf %543, %549 : vector<32x256xf32>
    %cst_379 = arith.constant 0.000000e+00 : f32
    %551 = vector.broadcast %cst_379 : f32 to vector<32x256xf32>
    %552 = arith.select %21, %512, %551 : vector<32x256xi1>, vector<32x256xf32>
    %c5_380 = arith.constant 5 : index
    %c5_381 = arith.constant 5 : index
    %c0_382 = arith.constant 0 : index
    %c0_383 = arith.constant 0 : index
    %553 = vector.load %arg6[%c5_380, %c5_381, %c0_382, %c0_383] : memref<6x9x1x256xf32, #tpu.memory_space<vmem>>, vector<1x1x1x256xf32>
    %554 = vector.shape_cast %553 : vector<1x1x1x256xf32> to vector<1x256xf32>
    %555 = vector.broadcast %554 : vector<1x256xf32> to vector<32x256xf32>
    %556 = arith.mulf %552, %555 : vector<32x256xf32>
    %557 = arith.addf %550, %556 : vector<32x256xf32>
    %cst_384 = arith.constant 0.000000e+00 : f32
    %558 = vector.broadcast %cst_384 : f32 to vector<32x256xf32>
    %559 = arith.select %28, %516, %558 : vector<32x256xi1>, vector<32x256xf32>
    %c5_385 = arith.constant 5 : index
    %c6_386 = arith.constant 6 : index
    %c0_387 = arith.constant 0 : index
    %c0_388 = arith.constant 0 : index
    %560 = vector.load %arg6[%c5_385, %c6_386, %c0_387, %c0_388] : memref<6x9x1x256xf32, #tpu.memory_space<vmem>>, vector<1x1x1x256xf32>
    %561 = vector.shape_cast %560 : vector<1x1x1x256xf32> to vector<1x256xf32>
    %562 = vector.broadcast %561 : vector<1x256xf32> to vector<32x256xf32>
    %563 = arith.mulf %559, %562 : vector<32x256xf32>
    %564 = arith.addf %557, %563 : vector<32x256xf32>
    %cst_389 = arith.constant 0.000000e+00 : f32
    %565 = vector.broadcast %cst_389 : f32 to vector<32x256xf32>
    %566 = arith.select %25, %514, %565 : vector<32x256xi1>, vector<32x256xf32>
    %c5_390 = arith.constant 5 : index
    %c7_391 = arith.constant 7 : index
    %c0_392 = arith.constant 0 : index
    %c0_393 = arith.constant 0 : index
    %567 = vector.load %arg6[%c5_390, %c7_391, %c0_392, %c0_393] : memref<6x9x1x256xf32, #tpu.memory_space<vmem>>, vector<1x1x1x256xf32>
    %568 = vector.shape_cast %567 : vector<1x1x1x256xf32> to vector<1x256xf32>
    %569 = vector.broadcast %568 : vector<1x256xf32> to vector<32x256xf32>
    %570 = arith.mulf %566, %569 : vector<32x256xf32>
    %571 = arith.addf %564, %570 : vector<32x256xf32>
    %cst_394 = arith.constant 0.000000e+00 : f32
    %572 = vector.broadcast %cst_394 : f32 to vector<32x256xf32>
    %573 = arith.select %29, %518, %572 : vector<32x256xi1>, vector<32x256xf32>
    %c5_395 = arith.constant 5 : index
    %c8_396 = arith.constant 8 : index
    %c0_397 = arith.constant 0 : index
    %c0_398 = arith.constant 0 : index
    %574 = vector.load %arg6[%c5_395, %c8_396, %c0_397, %c0_398] : memref<6x9x1x256xf32, #tpu.memory_space<vmem>>, vector<1x1x1x256xf32>
    %575 = vector.shape_cast %574 : vector<1x1x1x256xf32> to vector<1x256xf32>
    %576 = vector.broadcast %575 : vector<1x256xf32> to vector<32x256xf32>
    %577 = arith.mulf %573, %576 : vector<32x256xf32>
    %578 = arith.addf %571, %577 : vector<32x256xf32>
    %579 = arith.truncf %578 : vector<32x256xf32> to vector<32x256xbf16>
    %c5_399 = arith.constant 5 : index
    %c0_400 = arith.constant 0 : index
    %c0_401 = arith.constant 0 : index
    %580 = vector.load %arg5[%c5_399, %c0_400, %c0_401] : memref<6x256x256xbf16, #tpu.memory_space<vmem>>, vector<1x256x256xbf16>
    %581 = vector.shape_cast %580 : vector<1x256x256xbf16> to vector<256x256xbf16>
    %cst_402 = arith.constant dense<0.000000e+00> : vector<32x256xf32>
    %582 = tpu.matmul %579, %581, %cst_402 {dimension_numbers = #tpu.dot_dimension_numbers<[1], [0], [0], [1], [0, 0, 1, 1], [], []>} : vector<32x256xbf16>, vector<256x256xbf16>, vector<32x256xf32> -> vector<32x256xf32>
    %c7_403 = arith.constant 7 : index
    %c0_404 = arith.constant 0 : index
    %c0_405 = arith.constant 0 : index
    %583 = vector.load %arg7[%c7_403, %c0_404, %c0_405] : memref<8x1x256xf32, #tpu.memory_space<vmem>>, vector<1x1x256xf32>
    %584 = vector.shape_cast %583 : vector<1x1x256xf32> to vector<1x256xf32>
    %585 = vector.broadcast %584 : vector<1x256xf32> to vector<32x256xf32>
    %586 = arith.addf %582, %585 : vector<32x256xf32>
    %cst_406 = arith.constant 0xFF800000 : f32
    %587 = vector.broadcast %cst_406 : f32 to vector<32x256xf32>
    %588 = arith.select %26, %400, %587 : vector<32x256xi1>, vector<32x256xf32>
    %589 = arith.maximumf %238, %588 : vector<32x256xf32>
    %cst_407 = arith.constant 0xFF800000 : f32
    %590 = vector.broadcast %cst_407 : f32 to vector<32x256xf32>
    %591 = arith.select %23, %398, %590 : vector<32x256xi1>, vector<32x256xf32>
    %592 = arith.maximumf %589, %591 : vector<32x256xf32>
    %cst_408 = arith.constant 0xFF800000 : f32
    %593 = vector.broadcast %cst_408 : f32 to vector<32x256xf32>
    %594 = arith.select %27, %402, %593 : vector<32x256xi1>, vector<32x256xf32>
    %595 = arith.maximumf %592, %594 : vector<32x256xf32>
    %cst_409 = arith.constant 0xFF800000 : f32
    %596 = vector.broadcast %cst_409 : f32 to vector<32x256xf32>
    %597 = arith.select %19, %396, %596 : vector<32x256xi1>, vector<32x256xf32>
    %598 = arith.maximumf %595, %597 : vector<32x256xf32>
    %cst_410 = arith.constant 0xFF800000 : f32
    %599 = vector.broadcast %cst_410 : f32 to vector<32x256xf32>
    %600 = arith.select %21, %397, %599 : vector<32x256xi1>, vector<32x256xf32>
    %601 = arith.maximumf %598, %600 : vector<32x256xf32>
    %cst_411 = arith.constant 0xFF800000 : f32
    %602 = vector.broadcast %cst_411 : f32 to vector<32x256xf32>
    %603 = arith.select %28, %401, %602 : vector<32x256xi1>, vector<32x256xf32>
    %604 = arith.maximumf %601, %603 : vector<32x256xf32>
    %cst_412 = arith.constant 0xFF800000 : f32
    %605 = vector.broadcast %cst_412 : f32 to vector<32x256xf32>
    %606 = arith.select %25, %399, %605 : vector<32x256xi1>, vector<32x256xf32>
    %607 = arith.maximumf %604, %606 : vector<32x256xf32>
    %cst_413 = arith.constant 0xFF800000 : f32
    %608 = vector.broadcast %cst_413 : f32 to vector<32x256xf32>
    %609 = arith.select %29, %403, %608 : vector<32x256xi1>, vector<32x256xf32>
    %610 = arith.maximumf %607, %609 : vector<32x256xf32>
    %611 = arith.addf %586, %610 : vector<32x256xf32>
    %c0_414 = arith.constant 0 : index
    %c0_415 = arith.constant 0 : index
    %c0_416 = arith.constant 0 : index
    %612 = vector.load %arg9[%c0_414, %c0_415, %c0_416] : memref<4x32x256xf32, #tpu.memory_space<vmem>>, vector<1x32x256xf32>
    %613 = vector.shape_cast %612 : vector<1x32x256xf32> to vector<32x256xf32>
    %614 = vector.shape_cast %238 : vector<32x256xf32> to vector<1x32x256xf32>
    tpu.vector_store %arg9[%c0_414, %c0_415, %c0_416], %614 {strides = array<i32>} : memref<4x32x256xf32, #tpu.memory_space<vmem>>, vector<1x32x256xf32>,
    %c1_417 = arith.constant 1 : index
    %c0_418 = arith.constant 0 : index
    %c0_419 = arith.constant 0 : index
    %615 = vector.load %arg9[%c1_417, %c0_418, %c0_419] : memref<4x32x256xf32, #tpu.memory_space<vmem>>, vector<1x32x256xf32>
    %616 = vector.shape_cast %615 : vector<1x32x256xf32> to vector<32x256xf32>
    %617 = vector.shape_cast %395 : vector<32x256xf32> to vector<1x32x256xf32>
    tpu.vector_store %arg9[%c1_417, %c0_418, %c0_419], %617 {strides = array<i32>} : memref<4x32x256xf32, #tpu.memory_space<vmem>>, vector<1x32x256xf32>,
    %c2_420 = arith.constant 2 : index
    %c0_421 = arith.constant 0 : index
    %c0_422 = arith.constant 0 : index
    %618 = vector.load %arg9[%c2_420, %c0_421, %c0_422] : memref<4x32x256xf32, #tpu.memory_space<vmem>>, vector<1x32x256xf32>
    %619 = vector.shape_cast %618 : vector<1x32x256xf32> to vector<32x256xf32>
    %620 = vector.shape_cast %430 : vector<32x256xf32> to vector<1x32x256xf32>
    tpu.vector_store %arg9[%c2_420, %c0_421, %c0_422], %620 {strides = array<i32>} : memref<4x32x256xf32, #tpu.memory_space<vmem>>, vector<1x32x256xf32>,
    %c3_423 = arith.constant 3 : index
    %c0_424 = arith.constant 0 : index
    %c0_425 = arith.constant 0 : index
    %621 = vector.load %arg9[%c3_423, %c0_424, %c0_425] : memref<4x32x256xf32, #tpu.memory_space<vmem>>, vector<1x32x256xf32>
    %622 = vector.shape_cast %621 : vector<1x32x256xf32> to vector<32x256xf32>
    %623 = vector.shape_cast %611 : vector<32x256xf32> to vector<1x32x256xf32>
    tpu.vector_store %arg9[%c3_423, %c0_424, %c0_425], %623 {strides = array<i32>} : memref<4x32x256xf32, #tpu.memory_space<vmem>>, vector<1x32x256xf32>,
    return
  }
  func.func @transform_0(%arg0: i32) -> (i32, i32) {
    %c0_i32 = arith.constant 0 : i32
    %c0_i32_0 = arith.constant 0 : i32
    return %arg0, %c0_i32 : i32, i32
  }
  func.func @transform_1(%arg0: i32) -> (i32, i32) {
    %c0_i32 = arith.constant 0 : i32
    %c0_i32_0 = arith.constant 0 : i32
    return %arg0, %c0_i32 : i32, i32
  }
  func.func @transform_2(%arg0: i32) -> (i32, i32) {
    %c0_i32 = arith.constant 0 : i32
    %c0_i32_0 = arith.constant 0 : i32
    %c0_i32_1 = arith.constant 0 : i32
    return %c0_i32, %c0_i32_0 : i32, i32
  }
  func.func @transform_3(%arg0: i32) -> (i32, i32) {
    %c0_i32 = arith.constant 0 : i32
    %c0_i32_0 = arith.constant 0 : i32
    %c0_i32_1 = arith.constant 0 : i32
    return %c0_i32, %c0_i32_0 : i32, i32
  }
  func.func @transform_4(%arg0: i32) -> (i32, i32, i32) {
    %c0_i32 = arith.constant 0 : i32
    %c0_i32_0 = arith.constant 0 : i32
    %c0_i32_1 = arith.constant 0 : i32
    %c0_i32_2 = arith.constant 0 : i32
    return %c0_i32, %c0_i32_0, %c0_i32_1 : i32, i32, i32
  }
  func.func @transform_5(%arg0: i32) -> (i32, i32, i32, i32) {
    %c0_i32 = arith.constant 0 : i32
    %c0_i32_0 = arith.constant 0 : i32
    %c0_i32_1 = arith.constant 0 : i32
    %c0_i32_2 = arith.constant 0 : i32
    %c0_i32_3 = arith.constant 0 : i32
    return %c0_i32, %c0_i32_0, %c0_i32_1, %c0_i32_2 : i32, i32, i32, i32
  }
  func.func @transform_6(%arg0: i32) -> (i32, i32, i32) {
    %c0_i32 = arith.constant 0 : i32
    %c0_i32_0 = arith.constant 0 : i32
    %c0_i32_1 = arith.constant 0 : i32
    %c0_i32_2 = arith.constant 0 : i32
    return %c0_i32, %c0_i32_0, %c0_i32_1 : i32, i32, i32
  }
  func.func @transform_7(%arg0: i32) -> (i32, i32) {
    %c0_i32 = arith.constant 0 : i32
    %c0_i32_0 = arith.constant 0 : i32
    %c0_i32_1 = arith.constant 0 : i32
    return %c0_i32, %c0_i32_0 : i32, i32
  }
  func.func @transform_8(%arg0: i32) -> (i32, i32, i32) {
    %c0_i32 = arith.constant 0 : i32
    %c0_i32_0 = arith.constant 0 : i32
    %c0_i32_1 = arith.constant 0 : i32
    return %c0_i32, %arg0, %c0_i32_0 : i32, i32, i32
  }
}

</mosaic_0001>

<bundles_post_ra>
// kernel: tile.62
= control target key start
LH: loop header
LB: loop body
LE: loop exit
PB: predicated region body
PF: predicated region fallthrough
CT: control target
= control target key end

     0   :  { %s28_s0 = inlined_call_operand.vmem [shape: f32[16], index: 0, kind: input, shape index: {}]   ;;  %s29_s1 = inlined_call_operand.vmem [shape: f32[16,16], index: 1, kind: output, shape index: {}]  }
   0x1   :  { %v4_v0 = vld [vmem:[%s28_s0] ss:$0 sm:$0xff] }
   0x2   :  { %5 = vst [vmem:[%s29_s1] sm:$0xff] %v4_v0  ;;  %8 = vst [vmem:[%s29_s1 + $0x8] sm:$0xff] %v4_v0 }

// kernel: tile.108
= control target key start
LH: loop header
LB: loop body
LE: loop exit
PB: predicated region body
PF: predicated region fallthrough
CT: control target
= control target key end

     0   :  { %s7_s6 = smov 3  ;;  %s21_s9 = smov 3  ;;  %vm4_vm0 = vcmask 130048   ;;  %vm11_vm1 = vcmask 1048448   ;;  %vm18_vm2 = vcmask 917248   ;;  %vm25_vm3 = vcmask 786048   ;;  %s128_s0 = inlined_call_operand.vmem [shape: f32[16,16], index: 0, kind: input, shape index: {}]   ;;  %s129_s1 = inlined_call_operand.vmem [shape: f32[1,1,256], index: 1, kind: output, shape index: {}]  }
   0x1   :  { %v66_v0 = vld [vmem:[%s128_s0 + $0x7] ss:$8 sm:%s7_s6]   ;;  %s81_s10 = smov 112   ;;  %v68_v1 = vld [vmem:[%s128_s0 + $0x5] ss:$8 sm:%s21_s9]   ;;  %s14_s13 = smov 3 }
   0x2   :  { %9 = vrot.lane.b32.xlu0 %v66_v0, %s81_s10  ;;  %s82_s14 = smov 80   ;;  %v67_v2 = vld [vmem:[%s128_s0 + $0x6] ss:$8 sm:%s14_s13]   ;;  %s28_s17 = smov 3  ;;  %vm32_vm4 = vcmask 654848   ;;  %vm39_vm5 = vcmask 523648  }
   0x3   :  { %23 = vrot.lane.b32.xlu1 %v68_v1, %s82_s14  ;;  %v69_v3 = vld [vmem:[%s128_s0 + $0x4] ss:$8 sm:%s28_s17]   ;;  %s35_s20 = smov 3  ;;  %s42_s21 = smov 3  ;;  %vm46_vm6 = vcmask 392448   ;;  %vm53_vm7 = vcmask 261248  }
   0x4   :  { %s83_s22 = smov 96   ;;  %s84_s23 = smov 64   ;;  %v70_v4 = vld [vmem:[%s128_s0 + $0x3] ss:$8 sm:%s35_s20]   ;;  %v71_v5 = vld [vmem:[%s128_s0 + $0x2] ss:$8 sm:%s42_s21]  }
   0x5   :  { %s2_s26 = smov 3  ;;  %s49_s29 = smov 3 }
   0x6   :  { %16 = vrot.lane.b32.xlu0 %v67_v2, %s83_s22  ;;  %v3_v6 = vld [vmem:[%s128_s0] ss:$8 sm:%s2_s26]   ;;  %s85_s3 = smov 48   ;;  %s86_s4 = smov 32  }
   0x7   :  { %30 = vrot.lane.b32.xlu1 %v69_v3, %s84_s23  ;;  %5 = vst.msk [vmem:[#allocation0] ss:$8 sm:$0x3] %vm4_vm0, %v3_v6   ;;  %v72_v7 = vld [vmem:[%s128_s0 + $0x1] ss:$8 sm:%s49_s29]   ;;  %s87_s0 = smov 16  }
   0xa   :  { %37 = vrot.lane.b32.xlu0 %v70_v4, %s85_s3 }
   0xb   :  { %44 = vrot.lane.b32.xlu1 %v71_v5, %s86_s4 }
   0xe   :  { %51 = vrot.lane.b32.xlu0 %v72_v7, %s87_s0 }
  0x74   :  { %v10_v8 = vpop.permute.xlu0 %9  }
  0x75   :  { %12 = vst.msk [vmem:[#allocation0] ss:$8 sm:$0x3] %vm11_vm1, %v10_v8   ;;  %v24_v9 = vpop.permute.xlu1 %23  }
  0x78   :  { %v17_v10 = vpop.permute.xlu0 %16  }
  0x79   :  { %19 = vst.msk [vmem:[#allocation0] ss:$8 sm:$0x3] %vm18_vm2, %v17_v10   ;;  %v31_v11 = vpop.permute.xlu1 %30  }
  0x7a   :  { %26 = vst.msk [vmem:[#allocation0] ss:$8 sm:$0x3] %vm25_vm3, %v24_v9  }
  0x7b   :  { %33 = vst.msk [vmem:[#allocation0] ss:$8 sm:$0x3] %vm32_vm4, %v31_v11  }
  0x7c   :  { %v38_v12 = vpop.permute.xlu0 %37  }
  0x7d   :  { %40 = vst.msk [vmem:[#allocation0] ss:$8 sm:$0x3] %vm39_vm5, %v38_v12   ;;  %v45_v13 = vpop.permute.xlu1 %44  }
  0x7e   :  { %47 = vst.msk [vmem:[#allocation0] ss:$8 sm:$0x3] %vm46_vm6, %v45_v13  }
  0x80   :  { %v52_v14 = vpop.permute.xlu0 %51  }
  0x81   :  { %54 = vst.msk [vmem:[#allocation0] ss:$8 sm:$0x3] %vm53_vm7, %v52_v14  }
  0x88   :  { %v58_v15 = vld [vmem:[#allocation0] sm:$0x1]  ;;  %v62_v16 = vld [vmem:[#allocation0 + $0x8] sm:$0x1] }
  0x89   :  { %60 = vst [vmem:[%s129_s1] sm:$0x1] %v58_v15  ;;  %73 = vst [vmem:[%s129_s1 + $0x1] sm:$0x1] %v62_v16 }

// kernel: cell_forward.1
= control target key start
LH: loop header
LB: loop body
LE: loop exit
PB: predicated region body
PF: predicated region fallthrough
CT: control target
= control target key end

     0   :  { %s6723_s18 = smov 16   ;;  %s6724_s19 = smov 112   ;;  %s13985_s2 = inlined_call_operand.vmem [shape: bf16[256,256], index: 2, kind: input, shape index: {}]   ;;  %s13986_s3 = inlined_call_operand.vmem [shape: bf16[256,256], index: 3, kind: input, shape index: {}]   ;;  %s13987_s0 = inlined_call_operand.vmem [shape: f32[32,256], index: 0, kind: input, shape index: {}]   ;;  %s13988_s1 = inlined_call_operand.vmem [shape: f32[32,256], index: 1, kind: input, shape index: {}]   ;;  %s13989_s4 = inlined_call_operand.vmem [shape: bf16[6,256,256], index: 4, kind: input, shape index: {}]   ;;  %s13990_s6 = inlined_call_operand.vmem [shape: f32[8,1,256], index: 6, kind: input, shape index: {}]   ;;  %s13991_s5 = inlined_call_operand.vmem [shape: f32[6,9,1,256], index: 5, kind: input, shape index: {}]   ;;  %s13992_s8 = inlined_call_operand.vmem [shape: f32[4,32,256], index: 8, kind: output, shape index: {}]   ;;  %s13993_s7 = inlined_call_operand.vmem [shape: f32[32,256], index: 7, kind: input, shape index: {}]  }
   0x1   :  { %v6339_v0 = vld [vmem:[%s13985_s2 + $0x4] ss:$8 sps:$4 sm:$0xff]   ;;  %v6341_v1 = vld [vmem:[%s13985_s2] ss:$8 sps:$4 sm:$0xff]   ;;  %v6342_v2 = vld [vmem:[%s13985_s2 + $0x14] ss:$8 sps:$4 sm:$0xff]  }
   0x2   :  { %353 = vmatprep.subr.bf16.mxu0 %v6339_v0  ;;  %v6344_v3 = vld [vmem:[%s13985_s2 + $0x10] ss:$8 sps:$4 sm:$0xff]   ;;  %v6345_v4 = vld [vmem:[%s13985_s2 + $0x24] ss:$8 sps:$4 sm:$0xff]   ;;  %v6347_v5 = vld [vmem:[%s13985_s2 + $0x20] ss:$8 sps:$4 sm:$0xff]  }
   0x3   :  { %354 = vmatpush1.bf16.msra.mxu0 %v6341_v1  ;;  %v6348_v6 = vld [vmem:[%s13985_s2 + $0x34] ss:$8 sps:$4 sm:$0xff]   ;;  %v6357_v7 = vld [vmem:[%s13986_s3 + $0x4] ss:$8 sps:$4 sm:$0xff]   ;;  %v6350_v8 = vld [vmem:[%s13985_s2 + $0x30] ss:$8 sps:$4 sm:$0xff]  }
   0x4   :  { %355 = vmatprep.subr.bf16.mxu0 %v6342_v2  ;;  %631 = vmatprep.subr.bf16.mxu1 %v6357_v7  ;;  %v6361_v9 = vld [vmem:[%s13986_s3] ss:$8 sps:$4 sm:$0xff]   ;;  %v6363_v10 = vld [vmem:[%s13986_s3 + $0x14] ss:$8 sps:$4 sm:$0xff]   ;;  %v6351_v11 = vld [vmem:[%s13985_s2 + $0x44] ss:$8 sps:$4 sm:$0xff]  }
   0x5   :  { %632 = vmatpush1.bf16.msra.mxu1 %v6361_v9  ;;  %v6367_v12 = vld [vmem:[%s13986_s3 + $0x10] ss:$8 sps:$4 sm:$0xff]   ;;  %v6369_v13 = vld [vmem:[%s13986_s3 + $0x24] ss:$8 sps:$4 sm:$0xff]   ;;  %v6353_v14 = vld [vmem:[%s13985_s2 + $0x40] ss:$8 sps:$4 sm:$0xff]  }
   0x6   :  { %633 = vmatprep.subr.bf16.mxu1 %v6363_v10  ;;  %v6354_v15 = vld [vmem:[%s13985_s2 + $0x54] ss:$8 sps:$4 sm:$0xff]   ;;  %v6373_v16 = vld [vmem:[%s13986_s3 + $0x20] ss:$8 sps:$4 sm:$0xff]   ;;  %v6356_v18 = vld [vmem:[%s13985_s2 + $0x50] ss:$8 sps:$4 sm:$0xff]  }
   0x7   :  { %356 = vmatpush1.bf16.msra.mxu0 %v6344_v3  ;;  %v6375_v17 = vld [vmem:[%s13986_s3 + $0x34] ss:$8 sps:$4 sm:$0xff]   ;;  %v6359_v19 = vld [vmem:[%s13985_s2 + $0x64] ss:$8 sps:$4 sm:$0xff]   ;;  %v6379_v20 = vld [vmem:[%s13986_s3 + $0x30] ss:$8 sps:$4 sm:$0xff]  }
   0x8   :  { %357 = vmatprep.subr.bf16.mxu0 %v6345_v4  ;;  %v6381_v21 = vld [vmem:[%s13986_s3 + $0x44] ss:$8 sps:$4 sm:$0xff]   ;;  %v6362_v22 = vld [vmem:[%s13985_s2 + $0x60] ss:$8 sps:$4 sm:$0xff]   ;;  %v6365_v23 = vld [vmem:[%s13985_s2 + $0x74] ss:$8 sps:$4 sm:$0xff]  }
   0x9   :  { %634 = vmatpush1.bf16.msra.mxu1 %v6367_v12  ;;  %v6385_v24 = vld [vmem:[%s13986_s3 + $0x40] ss:$8 sps:$4 sm:$0xff]   ;;  %v6387_v25 = vld [vmem:[%s13986_s3 + $0x54] ss:$8 sps:$4 sm:$0xff]   ;;  %v6368_v26 = vld [vmem:[%s13985_s2 + $0x70] ss:$8 sps:$4 sm:$0xff]  }
   0xa   :  { %635 = vmatprep.subr.bf16.mxu1 %v6369_v13  ;;  %v6371_v27 = vld [vmem:[%s13985_s2 + $0x84] ss:$8 sps:$4 sm:$0xff]   ;;  %v6391_v28 = vld [vmem:[%s13986_s3 + $0x50] ss:$8 sps:$4 sm:$0xff]   ;;  %v6374_v30 = vld [vmem:[%s13985_s2 + $0x80] ss:$8 sps:$4 sm:$0xff]  }
   0xb   :  { %358 = vmatpush1.bf16.msra.mxu0 %v6347_v5  ;;  %v6393_v29 = vld [vmem:[%s13986_s3 + $0x64] ss:$8 sps:$4 sm:$0xff]   ;;  %v6377_v31 = vld [vmem:[%s13985_s2 + $0x94] ss:$8 sps:$4 sm:$0xff]   ;;  %v6397_v32 = vld [vmem:[%s13986_s3 + $0x60] ss:$8 sps:$4 sm:$0xff]  }
   0xc   :  { %359 = vmatprep.subr.bf16.mxu0 %v6348_v6  ;;  %v6399_v33 = vld [vmem:[%s13986_s3 + $0x74] ss:$8 sps:$4 sm:$0xff]   ;;  %v6380_v34 = vld [vmem:[%s13985_s2 + $0x90] ss:$8 sps:$4 sm:$0xff]   ;;  %v130_v35 = vld [vmem:[%s13987_s0 + $0x8] sm:$0xff] }
   0xd   :  { %636 = vmatpush1.bf16.msra.mxu1 %v6373_v16  ;;  %v132_v36 = vld [vmem:[%s13987_s0 + $0x18] sm:$0xff]  ;;  %v138_v37 = vmax.f32 %v130_v35, 0.0  ;;  %v6383_v38 = vld [vmem:[%s13985_s2 + $0xa4] ss:$8 sps:$4 sm:$0xff]   ;;  %v6386_v43 = vld [vmem:[%s13985_s2 + $0xa0] ss:$8 sps:$4 sm:$0xff]  }
   0xe   :  { %637 = vmatprep.subr.bf16.mxu1 %v6375_v17  ;;  %v6403_v39 = vld [vmem:[%s13986_s3 + $0x70] ss:$8 sps:$4 sm:$0xff]   ;;  %v140_v40 = vmax.f32 %v132_v36, 0.0  ;;  %v6405_v41 = vld [vmem:[%s13986_s3 + $0x84] ss:$8 sps:$4 sm:$0xff]  }
   0xf   :  { %360 = vmatpush1.bf16.msra.mxu0 %v6350_v8  ;;  %v6389_v44 = vld [vmem:[%s13985_s2 + $0xb4] ss:$8 sps:$4 sm:$0xff]   ;;  %v6409_v45 = vld [vmem:[%s13986_s3 + $0x80] ss:$8 sps:$4 sm:$0xff]   ;;  %v6392_v47 = vld [vmem:[%s13985_s2 + $0xb0] ss:$8 sps:$4 sm:$0xff]  }
  0x10   :  { %361 = vmatprep.subr.bf16.mxu0 %v6351_v11  ;;  %v146_v42 = vpack.c.bf16 %v140_v40, %v138_v37  ;;  %v6411_v46 = vld [vmem:[%s13986_s3 + $0x94] ss:$8 sps:$4 sm:$0xff]   ;;  %v6395_v48 = vld [vmem:[%s13985_s2 + $0xc4] ss:$8 sps:$4 sm:$0xff]   ;;  %v6415_v49 = vld [vmem:[%s13986_s3 + $0x90] ss:$8 sps:$4 sm:$0xff]  }
  0x11   :  { %638 = vmatpush1.bf16.msra.mxu1 %v6379_v20  ;;  %v6417_v50 = vld [vmem:[%s13986_s3 + $0xa4] ss:$8 sps:$4 sm:$0xff]   ;;  %v409_v52 = vld [vmem:[%s13988_s1 + $0x18] sm:$0xff]  ;;  %v6398_v55 = vld [vmem:[%s13985_s2 + $0xc0] ss:$8 sps:$4 sm:$0xff]  }
  0x12   :  { %639 = vmatprep.subr.bf16.mxu1 %v6381_v21  ;;  %385 = vmatprep.mubr.bf16.mxu0 %v146_v42  ;;  %v407_v51 = vld [vmem:[%s13988_s1 + $0x8] sm:$0xff]  ;;  %v417_v54 = vmax.f32 %v409_v52, 0.0  ;;  %v6401_v56 = vld [vmem:[%s13985_s2 + $0xd4] ss:$8 sps:$4 sm:$0xff]   ;;  %v6404_v60 = vld [vmem:[%s13985_s2 + $0xd0] ss:$8 sps:$4 sm:$0xff]   ;;  %v13994_v52 = vlaneseq }
  0x13   :  { %362 = vmatpush1.bf16.msra.mxu0 %v6353_v14  ;;  %v415_v53 = vmax.f32 %v407_v51, 0.0  ;;  %v6419_v57 = vld [vmem:[%s13986_s3 + $0xa0] ss:$8 sps:$4 sm:$0xff]   ;;  %v6420_v59 = vld [vmem:[%s13986_s3 + $0xb4] ss:$8 sps:$4 sm:$0xff]  }
  0x14   :  { %363 = vmatprep.subr.bf16.mxu0 %v6354_v15  ;;  %v6407_v61 = vld [vmem:[%s13985_s2 + $0xe4] ss:$8 sps:$4 sm:$0xff]   ;;  %v6422_v62 = vld [vmem:[%s13986_s3 + $0xb0] ss:$8 sps:$4 sm:$0xff]   ;;  %v6410_v0 = vld [vmem:[%s13985_s2 + $0xe0] ss:$8 sps:$4 sm:$0xff]  }
  0x15   :  { %640 = vmatpush1.bf16.msra.mxu1 %v6385_v24  ;;  %v423_v58 = vpack.c.bf16 %v417_v54, %v415_v53  ;;  %v6423_v63 = vld [vmem:[%s13986_s3 + $0xc4] ss:$8 sps:$4 sm:$0xff]   ;;  %v6413_v1 = vld [vmem:[%s13985_s2 + $0xf4] ss:$8 sps:$4 sm:$0xff]   ;;  %v6425_v6 = vld [vmem:[%s13986_s3 + $0xc0] ss:$8 sps:$4 sm:$0xff]  }
  0x16   :  { %641 = vmatprep.subr.bf16.mxu1 %v6387_v25  ;;  %v129_v2 = vld [vmem:[%s13987_s0] sm:$0xff]  ;;  %v131_v3 = vld [vmem:[%s13987_s0 + $0x10] sm:$0xff]  ;;  %v134_v4 = vld [vmem:[%s13987_s0 + $0x28] sm:$0xff]  ;;  %v7047_v53 = vshrl.u32 %v13994_v52, 7 }
  0x17   :  { %364 = vmatpush1.bf16.msra.mxu0 %v6356_v18  ;;  %663 = vmatprep.mubr.bf16.mxu1 %v423_v58  ;;  %v136_v5 = vld [vmem:[%s13987_s0 + $0x38] sm:$0xff]  ;;  %v137_v8 = vmax.f32 %v129_v2, 0.0  ;;  %v139_v9 = vmax.f32 %v131_v3, 0.0  ;;  %v142_v11 = vmax.f32 %v134_v4, 0.0  ;;  %v6429_v14 = vld [vmem:[%s13986_s3 + $0xe4] ss:$8 sps:$4 sm:$0xff]  }
  0x18   :  { %365 = vmatprep.subr.bf16.mxu0 %v6359_v19  ;;  %v6426_v7 = vld [vmem:[%s13986_s3 + $0xd4] ss:$8 sps:$4 sm:$0xff]   ;;  %v6416_v10 = vld [vmem:[%s13985_s2 + $0xf0] ss:$8 sps:$4 sm:$0xff]   ;;  %v144_v12 = vmax.f32 %v136_v5, 0.0  ;;  %v133_v17 = vld [vmem:[%s13987_s0 + $0x20] sm:$0xff] }
  0x19   :  { %642 = vmatpush1.bf16.msra.mxu1 %v6391_v28  ;;  %v6428_v13 = vld [vmem:[%s13986_s3 + $0xd0] ss:$8 sps:$4 sm:$0xff]   ;;  %v145_v15 = vpack.c.bf16 %v139_v9, %v137_v8  ;;  %v6431_v19 = vld [vmem:[%s13986_s3 + $0xe0] ss:$8 sps:$4 sm:$0xff]   ;;  %v141_v25 = vmax.f32 %v133_v17, 0.0  ;;  %14263 = vst [vmem:[#allocation2_spill] sm:$0xff] %v7047_v53 }
  0x1a   :  { %643 = vmatprep.subr.bf16.mxu1 %v6393_v29  ;;  %v148_v16 = vpack.c.bf16 %v144_v12, %v142_v11  ;;  %v135_v18 = vld [vmem:[%s13987_s0 + $0x30] sm:$0xff]  ;;  %v406_v20 = vld [vmem:[%s13988_s1] sm:$0xff]  ;;  %v413_v24 = vld [vmem:[%s13988_s1 + $0x38] sm:$0xff]  ;;  %vm14103_vm0 = vcmp.lt.s32.totalorder %v7047_v53, 1  ;;  %vm14086_vm1 = vcmp.lt.s32.totalorder %v7047_v53, 7 }
  0x1b   :  { %366 = vmatpush1.bf16.msra.mxu0 %v6362_v22  ;;  %v408_v21 = vld [vmem:[%s13988_s1 + $0x10] sm:$0xff]  ;;  %v410_v35 = vld [vmem:[%s13988_s1 + $0x20] sm:$0xff] }
  0x1c   :  { %367 = vmatprep.subr.bf16.mxu0 %v6365_v23  ;;  %v6432_v22 = vld [vmem:[%s13986_s3 + $0xf4] ss:$8 sps:$4 sm:$0xff]   ;;  %v411_v23 = vld [vmem:[%s13988_s1 + $0x28] sm:$0xff]  ;;  %v416_v28 = vmax.f32 %v408_v21, 0.0  ;;  %v6434_v29 = vld [vmem:[%s13986_s3 + $0xf0] ss:$8 sps:$4 sm:$0xff]  }
  0x1d   :  { %644 = vmatpush1.bf16.msra.mxu1 %v6397_v32  ;;  %v412_v36 = vld [vmem:[%s13988_s1 + $0x30] sm:$0xff]  ;;  %v418_v37 = vmax.f32 %v410_v35, 0.0  ;;  %v6435_v40 = vld [vmem:[%s13989_s4] ss:$8 sps:$4 sm:$0xff]  }
  0x1e   :  { %645 = vmatprep.subr.bf16.mxu1 %v6399_v33  ;;  %v6440_v42 = vld [vmem:[%s13989_s4 + $0x14] ss:$8 sps:$4 sm:$0xff]   ;;  %v6450_v51 = vld [vmem:[%s13989_s4 + $0x50] ss:$8 sps:$4 sm:$0xff]   ;;  %v181_v54 = vld [vmem:[%s13990_s6] sm:$0x3] }
  0x1f   :  { %368 = vmatpush1.bf16.msra.mxu0 %v6368_v26  ;;  %v143_v26 = vmax.f32 %v135_v18, 0.0  ;;  %v6453_v58 = vld [vmem:[%s13989_s4 + $0x60] ss:$8 sps:$4 sm:$0xff]  }
  0x20   :  { %369 = vmatprep.subr.bf16.mxu0 %v6371_v27  ;;  %v414_v27 = vmax.f32 %v406_v20, 0.0 }
  0x21   :  { %646 = vmatpush1.bf16.msra.mxu1 %v6403_v39  ;;  %v147_v32 = vpack.c.bf16 %v143_v26, %v141_v25 }
  0x22   :  { %647 = vmatprep.subr.bf16.mxu1 %v6405_v41  ;;  %v422_v33 = vpack.c.bf16 %v416_v28, %v414_v27  ;;  %v6437_v41 = vld [vmem:[%s13989_s4 + $0x4] ss:$8 sps:$4 sm:$0xff]  }
  0x23   :  { %370 = vmatpush1.bf16.msra.mxu0 %v6374_v30  ;;  %v419_v30 = vmax.f32 %v411_v23, 0.0 }
  0x24   :  { %371 = vmatprep.subr.bf16.mxu0 %v6377_v31  ;;  %v421_v31 = vmax.f32 %v413_v24, 0.0 }
  0x25   :  { %648 = vmatpush1.bf16.msra.mxu1 %v6409_v45  ;;  %v6441_v45 = vld [vmem:[%s13989_s4 + $0x20] ss:$8 sps:$4 sm:$0xff]  }
  0x26   :  { %649 = vmatprep.subr.bf16.mxu1 %v6411_v46  ;;  %v6446_v46 = vld [vmem:[%s13989_s4 + $0x34] ss:$8 sps:$4 sm:$0xff]  }
  0x27   :  { %372 = vmatpush1.bf16.msra.mxu0 %v6380_v34  ;;  %v425_v34 = vpack.c.bf16 %v421_v31, %v419_v30  ;;  %v6464_v30 = vld [vmem:[%s13989_s4 + $0x94] ss:$8 sps:$4 sm:$0xff]  }
  0x28   :  { %373 = vmatprep.subr.bf16.mxu0 %v6383_v38  ;;  %v420_v38 = vmax.f32 %v412_v36, 0.0 }
  0x29   :  { %650 = vmatpush1.bf16.msra.mxu1 %v6415_v49  ;;  %v6447_v49 = vld [vmem:[%s13989_s4 + $0x40] ss:$8 sps:$4 sm:$0xff]  }
  0x2a   :  { %651 = vmatprep.subr.bf16.mxu1 %v6417_v50  ;;  %v424_v39 = vpack.c.bf16 %v420_v38, %v418_v37  ;;  %v6452_v50 = vld [vmem:[%s13989_s4 + $0x54] ss:$8 sps:$4 sm:$0xff]  }
  0x2b   :  { %374 = vmatpush1.bf16.msra.mxu0 %v6386_v43  ;;  %v6438_v43 = vld [vmem:[%s13989_s4 + $0x10] ss:$8 sps:$4 sm:$0xff]  }
  0x2c   :  { %375 = vmatprep.subr.bf16.mxu0 %v6389_v44  ;;  %v6443_v44 = vld [vmem:[%s13989_s4 + $0x24] ss:$8 sps:$4 sm:$0xff]  }
  0x2d   :  { %652 = vmatpush1.bf16.msra.mxu1 %v6419_v57  ;;  %v7059_v57 = vsub.s32 1, %v7047_v53 }
  0x2e   :  { %653 = vmatprep.subr.bf16.mxu1 %v6420_v59 }
  0x2f   :  { %376 = vmatpush1.bf16.msra.mxu0 %v6392_v47  ;;  %v6444_v47 = vld [vmem:[%s13989_s4 + $0x30] ss:$8 sps:$4 sm:$0xff]   ;;  %14265 = vst [vmem:[#allocation4_spill] sm:$0xff] %v7059_v57 }
  0x30   :  { %377 = vmatprep.subr.bf16.mxu0 %v6395_v48  ;;  %v6449_v48 = vld [vmem:[%s13989_s4 + $0x44] ss:$8 sps:$4 sm:$0xff]  }
  0x31   :  { %654 = vmatpush1.bf16.msra.mxu1 %v6422_v62  ;;  %v6456_v62 = vld [vmem:[%s13989_s4 + $0x70] ss:$8 sps:$4 sm:$0xff]  }
  0x32   :  { %655 = vmatprep.subr.bf16.mxu1 %v6423_v63 }
  0x33   :  { %378 = vmatpush1.bf16.msra.mxu0 %v6398_v55  ;;  %v7053_v55 = vsub.s32 0, %v7047_v53 }
  0x34   :  { %379 = vmatprep.subr.bf16.mxu0 %v6401_v56  ;;  %v6455_v56 = vld [vmem:[%s13989_s4 + $0x64] ss:$8 sps:$4 sm:$0xff]  }
  0x35   :  { %656 = vmatpush1.bf16.msra.mxu1 %v6425_v6  ;;  %14264 = vst [vmem:[#allocation3_spill] sm:$0xff] %v7053_v55  ;;  %v186_v59 = vrot.slane %v181_v54, %v7053_v55 }
  0x36   :  { %657 = vmatprep.subr.bf16.mxu1 %v6426_v7 }
  0x37   :  { %380 = vmatpush1.bf16.msra.mxu0 %v6404_v60  ;;  %v6458_v60 = vld [vmem:[%s13989_s4 + $0x74] ss:$8 sps:$4 sm:$0xff]  }
  0x38   :  { %381 = vmatprep.subr.bf16.mxu0 %v6407_v61  ;;  %v190_v61 = vrot.slane %v181_v54, %v7059_v57 }
  0x39   :  { %658 = vmatpush1.bf16.msra.mxu1 %v6428_v13 }
  0x3a   :  { %659 = vmatprep.subr.bf16.mxu1 %v6429_v14 }
  0x3b   :  { %382 = vmatpush1.bf16.msra.mxu0 %v6410_v0  ;;  %v6459_v0 = vld [vmem:[%s13989_s4 + $0x80] ss:$8 sps:$4 sm:$0xff]  }
  0x3c   :  { %383 = vmatprep.subr.bf16.mxu0 %v6413_v1  ;;  %v6461_v1 = vld [vmem:[%s13989_s4 + $0x84] ss:$8 sps:$4 sm:$0xff]  }
  0x3d   :  { %660 = vmatpush1.bf16.msra.mxu1 %v6431_v19 }
  0x3e   :  { %661 = vmatprep.subr.bf16.mxu1 %v6432_v22 }
  0x3f   :  { %384 = vmatpush1.bf16.msra.mxu0 %v6416_v10 }
  0x40   :  { %1365 = vmatprep.subr.bf16.mxu0 %v6437_v41 }
  0x41   :  { %662 = vmatpush1.bf16.msra.mxu1 %v6434_v29 }
  0x42   :  { %386 = vmatmul.mubr.bf16.vlgmr.msra.gmra.mrb[0].mxu0 %v145_v15 }
  0x43   :  { %395 = vmatprep.mubr.bf16.mxu0 %v148_v16  ;;  %1366 = vmatpush1.bf16.msra.mxu0 %v6435_v40 }
  0x44   :  { %664 = vmatmul.mubr.bf16.vlgmr.msra.gmra.mrb[0].mxu1 %v422_v33  ;;  %1367 = vmatprep.subr.bf16.mxu0 %v6440_v42  ;;  %v6467_v42 = vld [vmem:[%s13989_s4 + $0xa4] ss:$8 sps:$4 sm:$0xff]  }
  0x45   :  { %673 = vmatprep.mubr.bf16.mxu1 %v425_v34  ;;  %v6462_v34 = vld [vmem:[%s13989_s4 + $0x90] ss:$8 sps:$4 sm:$0xff]  }
  0x47   :  { %1368 = vmatpush1.bf16.msra.mxu0 %v6438_v43 }
  0x48   :  { %1369 = vmatprep.subr.bf16.mxu0 %v6443_v44 }
  0x4a   :  { %396 = vmatmul.mubr.bf16.gmra.mrb[4].mxu0 %v147_v32  ;;  %v5869_v32 = vld [vmem:[%s13990_s6 + $0x2] sm:$0x3] }
  0x4b   :  { %1370 = vmatpush1.bf16.msra.mxu0 %v6441_v45  ;;  %v464_v44 = vrot.slane %v5869_v32, %v7053_v55  ;;  %v6465_v45 = vld [vmem:[%s13989_s4 + $0xa0] ss:$8 sps:$4 sm:$0xff]  }
  0x4c   :  { %674 = vmatmul.mubr.bf16.gmra.mrb[4].mxu1 %v424_v39  ;;  %1371 = vmatprep.subr.bf16.mxu0 %v6446_v46 }
  0x4f   :  { %1372 = vmatpush1.bf16.msra.mxu0 %v6444_v47 }
  0x50   :  { %1373 = vmatprep.subr.bf16.mxu0 %v6449_v48 }
  0x53   :  { %1374 = vmatpush1.bf16.msra.mxu0 %v6447_v49 }
  0x54   :  { %1375 = vmatprep.subr.bf16.mxu0 %v6452_v50 }
  0x57   :  { %1376 = vmatpush1.bf16.msra.mxu0 %v6450_v51  ;;  %v468_v51 = vrot.slane %v5869_v32, %v7059_v57 }
  0x58   :  { %1377 = vmatprep.subr.bf16.mxu0 %v6455_v56 }
  0x5b   :  { %1378 = vmatpush1.bf16.msra.mxu0 %v6453_v58 }
  0x5c   :  { %1379 = vmatprep.subr.bf16.mxu0 %v6458_v60 }
  0x5f   :  { %1380 = vmatpush1.bf16.msra.mxu0 %v6456_v62 }
  0x60   :  { %1381 = vmatprep.subr.bf16.mxu0 %v6461_v1  ;;  %v6470_v1 = vld [vmem:[%s13989_s4 + $0xb4] ss:$8 sps:$4 sm:$0xff]  }
  0x63   :  { %1382 = vmatpush1.bf16.msra.mxu0 %v6459_v0 }
  0x64   :  { %1383 = vmatprep.subr.bf16.mxu0 %v6464_v30 }
  0x67   :  { %1384 = vmatpush1.bf16.msra.mxu0 %v6462_v34 }
  0x68   :  { %1385 = vmatprep.subr.bf16.mxu0 %v6467_v42 }
  0x6b   :  { %1386 = vmatpush1.bf16.msra.mxu0 %v6465_v45 }
  0x6c   :  { %1387 = vmatprep.subr.bf16.mxu0 %v6470_v1 }
 0x115   :  { %v387_v63 = vpop.f32.mrb[0].mxu0 }
 0x116   :  { %v7078_v2 = vadd.f32 %v387_v63, %v186_v59  ;;  %v389_v3 = vpop.f32.mrb[1].mxu0 }
 0x117   :  { %v7080_v4 = vadd.f32 %v389_v3, %v190_v61  ;;  %v391_v5 = vpop.f32.mrb[2].mxu0  ;;  %v665_v20 = vpop.f32.mrb[0].mxu1 }
 0x118   :  { %14266 = vst [vmem:[#allocation5_spill] sm:$0xff] %v7078_v2  ;;  %v7083_v6 = vmax.f32 %v7078_v2, 0.0  ;;  %v7085_v7 = vadd.f32 %v391_v5, %v186_v59  ;;  %v393_v8 = vpop.f32.mrb[3].mxu0  ;;  %v667_v23 = vpop.f32.mrb[1].mxu1 }
 0x119   :  { %14267 = vst [vmem:[#allocation6_spill] sm:$0xff] %v7080_v4  ;;  %v7088_v9 = vmax.f32 %v7080_v4, 0.0  ;;  %v7090_v10 = vadd.f32 %v393_v8, %v190_v61  ;;  %v669_v28 = vpop.f32.mrb[2].mxu1  ;;  %v7212_v5 = vadd.f32 %v667_v23, %v468_v51  ;;  %v6468_v8 = vld [vmem:[%s13989_s4 + $0xb0] ss:$8 sps:$4 sm:$0xff]  }
 0x11a   :  { %14268 = vst [vmem:[#allocation7_spill] sm:$0xff] %v7085_v7  ;;  %v7093_v11 = vmax.f32 %v7085_v7, 0.0  ;;  %692 = vrot.lane.b32.xlu0 %v7083_v6, %s6723_s18  ;;  %v742_v14 = vrot.slane %v7083_v6, 7  ;;  %v671_v33 = vpop.f32.mrb[3].mxu1  ;;  %1388 = vmatpush1.bf16.msra.mxu0 %v6468_v8  ;;  %v5908_v7 = vld [vmem:[%s13991_s5 + $0xe] sm:$0x3] }
 0x11b   :  { %14269 = vst [vmem:[#allocation8_spill] sm:$0xff] %v7090_v10  ;;  %v7098_v12 = vmax.f32 %v7090_v10, 0.0  ;;  %700 = vrot.lane.b32.xlu1 %v7088_v9, %s6723_s18  ;;  %v743_v17 = vrot.slane %v7088_v9, 7  ;;  %14277 = vst [vmem:[#allocation16_spill] sm:$0xff] %v7212_v5  ;;  %v7266_v42 = vmax.f32 %v7212_v5, 0.0 }
 0x11c   :  { %v744_v13 = vrot.slane %v7093_v11, 7  ;;  %v761_v35 = vrot.slane %v7093_v11, 1  ;;  %v6017_v10 = vld [vmem:[%s13991_s5 + $0x2c] sm:$0x3] }
 0x11d   :  { %v745_v15 = vrot.slane %v7098_v12, 7  ;;  %v397_v16 = vpop.f32.mrb[4].mxu0  ;;  %v762_v62 = vrot.slane %v7098_v12, 1 }
 0x11e   :  { %v7107_v18 = vadd.f32 %v397_v16, %v186_v59  ;;  %v399_v19 = vpop.f32.mrb[5].mxu0  ;;  %717 = vrot.lane.b32.xlu0 %v7083_v6, %s6724_s19  ;;  %v7119_v24 = vsel %vm14103_vm0, %v742_v14, %v744_v13 }
 0x11f   :  { %v7111_v21 = vadd.f32 %v399_v19, %v190_v61  ;;  %v401_v22 = vpop.f32.mrb[6].mxu0  ;;  %725 = vrot.lane.b32.xlu1 %v7088_v9, %s6724_s19  ;;  %v7130_v29 = vsel %vm14103_vm0, %v743_v17, %v745_v15  ;;  %v675_v48 = vpop.f32.mrb[4].mxu1  ;;  %v760_v19 = vrot.slane %v7088_v9, 1 }
 0x120   :  { %14270 = vst [vmem:[#allocation9_spill] sm:$0xff] %v7107_v18  ;;  %v7122_v25 = vmax.f32 %v7107_v18, 0.0  ;;  %v7124_v26 = vadd.f32 %v401_v22, %v186_v59  ;;  %v403_v27 = vpop.f32.mrb[7].mxu0  ;;  %v677_v54 = vpop.f32.mrb[5].mxu1  ;;  %v7193_v59 = vadd.f32 %v665_v20, %v464_v44  ;;  %v7231_v20 = vadd.f32 %v669_v28, %v464_v44 }
 0x121   :  { %14271 = vst [vmem:[#allocation10_spill] sm:$0xff] %v7111_v21  ;;  %v7135_v31 = vadd.f32 %v403_v27, %v190_v61  ;;  %v7146_v37 = vmax.f32 %v7111_v21, 0.0  ;;  %v679_v56 = vpop.f32.mrb[6].mxu1  ;;  %v7233_v22 = vadd.f32 %v671_v33, %v468_v51  ;;  %v7253_v30 = vsel %vm14086_vm1, %v760_v19, %v762_v62 }
 0x122   :  { %14272 = vst [vmem:[#allocation11_spill] sm:$0xff] %v7124_v26  ;;  %v763_v36 = vrot.slane %v7122_v25, 1  ;;  %v7149_v38 = vmax.f32 %v7124_v26, 0.0  ;;  %694 = vrot.lane.b32.xlu0 %v7093_v11, %s6723_s18  ;;  %v746_v49 = vrot.slane %v7122_v25, 7  ;;  %14274 = vst [vmem:[#allocation13_spill] sm:$0xff] %v7193_v59  ;;  %v7195_v60 = vadd.f32 %v679_v56, %v464_v44  ;;  %v681_v61 = vpop.f32.mrb[7].mxu1 }
 0x123   :  { %14273 = vst [vmem:[#allocation12_spill] sm:$0xff] %v7135_v31  ;;  %v7155_v39 = vmax.f32 %v7135_v31, 0.0  ;;  %719 = vrot.lane.b32.xlu1 %v7093_v11, %s6724_s19  ;;  %v747_v46 = vrot.slane %v7146_v37, 7  ;;  %v764_v63 = vrot.slane %v7146_v37, 1  ;;  %v7201_v0 = vadd.f32 %v681_v61, %v468_v51  ;;  %14278 = vst [vmem:[#allocation17_spill] sm:$0xff] %v7231_v20 }
 0x124   :  { %v7163_v40 = vsel %vm14086_vm1, %v761_v35, %v763_v36  ;;  %v748_v41 = vrot.slane %v7149_v38, 7  ;;  %14275 = vst [vmem:[#allocation14_spill] sm:$0xff] %v7195_v60  ;;  %14279 = vst [vmem:[#allocation18_spill] sm:$0xff] %v7233_v22  ;;  %v7240_v27 = vmax.f32 %v7195_v60, 0.0  ;;  %v765_v33 = vrot.slane %v7149_v38, 1 }
 0x125   :  { %v749_v43 = vrot.slane %v7155_v39, 7  ;;  %14276 = vst [vmem:[#allocation15_spill] sm:$0xff] %v7201_v0  ;;  %v7227_v16 = vsel %vm14103_vm0, %v745_v15, %v747_v46  ;;  %v766_v23 = vrot.slane %v7155_v39, 1  ;;  %v7245_v15 = vmax.f32 %v7201_v0, 0.0 }
 0x126   :  { %v7177_v47 = vsel %vm14103_vm0, %v748_v41, %v742_v14  ;;  %727 = vrot.lane.b32.xlu0 %v7098_v12, %s6724_s19  ;;  %v7208_v3 = vsel %vm14103_vm0, %v746_v49, %v748_v41  ;;  %v7221_v14 = vsel %vm14103_vm0, %v744_v13, %v746_v49  ;;  %v7237_v13 = vmax.f32 %v7193_v59, 0.0  ;;  %14280 = vst [vmem:[#allocation19_spill] sm:$0xff] %v7240_v27 }
 0x127   :  { %v7184_v50 = vsel %vm14103_vm0, %v749_v43, %v743_v17  ;;  %702 = vrot.lane.b32.xlu1 %v7098_v12, %s6723_s18  ;;  %v7191_v58 = vsel %vm14103_vm0, %v747_v46, %v749_v43  ;;  %v759_v17 = vrot.slane %v7083_v6, 1  ;;  %14281 = vst [vmem:[#allocation20_spill] sm:$0xff] %v7245_v15  ;;  %v7249_v28 = vsel %vm14086_vm1, %v762_v62, %v764_v63  ;;  %v6473_v62 = vld [vmem:[%s13989_s4 + $0xc4] ss:$8 sps:$4 sm:$0xff]  }
 0x128   :  { %v7262_v34 = vadd.f32 %v675_v48, %v464_v44  ;;  %v2492_v41 = vrot.slane %v7240_v27, 7  ;;  %v7268_v43 = vadd.f32 %v677_v54, %v468_v51  ;;  %v7271_v45 = vmax.f32 %v7233_v22, 0.0  ;;  %1389 = vmatprep.subr.bf16.mxu0 %v6473_v62 }
 0x129   :  { %v7257_v32 = vsel %vm14086_vm1, %v759_v17, %v761_v35  ;;  %v7274_v35 = vmax.f32 %v7231_v20, 0.0  ;;  %v2493_v46 = vrot.slane %v7245_v15, 7  ;;  %v7279_v49 = vsel %vm14086_vm1, %v764_v63, %v766_v23 }
 0x12a   :  { %698 = vrot.lane.b32.xlu0 %v7149_v38, %s6723_s18  ;;  %14282 = vst [vmem:[#allocation21_spill] sm:$0xff] %v7262_v34  ;;  %14283 = vst [vmem:[#allocation22_spill] sm:$0xff] %v7268_v43  ;;  %v7283_v44 = vsel %vm14086_vm1, %v766_v23, %v760_v19  ;;  %v2486_v48 = vrot.slane %v7237_v13, 7  ;;  %v2487_v51 = vrot.slane %v7266_v42, 7  ;;  %v2489_v56 = vrot.slane %v7271_v45, 7 }
 0x12b   :  { %706 = vrot.lane.b32.xlu1 %v7155_v39, %s6723_s18  ;;  %v2488_v54 = vrot.slane %v7274_v35, 7  ;;  %v7294_v61 = vmax.f32 %v7262_v34, 0.0  ;;  %v7303_v63 = vsel %vm14086_vm1, %v763_v36, %v765_v33  ;;  %v7307_v1 = vsel %vm14086_vm1, %v765_v33, %v759_v17  ;;  %v6471_v23 = vld [vmem:[%s13989_s4 + $0xc0] ss:$8 sps:$4 sm:$0xff]  }
 0x12c   :  { %v7311_v8 = vsel %vm14103_vm0, %v2492_v41, %v2486_v48  ;;  %v7314_v19 = vmax.f32 %v7268_v43, 0.0  ;;  %v7325_v36 = vsel %vm14103_vm0, %v2487_v51, %v2489_v56  ;;  %v7329_v17 = vsel %vm14103_vm0, %v2493_v46, %v2487_v51  ;;  %1390 = vmatpush1.bf16.msra.mxu0 %v6471_v23 }
 0x12d   :  { %14284 = vst [vmem:[#allocation23_spill] sm:$0xff] %v7294_v61  ;;  %v7321_v52 = vsel %vm14103_vm0, %v2486_v48, %v2488_v54  ;;  %v2490_v33 = vrot.slane %v7294_v61, 7  ;;  %v2504_v0 = vrot.slane %v7274_v35, 1  ;;  %v2506_v43 = vrot.slane %v7294_v61, 1 }
 0x12e   :  { %723 = vrot.lane.b32.xlu0 %v7149_v38, %s6724_s19  ;;  %v2491_v48 = vrot.slane %v7314_v19, 7  ;;  %v2503_v23 = vrot.slane %v7266_v42, 1  ;;  %v2505_v22 = vrot.slane %v7271_v45, 1  ;;  %v2509_v34 = vrot.slane %v7245_v15, 1 }
 0x12f   :  { %731 = vrot.lane.b32.xlu1 %v7155_v39, %s6724_s19  ;;  %v7341_v62 = vsel %vm14103_vm0, %v2490_v33, %v2492_v41  ;;  %v7345_v51 = vsel %vm14103_vm0, %v2488_v54, %v2490_v33  ;;  %v7361_v41 = vsel %vm14086_vm1, %v2504_v0, %v2506_v43  ;;  %v6476_v54 = vld [vmem:[%s13989_s4 + $0xd4] ss:$8 sps:$4 sm:$0xff]   ;;  %v2507_v33 = vrot.slane %v7314_v19, 1 }
 0x130   :  { %14285 = vst [vmem:[#allocation24_spill] sm:$0xff] %v7341_v62  ;;  %v7353_v5 = vsel %vm14103_vm0, %v2491_v48, %v2493_v46  ;;  %v7357_v60 = vsel %vm14103_vm0, %v2489_v56, %v2491_v48  ;;  %14287 = vst [vmem:[#allocation26_spill] sm:$0xff] %v7361_v41  ;;  %v7371_v46 = vsel %vm14086_vm1, %v2503_v23, %v2505_v22  ;;  %v6474_v56 = vld [vmem:[%s13989_s4 + $0xd0] ss:$8 sps:$4 sm:$0xff]   ;;  %v2502_v48 = vrot.slane %v7237_v13, 1 }
 0x131   :  { %14286 = vst [vmem:[#allocation25_spill] sm:$0xff] %v7353_v5  ;;  %14288 = vst [vmem:[#allocation27_spill] sm:$0xff] %v7371_v46  ;;  %1391 = vmatprep.subr.bf16.mxu0 %v6476_v54  ;;  %v7382_v20 = vsel %vm14086_vm1, %v2505_v22, %v2507_v33  ;;  %v2508_v59 = vrot.slane %v7240_v27, 1  ;;  %v7393_v26 = vsel %vm14086_vm1, %v2507_v33, %v2509_v34  ;;  %v6479_v22 = vld [vmem:[%s13989_s4 + $0xe4] ss:$8 sps:$4 sm:$0xff]  }
 0x132   :  { %696 = vrot.lane.b32.xlu0 %v7122_v25, %s6723_s18  ;;  %14289 = vst [vmem:[#allocation28_spill] sm:$0xff] %v7382_v20  ;;  %1392 = vmatpush1.bf16.msra.mxu0 %v6474_v56  ;;  %v7389_v31 = vsel %vm14086_vm1, %v2502_v48, %v2504_v0  ;;  %14291 = vst [vmem:[#allocation30_spill] sm:$0xff] %v7393_v26  ;;  %v7397_v54 = vsel %vm14086_vm1, %v2509_v34, %v2503_v23  ;;  %v6477_v56 = vld [vmem:[%s13989_s4 + $0xe0] ss:$8 sps:$4 sm:$0xff]   ;;  %v6480_v34 = vld [vmem:[%s13989_s4 + $0xf0] ss:$8 sps:$4 sm:$0xff]  }
 0x133   :  { %704 = vrot.lane.b32.xlu1 %v7146_v37, %s6723_s18  ;;  %14290 = vst [vmem:[#allocation29_spill] sm:$0xff] %v7389_v31  ;;  %14292 = vst [vmem:[#allocation31_spill] sm:$0xff] %v7397_v54  ;;  %v7407_v0 = vsel %vm14086_vm1, %v2506_v43, %v2508_v59  ;;  %v7411_v33 = vsel %vm14086_vm1, %v2508_v59, %v2502_v48  ;;  %1393 = vmatprep.subr.bf16.mxu0 %v6479_v22  ;;  %v6482_v43 = vld [vmem:[%s13989_s4 + $0xf4] ss:$8 sps:$4 sm:$0xff]   ;;  %v6485_v59 = vld [vmem:[%s13989_s4 + $0x204] ss:$8 sps:$4 sm:$0xff]  }
 0x134   :  { %14293 = vst [vmem:[#allocation32_spill] sm:$0xff] %v7407_v0  ;;  %14294 = vst [vmem:[#allocation33_spill] sm:$0xff] %v7411_v33  ;;  %v36_v23 = vadd.s32 24, %v7047_v53  ;;  %v34_v48 = vadd.s32 8, %v7047_v53  ;;  %v35_v22 = vadd.s32 16, %v7047_v53  ;;  %v14295_v0 = vmov 0 }
 0x135   :  { %v14303_v26 = vmov 0  ;;  %v14306_v31 = vmov 0  ;;  %v5904_v46 = vld [vmem:[%s13991_s5 + $0x4] sm:$0x3]  ;;  %v7509_v5 = vrot.slane %v5908_v7, %v7053_v55  ;;  %v1100_v62 = vrot.slane %v5908_v7, %v7059_v57 }
 0x136   :  { %721 = vrot.lane.b32.xlu0 %v7122_v25, %s6724_s19  ;;  %1394 = vmatpush1.bf16.msra.mxu0 %v6477_v56  ;;  %v5902_v56 = vld [vmem:[%s13991_s5 + $0x8] sm:$0x3]  ;;  %v48_v21 = vand.u32 15, %v34_v48  ;;  %v55_v18 = vand.u32 15, %v35_v22  ;;  %v6024_v48 = vld [vmem:[%s13991_s5 + $0x32] sm:$0x3]  ;;  %v14298_v22 = vlaneseq  ;;  %v7513_v54 = vrot.slane %v6017_v10, %v7059_v57 }
 0x137   :  { %729 = vrot.lane.b32.xlu1 %v7146_v37, %s6724_s19  ;;  %1395 = vmatprep.subr.bf16.mxu0 %v6482_v43  ;;  %v5903_v43 = vld [vmem:[%s13991_s5 + $0x2] sm:$0x3]  ;;  %v846_v4 = vrot.slane %v5902_v56, %v7053_v55  ;;  %v850_v2 = vrot.slane %v5902_v56, %v7059_v57  ;;  %v5905_v56 = vld [vmem:[%s13991_s5 + $0x6] sm:$0x3]  ;;  %v7522_v20 = vrot.slane %v6024_v48, %v7053_v55 }
 0x138   :  { %v7476_v33 = vand.u32 127, %v14298_v22  ;;  %vm7485_vm4 = vcmp.ge.s32.totalorder %v55_v18, 1  ;;  %vm7489_vm5 = vcmp.lt.s32.totalorder %v48_v21, 15  ;;  %v5906_v22 = vld [vmem:[%s13991_s5 + $0xa] sm:$0x3]  ;;  %v915_v18 = vrot.slane %v5903_v43, %v7059_v57 }
 0x139   :  { %v14304_v26 = vsel %vm7485_vm4, 4294967295, %v14303_v26  ;;  %v14307_v31 = vsel %vm7489_vm5, 4294967295, %v14306_v31  ;;  %v7506_v21 = vrot.slane %v6017_v10, %v7053_v55  ;;  %14309 = vst [vmem:[#allocation39_spill] sm:$0xff] %v7522_v20  ;;  %v7528_v41 = vrot.slane %v5905_v56, %v7059_v57  ;;  %v869_v10 = vld [vmem:[%s13991_s5] sm:$0x3] }
 0x13a   :  { %2438 = vrot.lane.b32.xlu0 %v7237_v13, %s6723_s18  ;;  %1396 = vmatpush1.bf16.msra.mxu0 %v6480_v34  ;;  %v41_v34 = vand.u32 15, %v7047_v53  ;;  %v911_v53 = vrot.slane %v5903_v43, %v7053_v55  ;;  %14299 = vst [vmem:[#allocation35_spill] sm:$0xff] %v7476_v33  ;;  %14305 = vst [vmem:[#allocation37_spill] sm:$0xff] %v14304_v26  ;;  %v7525_v43 = vrot.slane %v5905_v56, %v7053_v55 }
 0x13b   :  { %2444 = vrot.lane.b32.xlu1 %v7240_v27, %s6723_s18  ;;  %3109 = vmatprep.subr.bf16.mxu0 %v6485_v59  ;;  %v62_v59 = vand.u32 15, %v36_v23  ;;  %v6019_v23 = vld [vmem:[%s13991_s5 + $0x26] sm:$0x3]  ;;  %14308 = vst [vmem:[#allocation38_spill] sm:$0xff] %v14307_v31  ;;  %14311 = vst [vmem:[#allocation41_spill] sm:$0xff] %v7528_v41  ;;  %v7531_v7 = vadd.s32 128, %v7476_v33  ;;  %v7543_v20 = vrot.slane %v5906_v22, %v7059_v57 }
 0x13c   :  { %vm7465_vm2 = vcmp.ge.s32.totalorder %v41_v34, 1  ;;  %v14300_v34 = vmov 0  ;;  %14310 = vst [vmem:[#allocation40_spill] sm:$0xff] %v7525_v43  ;;  %v7546_v43 = vrot.slane %v5904_v46, %v7053_v55  ;;  %v5907_v41 = vld [vmem:[%s13991_s5 + $0xc] sm:$0x3]  ;;  %vm14064_vm6 = vcmp.lt.s32.totalorder %v7476_v33, 16 }
 0x13d   :  { %v14296_v0 = vsel %vm7465_vm2, 4294967295, %v14295_v0  ;;  %vm7481_vm3 = vcmp.lt.s32.totalorder %v62_v59, 15  ;;  %v7502_v59 = vld [vmem:[%s13991_s5 + $0x10] sm:$0x3]  ;;  %14312 = vst [vmem:[#allocation42_spill] sm:$0xff] %v7531_v7  ;;  %14315 = vst [vmem:[#allocation45_spill] sm:$0xff] %v7543_v20  ;;  %v7565_v20 = vmul.f32 %v850_v2, %v7098_v12  ;;  %v7586_v12 = vrot.slane %v5907_v41, %v7059_v57 }
 0x13e   :  { %2446 = vrot.lane.b32.xlu0 %v7266_v42, %s6723_s18  ;;  %14297 = vst [vmem:[#allocation34_spill] sm:$0xff] %v14296_v0  ;;  %v14301_v34 = vsel %vm7481_vm3, 4294967295, %v14300_v34  ;;  %14316 = vst [vmem:[#allocation46_spill] sm:$0xff] %v7546_v43  ;;  %v7550_v56 = vrot.slane %v7502_v59, %v7053_v55  ;;  %v7568_v43 = vrot.slane %v869_v10, %v7053_v55  ;;  %vm14085_vm7 = vcmp.lt.s32.totalorder %v7476_v33, 112 }
 0x13f   :  { %2448 = vrot.lane.b32.xlu1 %v7271_v45, %s6723_s18  ;;  %14302 = vst [vmem:[#allocation36_spill] sm:$0xff] %v14301_v34  ;;  %vm14090_vm8 = vcmp.ge.s32.totalorder %v7476_v33, 16  ;;  %vm14100_vm9 = vcmp.lt.s32.totalorder %v7531_v7, 240 }
 0x140   :  { %14317 = vst [vmem:[#allocation47_spill] sm:$0xff] %v7550_v56  ;;  %v7571_v56 = vrot.slane %v869_v10, %v7059_v57  ;;  %v898_v10 = vsel %vm7465_vm2, %v7184_v50, 0.0  ;;  %vm7990_vm10 = vmand %vm7465_vm2, %vm14090_vm8 }
 0x141   :  { %vm8015_vm11 = vmand %vm7481_vm3, %vm14090_vm8 }
 0x142   :  { %2440 = vrot.lane.b32.xlu0 %v7274_v35, %s6723_s18  ;;  %vm8074_vm12 = vmand %vm7465_vm2, %vm14100_vm9 }
 0x143   :  { %2464 = vrot.lane.b32.xlu1 %v7274_v35, %s6724_s19  ;;  %vm8126_vm13 = vmand %vm7485_vm4, %vm14090_vm8 }
 0x144   :  { %vm8159_vm14 = vmand %vm7489_vm5, %vm14090_vm8 }
 0x145   :  { %vm8228_vm15 = vmand %vm7485_vm4, %vm14100_vm9 }
 0x146   :  { %2462 = vrot.lane.b32.xlu0 %v7237_v13, %s6724_s19 }
 0x147   :  { %2470 = vrot.lane.b32.xlu1 %v7266_v42, %s6724_s19 }
 0x14a   :  { %2468 = vrot.lane.b32.xlu0 %v7240_v27, %s6724_s19  ;;  %v7537_v27 = vrot.slane %v6024_v48, %v7059_v57  ;;  %v7556_v48 = vmul.f32 %v846_v4, %v7083_v6  ;;  %v897_v6 = vsel %vm7465_vm2, %v7177_v47, 0.0  ;;  %v7598_v47 = vmul.f32 %v850_v2, %v7155_v39 }
 0x14b   :  { %2452 = vrot.lane.b32.xlu1 %v7245_v15, %s6723_s18  ;;  %v7609_v50 = vmul.f32 %v911_v53, %v897_v6  ;;  %v7629_v39 = vmul.f32 %v911_v53, %v7208_v3 }
 0x14c   :  { %14313 = vst [vmem:[#allocation43_spill] sm:$0xff] %v7537_v27  ;;  %v7559_v27 = vmul.f32 %v850_v2, %v7088_v9  ;;  %v7580_v9 = vmul.f32 %v846_v4, %v7122_v25  ;;  %v901_v25 = vsel %vm7485_vm4, %v7221_v14, 0.0  ;;  %v7633_v14 = vmul.f32 %v7506_v21, %v7274_v35 }
 0x14e   :  { %2472 = vrot.lane.b32.xlu0 %v7271_v45, %s6724_s19  ;;  %14318 = vst [vmem:[#allocation48_spill] sm:$0xff] %v7559_v27  ;;  %14319 = vst [vmem:[#allocation49_spill] sm:$0xff] %v7580_v9  ;;  %v7595_v27 = vmul.f32 %v846_v4, %v7149_v38  ;;  %v7607_v9 = vmul.f32 %v915_v18, %v7130_v29  ;;  %v1085_v38 = vsel %vm7489_vm5, %v7249_v28, 0.0 }
 0x14f   :  { %2476 = vrot.lane.b32.xlu1 %v7245_v15, %s6724_s19  ;;  %v7519_v15 = vrot.slane %v6019_v23, %v7059_v57  ;;  %v7626_v29 = vmul.f32 %v911_v53, %v901_v25  ;;  %14320 = vst [vmem:[#allocation50_spill] sm:$0xff] %v7633_v14  ;;  %v7645_v28 = vmul.f32 %v1100_v62, %v7253_v30  ;;  %v1088_v30 = vsel %vm7481_vm3, %v7307_v1, 0.0  ;;  %v14336_v25 = vld [vmem:[#allocation19_spill] sm:$0xff] }
 0x150   :  { %v7652_v3 = vmul.f32 %v1100_v62, %v1085_v38  ;;  %v14339_v38 = vld [vmem:[#allocation28_spill] sm:$0xff] }
 0x151   :  { %14322 = vst [vmem:[#allocation52_spill] sm:$0xff] %v7645_v28  ;;  %v7683_v1 = vmul.f32 %v7519_v15, %v7325_v36  ;;  %v2644_v36 = vsel %vm7485_vm4, %v7345_v51, 0.0  ;;  %v2828_v51 = vsel %vm7489_vm5, %v14339_v38, 0.0 }
 0x152   :  { %2442 = vrot.lane.b32.xlu0 %v7294_v61, %s6723_s18  ;;  %14324 = vst [vmem:[#allocation54_spill] sm:$0xff] %v7652_v3 }
 0x153   :  { %2450 = vrot.lane.b32.xlu1 %v7314_v19, %s6723_s18  ;;  %14331 = vst [vmem:[#allocation61_spill] sm:$0xff] %v7683_v1  ;;  %v14380_v1 = vld [vmem:[#allocation41_spill] sm:$0xff] }
 0x156   :  { %2466 = vrot.lane.b32.xlu0 %v7294_v61, %s6724_s19  ;;  %v7516_v61 = vrot.slane %v6019_v23, %v7053_v55  ;;  %v7540_v23 = vrot.slane %v5906_v22, %v7053_v55  ;;  %v7562_v22 = vmul.f32 %v846_v4, %v7093_v11  ;;  %v7583_v11 = vrot.slane %v5907_v41, %v7053_v55 }
 0x157   :  { %2474 = vrot.lane.b32.xlu1 %v7314_v19, %s6724_s19  ;;  %v7604_v41 = vmul.f32 %v911_v53, %v7119_v24  ;;  %v902_v4 = vsel %vm7485_vm4, %v7227_v16, 0.0  ;;  %v1084_v24 = vsel %vm7489_vm5, %v7163_v40, 0.0  ;;  %v7642_v40 = vmul.f32 %v7513_v54, %v7271_v45 }
 0x158   :  { %14314 = vst [vmem:[#allocation44_spill] sm:$0xff] %v7540_v23  ;;  %v7574_v23 = vrot.slane %v5904_v46, %v7059_v57  ;;  %v7592_v46 = vmul.f32 %v850_v2, %v7146_v37  ;;  %v7614_v37 = vmul.f32 %v915_v18, %v898_v10  ;;  %v7617_v2 = vmul.f32 %v915_v18, %v7191_v58 }
 0x159   :  { %v1089_v58 = vsel %vm7481_vm3, %v7283_v44, 0.0  ;;  %v7638_v16 = vmul.f32 %v915_v18, %v902_v4  ;;  %14321 = vst [vmem:[#allocation51_spill] sm:$0xff] %v7642_v40  ;;  %v7649_v53 = vmul.f32 %v7509_v5, %v7257_v32  ;;  %v7655_v35 = vmul.f32 %v7509_v5, %v1084_v24  ;;  %v14338_v4 = vld [vmem:[#allocation26_spill] sm:$0xff] }
 0x15a   :  { %v7659_v44 = vmul.f32 %v7506_v21, %v7237_v13  ;;  %v7667_v32 = vmul.f32 %v7513_v54, %v7266_v42  ;;  %v7670_v45 = vmul.f32 %v1100_v62, %v7279_v49  ;;  %v7672_v18 = vmul.f32 %v1100_v62, %v1089_v58 }
 0x15b   :  { %14323 = vst [vmem:[#allocation53_spill] sm:$0xff] %v7649_v53  ;;  %14325 = vst [vmem:[#allocation55_spill] sm:$0xff] %v7655_v35  ;;  %v2640_v13 = vsel %vm7465_vm2, %v7311_v8, 0.0  ;;  %v7679_v6 = vmul.f32 %v7516_v61, %v7321_v52  ;;  %v7687_v42 = vmul.f32 %v7509_v5, %v7303_v63  ;;  %v2641_v49 = vsel %vm7465_vm2, %v7329_v17, 0.0 }
 0x15c   :  { %14326 = vst [vmem:[#allocation56_spill] sm:$0xff] %v7659_v44  ;;  %14327 = vst [vmem:[#allocation57_spill] sm:$0xff] %v7667_v32  ;;  %v7694_v8 = vmul.f32 %v7509_v5, %v1088_v30  ;;  %v7698_v52 = vmul.f32 %v7513_v54, %v7314_v19  ;;  %v2645_v63 = vsel %vm7485_vm4, %v7357_v60, 0.0  ;;  %v7707_v17 = vmul.f32 %v7516_v61, %v2640_v13  ;;  %v14341_v60 = vld [vmem:[#allocation20_spill] sm:$0xff]  ;;  %v14343_v30 = vld [vmem:[#allocation23_spill] sm:$0xff] }
 0x15d   :  { %14328 = vst [vmem:[#allocation58_spill] sm:$0xff] %v7670_v45  ;;  %14329 = vst [vmem:[#allocation59_spill] sm:$0xff] %v7672_v18  ;;  %v7711_v5 = vmul.f32 %v7506_v21, %v14336_v25  ;;  %v2827_v19 = vsel %vm7489_vm5, %v14338_v4, 0.0  ;;  %v7720_v24 = vmul.f32 %v7519_v15, %v2641_v49  ;;  %v7724_v58 = vmul.f32 %v7513_v54, %v14341_v60  ;;  %v14345_v25 = vld [vmem:[#allocation31_spill] sm:$0xff]  ;;  %v6018_v49 = vld [vmem:[%s13991_s5 + $0x24] sm:$0x3] }
 0x15e   :  { %14330 = vst [vmem:[#allocation60_spill] sm:$0xff] %v7679_v6  ;;  %14332 = vst [vmem:[#allocation62_spill] sm:$0xff] %v7687_v42  ;;  %v7728_v13 = vmul.f32 %v7506_v21, %v14343_v30  ;;  %v6021_v4 = vld [vmem:[%s13991_s5 + $0x2a] sm:$0x3]  ;;  %v7740_v38 = vmul.f32 %v7516_v61, %v2644_v36  ;;  %v7743_v54 = vmul.f32 %v7519_v15, %v2645_v63  ;;  %v14348_v21 = vld [vmem:[#allocation24_spill] sm:$0xff] }
 0x15f   :  { %14333 = vst [vmem:[#allocation63_spill] sm:$0xff] %v7694_v8  ;;  %14334 = vst [vmem:[#allocation64_spill] sm:$0xff] %v7698_v52  ;;  %v7747_v60 = vmul.f32 %v7516_v61, %v14348_v21  ;;  %v14350_v30 = vld [vmem:[#allocation25_spill] sm:$0xff]  ;;  %v14352_v52 = vld [vmem:[#allocation39_spill] sm:$0xff] }
 0x160   :  { %14335 = vst [vmem:[#allocation65_spill] sm:$0xff] %v7707_v17  ;;  %14337 = vst [vmem:[#allocation19_spill] sm:$0xff] %v7711_v5  ;;  %v2832_v5 = vsel %vm7481_vm3, %v14345_v25, 0.0  ;;  %v7751_v25 = vmul.f32 %v7519_v15, %v14350_v30  ;;  %v7757_v8 = vmul.f32 %v14352_v52, %v2827_v19  ;;  %v14354_v36 = vld [vmem:[#allocation27_spill] sm:$0xff]  ;;  %v14358_v61 = vld [vmem:[#allocation29_spill] sm:$0xff] }
 0x161   :  { %14340 = vst [vmem:[#allocation26_spill] sm:$0xff] %v7720_v24  ;;  %14342 = vst [vmem:[#allocation28_spill] sm:$0xff] %v7724_v58  ;;  %v6023_v58 = vld [vmem:[%s13991_s5 + $0x30] sm:$0x3]  ;;  %v7768_v21 = vmul.f32 %v14352_v52, %v14358_v61  ;;  %v6022_v30 = vld [vmem:[%s13991_s5 + $0x2e] sm:$0x3] }
 0x162   :  { %14344 = vst [vmem:[#allocation20_spill] sm:$0xff] %v7728_v13  ;;  %14346 = vst [vmem:[#allocation23_spill] sm:$0xff] %v7740_v38  ;;  %v14355_v38 = vld [vmem:[#allocation43_spill] sm:$0xff]  ;;  %v14382_v17 = vld [vmem:[#allocation40_spill] sm:$0xff] }
 0x163   :  { %14347 = vst [vmem:[#allocation31_spill] sm:$0xff] %v7743_v54  ;;  %14349 = vst [vmem:[#allocation24_spill] sm:$0xff] %v7747_v60  ;;  %v7761_v63 = vmul.f32 %v14355_v38, %v14354_v36  ;;  %v7764_v54 = vmul.f32 %v14355_v38, %v2828_v51  ;;  %v7808_v51 = vrot.slane %v6018_v49, %v7059_v57  ;;  %v6025_v36 = vld [vmem:[%s13991_s5 + $0x34] sm:$0x3]  ;;  %v14384_v6 = vld [vmem:[#allocation45_spill] sm:$0xff] }
 0x164   :  { %14351 = vst [vmem:[#allocation25_spill] sm:$0xff] %v7751_v25  ;;  %14353 = vst [vmem:[#allocation66_spill] sm:$0xff] %v7757_v8  ;;  %v14360_v25 = vld [vmem:[#allocation30_spill] sm:$0xff]  ;;  %v7778_v8 = vmul.f32 %v14355_v38, %v2832_v5  ;;  %v7798_v5 = vrot.slane %v6018_v49, %v7053_v55  ;;  %v7831_v49 = vrot.slane %v6022_v30, %v7059_v57 }
 0x165   :  { %14356 = vst [vmem:[#allocation27_spill] sm:$0xff] %v7761_v63  ;;  %14357 = vst [vmem:[#allocation43_spill] sm:$0xff] %v7764_v54  ;;  %v7775_v19 = vmul.f32 %v14355_v38, %v14360_v25  ;;  %v14364_v63 = vld [vmem:[#allocation32_spill] sm:$0xff]  ;;  %v7792_v54 = vrot.slane %v6021_v4, %v7053_v55  ;;  %v7795_v25 = vrot.slane %v6021_v4, %v7059_v57  ;;  %v6020_v38 = vld [vmem:[%s13991_s5 + $0x28] sm:$0x3] }
 0x166   :  { %14359 = vst [vmem:[#allocation29_spill] sm:$0xff] %v7768_v21  ;;  %14362 = vst [vmem:[#allocation67_spill] sm:$0xff] %v7778_v8  ;;  %v7785_v61 = vmul.f32 %v14352_v52, %v14364_v63  ;;  %v7811_v52 = vrot.slane %v6023_v58, %v7053_v55  ;;  %v7814_v4 = vrot.slane %v6023_v58, %v7059_v57 }
 0x167   :  { %14361 = vst [vmem:[#allocation30_spill] sm:$0xff] %v7775_v19  ;;  %14366 = vst [vmem:[#allocation68_spill] sm:$0xff] %v7792_v54  ;;  %v7841_v24 = vrot.slane %v6020_v38, %v7053_v55  ;;  %v7849_v42 = vrot.slane %v6025_v36, %v7053_v55  ;;  %v7852_v18 = vrot.slane %v6025_v36, %v7059_v57 }
 0x168   :  { %14365 = vst [vmem:[#allocation32_spill] sm:$0xff] %v7785_v61  ;;  %14367 = vst [vmem:[#allocation69_spill] sm:$0xff] %v7795_v25 }
 0x169   :  { %14368 = vst [vmem:[#allocation70_spill] sm:$0xff] %v7798_v5  ;;  %14369 = vst [vmem:[#allocation71_spill] sm:$0xff] %v7808_v51 }
 0x16a   :  { %14370 = vst [vmem:[#allocation72_spill] sm:$0xff] %v7811_v52  ;;  %14371 = vst [vmem:[#allocation73_spill] sm:$0xff] %v7814_v4 }
 0x16b   :  { %14374 = vst [vmem:[#allocation76_spill] sm:$0xff] %v7831_v49  ;;  %14376 = vst [vmem:[#allocation78_spill] sm:$0xff] %v7841_v24 }
 0x16c   :  { %14378 = vst [vmem:[#allocation80_spill] sm:$0xff] %v7849_v42  ;;  %14379 = vst [vmem:[#allocation81_spill] sm:$0xff] %v7852_v18  ;;  %v14383_v18 = vld [vmem:[#allocation44_spill] sm:$0xff] }
 0x18c   :  { %v693_v62 = vpop.permute.xlu0 %692 }
 0x18d   :  { %v701_v10 = vpop.permute.xlu1 %700 }
 0x18e   :  { %v7789_v21 = vsel %vm14064_vm6, %v701_v10, %v693_v62  ;;  %v7805_v63 = vsel %vm14064_vm6, %v693_v62, %v701_v10  ;;  %v7825_v62 = vrot.slane %v7502_v59, %v7059_v57  ;;  %v7828_v10 = vrot.slane %v6022_v30, %v7053_v55 }
 0x18f   :  { %v971_v58 = vsel %vm14090_vm8, %v7789_v21, 0.0  ;;  %v7844_v59 = vrot.slane %v6020_v38, %v7059_v57  ;;  %v7858_v24 = vmul.f32 %v14380_v1, %v7805_v63  ;;  %v14397_v14 = vrot.slane %v7805_v63, 7 }
 0x190   :  { %v718_v13 = vpop.permute.xlu0 %717  ;;  %14372 = vst [vmem:[#allocation74_spill] sm:$0xff] %v7825_v62  ;;  %14373 = vst [vmem:[#allocation75_spill] sm:$0xff] %v7828_v10  ;;  %v7864_v30 = vmul.f32 %v14382_v17, %v971_v58  ;;  %v14401_v5 = vrot.slane %v7805_v63, 1 }
 0x191   :  { %v726_v15 = vpop.permute.xlu1 %725  ;;  %14377 = vst [vmem:[#allocation79_spill] sm:$0xff] %v7844_v59  ;;  %14381 = vst [vmem:[#allocation41_spill] sm:$0xff] %v7858_v24 }
 0x192   :  { %v7821_v8 = vsel %vm14085_vm7, %v726_v15, %v718_v13  ;;  %v7838_v19 = vsel %vm14085_vm7, %v718_v13, %v726_v15  ;;  %v14387_v15 = vld [vmem:[#allocation2_spill] sm:$0xff] }
 0x193   :  { %14375 = vst [vmem:[#allocation77_spill] sm:$0xff] %v7838_v19  ;;  %v1009_v38 = vsel %vm14100_vm9, %v7821_v8, 0.0  ;;  %v7872_v42 = vmul.f32 %v14383_v18, %v7838_v19  ;;  %v14389_v49 = vrot.slane %v7821_v8, 7  ;;  %v14391_v3 = vrot.slane %v7838_v19, 1 }
 0x194   :  { %v695_v61 = vpop.permute.xlu0 %694  ;;  %v7883_v36 = vmul.f32 %v14384_v6, %v1009_v38  ;;  %v14386_v38 = vrot.slane %v7838_v19, 7 }
 0x195   :  { %v720_v60 = vpop.permute.xlu1 %719 }
 0x196   :  { %14385 = vst [vmem:[#allocation40_spill] sm:$0xff] %v7883_v36  ;;  %v14393_v36 = vld [vmem:[#allocation47_spill] sm:$0xff] }
 0x198   :  { %v728_v13 = vpop.permute.xlu0 %727 }
 0x199   :  { %v7876_v59 = vsel %vm14085_vm7, %v720_v60, %v728_v13  ;;  %v7880_v58 = vsel %vm14085_vm7, %v728_v13, %v720_v60  ;;  %v703_v55 = vpop.permute.xlu1 %702 }
 0x19a   :  { %v14044_v57 = vrot.slane %v7876_v59, 7  ;;  %v1011_v32 = vsel %vm14100_vm9, %v7880_v58, 0.0  ;;  %v7894_v60 = vsel %vm14064_vm6, %v695_v61, %v703_v55  ;;  %v7898_v13 = vsel %vm14064_vm6, %v703_v55, %v695_v61 }
 0x19b   :  { %v14388_v44 = vrot.slane %v7880_v58, 7  ;;  %v14390_v28 = vrot.slane %v7876_v59, 1  ;;  %v7920_v61 = vmul.f32 %v14383_v18, %v7876_v59  ;;  %v7926_v62 = vmul.f32 %v14384_v6, %v1011_v32 }
 0x19c   :  { %v820_v45 = vsel %vm14103_vm0, %v14386_v38, %v14044_v57  ;;  %v699_v35 = vpop.permute.xlu0 %698  ;;  %v14392_v57 = vld [vmem:[#allocation46_spill] sm:$0xff]  ;;  %v14398_v24 = vrot.slane %v7898_v13, 1  ;;  %v995_v4 = vmul.f32 %v14380_v1, %v7894_v60  ;;  %v14400_v40 = vrot.slane %v7894_v60, 1 }
 0x19d   :  { %v821_v10 = vsel %vm14103_vm0, %v14389_v49, %v14388_v44  ;;  %v836_v55 = vsel %vm14086_vm1, %v14391_v3, %v14390_v28  ;;  %v957_v53 = vmul.f32 %v14392_v57, %v820_v45  ;;  %v14047_v44 = vrot.slane %v7898_v13, 7  ;;  %v707_v49 = vpop.permute.xlu1 %706 }
 0x19e   :  { %v937_v38 = vsel %vm14100_vm9, %v821_v10, 0.0  ;;  %v7930_v52 = vmul.f32 %v14393_v36, %v836_v55  ;;  %v14395_v10 = vrot.slane %v7789_v21, 7  ;;  %v973_v55 = vsel %vm14090_vm8, %v7898_v13, 0.0 }
 0x19f   :  { %v958_v45 = vmul.f32 %v7574_v23, %v937_v38  ;;  %v7947_v28 = vsel %vm14064_vm6, %v699_v35, %v707_v49  ;;  %v14396_v3 = vrot.slane %v7894_v60, 7  ;;  %v7981_v54 = vsel %vm14064_vm6, %v707_v49, %v699_v35 }
 0x1a0   :  { %14394 = vst [vmem:[#allocation44_spill] sm:$0xff] %v7930_v52  ;;  %v788_v32 = vsel %vm14103_vm0, %v14395_v10, %v14047_v44  ;;  %v14399_v10 = vrot.slane %v7789_v21, 1  ;;  %v14053_v36 = vrot.slane %v7947_v28, 7  ;;  %v14054_v35 = vrot.slane %v7981_v54, 1 }
 0x1a1   :  { %v789_v52 = vsel %vm14103_vm0, %v14397_v14, %v14396_v3  ;;  %v863_v44 = vsel %vm14090_vm8, %v788_v32, 0.0  ;;  %v805_v14 = vsel %vm14086_vm1, %v14401_v5, %v14400_v40  ;;  %v994_v32 = vmul.f32 %v14382_v17, %v973_v55  ;;  %v732_v40 = vpop.permute.xlu1 %731 }
 0x1a2   :  { %v804_v38 = vsel %vm14086_vm1, %v14399_v10, %v14398_v24  ;;  %v883_v3 = vmul.f32 %v7568_v43, %v863_v44  ;;  %v884_v51 = vmul.f32 %v7571_v56, %v789_v52  ;;  %v724_v10 = vpop.permute.xlu0 %723  ;;  %v14403_v44 = vmov 0 }
 0x1a3   :  { %v1045_v24 = vsel %vm14090_vm8, %v804_v38, 0.0  ;;  %v14404_v44 = vsel %vm7990_vm10, 4294967295, %v14403_v44  ;;  %v14055_v55 = vrot.slane %v7981_v54, 7  ;;  %v7997_v49 = vmul.f32 %v7586_v12, %v805_v14 }
 0x1a4   :  { %v7977_v25 = vmul.f32 %v7583_v11, %v1045_v24  ;;  %v891_v5 = vadd.f32 %v883_v3, %v7562_v22  ;;  %v892_v52 = vadd.f32 %v884_v51, %v7565_v20  ;;  %14405 = vst [vmem:[#allocation46_spill] sm:$0xff] %v14404_v44  ;;  %v14407_v38 = vrot.slane %v7805_v63, 7 }
 0x1a5   :  { %14406 = vst [vmem:[#allocation82_spill] sm:$0xff] %v7997_v49  ;;  %v977_v51 = vsel %vm14090_vm8, %v7981_v54, 0.0  ;;  %v14408_v14 = vmov 0  ;;  %v14412_v22 = vrot.slane %v7789_v21, 1 }
 0x1a6   :  { %14402 = vst [vmem:[#allocation45_spill] sm:$0xff] %v7977_v25  ;;  %v791_v20 = vsel %vm14103_vm0, %v14053_v36, %v14407_v38  ;;  %v928_v3 = vadd.f32 %v7604_v41, %v891_v5  ;;  %v929_v24 = vadd.f32 %v7607_v9, %v892_v52  ;;  %v14409_v14 = vsel %vm8015_vm11, 4294967295, %v14408_v14  ;;  %v697_v25 = vpop.permute.xlu0 %696 }
 0x1a7   :  { %14410 = vst [vmem:[#allocation83_spill] sm:$0xff] %v14409_v14  ;;  %v14411_v38 = vrot.slane %v7789_v21, 7  ;;  %v8031_v9 = vsel %vm14086_vm1, %v14054_v35, %v14412_v22  ;;  %v14414_v41 = vrot.slane %v7805_v63, 1  ;;  %v14415_v5 = vrot.slane %v7947_v28, 1 }
 0x1a8   :  { %14413 = vst [vmem:[#allocation84_spill] sm:$0xff] %v8031_v9  ;;  %v862_v21 = vsel %vm7465_vm2, %v791_v20, 0.0  ;;  %v965_v22 = vadd.f32 %v957_v53, %v928_v3  ;;  %v966_v35 = vadd.f32 %v958_v45, %v929_v24  ;;  %v8059_v20 = vsel %vm14085_vm7, %v724_v10, %v732_v40  ;;  %v705_v45 = vpop.permute.xlu1 %704 }
 0x1a9   :  { %v790_v36 = vsel %vm14103_vm0, %v14055_v55, %v14411_v38  ;;  %v8039_v52 = vsel %vm14086_vm1, %v14415_v5, %v14414_v41  ;;  %v8047_v38 = vmul.f32 %v14380_v1, %v7947_v28  ;;  %v882_v55 = vmul.f32 %v7571_v56, %v862_v21  ;;  %v14417_v5 = vld [vmem:[#allocation48_spill] sm:$0xff] }
 0x1aa   :  { %v861_v49 = vsel %vm7990_vm10, %v790_v36, 0.0  ;;  %v8052_v41 = vmul.f32 %v14382_v17, %v977_v51  ;;  %v8063_v53 = vsel %vm14085_vm7, %v732_v40, %v724_v10  ;;  %v1003_v3 = vadd.f32 %v995_v4, %v966_v35 }
 0x1ab   :  { %v881_v63 = vmul.f32 %v7568_v43, %v861_v49  ;;  %v1002_v49 = vadd.f32 %v994_v32, %v965_v22  ;;  %v890_v51 = vadd.f32 %v882_v55, %v14417_v5  ;;  %v14418_v36 = vmov 0 }
 0x1ac   :  { %14416 = vst [vmem:[#allocation85_spill] sm:$0xff] %v8052_v41  ;;  %v14419_v36 = vsel %vm8074_vm12, 4294967295, %v14418_v36  ;;  %v14057_v10 = vrot.slane %v8059_v20, 7  ;;  %v14056_v4 = vrot.slane %v8063_v53, 7  ;;  %v8088_v22 = vadd.f32 %v7926_v62, %v1003_v3 }
 0x1ad   :  { %v889_v24 = vadd.f32 %v881_v63, %v7556_v48  ;;  %14420 = vst [vmem:[#allocation48_spill] sm:$0xff] %v14419_v36  ;;  %v8082_v32 = vadd.f32 %v7920_v61, %v1002_v49  ;;  %v927_v35 = vadd.f32 %v7614_v37, %v890_v51  ;;  %v14421_v63 = vrot.slane %v7838_v19, 7 }
 0x1ae   :  { %v14422_v48 = vrot.slane %v7821_v8, 7  ;;  %v8111_v49 = vmul.f32 %v14383_v18, %v8059_v20  ;;  %v711_v3 = vsel %vm14064_vm6, %v697_v25, %v705_v45  ;;  %v14427_v36 = vrot.slane %v7947_v28, 7 }
 0x1af   :  { %v926_v55 = vadd.f32 %v7609_v50, %v889_v24  ;;  %v822_v5 = vsel %vm14103_vm0, %v14057_v10, %v14421_v63  ;;  %v1015_v50 = vsel %vm14100_vm9, %v8063_v53, 0.0  ;;  %v722_v24 = vpop.permute.xlu0 %721  ;;  %v715_v63 = vsel %vm14064_vm6, %v705_v45, %v697_v25 }
 0x1b0   :  { %v823_v61 = vsel %vm14103_vm0, %v14056_v4, %v14422_v48  ;;  %v934_v37 = vsel %vm7465_vm2, %v822_v5, 0.0  ;;  %14423 = vst [vmem:[#allocation86_spill] sm:$0xff] %v8111_v49  ;;  %v781_v21 = vrot.slane %v711_v3, 7  ;;  %v730_v5 = vpop.permute.xlu1 %729  ;;  %v8120_v40 = vmul.f32 %v14384_v6, %v1015_v50 }
 0x1b1   :  { %v935_v62 = vsel %vm8074_vm12, %v823_v61, 0.0  ;;  %v955_v51 = vmul.f32 %v14392_v57, %v934_v37  ;;  %v14424_v61 = vmov 0  ;;  %v780_v4 = vrot.slane %v715_v63, 7 }
 0x1b2   :  { %v956_v48 = vmul.f32 %v7574_v23, %v935_v62  ;;  %v14425_v61 = vsel %vm8126_vm13, 4294967295, %v14424_v61  ;;  %v796_v37 = vrot.slane %v715_v63, 1  ;;  %v797_v10 = vrot.slane %v711_v3, 1 }
 0x1b3   :  { %14426 = vst [vmem:[#allocation87_spill] sm:$0xff] %v14425_v61  ;;  %v963_v62 = vadd.f32 %v955_v51, %v926_v55  ;;  %v785_v25 = vsel %vm14103_vm0, %v781_v21, %v14427_v36  ;;  %v14428_v45 = vrot.slane %v7894_v60, 7  ;;  %v975_v49 = vsel %vm14090_vm8, %v715_v63, 0.0 }
 0x1b4   :  { %v8140_v9 = vadd.f32 %v956_v48, %v927_v35  ;;  %v14429_v41 = vrot.slane %v7981_v54, 7  ;;  %v14430_v51 = vrot.slane %v7898_v13, 7  ;;  %v14431_v19 = vrot.slane %v7981_v54, 1 }
 0x1b5   :  { %v787_v50 = vsel %vm14103_vm0, %v14428_v45, %v781_v21  ;;  %v1000_v45 = vadd.f32 %v7864_v30, %v963_v62  ;;  %v14432_v35 = vmov 0  ;;  %v14436_v54 = vrot.slane %v7894_v60, 1 }
 0x1b6   :  { %v784_v55 = vsel %vm14103_vm0, %v780_v4, %v14429_v41  ;;  %v786_v36 = vsel %vm14103_vm0, %v14430_v51, %v780_v4  ;;  %v800_v21 = vsel %vm14086_vm1, %v796_v37, %v14431_v19  ;;  %v14433_v35 = vsel %vm8159_vm14, 4294967295, %v14432_v35 }
 0x1b7   :  { %14434 = vst [vmem:[#allocation88_spill] sm:$0xff] %v14433_v35  ;;  %v14435_v41 = vrot.slane %v7898_v13, 1  ;;  %v8171_v19 = vsel %vm14086_vm1, %v14436_v54, %v797_v10  ;;  %v865_v30 = vsel %vm8126_vm13, %v786_v36, 0.0  ;;  %v866_v48 = vsel %vm7485_vm4, %v787_v50, 0.0  ;;  %v8190_v54 = vpop.permute.xlu1 %2444 }
 0x1b8   :  { %v867_v63 = vsel %vm14090_vm8, %v784_v55, 0.0  ;;  %v885_v13 = vmul.f32 %v7568_v43, %v865_v30  ;;  %v888_v62 = vmul.f32 %v7571_v56, %v785_v25  ;;  %v8182_v60 = vadd.f32 %v7872_v42, %v1000_v45  ;;  %v14438_v55 = vld [vmem:[#allocation49_spill] sm:$0xff] }
 0x1b9   :  { %v802_v4 = vsel %vm14086_vm1, %v14435_v41, %v796_v37  ;;  %v2439_v37 = vpop.permute.xlu0 %2438  ;;  %v14437_v51 = vrot.slane %v7947_v28, 1  ;;  %v886_v36 = vmul.f32 %v7571_v56, %v866_v48  ;;  %v887_v50 = vmul.f32 %v7568_v43, %v867_v63 }
 0x1ba   :  { %v893_v61 = vadd.f32 %v885_v13, %v14438_v55  ;;  %v896_v30 = vadd.f32 %v888_v62, %v7598_v47  ;;  %v996_v25 = vmul.f32 %v14382_v17, %v975_v49  ;;  %v1047_v42 = vsel %vm8159_vm14, %v802_v4, 0.0 }
 0x1bb   :  { %v801_v41 = vsel %vm14086_vm1, %v797_v10, %v14437_v51  ;;  %v894_v28 = vadd.f32 %v886_v36, %v7592_v46  ;;  %v895_v45 = vadd.f32 %v887_v50, %v7595_v27  ;;  %v997_v10 = vmul.f32 %v14380_v1, %v711_v3  ;;  %v2449_v51 = vpop.permute.xlu1 %2448 }
 0x1bc   :  { %v933_v56 = vadd.f32 %v7617_v2, %v896_v30  ;;  %v1049_v47 = vsel %vm14090_vm8, %v800_v21, 0.0  ;;  %v1068_v17 = vmul.f32 %v7583_v11, %v1047_v42  ;;  %v8209_v49 = vsel %vm14085_vm7, %v722_v24, %v730_v5 }
 0x1bd   :  { %v8213_v27 = vsel %vm14085_vm7, %v730_v5, %v722_v24  ;;  %v812_v46 = vrot.slane %v8209_v49, 7  ;;  %v14069_v1 = vrot.slane %v8209_v49, 1  ;;  %v930_v3 = vadd.f32 %v7626_v29, %v893_v61  ;;  %v2447_v48 = vpop.permute.xlu0 %2446 }
 0x1be   :  { %v8219_v2 = vmul.f32 %v7586_v12, %v801_v41  ;;  %v8222_v21 = vadd.f32 %v1068_v17, %v8082_v32  ;;  %v14439_v4 = vmov 0  ;;  %v813_v24 = vrot.slane %v8213_v27, 7 }
 0x1bf   :  { %v14440_v4 = vsel %vm8228_vm15, 4294967295, %v14439_v4  ;;  %v931_v5 = vadd.f32 %v7638_v16, %v894_v28  ;;  %v14442_v29 = vrot.slane %v8059_v20, 7  ;;  %v14443_v32 = vrot.slane %v7876_v59, 7 }
 0x1c0   :  { %14441 = vst [vmem:[#allocation49_spill] sm:$0xff] %v14440_v4  ;;  %v14444_v13 = vrot.slane %v7876_v59, 1  ;;  %v932_v16 = vadd.f32 %v7629_v39, %v895_v45  ;;  %v14445_v41 = vrot.slane %v8063_v53, 7  ;;  %v14446_v50 = vrot.slane %v7880_v58, 7  ;;  %v14462_v4 = vld [vmem:[#allocation41_spill] sm:$0xff] }
 0x1c1   :  { %v816_v61 = vsel %vm14103_vm0, %v812_v46, %v14442_v29  ;;  %v818_v63 = vsel %vm14103_vm0, %v14443_v32, %v812_v46  ;;  %v1013_v45 = vsel %vm14100_vm9, %v8213_v27, 0.0  ;;  %v14078_v17 = vrot.slane %v8213_v27, 1 }
 0x1c2   :  { %v834_v62 = vsel %vm14086_vm1, %v14444_v13, %v14069_v1  ;;  %v817_v36 = vsel %vm14103_vm0, %v813_v24, %v14445_v41  ;;  %v819_v55 = vsel %vm14103_vm0, %v14446_v50, %v813_v24  ;;  %v938_v30 = vsel %vm7485_vm4, %v818_v63, 0.0 }
 0x1c3   :  { %v961_v59 = vmul.f32 %v14392_v57, %v816_v61  ;;  %v939_v42 = vsel %vm8228_vm15, %v819_v55, 0.0  ;;  %v941_v39 = vsel %vm14100_vm9, %v817_v36, 0.0  ;;  %v959_v28 = vmul.f32 %v14392_v57, %v938_v30 }
 0x1c4   :  { %v960_v46 = vmul.f32 %v7574_v23, %v939_v42  ;;  %v962_v24 = vmul.f32 %v7574_v23, %v941_v39  ;;  %v1033_v32 = vmul.f32 %v14383_v18, %v8209_v49  ;;  %v1034_v63 = vmul.f32 %v14384_v6, %v1013_v45  ;;  %v2441_v23 = vpop.permute.xlu0 %2440  ;;  %v14448_v42 = vld [vmem:[#allocation68_spill] sm:$0xff] }
 0x1c5   :  { %v8271_v29 = vadd.f32 %v961_v59, %v932_v16  ;;  %v967_v61 = vadd.f32 %v959_v28, %v930_v3  ;;  %v1121_v57 = vsel %vm7489_vm5, %v834_v62, 0.0  ;;  %v1070_v36 = vmul.f32 %v7583_v11, %v1049_v47  ;;  %v14447_v3 = vld [vmem:[#allocation47_spill] sm:$0xff]  ;;  %v8291_v62 = vpop.permute.xlu1 %2464 }
 0x1c6   :  { %v968_v13 = vadd.f32 %v960_v46, %v931_v5  ;;  %v8278_v41 = vadd.f32 %v962_v24, %v933_v56  ;;  %v8283_v50 = vsel %vm14064_vm6, %v2439_v37, %v2447_v48  ;;  %v1142_v55 = vmul.f32 %v14447_v3, %v1121_v57 }
 0x1c7   :  { %v1004_v16 = vadd.f32 %v996_v25, %v967_v61  ;;  %v8288_v18 = vsel %vm14064_vm6, %v2447_v48, %v2439_v37  ;;  %v14073_v6 = vrot.slane %v8283_v50, 7  ;;  %v14072_v47 = vrot.slane %v8283_v50, 1 }
 0x1c8   :  { %v1005_v56 = vadd.f32 %v997_v10, %v968_v13  ;;  %v14071_v5 = vrot.slane %v8288_v18, 7  ;;  %v2714_v30 = vsel %vm14090_vm8, %v8288_v18, 0.0  ;;  %v14070_v59 = vrot.slane %v8288_v18, 1  ;;  %v14449_v10 = vld [vmem:[#allocation69_spill] sm:$0xff] }
 0x1c9   :  { %v1041_v25 = vadd.f32 %v1033_v32, %v1004_v16  ;;  %v8300_v39 = vmul.f32 %v14448_v42, %v2714_v30  ;;  %v8304_v37 = vsel %vm14064_vm6, %v2441_v23, %v2449_v51  ;;  %v8308_v48 = vmul.f32 %v14449_v10, %v8283_v50 }
 0x1ca   :  { %v8312_v28 = vsel %vm14064_vm6, %v2449_v51, %v2441_v23  ;;  %v14068_v45 = vrot.slane %v8304_v37, 7  ;;  %v14065_v46 = vrot.slane %v8304_v37, 1  ;;  %v8316_v24 = vadd.f32 %v1034_v63, %v1005_v56  ;;  %v14451_v56 = vld [vmem:[#allocation71_spill] sm:$0xff]  ;;  %vm8361_vm6 = vmand %vm7489_vm5, %vm14100_vm9 }
 0x1cb   :  { %14450 = vst [vmem:[#allocation47_spill] sm:$0xff] %v8308_v48  ;;  %v14066_v61 = vrot.slane %v8312_v28, 7  ;;  %v14067_v32 = vrot.slane %v8312_v28, 1  ;;  %v2716_v57 = vsel %vm14090_vm8, %v8312_v28, 0.0  ;;  %v8323_v13 = vadd.f32 %v1070_v36, %v1041_v25 }
 0x1cc   :  { %v2531_v51 = vsel %vm14103_vm0, %v14073_v6, %v14068_v45  ;;  %v2547_v63 = vsel %vm14086_vm1, %v14072_v47, %v14065_v46  ;;  %v8338_v23 = vmul.f32 %v14448_v42, %v2716_v57  ;;  %v8355_v25 = vmul.f32 %v14449_v10, %v8304_v37  ;;  %v2471_v46 = vpop.permute.xlu1 %2470  ;;  %v14458_v47 = vld [vmem:[#allocation70_spill] sm:$0xff] }
 0x1cd   :  { %v2530_v36 = vsel %vm14103_vm0, %v14071_v5, %v14066_v61  ;;  %v2546_v16 = vsel %vm14086_vm1, %v14070_v59, %v14067_v32  ;;  %v2627_v30 = vmul.f32 %v14451_v56, %v2531_v51  ;;  %v14452_v57 = vmov 0 }
 0x1ce   :  { %v14453_v57 = vsel %vm8361_vm6, 4294967295, %v14452_v57  ;;  %v2605_v61 = vsel %vm14090_vm8, %v2530_v36, 0.0  ;;  %v2788_v32 = vsel %vm14090_vm8, %v2546_v16, 0.0  ;;  %v14455_v51 = vrot.slane %v7880_v58, 1  ;;  %v14459_v36 = vld [vmem:[#allocation51_spill] sm:$0xff]  ;;  %v14460_v16 = vld [vmem:[#allocation73_spill] sm:$0xff] }
 0x1cf   :  { %14454 = vst [vmem:[#allocation68_spill] sm:$0xff] %v14453_v57  ;;  %v14457_v59 = vrot.slane %v7821_v8, 1  ;;  %v2626_v6 = vmul.f32 %v14458_v47, %v2605_v61  ;;  %v8383_v43 = vadd.f32 %v2627_v30, %v14459_v36  ;;  %v8386_v48 = vmul.f32 %v14460_v16, %v2547_v63  ;;  %v2463_v61 = vpop.permute.xlu0 %2462  ;;  %v14464_v30 = vld [vmem:[#allocation45_spill] sm:$0xff]  ;;  %v14465_v36 = vld [vmem:[#allocation50_spill] sm:$0xff] }
 0x1d0   :  { %v835_v45 = vsel %vm14086_vm1, %v14455_v51, %v14078_v17  ;;  %v14456_v1 = vmov %v14455_v51  ;;  %v1001_v35 = vadd.f32 %v14462_v4, %v8140_v9  ;;  %v14463_v58 = vsel %vm7489_vm5, %v8171_v19, 0.0  ;;  %v14466_v9 = vld [vmem:[#allocation72_spill] sm:$0xff]  ;;  %v14469_v16 = vld [vmem:[#allocation74_spill] sm:$0xff] }
 0x1d1   :  { %v837_v5 = vsel %vm14086_vm1, %v14457_v59, %v14456_v1  ;;  %14461 = vst [vmem:[#allocation69_spill] sm:$0xff] %v8386_v48  ;;  %v1069_v51 = vmul.f32 %v7586_v12, %v14463_v58  ;;  %v1122_v59 = vsel %vm8361_vm6, %v835_v45, 0.0  ;;  %v1074_v63 = vadd.f32 %v14464_v30, %v8182_v60  ;;  %v14468_v48 = vld [vmem:[#allocation40_spill] sm:$0xff]  ;;  %v14471_v45 = vld [vmem:[#allocation55_spill] sm:$0xff] }
 0x1d2   :  { %v1120_v1 = vsel %vm14100_vm9, %v837_v5, 0.0  ;;  %v8402_v17 = vadd.f32 %v2626_v6, %v14465_v36  ;;  %v8405_v4 = vmul.f32 %v14466_v9, %v2788_v32  ;;  %v1038_v19 = vadd.f32 %v14468_v48, %v1001_v35  ;;  %v14470_v5 = vld [vmem:[#allocation53_spill] sm:$0xff]  ;;  %v14472_v6 = vld [vmem:[#allocation82_spill] sm:$0xff]  ;;  %v14476_v48 = vld [vmem:[#allocation75_spill] sm:$0xff] }
 0x1d3   :  { %v1143_v58 = vmul.f32 %v14469_v16, %v1122_v59  ;;  %v1077_v31 = vadd.f32 %v1069_v51, %v8088_v22  ;;  %v1111_v26 = vadd.f32 %v14470_v5, %v1074_v63  ;;  %v1113_v57 = vadd.f32 %v14471_v45, %v8222_v21  ;;  %v2453_v22 = vpop.permute.xlu1 %2452  ;;  %v14473_v51 = vld [vmem:[#allocation54_spill] sm:$0xff]  ;;  %v14474_v63 = vld [vmem:[#allocation44_spill] sm:$0xff] }
 0x1d4   :  { %14467 = vst [vmem:[#allocation71_spill] sm:$0xff] %v8405_v4  ;;  %v8415_v60 = vsel %vm14085_vm7, %v2463_v61, %v2471_v46  ;;  %v1075_v30 = vadd.f32 %v14472_v6, %v1038_v19  ;;  %v1141_v32 = vmul.f32 %v14469_v16, %v1120_v1  ;;  %v8421_v35 = vsel %vm14085_vm7, %v2471_v46, %v2463_v61  ;;  %v14475_v45 = vld [vmem:[#allocation52_spill] sm:$0xff] }
 0x1d5   :  { %v1114_v59 = vadd.f32 %v14473_v51, %v1077_v31  ;;  %v1148_v36 = vadd.f32 %v14474_v63, %v1111_v26  ;;  %v1150_v21 = vadd.f32 %v1142_v55, %v1113_v57  ;;  %v2752_v46 = vsel %vm14100_vm9, %v8421_v35, 0.0  ;;  %v8437_v26 = vpop.permute.xlu0 %2468 }
 0x1d6   :  { %v1112_v4 = vadd.f32 %v14475_v45, %v1075_v30  ;;  %v8435_v31 = vmul.f32 %v14476_v48, %v8415_v60  ;;  %vm14477_vm7 = vcmp.lt.s32.totalorder %v7476_v33, 16  ;;  %v14483_v19 = vrot.slane %v8288_v18, 7 }
 0x1d7   :  { %v1151_v61 = vadd.f32 %v1143_v58, %v1114_v59  ;;  %v1156_v6 = vpack.c.bf16 %v1150_v21, %v1148_v36  ;;  %v8442_v55 = vsel %vm14477_vm7, %v8190_v54, %v2453_v22  ;;  %vm14478_vm1 = vmmov %vm14477_vm7  ;;  %v14479_v59 = vld [vmem:[#allocation76_spill] sm:$0xff] }
 0x1d8   :  { %v1149_v57 = vadd.f32 %v1141_v32, %v1112_v4  ;;  %v8447_v30 = vsel %vm14478_vm1, %v2453_v22, %v8190_v54  ;;  %v14088_v58 = vrot.slane %v8442_v55, 7  ;;  %v14087_v51 = vrot.slane %v8442_v55, 1  ;;  %v6483_v54 = vld [vmem:[%s13989_s4 + $0x200] ss:$8 sps:$4 sm:$0xff]  }
 0x1d9   :  { %v8452_v63 = vmul.f32 %v14479_v59, %v2752_v46  ;;  %v14091_v36 = vrot.slane %v8447_v30, 7  ;;  %v14089_v21 = vrot.slane %v8447_v30, 1  ;;  %v2720_v4 = vsel %vm14090_vm8, %v8447_v30, 0.0  ;;  %v2473_v44 = vpop.permute.xlu0 %2472 }
 0x1da   :  { %v1157_v32 = vpack.c.bf16 %v1151_v61, %v1149_v57  ;;  %v14480_v22 = vrot.slane %v8283_v50, 7  ;;  %v14481_v46 = vrot.slane %v8283_v50, 1  ;;  %vm14482_vm1 = vcmp.lt.s32.totalorder %v14387_v15, 7  ;;  %v6488_v57 = vld [vmem:[%s13989_s4 + $0x214] ss:$8 sps:$4 sm:$0xff]  }
 0x1db   :  { %v8478_v61 = vmul.f32 %v14449_v10, %v8442_v55  ;;  %v2532_v50 = vsel %vm14103_vm0, %v14091_v36, %v14483_v19  ;;  %vm14485_vm7 = vmmov %vm14482_vm1 }
 0x1dc   :  { %v2533_v45 = vsel %vm14103_vm0, %v14088_v58, %v14480_v22  ;;  %v8474_v1 = vsel %vm14482_vm1, %v14087_v51, %v14481_v46  ;;  %v14484_v22 = vrot.slane %v8288_v18, 1  ;;  %v8500_v58 = vmul.f32 %v14448_v42, %v2720_v4  ;;  %1397 = vmatprep.mubr.bf16.mxu0 %v1157_v32  ;;  %vm8512_vm1 = vmand %vm7481_vm3, %vm14100_vm9 }
 0x1dd   :  { %v2604_v51 = vsel %vm7465_vm2, %v2533_v45, 0.0  ;;  %v2603_v5 = vsel %vm7990_vm10, %v2532_v50, 0.0  ;;  %v14490_v4 = vrot.slane %v8063_v53, 1  ;;  %v14491_v32 = vrot.slane %v8213_v27, 1  ;;  %1398 = vmatmul.mubr.bf16.vlgmr.msra.gmra.mrb[8].mxu0 %v1156_v6  ;;  %vm14494_vm8 = vmmov %vm14485_vm7  ;;  %v14495_v6 = vld [vmem:[#allocation57_spill] sm:$0xff] }
 0x1de   :  { %v8495_v46 = vsel %vm14485_vm7, %v14089_v21, %v14484_v22  ;;  %v2625_v19 = vmul.f32 %v14451_v56, %v2604_v51  ;;  %v14487_v22 = vmov 0  ;;  %v2624_v51 = vmul.f32 %v14458_v47, %v2603_v5  ;;  %3110 = vmatpush1.bf16.msra.mxu0 %v6483_v54  ;;  %v6486_v5 = vld [vmem:[%s13989_s4 + $0x210] ss:$8 sps:$4 sm:$0xff]  }
 0x1df   :  { %14486 = vst [vmem:[#allocation70_spill] sm:$0xff] %v8495_v46  ;;  %v14488_v22 = vsel %vm8512_vm1, 4294967295, %v14487_v22  ;;  %v833_v45 = vsel %vm14485_vm7, %v14491_v32, %v14490_v4  ;;  %v14492_v18 = vrot.slane %v7821_v8, 1  ;;  %v14493_v21 = vmov %v14490_v4  ;;  %3111 = vmatprep.subr.bf16.mxu0 %v6488_v57  ;;  %v14500_v57 = vld [vmem:[#allocation61_spill] sm:$0xff]  ;;  %v14517_v46 = vld [vmem:[#allocation80_spill] sm:$0xff] }
 0x1e0   :  { %14489 = vst [vmem:[#allocation51_spill] sm:$0xff] %v14488_v22  ;;  %v1007_v27 = vadd.f32 %v8047_v38, %v8278_v41  ;;  %v8538_v4 = vadd.f32 %v2625_v19, %v14495_v6  ;;  %v14496_v8 = vsel %vm7481_vm3, %v8039_v52, 0.0  ;;  %v1124_v38 = vsel %vm14100_vm9, %v833_v45, 0.0  ;;  %v14497_v41 = vld [vmem:[#allocation56_spill] sm:$0xff]  ;;  %v14498_v52 = vld [vmem:[#allocation58_spill] sm:$0xff]  ;;  %v14518_v22 = vld [vmem:[#allocation85_spill] sm:$0xff] }
 0x1e1   :  { %v839_v36 = vsel %vm14494_vm8, %v14493_v21, %v14492_v18  ;;  %v1073_v53 = vmul.f32 %v7586_v12, %v14496_v8  ;;  %v1079_v21 = vadd.f32 %v8219_v2, %v8316_v24  ;;  %v2632_v54 = vadd.f32 %v2624_v51, %v14497_v41  ;;  %v6491_v12 = vld [vmem:[%s13989_s4 + $0x224] ss:$8 sps:$4 sm:$0xff]   ;;  %v14499_v2 = vld [vmem:[#allocation60_spill] sm:$0xff] }
 0x1e2   :  { %v1044_v18 = vadd.f32 %v8120_v40, %v1007_v27  ;;  %v1126_v19 = vsel %vm8512_vm1, %v839_v36, 0.0  ;;  %v1145_v32 = vmul.f32 %v14469_v16, %v1124_v38  ;;  %v2671_v24 = vadd.f32 %v14499_v2, %v8402_v17  ;;  %3112 = vmatpush1.bf16.msra.mxu0 %v6486_v5 }
 0x1e3   :  { %v1116_v6 = vadd.f32 %v14498_v52, %v1079_v21  ;;  %v2672_v45 = vadd.f32 %v14500_v57, %v8383_v43  ;;  %vm14501_vm8 = vcmp.lt.s32.totalorder %v7476_v33, 112  ;;  %v1147_v17 = vmul.f32 %v14469_v16, %v1126_v19  ;;  %v6489_v43 = vld [vmem:[%s13989_s4 + $0x220] ss:$8 sps:$4 sm:$0xff]   ;;  %3113 = vmatprep.subr.bf16.mxu0 %v6491_v12 }
 0x1e4   :  { %v8565_v40 = vsel %vm14501_vm8, %v8291_v62, %v2473_v44  ;;  %v1081_v36 = vadd.f32 %v1073_v53, %v1044_v18  ;;  %vm14502_vm7 = vmmov %vm14501_vm8  ;;  %v14504_v5 = vrot.slane %v8415_v60, 7  ;;  %v14505_v18 = vrot.slane %v8415_v60, 1 }
 0x1e5   :  { %v8570_v51 = vsel %vm14502_vm7, %v2473_v44, %v8291_v62  ;;  %v14096_v27 = vrot.slane %v8565_v40, 7  ;;  %v14094_v8 = vrot.slane %v8565_v40, 1  ;;  %v1153_v21 = vadd.f32 %v1145_v32, %v1116_v6  ;;  %v14503_v44 = vld [vmem:[#allocation59_spill] sm:$0xff]  ;;  %v6494_v32 = vld [vmem:[%s13989_s4 + $0x234] ss:$8 sps:$4 sm:$0xff]   ;;  %v14508_v6 = vld [vmem:[#allocation78_spill] sm:$0xff] }
 0x1e6   :  { %v14095_v38 = vrot.slane %v8570_v51, 7  ;;  %v2754_v53 = vsel %vm14100_vm9, %v8570_v51, 0.0  ;;  %v1118_v62 = vadd.f32 %v14503_v44, %v1081_v36  ;;  %vm14506_vm8 = vcmp.lt.s32.totalorder %v14387_v15, 7  ;;  %3114 = vmatpush1.bf16.msra.mxu0 %v6489_v43  ;;  %v14522_v43 = vld [vmem:[#allocation86_spill] sm:$0xff] }
 0x1e7   :  { %v2562_v16 = vsel %vm14103_vm0, %v14504_v5, %v14096_v27  ;;  %v2578_v19 = vsel %vm14506_vm8, %v14505_v18, %v14094_v8  ;;  %v14507_v12 = vrot.slane %v8421_v35, 7  ;;  %v2774_v57 = vmul.f32 %v14476_v48, %v8565_v40  ;;  %vm14511_vm7 = vmmov %vm14506_vm8  ;;  %v14512_v8 = vld [vmem:[#allocation77_spill] sm:$0xff]  ;;  %v2477_v27 = vpop.permute.xlu1 %2476  ;;  %3115 = vmatprep.subr.bf16.mxu0 %v6494_v32 }
 0x1e8   :  { %v2700_v2 = vmul.f32 %v14508_v6, %v2562_v16  ;;  %v2775_v36 = vmul.f32 %v14479_v59, %v2754_v53  ;;  %v1155_v44 = vadd.f32 %v1147_v17, %v1118_v62  ;;  %v14509_v18 = vrot.slane %v8059_v20, 1  ;;  %vm14515_vm8 = vmmov %vm14511_vm7  ;;  %v14516_v53 = vld [vmem:[#allocation79_spill] sm:$0xff]  ;;  %v14519_v20 = vld [vmem:[#allocation84_spill] sm:$0xff] }
 0x1e9   :  { %v2563_v52 = vsel %vm14103_vm0, %v14507_v12, %v14095_v38  ;;  %v14510_v50 = vrot.slane %v8209_v49, 1  ;;  %v14513_v12 = vrot.slane %v14512_v8, 1  ;;  %v1006_v49 = vadd.f32 %v14518_v22, %v8271_v29  ;;  %v6497_v29 = vld [vmem:[%s13989_s4 + $0x244] ss:$8 sps:$4 sm:$0xff]  }
 0x1ea   :  { %v2680_v5 = vsel %vm14100_vm9, %v2563_v52, 0.0  ;;  %v14514_v16 = vmov %v14509_v18  ;;  %v2708_v62 = vadd.f32 %v2700_v2, %v2671_v24  ;;  %v8625_v52 = vmul.f32 %v14517_v46, %v2578_v19  ;;  %v14521_v24 = vld [vmem:[#allocation62_spill] sm:$0xff] }
 0x1eb   :  { %v832_v41 = vsel %vm14511_vm7, %v14510_v50, %v14509_v18  ;;  %v838_v38 = vsel %vm14515_vm8, %v14514_v16, %v14513_v12  ;;  %v2701_v17 = vmul.f32 %v14516_v53, %v2680_v5  ;;  %v6492_v50 = vld [vmem:[%s13989_s4 + $0x230] ss:$8 sps:$4 sm:$0xff]   ;;  %v1159_v8 = vpack.c.bf16 %v1155_v44, %v1153_v21 }
 0x1ec   :  { %v14520_v18 = vsel %vm8015_vm11, %v14519_v20, 0.0  ;;  %v1115_v2 = vadd.f32 %v14521_v24, %v8323_v13  ;;  %v1125_v19 = vsel %vm7481_vm3, %v838_v38, 0.0  ;;  %v2745_v21 = vadd.f32 %v8338_v23, %v2708_v62  ;;  %3116 = vmatpush1.bf16.msra.mxu0 %v6492_v50  ;;  %v6500_v50 = vld [vmem:[%s13989_s4 + $0x254] ss:$8 sps:$4 sm:$0xff]  }
 0x1ed   :  { %v1072_v12 = vmul.f32 %v7583_v11, %v14520_v18  ;;  %v2709_v22 = vadd.f32 %v2701_v17, %v2672_v45  ;;  %v1043_v44 = vadd.f32 %v14522_v43, %v1006_v49  ;;  %v1144_v5 = vmul.f32 %v14447_v3, %v832_v41  ;;  %1407 = vmatprep.mubr.bf16.mxu0 %v1159_v8  ;;  %v14525_v45 = vld [vmem:[#allocation65_spill] sm:$0xff]  ;;  %v2451_v8 = vpop.permute.xlu1 %2450  ;;  %v14527_v18 = vld [vmem:[#allocation63_spill] sm:$0xff] }
 0x1ee   :  { %v1146_v11 = vmul.f32 %v14447_v3, %v1125_v19  ;;  %vm14523_vm7 = vcmp.lt.s32.totalorder %v7476_v33, 112  ;;  %v2669_v32 = vadd.f32 %v14525_v45, %v2632_v54  ;;  %v6495_v3 = vld [vmem:[%s13989_s4 + $0x240] ss:$8 sps:$4 sm:$0xff]   ;;  %v8664_v62 = vadd.f32 %v2774_v57, %v2745_v21  ;;  %3117 = vmatprep.subr.bf16.mxu0 %v6497_v29 }
 0x1ef   :  { %v8651_v13 = vsel %vm14523_vm7, %v8437_v26, %v2477_v27  ;;  %vm14524_vm8 = vmmov %vm14523_vm7  ;;  %v2746_v23 = vadd.f32 %v8355_v25, %v2709_v22  ;;  %v1080_v16 = vadd.f32 %v1072_v12, %v1043_v44  ;;  %v1152_v17 = vadd.f32 %v1144_v5, %v1115_v2  ;;  %v2443_v25 = vpop.permute.xlu0 %2442 }
 0x1f0   :  { %v8656_v38 = vsel %vm14524_vm8, %v2477_v27, %v8437_v26  ;;  %v14102_v41 = vrot.slane %v8651_v13, 7  ;;  %v14526_v27 = vld [vmem:[#allocation26_spill] sm:$0xff]  ;;  %v14528_v57 = vrot.slane %v8415_v60, 7  ;;  %v14529_v2 = vrot.slane %v8421_v35, 7  ;;  %3118 = vmatpush1.bf16.msra.mxu0 %v6495_v3 }
 0x1f1   :  { %v14101_v49 = vrot.slane %v8656_v38, 7  ;;  %v2670_v54 = vadd.f32 %v14526_v27, %v8538_v4  ;;  %v8673_v20 = vadd.f32 %v2775_v36, %v2746_v23  ;;  %v1117_v12 = vadd.f32 %v14527_v18, %v1080_v16  ;;  %3119 = vmatprep.subr.bf16.mxu0 %v6500_v50  ;;  %v6503_v3 = vld [vmem:[%s13989_s4 + $0x264] ss:$8 sps:$4 sm:$0xff]  }
 0x1f2   :  { %v2564_v24 = vsel %vm14103_vm0, %v14102_v41, %v14528_v57  ;;  %v2758_v29 = vsel %vm14100_vm9, %v8656_v38, 0.0  ;;  %v8696_v22 = vmul.f32 %v14476_v48, %v8651_v13  ;;  %vm14531_vm7 = vcmp.lt.s32.totalorder %v7476_v33, 16  ;;  %v14562_v26 = vld [vmem:[#allocation66_spill] sm:$0xff] }
 0x1f3   :  { %v2565_v19 = vsel %vm14103_vm0, %v14101_v49, %v14529_v2  ;;  %v2677_v36 = vsel %vm7465_vm2, %v2564_v24, 0.0  ;;  %v1154_v21 = vadd.f32 %v1146_v11, %v1117_v12  ;;  %v2456_v45 = vsel %vm14531_vm7, %v2443_v25, %v2451_v8  ;;  %vm14532_vm8 = vmmov %vm14531_vm7  ;;  %v6498_v11 = vld [vmem:[%s13989_s4 + $0x250] ss:$8 sps:$4 sm:$0xff]  }
 0x1f4   :  { %v2678_v44 = vsel %vm8074_vm12, %v2565_v19, 0.0  ;;  %v2698_v5 = vmul.f32 %v14508_v6, %v2677_v36  ;;  %v2460_v16 = vsel %vm14532_vm8, %v2451_v8, %v2443_v25  ;;  %v2523_v27 = vrot.slane %v2456_v45, 7  ;;  %3120 = vmatpush1.bf16.msra.mxu0 %v6498_v11  ;;  %v6506_v11 = vld [vmem:[%s13989_s4 + $0x274] ss:$8 sps:$4 sm:$0xff]  }
 0x1f5   :  { %v2699_v23 = vmul.f32 %v14516_v53, %v2678_v44  ;;  %v2539_v18 = vrot.slane %v2456_v45, 1  ;;  %v1158_v12 = vpack.c.bf16 %v1154_v21, %v1152_v17  ;;  %v2522_v24 = vrot.slane %v2460_v16, 7  ;;  %3121 = vmatprep.subr.bf16.mxu0 %v6503_v3 }
 0x1f6   :  { %v2706_v57 = vadd.f32 %v2698_v5, %v2669_v32  ;;  %v2538_v2 = vrot.slane %v2460_v16, 1  ;;  %v8715_v36 = vmul.f32 %v14479_v59, %v2758_v29  ;;  %v14533_v8 = vrot.slane %v8442_v55, 7 }
 0x1f7   :  { %v8712_v19 = vadd.f32 %v2699_v23, %v2670_v54  ;;  %v14534_v50 = vrot.slane %v8304_v37, 7  ;;  %1408 = vmatmul.mubr.bf16.gmra.mrb[12].mxu0 %v1158_v12  ;;  %v14535_v21 = vrot.slane %v8447_v30, 7  ;;  %v14536_v29 = vrot.slane %v8312_v28, 7 }
 0x1f8   :  { %v2527_v25 = vsel %vm14103_vm0, %v2523_v27, %v14533_v8  ;;  %v2743_v17 = vadd.f32 %v8300_v39, %v2706_v57  ;;  %v14537_v5 = vrot.slane %v8442_v55, 1  ;;  %vm14538_vm7 = vcmp.lt.s32.totalorder %v14387_v15, 7  ;;  %v6501_v55 = vld [vmem:[%s13989_s4 + $0x260] ss:$8 sps:$4 sm:$0xff]  }
 0x1f9   :  { %v2529_v32 = vsel %vm14103_vm0, %v14534_v50, %v2523_v27  ;;  %v2526_v54 = vsel %vm14103_vm0, %v2522_v24, %v14535_v21  ;;  %v2528_v44 = vsel %vm14103_vm0, %v14536_v29, %v2522_v24  ;;  %v14539_v27 = vrot.slane %v8447_v30, 1  ;;  %vm14540_vm8 = vmmov %vm14538_vm7  ;;  %3122 = vmatpush1.bf16.msra.mxu0 %v6501_v55  ;;  %v6509_v55 = vld [vmem:[%s13989_s4 + $0x284] ss:$8 sps:$4 sm:$0xff]  }
 0x1fa   :  { %v2543_v23 = vsel %vm14538_vm7, %v2539_v18, %v14537_v5  ;;  %v14541_v12 = vrot.slane %v8312_v28, 1  ;;  %vm14542_vm9 = vmmov %vm14538_vm7  ;;  %v2607_v50 = vsel %vm8126_vm13, %v2528_v44, 0.0  ;;  %v2608_v24 = vsel %vm7485_vm4, %v2529_v32, 0.0  ;;  %3123 = vmatprep.subr.bf16.mxu0 %v6506_v11 }
 0x1fb   :  { %v2542_v39 = vsel %vm14540_vm8, %v2538_v2, %v14539_v27  ;;  %v14545_v30 = vrot.slane %v8304_v37, 1  ;;  %vm14546_vm8 = vcmp.ge.s32.totalorder %v7476_v33, 16  ;;  %v2629_v44 = vmul.f32 %v14451_v56, %v2608_v24  ;;  %v2467_v27 = vpop.permute.xlu0 %2466 }
 0x1fc   :  { %v2544_v57 = vsel %vm14542_vm9, %v14541_v12, %v2538_v2  ;;  %v2609_v28 = vsel %vm14546_vm8, %v2526_v54, 0.0  ;;  %v2628_v2 = vmul.f32 %v14458_v47, %v2607_v50  ;;  %v8767_v32 = vadd.f32 %v8435_v31, %v2743_v17  ;;  %vm14547_vm9 = vmmov %vm14546_vm8  ;;  %v2475_v54 = vpop.permute.xlu1 %2474  ;;  %v14548_v12 = vld [vmem:[#allocation64_spill] sm:$0xff]  ;;  %v14550_v17 = vld [vmem:[#allocation19_spill] sm:$0xff] }
 0x1fd   :  { %v8757_v29 = vsel %vm14538_vm7, %v14545_v30, %v2539_v18  ;;  %v2630_v37 = vmul.f32 %v14458_v47, %v2609_v28  ;;  %v2631_v18 = vmul.f32 %v14451_v56, %v2527_v25  ;;  %v2718_v5 = vsel %vm14547_vm9, %v2460_v16, 0.0  ;;  %v14551_v28 = vld [vmem:[#allocation28_spill] sm:$0xff]  ;;  %vm14555_vm7 = vmmov %vm14546_vm8 }
 0x1fe   :  { %v2637_v50 = vadd.f32 %v2629_v44, %v14548_v12  ;;  %v8775_v3 = vmul.f32 %v14448_v42, %v2718_v5  ;;  %v8778_v24 = vmul.f32 %v14449_v10, %v2456_v45  ;;  %v2790_v31 = vsel %vm8159_vm14, %v2544_v57, 0.0  ;;  %v14552_v16 = vld [vmem:[#allocation20_spill] sm:$0xff]  ;;  %v14554_v45 = vld [vmem:[#allocation31_spill] sm:$0xff] }
 0x1ff   :  { %v2638_v47 = vadd.f32 %v2630_v37, %v14550_v17  ;;  %v2639_v56 = vadd.f32 %v2631_v18, %v14551_v28  ;;  %v2811_v25 = vmul.f32 %v14466_v9, %v2790_v31  ;;  %v2636_v4 = vadd.f32 %v2628_v2, %v14552_v16  ;;  %v6504_v42 = vld [vmem:[%s13989_s4 + $0x270] ss:$8 sps:$4 sm:$0xff]   ;;  %v14557_v18 = vld [vmem:[#allocation23_spill] sm:$0xff] }
 0x200   :  { %v2791_v10 = vsel %vm7489_vm5, %v8757_v29, 0.0  ;;  %v2674_v5 = vadd.f32 %v14554_v45, %v2637_v50  ;;  %v2792_v57 = vsel %vm14555_vm7, %v2542_v39, 0.0  ;;  %vm14556_vm8 = vcmp.lt.s32.totalorder %v7476_v33, 112  ;;  %v14558_v31 = vld [vmem:[#allocation24_spill] sm:$0xff]  ;;  %v14559_v29 = vld [vmem:[#allocation25_spill] sm:$0xff]  ;;  %3124 = vmatpush1.bf16.msra.mxu0 %v6504_v42 }
 0x201   :  { %v2480_v37 = vsel %vm14556_vm8, %v2467_v27, %v2475_v54  ;;  %v2819_v2 = vadd.f32 %v2811_v25, %v8664_v62  ;;  %v2673_v12 = vadd.f32 %v14557_v18, %v2636_v4  ;;  %v2675_v17 = vadd.f32 %v14558_v31, %v2638_v47  ;;  %v14560_v50 = vld [vmem:[#allocation73_spill] sm:$0xff]  ;;  %vm14561_vm9 = vmmov %vm14556_vm8  ;;  %v6507_v4 = vld [vmem:[%s13989_s4 + $0x280] ss:$8 sps:$4 sm:$0xff]   ;;  %3125 = vmatprep.subr.bf16.mxu0 %v6509_v55 }
 0x202   :  { %v2676_v28 = vadd.f32 %v14559_v29, %v2639_v56  ;;  %v8805_v16 = vmul.f32 %v14560_v50, %v2543_v23  ;;  %v2484_v39 = vsel %vm14561_vm9, %v2475_v54, %v2467_v27  ;;  %v2554_v45 = vrot.slane %v2480_v37, 7 }
 0x203   :  { %v2570_v11 = vrot.slane %v2480_v37, 1  ;;  %v2813_v49 = vmul.f32 %v14466_v9, %v2792_v57  ;;  %v8811_v41 = vadd.f32 %v14562_v26, %v2819_v2  ;;  %v2555_v62 = vrot.slane %v2484_v39, 7  ;;  %v6512_v57 = vld [vmem:[%s13989_s4 + $0x294] ss:$8 sps:$4 sm:$0xff]  }
 0x204   :  { %v2571_v25 = vrot.slane %v2484_v39, 1  ;;  %v14563_v23 = vrot.slane %v8651_v13, 7  ;;  %v14564_v54 = vrot.slane %v8565_v40, 7  ;;  %v14565_v26 = vrot.slane %v8651_v13, 1  ;;  %3126 = vmatpush1.bf16.msra.mxu0 %v6507_v4 }
 0x205   :  { %vm14566_vm7 = vcmp.lt.s32.totalorder %v14387_v15, 7  ;;  %vm14567_vm8 = vcmp.lt.s32.totalorder %v7531_v7, 240  ;;  %v14568_v2 = vrot.slane %v8656_v38, 7  ;;  %v14569_v31 = vrot.slane %v8570_v51, 7  ;;  %3127 = vmatprep.subr.bf16.mxu0 %v6512_v57 }
 0x206   :  { %v2558_v47 = vsel %vm14103_vm0, %v2554_v45, %v14563_v23  ;;  %v2560_v27 = vsel %vm14103_vm0, %v14564_v54, %v2554_v45  ;;  %v8828_v56 = vsel %vm14566_vm7, %v2570_v11, %v14565_v26  ;;  %v2756_v42 = vsel %vm14567_vm8, %v2484_v39, 0.0  ;;  %vm14571_vm9 = vmmov %vm14566_vm7 }
 0x207   :  { %v2559_v18 = vsel %vm14103_vm0, %v2555_v62, %v14568_v2  ;;  %v2561_v29 = vsel %vm14103_vm0, %v14569_v31, %v2555_v62  ;;  %v14570_v45 = vrot.slane %v8656_v38, 1  ;;  %v14572_v55 = vrot.slane %v8565_v40, 1 }
 0x208   :  { %v2681_v54 = vsel %vm7485_vm4, %v2560_v27, 0.0  ;;  %v2682_v2 = vsel %vm8228_vm15, %v2561_v29, 0.0  ;;  %v2684_v30 = vsel %vm14567_vm8, %v2559_v18, 0.0  ;;  %v2704_v62 = vmul.f32 %v14508_v6, %v2558_v47  ;;  %v6510_v27 = vld [vmem:[%s13989_s4 + $0x290] ss:$8 sps:$4 sm:$0xff]  }
 0x209   :  { %v2575_v39 = vsel %vm14571_vm9, %v2571_v25, %v14570_v45  ;;  %v2576_v23 = vsel %vm14566_vm7, %v14572_v55, %v2570_v11  ;;  %v14574_v31 = vrot.slane %v8570_v51, 1  ;;  %vm14575_vm9 = vmmov %vm14566_vm7  ;;  %v2702_v40 = vmul.f32 %v14508_v6, %v2681_v54  ;;  %3128 = vmatpush1.bf16.msra.mxu0 %v6510_v27 }
 0x20a   :  { %v2703_v11 = vmul.f32 %v14516_v53, %v2682_v2  ;;  %v2705_v55 = vmul.f32 %v14516_v53, %v2684_v30  ;;  %v2712_v29 = vadd.f32 %v2704_v62, %v2675_v17  ;;  %v2776_v18 = vmul.f32 %v14476_v48, %v2480_v37  ;;  %v6515_v53 = vld [vmem:[%s13989_s4 + $0x2a4] ss:$8 sps:$4 sm:$0xff]  }
 0x20b   :  { %v2577_v45 = vsel %vm14575_vm9, %v14574_v31, %v2571_v25  ;;  %v2864_v47 = vsel %vm7489_vm5, %v2576_v23, 0.0  ;;  %v14576_v26 = vmov %v14574_v31  ;;  %v14577_v25 = vrot.slane %v8421_v35, 1  ;;  %v14578_v23 = vld [vmem:[#allocation47_spill] sm:$0xff]  ;;  %3129 = vmatprep.subr.bf16.mxu0 %v6515_v53  ;;  %vm14584_vm9 = vmmov %vm14566_vm7  ;;  %v14588_v53 = vld [vmem:[#allocation29_spill] sm:$0xff] }
 0x20c   :  { %v2710_v30 = vadd.f32 %v2702_v40, %v2673_v12  ;;  %v2711_v4 = vadd.f32 %v2703_v11, %v2674_v5  ;;  %v2713_v17 = vadd.f32 %v2705_v55, %v2676_v28  ;;  %v2777_v48 = vmul.f32 %v14479_v59, %v2756_v42  ;;  %v6513_v59 = vld [vmem:[%s13989_s4 + $0x2a0] ss:$8 sps:$4 sm:$0xff]   ;;  %v14580_v42 = vld [vmem:[#allocation81_spill] sm:$0xff] }
 0x20d   :  { %v2579_v6 = vsel %vm14566_vm7, %v14577_v25, %v14576_v26  ;;  %v2885_v37 = vmul.f32 %v14517_v46, %v2864_v47  ;;  %v2744_v51 = vadd.f32 %v14578_v23, %v8712_v19  ;;  %v2812_v54 = vmul.f32 %v14560_v50, %v2791_v10  ;;  %v14585_v55 = vld [vmem:[#allocation69_spill] sm:$0xff]  ;;  %3130 = vmatpush1.bf16.msra.mxu0 %v6513_v59  ;;  %vm14589_vm7 = vmmov %vm14567_vm8 }
 0x20e   :  { %v2863_v26 = vsel %vm14567_vm8, %v2579_v6, 0.0  ;;  %v2747_v57 = vadd.f32 %v8775_v3, %v2710_v30  ;;  %v2748_v2 = vadd.f32 %v8778_v24, %v2711_v4  ;;  %v2749_v12 = vadd.f32 %v8500_v58, %v2712_v29  ;;  %v6518_v58 = vld [vmem:[%s13989_s4 + $0x2b4] ss:$8 sps:$4 sm:$0xff]   ;;  %v14586_v29 = vld [vmem:[#allocation43_spill] sm:$0xff]  ;;  %vm14595_vm8 = vmmov %vm14584_vm9 }
 0x20f   :  { %v2865_v28 = vsel %vm8361_vm6, %v2577_v45, 0.0  ;;  %v2781_v19 = vadd.f32 %v8452_v63, %v2744_v51  ;;  %v2820_v10 = vadd.f32 %v2812_v54, %v8673_v20  ;;  %v2884_v62 = vmul.f32 %v14580_v42, %v2863_v26  ;;  %v14581_v45 = vld [vmem:[#allocation71_spill] sm:$0xff]  ;;  %3131 = vmatprep.subr.bf16.mxu0 %v6518_v58  ;;  %v14592_v54 = vld [vmem:[#allocation30_spill] sm:$0xff] }
 0x210   :  { %v2886_v3 = vmul.f32 %v14580_v42, %v2865_v28  ;;  %v2784_v24 = vadd.f32 %v2776_v18, %v2747_v57  ;;  %v2785_v31 = vadd.f32 %v2777_v48, %v2748_v2  ;;  %v2817_v40 = vadd.f32 %v14581_v45, %v8767_v32 }
 0x211   :  { %v14582_v11 = vmov %v14577_v25  ;;  %v14583_v63 = vrot.slane %v8656_v38, 1  ;;  %v2818_v27 = vadd.f32 %v14585_v55, %v2781_v19  ;;  %v2857_v47 = vadd.f32 %v14586_v29, %v2820_v10  ;;  %v6516_v38 = vld [vmem:[%s13989_s4 + $0x2b0] ss:$8 sps:$4 sm:$0xff]   ;;  %v14596_v10 = vld [vmem:[#allocation70_spill] sm:$0xff] }
 0x212   :  { %v2750_v25 = vadd.f32 %v8478_v61, %v2713_v17  ;;  %v14587_v18 = vsel %vm7481_vm3, %v8474_v1, 0.0  ;;  %v2821_v32 = vadd.f32 %v2813_v49, %v2784_v24  ;;  %v2822_v35 = vadd.f32 %v8805_v16, %v2785_v31  ;;  %v14590_v61 = vld [vmem:[#allocation27_spill] sm:$0xff]  ;;  %3132 = vmatpush1.bf16.msra.mxu0 %v6516_v38  ;;  %v6530_v38 = vld [vmem:[%s13989_s4 + $0x2f4] ss:$8 sps:$4 sm:$0xff]  }
 0x213   :  { %v2581_v20 = vsel %vm14584_vm9, %v14583_v63, %v14582_v11  ;;  %v2816_v6 = vmul.f32 %v14560_v50, %v14587_v18  ;;  %v2854_v30 = vadd.f32 %v14588_v53, %v2817_v40  ;;  %v2867_v4 = vsel %vm14589_vm7, %v2575_v39, 0.0  ;;  %v6521_v1 = vld [vmem:[%s13989_s4 + $0x2c4] ss:$8 sps:$4 sm:$0xff]   ;;  %v14600_v40 = vld [vmem:[#allocation33_spill] sm:$0xff]  ;;  %v6531_v53 = vld [vmem:[%s13989_s4 + $0x100] ss:$8 sps:$4 sm:$0xff]  }
 0x214   :  { %v2855_v17 = vadd.f32 %v14590_v61, %v2818_v27  ;;  %v2894_v48 = vadd.f32 %v2886_v3, %v2857_v47  ;;  %v2787_v49 = vadd.f32 %v8715_v36, %v2750_v25  ;;  %v2869_v16 = vsel %vm8512_vm1, %v2581_v20, 0.0  ;;  %3133 = vmatprep.subr.bf16.mxu0 %v6521_v1  ;;  %v6522_v27 = vld [vmem:[%s13989_s4 + $0x2d0] ss:$8 sps:$4 sm:$0xff]   ;;  %v6527_v18 = vld [vmem:[%s13989_s4 + $0x2e4] ss:$8 sps:$4 sm:$0xff]   ;;  %vm14605_vm9 = vmmov %vm14595_vm8 }
 0x215   :  { %v2893_v23 = vadd.f32 %v2885_v37, %v8811_v41  ;;  %v2891_v51 = vadd.f32 %v8625_v52, %v2854_v30  ;;  %v2859_v26 = vadd.f32 %v14592_v54, %v2822_v35  ;;  %v2888_v39 = vmul.f32 %v14580_v42, %v2867_v4  ;;  %v6519_v52 = vld [vmem:[%s13989_s4 + $0x2c0] ss:$8 sps:$4 sm:$0xff]   ;;  %v6533_v30 = vld [vmem:[%s13989_s4 + $0x104] ss:$8 sps:$4 sm:$0xff]   ;;  %v6536_v4 = vld [vmem:[%s13989_s4 + $0x114] ss:$8 sps:$4 sm:$0xff]  }
 0x216   :  { %v2892_v57 = vadd.f32 %v2884_v62, %v2855_v17  ;;  %v2824_v2 = vadd.f32 %v2816_v6, %v2787_v49  ;;  %v14593_v28 = vrot.slane %v8415_v60, 1  ;;  %v14594_v59 = vrot.slane %v8651_v13, 1  ;;  %v14598_v13 = vld [vmem:[#allocation32_spill] sm:$0xff]  ;;  %3134 = vmatpush1.bf16.msra.mxu0 %v6519_v52  ;;  %2097 = vmatprep.subr.bf16.mxu1 %v6533_v30  ;;  %v6539_v17 = vld [vmem:[%s13989_s4 + $0x124] ss:$8 sps:$4 sm:$0xff]   ;;  %vm14606_vm7 = vmmov %vm14595_vm8 }
 0x217   :  { %v2786_v19 = vadd.f32 %v8696_v22, %v2749_v12  ;;  %v2899_v41 = vpack.c.bf16 %v2893_v23, %v2891_v51  ;;  %v2890_v37 = vmul.f32 %v14580_v42, %v2869_v16  ;;  %v14597_v62 = vsel %vm8015_vm11, %v14596_v10, 0.0  ;;  %v6524_v22 = vld [vmem:[%s13989_s4 + $0x2d4] ss:$8 sps:$4 sm:$0xff]   ;;  %v14599_v12 = vld [vmem:[#allocation67_spill] sm:$0xff]  ;;  %2098 = vmatpush1.bf16.msra.mxu1 %v6531_v53  ;;  %v6534_v61 = vld [vmem:[%s13989_s4 + $0x110] ss:$8 sps:$4 sm:$0xff]  }
 0x218   :  { %v2580_v36 = vsel %vm14595_vm8, %v14594_v59, %v14593_v28  ;;  %v2815_v60 = vmul.f32 %v14466_v9, %v14597_v62  ;;  %v2858_v3 = vadd.f32 %v14598_v13, %v2821_v32  ;;  %v2900_v58 = vpack.c.bf16 %v2894_v48, %v2892_v57  ;;  %v14602_v9 = vld [vmem:[#allocation39_spill] sm:$0xff]  ;;  %3135 = vmatprep.subr.bf16.mxu0 %v6524_v22  ;;  %v6542_v1 = vld [vmem:[%s13989_s4 + $0x134] ss:$8 sps:$4 sm:$0xff]   ;;  %v6540_v49 = vld [vmem:[%s13989_s4 + $0x130] ss:$8 sps:$4 sm:$0xff]  }
 0x219   :  { %v2861_v24 = vadd.f32 %v14599_v12, %v2824_v2  ;;  %v2896_v31 = vadd.f32 %v2888_v39, %v2859_v26  ;;  %v2868_v42 = vsel %vm7481_vm3, %v2580_v36, 0.0  ;;  %v14601_v11 = vsel %vm7481_vm3, %v14600_v40, 0.0  ;;  %2099 = vmatprep.subr.bf16.mxu1 %v6536_v4  ;;  %v6537_v48 = vld [vmem:[%s13989_s4 + $0x120] ss:$8 sps:$4 sm:$0xff]   ;;  %v6545_v16 = vld [vmem:[%s13989_s4 + $0x144] ss:$8 sps:$4 sm:$0xff]   ;;  %vm14607_vm8 = vmmov %vm14606_vm7 }
 0x21a   :  { %v2823_v45 = vadd.f32 %v2815_v60, %v2786_v19  ;;  %v2852_v63 = vmul.f32 %v14602_v9, %v14601_v11  ;;  %v2887_v20 = vmul.f32 %v14517_v46, %v8828_v56  ;;  %3141 = vmatprep.mubr.bf16.mxu0 %v2900_v58  ;;  %v2889_v47 = vmul.f32 %v14517_v46, %v2868_v42  ;;  %v6525_v56 = vld [vmem:[%s13989_s4 + $0x2e0] ss:$8 sps:$4 sm:$0xff]   ;;  %v6528_v46 = vld [vmem:[%s13989_s4 + $0x2f0] ss:$8 sps:$4 sm:$0xff]   ;;  %v6548_v51 = vld [vmem:[%s13989_s4 + $0x154] ss:$8 sps:$4 sm:$0xff]  }
 0x21b   :  { %v2898_v55 = vadd.f32 %v2890_v37, %v2861_v24  ;;  %3136 = vmatpush1.bf16.msra.mxu0 %v6522_v27  ;;  %2100 = vmatpush1.bf16.msra.mxu1 %v6534_v61  ;;  %v6543_v23 = vld [vmem:[%s13989_s4 + $0x140] ss:$8 sps:$4 sm:$0xff]   ;;  %v6546_v54 = vld [vmem:[%s13989_s4 + $0x150] ss:$8 sps:$4 sm:$0xff]   ;;  %v6551_v26 = vld [vmem:[%s13989_s4 + $0x164] ss:$8 sps:$4 sm:$0xff]  }
 0x21c   :  { %v2860_v29 = vadd.f32 %v2852_v63, %v2823_v45  ;;  %v2895_v25 = vadd.f32 %v2887_v20, %v2858_v3  ;;  %3137 = vmatprep.subr.bf16.mxu0 %v6527_v18  ;;  %2101 = vmatprep.subr.bf16.mxu1 %v6539_v17  ;;  %v5910_v39 = vld [vmem:[%s13990_s6 + $0x4] sm:$0x3]  ;;  %v6549_v57 = vld [vmem:[%s13989_s4 + $0x160] ss:$8 sps:$4 sm:$0xff]   ;;  %v14604_v59 = vld [vmem:[#allocation4_spill] sm:$0xff] }
 0x21d   :  { %v2902_v6 = vpack.c.bf16 %v2898_v55, %v2896_v31  ;;  %v14603_v2 = vld [vmem:[#allocation3_spill] sm:$0xff]  ;;  %v1202_v36 = vrot.slane %v5910_v39, %v14604_v59  ;;  %v6552_v19 = vld [vmem:[%s13989_s4 + $0x170] ss:$8 sps:$4 sm:$0xff]   ;;  %v6554_v52 = vld [vmem:[%s13989_s4 + $0x174] ss:$8 sps:$4 sm:$0xff]  }
 0x21e   :  { %v2897_v32 = vadd.f32 %v2889_v47, %v2860_v29  ;;  %v1198_v28 = vrot.slane %v5910_v39, %v14603_v2  ;;  %v6555_v22 = vld [vmem:[%s13989_s4 + $0x180] ss:$8 sps:$4 sm:$0xff]   ;;  %v6557_v12 = vld [vmem:[%s13989_s4 + $0x184] ss:$8 sps:$4 sm:$0xff]  }
 0x21f   :  { %3138 = vmatpush1.bf16.msra.mxu0 %v6525_v56  ;;  %2102 = vmatpush1.bf16.msra.mxu1 %v6537_v48  ;;  %v6560_v56 = vld [vmem:[%s13989_s4 + $0x194] ss:$8 sps:$4 sm:$0xff]  }
 0x220   :  { %v2901_v35 = vpack.c.bf16 %v2897_v32, %v2895_v25  ;;  %3139 = vmatprep.subr.bf16.mxu0 %v6530_v38  ;;  %2103 = vmatprep.subr.bf16.mxu1 %v6542_v1  ;;  %v6558_v32 = vld [vmem:[%s13989_s4 + $0x190] ss:$8 sps:$4 sm:$0xff]  }
 0x223   :  { %3140 = vmatpush1.bf16.msra.mxu0 %v6528_v46  ;;  %2104 = vmatpush1.bf16.msra.mxu1 %v6540_v49 }
 0x224   :  { %2105 = vmatprep.subr.bf16.mxu1 %v6545_v16 }
 0x226   :  { %3142 = vmatmul.mubr.bf16.vlgmr.msra.gmra.mrb[16].mxu0 %v2899_v41 }
 0x227   :  { %3151 = vmatprep.mubr.bf16.mxu0 %v2902_v6  ;;  %2106 = vmatpush1.bf16.msra.mxu1 %v6543_v23  ;;  %v6561_v23 = vld [vmem:[%s13989_s4 + $0x1a0] ss:$8 sps:$4 sm:$0xff]  }
 0x228   :  { %2107 = vmatprep.subr.bf16.mxu1 %v6548_v51 }
 0x22b   :  { %2108 = vmatpush1.bf16.msra.mxu1 %v6546_v54 }
 0x22c   :  { %2109 = vmatprep.subr.bf16.mxu1 %v6551_v26  ;;  %v6563_v26 = vld [vmem:[%s13989_s4 + $0x1a4] ss:$8 sps:$4 sm:$0xff]  }
 0x22e   :  { %3152 = vmatmul.mubr.bf16.gmra.mrb[20].mxu0 %v2901_v35 }
 0x22f   :  { %2110 = vmatpush1.bf16.msra.mxu1 %v6549_v57 }
 0x230   :  { %2111 = vmatprep.subr.bf16.mxu1 %v6554_v52 }
 0x233   :  { %2112 = vmatpush1.bf16.msra.mxu1 %v6552_v19 }
 0x234   :  { %2113 = vmatprep.subr.bf16.mxu1 %v6557_v12 }
 0x237   :  { %2114 = vmatpush1.bf16.msra.mxu1 %v6555_v22 }
 0x238   :  { %2115 = vmatprep.subr.bf16.mxu1 %v6560_v56  ;;  %v6573_v56 = vld [vmem:[%s13989_s4 + $0x1e0] ss:$8 sps:$4 sm:$0xff]  }
 0x23b   :  { %2116 = vmatpush1.bf16.msra.mxu1 %v6558_v32  ;;  %v6575_v32 = vld [vmem:[%s13989_s4 + $0x1e4] ss:$8 sps:$4 sm:$0xff]  }
 0x23c   :  { %2117 = vmatprep.subr.bf16.mxu1 %v6563_v26 }
 0x23f   :  { %2118 = vmatpush1.bf16.msra.mxu1 %v6561_v23 }
 0x2b0   :  { %v1399_v41 = vpop.f32.mrb[8].mxu0 }
 0x2b1   :  { %v1400_v37 = vadd.f32 %v1399_v41, %v1198_v28  ;;  %v1401_v10 = vpop.f32.mrb[9].mxu0 }
 0x2b2   :  { %v1402_v62 = vadd.f32 %v1401_v10, %v1202_v36  ;;  %v1403_v60 = vpop.f32.mrb[10].mxu0 }
 0x2b3   :  { %v9035_v13 = vmax.f32 %v1400_v37, 0.0  ;;  %v1404_v3 = vadd.f32 %v1403_v60, %v1198_v28  ;;  %v1405_v58 = vpop.f32.mrb[11].mxu0 }
 0x2b4   :  { %v9043_v24 = vmax.f32 %v1402_v62, 0.0  ;;  %v1406_v31 = vadd.f32 %v1405_v58, %v1202_v36 }
 0x2b5   :  { %v9045_v42 = vmax.f32 %v1404_v3, 0.0  ;;  %1426 = vrot.lane.b32.xlu0 %v9035_v13, %s6723_s18  ;;  %v1474_v40 = vrot.slane %v9035_v13, 7  ;;  %v1490_v11 = vrot.slane %v9035_v13, 1 }
 0x2b6   :  { %v9049_v45 = vmax.f32 %v1406_v31, 0.0  ;;  %1458 = vrot.lane.b32.xlu1 %v9043_v24, %s6724_s19  ;;  %v1475_v20 = vrot.slane %v9043_v24, 7  ;;  %v1491_v55 = vrot.slane %v9043_v24, 1 }
 0x2b7   :  { %v1476_v9 = vrot.slane %v9045_v42, 7  ;;  %v1492_v63 = vrot.slane %v9045_v42, 1 }
 0x2b8   :  { %v1477_v27 = vrot.slane %v9049_v45, 7  ;;  %v1493_v29 = vrot.slane %v9049_v45, 1 }
 0x2b9   :  { %v9063_v47 = vsel %vm14605_vm9, %v1490_v11, %v1492_v63  ;;  %1450 = vrot.lane.b32.xlu0 %v9035_v13, %s6724_s19  ;;  %v9069_v25 = vsel %vm14103_vm0, %v1474_v40, %v1476_v9  ;;  %vm14608_vm9 = vmmov %vm14606_vm7 }
 0x2ba   :  { %1452 = vrot.lane.b32.xlu1 %v9045_v42, %s6724_s19  ;;  %v9075_v18 = vsel %vm14103_vm0, %v1475_v20, %v1477_v27  ;;  %v9079_v6 = vsel %vm14606_vm7, %v1491_v55, %v1493_v29 }
 0x2bd   :  { %1434 = vrot.lane.b32.xlu0 %v9043_v24, %s6723_s18 }
 0x2be   :  { %1436 = vrot.lane.b32.xlu1 %v9049_v45, %s6723_s18 }
 0x2c1   :  { %1428 = vrot.lane.b32.xlu0 %v9045_v42, %s6723_s18 }
 0x2ca   :  { %v1409_v35 = vpop.f32.mrb[12].mxu0 }
 0x2cb   :  { %v1410_v38 = vadd.f32 %v1409_v35, %v1198_v28  ;;  %v1411_v46 = vpop.f32.mrb[13].mxu0  ;;  %v6578_v35 = vld [vmem:[%s13989_s4 + $0x1f4] ss:$8 sps:$4 sm:$0xff]  }
 0x2cc   :  { %v1412_v53 = vadd.f32 %v1411_v46, %v1202_v36  ;;  %v1413_v30 = vpop.f32.mrb[14].mxu0  ;;  %v6576_v46 = vld [vmem:[%s13989_s4 + $0x1f0] ss:$8 sps:$4 sm:$0xff]  }
 0x2cd   :  { %v9093_v4 = vmax.f32 %v1410_v38, 0.0  ;;  %v1414_v61 = vadd.f32 %v1413_v30, %v1198_v28  ;;  %v1415_v17 = vpop.f32.mrb[15].mxu0  ;;  %v6058_v38 = vld [vmem:[%s13990_s6 + $0x8] sm:$0x3] }
 0x2ce   :  { %v9095_v48 = vmax.f32 %v1412_v53, 0.0  ;;  %v1416_v1 = vadd.f32 %v1415_v17, %v1202_v36  ;;  %v2942_v53 = vrot.slane %v6058_v38, %v14603_v2  ;;  %v2946_v30 = vrot.slane %v6058_v38, %v14604_v59  ;;  %v6581_v17 = vld [vmem:[%s13989_s4 + $0x304] ss:$8 sps:$4 sm:$0xff]  }
 0x2cf   :  { %v1494_v49 = vrot.slane %v9093_v4, 1  ;;  %v9098_v16 = vmax.f32 %v1414_v61, 0.0  ;;  %v1478_v51 = vrot.slane %v9093_v4, 7 }
 0x2d0   :  { %v9104_v54 = vmax.f32 %v1416_v1, 0.0  ;;  %v1479_v57 = vrot.slane %v9095_v48, 7  ;;  %v1495_v19 = vrot.slane %v9095_v48, 1 }
 0x2d1   :  { %v9111_v39 = vsel %vm14607_vm8, %v1492_v63, %v1494_v49  ;;  %v1480_v28 = vrot.slane %v9098_v16, 7  ;;  %1432 = vrot.lane.b32.xlu1 %v9098_v16, %s6723_s18  ;;  %1456 = vrot.lane.b32.xlu0 %v9098_v16, %s6724_s19  ;;  %v9140_v60 = vsel %vm14103_vm0, %v1476_v9, %v1478_v51  ;;  %v1496_v3 = vrot.slane %v9098_v16, 1  ;;  %vm14609_vm8 = vmmov %vm14606_vm7  ;;  %v6564_v63 = vld [vmem:[%s13989_s4 + $0x1b0] ss:$8 sps:$4 sm:$0xff]  }
 0x2d2   :  { %v1481_v36 = vrot.slane %v9104_v54, 7  ;;  %v1497_v10 = vrot.slane %v9104_v54, 1  ;;  %v9149_v58 = vsel %vm14103_vm0, %v1477_v27, %v1479_v57  ;;  %v9153_v22 = vsel %vm14608_vm9, %v1493_v29, %v1495_v19  ;;  %v6572_v27 = vld [vmem:[%s13989_s4 + $0x1d4] ss:$8 sps:$4 sm:$0xff]   ;;  %v6570_v29 = vld [vmem:[%s13989_s4 + $0x1d0] ss:$8 sps:$4 sm:$0xff]  }
 0x2d3   :  { %v9123_v52 = vsel %vm14103_vm0, %v1480_v28, %v1474_v40  ;;  %v9127_v41 = vsel %vm14103_vm0, %v1478_v51, %v1480_v28 }
 0x2d4   :  { %v9131_v37 = vsel %vm14103_vm0, %v1481_v36, %v1475_v20  ;;  %v9136_v62 = vsel %vm14103_vm0, %v1479_v57, %v1481_v36  ;;  %v9157_v12 = vsel %vm14606_vm7, %v1495_v19, %v1497_v10  ;;  %v9161_v31 = vsel %vm14609_vm8, %v1497_v10, %v1491_v55  ;;  %vm14610_vm0 = vmmov %vm14606_vm7  ;;  %v6566_v20 = vld [vmem:[%s13989_s4 + $0x1b4] ss:$8 sps:$4 sm:$0xff]   ;;  %v6569_v55 = vld [vmem:[%s13989_s4 + $0x1c4] ss:$8 sps:$4 sm:$0xff]  }
 0x2d5   :  { %1440 = vrot.lane.b32.xlu1 %v9104_v54, %s6723_s18  ;;  %1460 = vrot.lane.b32.xlu0 %v9049_v45, %s6724_s19  ;;  %v9169_v40 = vsel %vm14610_vm0, %v1494_v49, %v1496_v3  ;;  %vm14611_vm9 = vmmov %vm14610_vm0  ;;  %vm14613_vm7 = vcmp.lt.s32.totalorder %v14387_v15, 1 }
 0x2d6   :  { %v9173_v9 = vsel %vm14611_vm9, %v1496_v3, %v1490_v11  ;;  %2119 = vmatprep.subr.bf16.mxu1 %v6566_v20  ;;  %v6567_v11 = vld [vmem:[%s13989_s4 + $0x1c0] ss:$8 sps:$4 sm:$0xff]   ;;  %vm14614_vm8 = vmmov %vm14613_vm7 }
 0x2d7   :  { %2120 = vmatpush1.bf16.msra.mxu1 %v6564_v63  ;;  %vm14615_vm9 = vmmov %vm14610_vm0 }
 0x2d8   :  { %2121 = vmatprep.subr.bf16.mxu1 %v6569_v55 }
 0x2d9   :  { %1464 = vrot.lane.b32.xlu1 %v9104_v54, %s6724_s19  ;;  %1430 = vrot.lane.b32.xlu0 %v9093_v4, %s6723_s18 }
 0x2db   :  { %2122 = vmatpush1.bf16.msra.mxu1 %v6567_v11 }
 0x2dc   :  { %2123 = vmatprep.subr.bf16.mxu1 %v6572_v27 }
 0x2dd   :  { %1438 = vrot.lane.b32.xlu1 %v9095_v48, %s6723_s18  ;;  %1454 = vrot.lane.b32.xlu0 %v9093_v4, %s6724_s19 }
 0x2df   :  { %2124 = vmatpush1.bf16.msra.mxu1 %v6570_v29 }
 0x2e0   :  { %2125 = vmatprep.subr.bf16.mxu1 %v6575_v32 }
 0x2e1   :  { %1462 = vrot.lane.b32.xlu1 %v9095_v48, %s6724_s19 }
 0x2e3   :  { %2126 = vmatpush1.bf16.msra.mxu1 %v6573_v56 }
 0x2e4   :  { %2127 = vmatprep.subr.bf16.mxu1 %v6578_v35 }
 0x2e7   :  { %2128 = vmatpush1.bf16.msra.mxu1 %v6576_v46 }
 0x2e8   :  { %3841 = vmatprep.subr.bf16.mxu1 %v6581_v17 }
 0x2f9   :  { %v3143_v61 = vpop.f32.mrb[16].mxu0 }
 0x2fa   :  { %v3144_v1 = vadd.f32 %v3143_v61, %v2942_v53  ;;  %v3145_v49 = vpop.f32.mrb[17].mxu0 }
 0x2fb   :  { %v3146_v23 = vadd.f32 %v3145_v49, %v2946_v30  ;;  %v3147_v51 = vpop.f32.mrb[18].mxu0 }
 0x2fc   :  { %v9219_v26 = vmax.f32 %v3144_v1, 0.0  ;;  %v3148_v57 = vadd.f32 %v3147_v51, %v2942_v53  ;;  %v3149_v28 = vpop.f32.mrb[19].mxu0 }
 0x2fd   :  { %v9221_v36 = vmax.f32 %v3146_v23, 0.0  ;;  %v3150_v19 = vadd.f32 %v3149_v28, %v2946_v30 }
 0x2fe   :  { %v9223_v10 = vmax.f32 %v3148_v57, 0.0  ;;  %3170 = vrot.lane.b32.xlu0 %v9219_v26, %s6723_s18  ;;  %v3218_v63 = vrot.slane %v9219_v26, 7  ;;  %v3234_v20 = vrot.slane %v9219_v26, 1 }
 0x2ff   :  { %v9227_v3 = vmax.f32 %v3150_v19, 0.0  ;;  %3202 = vrot.lane.b32.xlu1 %v9221_v36, %s6724_s19  ;;  %v3219_v27 = vrot.slane %v9221_v36, 7  ;;  %v3235_v29 = vrot.slane %v9221_v36, 1 }
 0x300   :  { %v3220_v11 = vrot.slane %v9223_v10, 7  ;;  %v3236_v55 = vrot.slane %v9223_v10, 1 }
 0x301   :  { %v3221_v32 = vrot.slane %v9227_v3, 7  ;;  %v3237_v56 = vrot.slane %v9227_v3, 1  ;;  %v3153_v35 = vpop.f32.mrb[20].mxu0 }
 0x302   :  { %v9241_v38 = vsel %vm14610_vm0, %v3234_v20, %v3236_v55  ;;  %v3154_v46 = vadd.f32 %v3153_v35, %v2942_v53  ;;  %v3155_v61 = vpop.f32.mrb[21].mxu0  ;;  %3194 = vrot.lane.b32.xlu0 %v9219_v26, %s6724_s19  ;;  %v9247_v17 = vsel %vm14613_vm7, %v3218_v63, %v3220_v11 }
 0x303   :  { %14612 = vst [vmem:[#allocation41_spill] sm:$0xff] %v9241_v38  ;;  %v3156_v1 = vadd.f32 %v3155_v61, %v2946_v30  ;;  %v3157_v49 = vpop.f32.mrb[22].mxu0  ;;  %3196 = vrot.lane.b32.xlu1 %v9223_v10, %s6724_s19  ;;  %v9253_v23 = vsel %vm14614_vm8, %v3219_v27, %v3221_v32  ;;  %v9257_v51 = vsel %vm14615_vm9, %v3235_v29, %v3237_v56  ;;  %vm14619_vm8 = vmmov %vm14613_vm7 }
 0x304   :  { %v9259_v57 = vmax.f32 %v3154_v46, 0.0  ;;  %v3158_v28 = vadd.f32 %v3157_v49, %v2942_v53  ;;  %v3159_v19 = vpop.f32.mrb[23].mxu0  ;;  %vm14620_vm9 = vmmov %vm14613_vm7 }
 0x305   :  { %v9261_v35 = vmax.f32 %v3156_v1, 0.0  ;;  %v3160_v50 = vadd.f32 %v3159_v19, %v2946_v30 }
 0x306   :  { %v3222_v61 = vrot.slane %v9259_v57, 7  ;;  %v3238_v5 = vrot.slane %v9259_v57, 1  ;;  %v9265_v8 = vmax.f32 %v3158_v28, 0.0  ;;  %3178 = vrot.lane.b32.xlu0 %v9221_v36, %s6723_s18 }
 0x307   :  { %v3223_v43 = vrot.slane %v9261_v35, 7  ;;  %v9270_v14 = vmax.f32 %v3160_v50, 0.0  ;;  %3180 = vrot.lane.b32.xlu1 %v9227_v3, %s6723_s18  ;;  %v3239_v46 = vrot.slane %v9261_v35, 1 }
 0x308   :  { %14616 = vst [vmem:[#allocation45_spill] sm:$0xff] %v9265_v8  ;;  %v9276_v53 = vsel %vm14610_vm0, %v3236_v55, %v3238_v5  ;;  %v3224_v30 = vrot.slane %v9265_v8, 7  ;;  %v9283_v49 = vsel %vm14613_vm7, %v3220_v11, %v3222_v61  ;;  %vm14622_vm0 = vmmov %vm14613_vm7  ;;  %v3240_v11 = vrot.slane %v9265_v8, 1 }
 0x309   :  { %14617 = vst [vmem:[#allocation50_spill] sm:$0xff] %v9270_v14  ;;  %14618 = vst [vmem:[#allocation72_spill] sm:$0xff] %v9276_v53  ;;  %v3225_v1 = vrot.slane %v9270_v14, 7  ;;  %v3241_v28 = vrot.slane %v9270_v14, 1  ;;  %v9298_v19 = vsel %vm14622_vm0, %v3221_v32, %v3223_v43 }
 0x30a   :  { %v9287_v50 = vsel %vm14619_vm8, %v3224_v30, %v3218_v63  ;;  %3172 = vrot.lane.b32.xlu0 %v9223_v10, %s6723_s18  ;;  %v9294_v55 = vsel %vm14620_vm9, %v3222_v61, %v3224_v30  ;;  %14623 = vst [vmem:[#allocation74_spill] sm:$0xff] %v9298_v19  ;;  %vm14624_vm7 = vmmov %vm14622_vm0  ;;  %vm14627_vm9 = vcmp.lt.s32.totalorder %v14387_v15, 7 }
 0x30b   :  { %14621 = vst [vmem:[#allocation40_spill] sm:$0xff] %v9294_v55  ;;  %v9303_v7 = vsel %vm14624_vm7, %v3225_v1, %v3219_v27  ;;  %3176 = vrot.lane.b32.xlu1 %v9265_v8, %s6723_s18  ;;  %vm14625_vm8 = vmmov %vm14622_vm0  ;;  %v9315_v32 = vsel %vm14627_vm9, %v3237_v56, %v3239_v46  ;;  %v6091_v56 = vld [vmem:[%s13991_s5 + $0x3e] sm:$0x3] }
 0x30c   :  { %v9309_v63 = vsel %vm14625_vm8, %v3223_v43, %v3225_v1  ;;  %14628 = vst [vmem:[#allocation55_spill] sm:$0xff] %v9315_v32  ;;  %vm14629_vm0 = vmmov %vm14627_vm9  ;;  %v9377_v32 = vrot.slane %v6091_v56, %v14603_v2  ;;  %v9380_v55 = vrot.slane %v6091_v56, %v14604_v59 }
 0x30d   :  { %14626 = vst [vmem:[#allocation53_spill] sm:$0xff] %v9309_v63  ;;  %v9319_v61 = vsel %vm14629_vm0, %v3239_v46, %v3241_v28  ;;  %vm14631_vm7 = vmmov %vm14629_vm0  ;;  %v6093_v46 = vld [vmem:[%s13991_s5 + $0x38] sm:$0x3] }
 0x30e   :  { %3204 = vrot.lane.b32.xlu0 %v9227_v3, %s6724_s19  ;;  %14630 = vst [vmem:[#allocation82_spill] sm:$0xff] %v9319_v61  ;;  %v9323_v27 = vsel %vm14631_vm7, %v3241_v28, %v3235_v29  ;;  %vm14633_vm8 = vmmov %vm14629_vm0  ;;  %v5950_v29 = vld [vmem:[%s13991_s5 + $0x20] sm:$0x3]  ;;  %v5948_v28 = vld [vmem:[%s13991_s5 + $0x1c] sm:$0x3]  ;;  %v9387_v19 = vrot.slane %v6093_v46, %v14603_v2 }
 0x30f   :  { %14632 = vst [vmem:[#allocation54_spill] sm:$0xff] %v9323_v27  ;;  %3184 = vrot.lane.b32.xlu1 %v9270_v14, %s6723_s18  ;;  %v9329_v43 = vsel %vm14633_vm8, %v3238_v5, %v3240_v11  ;;  %vm14635_vm1 = vmmov %vm14629_vm0  ;;  %v5943_v5 = vld [vmem:[%s13991_s5 + $0x1a] sm:$0x3]  ;;  %v5947_v61 = vld [vmem:[%s13991_s5 + $0x18] sm:$0x3]  ;;  %v1827_v27 = vrot.slane %v5950_v29, %v14603_v2  ;;  %v1831_v53 = vrot.slane %v5950_v29, %v14604_v59 }
 0x310   :  { %14634 = vst [vmem:[#allocation44_spill] sm:$0xff] %v9329_v43  ;;  %v9333_v30 = vsel %vm14635_vm1, %v3240_v11, %v3234_v20  ;;  %v5945_v20 = vld [vmem:[%s13991_s5 + $0x14] sm:$0x3]  ;;  %v1576_v1 = vrot.slane %v5943_v5, %v14603_v2  ;;  %v6098_v11 = vld [vmem:[%s13991_s5 + $0x44] sm:$0x3]  ;;  %v1580_v43 = vrot.slane %v5943_v5, %v14604_v59  ;;  %v9390_v63 = vrot.slane %v5948_v28, %v14603_v2 }
 0x311   :  { %14636 = vst [vmem:[#allocation52_spill] sm:$0xff] %v9333_v30  ;;  %v1642_v30 = vrot.slane %v5945_v20, %v14603_v2  ;;  %v1646_v15 = vrot.slane %v5945_v20, %v14604_v59  ;;  %v5944_v5 = vld [vmem:[%s13991_s5 + $0x12] sm:$0x3]  ;;  %v5949_v20 = vld [vmem:[%s13991_s5 + $0x1e] sm:$0x3]  ;;  %v9399_v56 = vrot.slane %v6098_v11, %v14603_v2  ;;  %v9402_v33 = vrot.slane %v6098_v11, %v14604_v59 }
 0x312   :  { %3200 = vrot.lane.b32.xlu0 %v9265_v8, %s6724_s19  ;;  %14637 = vst [vmem:[#allocation75_spill] sm:$0xff] %v9390_v63  ;;  %v9405_v29 = vmul.f32 %v1576_v1, %v9035_v13  ;;  %v9408_v8 = vrot.slane %v5948_v28, %v14604_v59  ;;  %v9411_v63 = vrot.slane %v5947_v61, %v14603_v2  ;;  %v5946_v28 = vld [vmem:[%s13991_s5 + $0x16] sm:$0x3] }
 0x313   :  { %3208 = vrot.lane.b32.xlu1 %v9270_v14, %s6724_s19  ;;  %v9396_v14 = vrot.slane %v6093_v46, %v14604_v59  ;;  %14638 = vst [vmem:[#allocation76_spill] sm:$0xff] %v9399_v56  ;;  %v9414_v38 = vrot.slane %v5947_v61, %v14604_v59  ;;  %v9417_v46 = vmul.f32 %v1580_v43, %v9043_v24 }
 0x314   :  { %14639 = vst [vmem:[#allocation57_spill] sm:$0xff] %v9405_v29  ;;  %14640 = vst [vmem:[#allocation56_spill] sm:$0xff] %v9411_v63  ;;  %v9420_v56 = vmul.f32 %v1576_v1, %v9045_v42  ;;  %v9423_v11 = vmul.f32 %v1580_v43, %v9049_v45  ;;  %v9426_v13 = vrot.slane %v5944_v5, %v14603_v2 }
 0x315   :  { %14641 = vst [vmem:[#allocation58_spill] sm:$0xff] %v9414_v38  ;;  %14642 = vst [vmem:[#allocation60_spill] sm:$0xff] %v9417_v46  ;;  %v9432_v29 = vrot.slane %v5944_v5, %v14604_v59  ;;  %v9435_v61 = vrot.slane %v5949_v20, %v14603_v2  ;;  %v9438_v24 = vrot.slane %v5949_v20, %v14604_v59  ;;  %v5951_v5 = vld [vmem:[%s13991_s5 + $0x22] sm:$0x3] }
 0x316   :  { %3174 = vrot.lane.b32.xlu0 %v9259_v57, %s6723_s18  ;;  %v9441_v42 = vmul.f32 %v1642_v30, %v9069_v25  ;;  %v9444_v45 = vmul.f32 %v1576_v1, %v9093_v4  ;;  %v9447_v38 = vmul.f32 %v1646_v15, %v9075_v18  ;;  %v9453_v63 = vmul.f32 %v1831_v53, %v9079_v6 }
 0x317   :  { %3182 = vrot.lane.b32.xlu1 %v9261_v35, %s6723_s18  ;;  %14643 = vst [vmem:[#allocation61_spill] sm:$0xff] %v9438_v24  ;;  %v9456_v20 = vmul.f32 %v1827_v27, %v9063_v47  ;;  %v9459_v25 = vmul.f32 %v1580_v43, %v9095_v48  ;;  %v9462_v4 = vmul.f32 %v1576_v1, %v9098_v16  ;;  %v1628_v24 = vsel %vm7465_vm2, %v9123_v52, 0.0 }
 0x318   :  { %14644 = vst [vmem:[#allocation59_spill] sm:$0xff] %v9444_v45  ;;  %14645 = vst [vmem:[#allocation78_spill] sm:$0xff] %v9453_v63  ;;  %v9467_v18 = vrot.slane %v5946_v28, %v14603_v2  ;;  %v9473_v6 = vrot.slane %v5946_v28, %v14604_v59  ;;  %v1629_v47 = vsel %vm7465_vm2, %v9131_v37, 0.0  ;;  %v1632_v48 = vsel %vm7485_vm4, %v9140_v60, 0.0 }
 0x319   :  { %14646 = vst [vmem:[#allocation77_spill] sm:$0xff] %v9456_v20  ;;  %14647 = vst [vmem:[#allocation79_spill] sm:$0xff] %v9459_v25  ;;  %v1633_v16 = vsel %vm7485_vm4, %v9149_v58, 0.0  ;;  %v9485_v1 = vrot.slane %v5951_v5, %v14603_v2  ;;  %v1815_v52 = vsel %vm7489_vm5, %v9111_v39, 0.0  ;;  %v1816_v28 = vsel %vm7489_vm5, %v9153_v22, 0.0 }
 0x31a   :  { %3198 = vrot.lane.b32.xlu0 %v9259_v57, %s6724_s19  ;;  %14648 = vst [vmem:[#allocation80_spill] sm:$0xff] %v9462_v4  ;;  %v1820_v37 = vsel %vm7481_vm3, %v9161_v31, 0.0  ;;  %v9498_v20 = vmul.f32 %v1642_v30, %v1628_v24  ;;  %v9501_v58 = vmul.f32 %v1580_v43, %v9104_v54  ;;  %v9504_v63 = vmul.f32 %v1646_v15, %v9136_v62 }
 0x31b   :  { %3206 = vrot.lane.b32.xlu1 %v9261_v35, %s6724_s19  ;;  %v1819_v39 = vsel %vm7481_vm3, %v9173_v9, 0.0  ;;  %v9509_v4 = vmul.f32 %v1646_v15, %v1629_v47  ;;  %v9511_v22 = vmul.f32 %v1642_v30, %v1632_v48  ;;  %v9513_v25 = vmul.f32 %v1646_v15, %v1633_v16  ;;  %v14665_v48 = vld [vmem:[#allocation76_spill] sm:$0xff] }
 0x31c   :  { %14649 = vst [vmem:[#allocation85_spill] sm:$0xff] %v9504_v63  ;;  %v9516_v31 = vmul.f32 %v1642_v30, %v9127_v41  ;;  %v9520_v54 = vmul.f32 %v1827_v27, %v1815_v52  ;;  %v9522_v43 = vmul.f32 %v1831_v53, %v1816_v28  ;;  %v9525_v62 = vmul.f32 %v1831_v53, %v9157_v12  ;;  %v14669_v52 = vld [vmem:[#allocation35_spill] sm:$0xff]  ;;  %v14672_v28 = vld [vmem:[#allocation50_spill] sm:$0xff] }
 0x31d   :  { %v9527_v63 = vmul.f32 %v1831_v53, %v1820_v37  ;;  %v9531_v9 = vmul.f32 %v9377_v32, %v9219_v26  ;;  %v9534_v15 = vrot.slane %v5951_v5, %v14604_v59  ;;  %v9537_v41 = vmul.f32 %v1827_v27, %v9169_v40 }
 0x31e   :  { %14650 = vst [vmem:[#allocation84_spill] sm:$0xff] %v9522_v43  ;;  %14651 = vst [vmem:[#allocation62_spill] sm:$0xff] %v9525_v62  ;;  %v9539_v30 = vmul.f32 %v1827_v27, %v1819_v39  ;;  %v9543_v47 = vmul.f32 %v9380_v55, %v9221_v36  ;;  %v9547_v12 = vmul.f32 %v9377_v32, %v9223_v10  ;;  %v3372_v36 = vsel %vm7465_vm2, %v9287_v50, 0.0  ;;  %v14664_v27 = vld [vmem:[#allocation41_spill] sm:$0xff]  ;;  %v14756_v62 = vld [vmem:[#allocation60_spill] sm:$0xff] }
 0x31f   :  { %14652 = vst [vmem:[#allocation86_spill] sm:$0xff] %v9527_v63  ;;  %14653 = vst [vmem:[#allocation65_spill] sm:$0xff] %v9531_v9  ;;  %v9551_v26 = vmul.f32 %v9380_v55, %v9227_v3  ;;  %v9555_v5 = vmul.f32 %v9387_v19, %v9247_v17  ;;  %v9559_v40 = vmul.f32 %v9396_v14, %v9253_v23  ;;  %v3376_v10 = vsel %vm7485_vm4, %v9283_v49, 0.0  ;;  %v14667_v49 = vld [vmem:[#allocation45_spill] sm:$0xff] }
 0x320   :  { %14654 = vst [vmem:[#allocation26_spill] sm:$0xff] %v9537_v41  ;;  %14655 = vst [vmem:[#allocation63_spill] sm:$0xff] %v9539_v30  ;;  %v9569_v3 = vmul.f32 %v9402_v33, %v9257_v51  ;;  %v9573_v17 = vmul.f32 %v9377_v32, %v9259_v57  ;;  %v9577_v23 = vmul.f32 %v9380_v55, %v9261_v35  ;;  %v3373_v50 = vsel %vm7465_vm2, %v9303_v7, 0.0  ;;  %v14742_v30 = vld [vmem:[#allocation61_spill] sm:$0xff] }
 0x321   :  { %14656 = vst [vmem:[#allocation37_spill] sm:$0xff] %v9543_v47  ;;  %14657 = vst [vmem:[#allocation64_spill] sm:$0xff] %v9547_v12  ;;  %v9584_v16 = vmul.f32 %v14665_v48, %v14664_v27  ;;  %v9588_v51 = vmul.f32 %v9377_v32, %v14667_v49  ;;  %vm14670_vm1 = vcmp.lt.s32.totalorder %v14669_v52, 16  ;;  %v9600_v37 = vmul.f32 %v9380_v55, %v14672_v28  ;;  %v14677_v49 = vld [vmem:[#allocation74_spill] sm:$0xff] }
 0x322   :  { %14658 = vst [vmem:[#allocation19_spill] sm:$0xff] %v9551_v26  ;;  %14659 = vst [vmem:[#allocation28_spill] sm:$0xff] %v9555_v5  ;;  %v9603_v27 = vmul.f32 %v9387_v19, %v3372_v36  ;;  %v9624_v36 = vmul.f32 %v9396_v14, %v3373_v50  ;;  %v14684_v50 = vld [vmem:[#allocation40_spill] sm:$0xff]  ;;  %v14723_v5 = vld [vmem:[#allocation75_spill] sm:$0xff] }
 0x323   :  { %14660 = vst [vmem:[#allocation20_spill] sm:$0xff] %v9559_v40  ;;  %14661 = vst [vmem:[#allocation31_spill] sm:$0xff] %v9569_v3  ;;  %v3377_v3 = vsel %vm7485_vm4, %v14677_v49, 0.0 }
 0x324   :  { %14662 = vst [vmem:[#allocation23_spill] sm:$0xff] %v9573_v17  ;;  %14663 = vst [vmem:[#allocation24_spill] sm:$0xff] %v9577_v23 }
 0x325   :  { %14666 = vst [vmem:[#allocation25_spill] sm:$0xff] %v9584_v16  ;;  %14668 = vst [vmem:[#allocation73_spill] sm:$0xff] %v9588_v51  ;;  %v14675_v16 = vld [vmem:[#allocation53_spill] sm:$0xff]  ;;  %v9641_v51 = vmul.f32 %v9387_v19, %v14684_v50 }
 0x326   :  { %vm14671_vm9 = vmmov %vm14670_vm1  ;;  %14673 = vst [vmem:[#allocation66_spill] sm:$0xff] %v9600_v37  ;;  %v9607_v32 = vmul.f32 %v9396_v14, %v14675_v16  ;;  %v14682_v16 = vld [vmem:[#allocation72_spill] sm:$0xff]  ;;  %v14690_v37 = vld [vmem:[#allocation2_spill] sm:$0xff] }
 0x327   :  { %v1427_v46 = vpop.permute.xlu0 %1426  ;;  %14674 = vst [vmem:[#allocation47_spill] sm:$0xff] %v9603_v27  ;;  %vm14679_vm0 = vmmov %vm14670_vm1  ;;  %v3559_v28 = vsel %vm7489_vm5, %v14682_v16, 0.0  ;;  %v14686_v16 = vld [vmem:[#allocation55_spill] sm:$0xff]  ;;  %vm14691_vm8 = vcmp.lt.s32.totalorder %v14690_v37, 1 }
 0x328   :  { %v9464_v45 = vpop.permute.xlu1 %1458  ;;  %14676 = vst [vmem:[#allocation81_spill] sm:$0xff] %v9607_v32  ;;  %vm14680_vm7 = vmmov %vm14679_vm0  ;;  %v3560_v49 = vsel %vm7489_vm5, %v14686_v16, 0.0  ;;  %v6095_v16 = vld [vmem:[%s13991_s5 + $0x3c] sm:$0x3] }
 0x329   :  { %14681 = vst [vmem:[#allocation69_spill] sm:$0xff] %v9624_v36  ;;  %14685 = vst [vmem:[#allocation29_spill] sm:$0xff] %v9641_v51  ;;  %v14696_v51 = vld [vmem:[#allocation52_spill] sm:$0xff] }
 0x32b   :  { %v9496_v60 = vpop.permute.xlu0 %1450 }
 0x32c   :  { %v9518_v24 = vpop.permute.xlu1 %1452 }
 0x32f   :  { %v1435_v53 = vpop.permute.xlu0 %1434 }
 0x330   :  { %v9592_v57 = vsel %vm14670_vm1, %v1427_v46, %v1435_v53  ;;  %v9596_v35 = vsel %vm14671_vm9, %v1435_v53, %v1427_v46  ;;  %v1437_v7 = vpop.permute.xlu1 %1436  ;;  %v9613_v46 = vmul.f32 %v9387_v19, %v3376_v10  ;;  %v14687_v10 = vld [vmem:[#allocation54_spill] sm:$0xff]  ;;  %vm14694_vm1 = vmmov %vm14691_vm8  ;;  %vm14697_vm9 = vcmp.ge.s32.totalorder %v14669_v52, 16 }
 0x331   :  { %v14689_v23 = vrot.slane %v9596_v35, 7  ;;  %v14693_v19 = vrot.slane %v9592_v57, 7 }
 0x332   :  { %14678 = vst [vmem:[#allocation71_spill] sm:$0xff] %v9613_v46  ;;  %v3564_v46 = vsel %vm7481_vm3, %v14687_v10, 0.0  ;;  %v9665_v10 = vmul.f32 %v14665_v48, %v3559_v28 }
 0x333   :  { %v1429_v39 = vpop.permute.xlu0 %1428 }
 0x334   :  { %v9617_v55 = vsel %vm14679_vm0, %v1429_v39, %v1437_v7  ;;  %v9621_v53 = vsel %vm14680_vm7, %v1437_v7, %v1429_v39  ;;  %v6096_v7 = vld [vmem:[%s13991_s5 + $0x40] sm:$0x3]  ;;  %v9637_v39 = vmul.f32 %v9396_v14, %v3377_v3  ;;  %14695 = vst [vmem:[#allocation27_spill] sm:$0xff] %v9665_v10  ;;  %vm14708_vm0 = vcmp.lt.s32.totalorder %v14669_v52, 112 }
 0x335   :  { %v14688_v32 = vrot.slane %v9621_v53, 7  ;;  %v14692_v3 = vrot.slane %v9617_v55, 7  ;;  %v9674_v17 = vrot.slane %v6096_v7, %v14603_v2  ;;  %v9682_v28 = vrot.slane %v6096_v7, %v14604_v59  ;;  %v6097_v7 = vld [vmem:[%s13991_s5 + $0x42] sm:$0x3]  ;;  %vm14710_vm7 = vmmov %vm14708_vm0 }
 0x336   :  { %14683 = vst [vmem:[#allocation43_spill] sm:$0xff] %v9637_v39  ;;  %v3563_v39 = vsel %vm7481_vm3, %v14696_v51, 0.0  ;;  %v6092_v51 = vld [vmem:[%s13991_s5 + $0x36] sm:$0x3]  ;;  %v14726_v47 = vrot.slane %v9617_v55, 1 }
 0x337   :  { %v1518_v14 = vsel %vm14691_vm8, %v14689_v23, %v14688_v32  ;;  %v1519_v50 = vsel %vm14694_vm1, %v14693_v19, %v14692_v3  ;;  %14698 = vst [vmem:[#allocation30_spill] sm:$0xff] %v9674_v17  ;;  %v14699_v3 = vld [vmem:[#allocation82_spill] sm:$0xff]  ;;  %14701 = vst [vmem:[#allocation32_spill] sm:$0xff] %v9682_v28  ;;  %v9705_v27 = vmul.f32 %v14665_v48, %v3563_v39  ;;  %v14736_v28 = vrot.slane %v9592_v57, 7 }
 0x338   :  { %v1593_v23 = vsel %vm14697_vm9, %v1518_v14, 0.0  ;;  %v1615_v32 = vmul.f32 %v9432_v29, %v1519_v50  ;;  %v9678_v19 = vmul.f32 %v9402_v33, %v14699_v3  ;;  %v9688_v14 = vmul.f32 %v9402_v33, %v3560_v49  ;;  %vm14717_vm1 = vmmov %vm14697_vm9 }
 0x339   :  { %v1614_v36 = vmul.f32 %v9426_v13, %v1593_v23  ;;  %v9691_v50 = vmul.f32 %v9402_v33, %v3564_v46  ;;  %v9695_v3 = vrot.slane %v6095_v16, %v14603_v2  ;;  %v14705_v23 = vld [vmem:[#allocation44_spill] sm:$0xff]  ;;  %14707 = vst [vmem:[#allocation76_spill] sm:$0xff] %v9705_v27  ;;  %v9711_v33 = vsel %vm14708_vm0, %v9464_v45, %v9496_v60  ;;  %vm14721_vm0 = vmmov %vm14717_vm1 }
 0x33a   :  { %14700 = vst [vmem:[#allocation70_spill] sm:$0xff] %v9678_v19  ;;  %14702 = vst [vmem:[#allocation67_spill] sm:$0xff] %v9688_v14  ;;  %v1623_v10 = vadd.f32 %v1615_v32, %v9423_v11  ;;  %v9702_v19 = vmul.f32 %v14665_v48, %v14705_v23  ;;  %v9716_v49 = vrot.slane %v6095_v16, %v14604_v59  ;;  %v6094_v32 = vld [vmem:[%s13991_s5 + $0x3a] sm:$0x3]  ;;  %vm14720_vm9 = vcmp.lt.s32.totalorder %v14690_v37, 7 }
 0x33b   :  { %14703 = vst [vmem:[#allocation33_spill] sm:$0xff] %v9691_v50  ;;  %14704 = vst [vmem:[#allocation39_spill] sm:$0xff] %v9695_v3  ;;  %v1622_v46 = vadd.f32 %v1614_v36, %v9420_v56  ;;  %v9725_v48 = vsel %vm14710_vm7, %v9496_v60, %v9464_v45  ;;  %v9731_v23 = vrot.slane %v6092_v51, %v14603_v2  ;;  %v1522_v36 = vrot.slane %v9596_v35, 1 }
 0x33c   :  { %14706 = vst [vmem:[#allocation41_spill] sm:$0xff] %v9702_v19  ;;  %14709 = vst [vmem:[#allocation45_spill] sm:$0xff] %v9716_v49  ;;  %v9728_v39 = vadd.f32 %v9447_v38, %v1623_v10  ;;  %v9734_v56 = vrot.slane %v6092_v51, %v14604_v59  ;;  %v9741_v11 = vrot.slane %v6097_v7, %v14603_v2  ;;  %v14715_v38 = vld [vmem:[#allocation42_spill] sm:$0xff]  ;;  %v1702_v10 = vsel %vm14717_vm1, %v9596_v35, 0.0 }
 0x33d   :  { %14711 = vst [vmem:[#allocation35_spill] sm:$0xff] %v9731_v23  ;;  %v9738_v16 = vadd.f32 %v9441_v42, %v1622_v46  ;;  %v9744_v45 = vrot.slane %v6097_v7, %v14604_v59  ;;  %vm14716_vm8 = vcmp.lt.s32.totalorder %v14715_v38, 240  ;;  %v9756_v42 = vrot.slane %v6094_v32, %v14603_v2  ;;  %vm14727_vm7 = vmmov %vm14720_vm9 }
 0x33e   :  { %14712 = vst [vmem:[#allocation50_spill] sm:$0xff] %v9734_v56  ;;  %14713 = vst [vmem:[#allocation53_spill] sm:$0xff] %v9741_v11  ;;  %v1740_v60 = vsel %vm14716_vm8, %v9711_v33, 0.0  ;;  %v14719_v7 = vrot.slane %v9621_v53, 1  ;;  %v1704_v14 = vsel %vm14721_vm0, %v9621_v53, 0.0  ;;  %v9767_v9 = vrot.slane %v6094_v32, %v14604_v59  ;;  %v14725_v32 = vld [vmem:[#allocation58_spill] sm:$0xff] }
 0x33f   :  { %14714 = vst [vmem:[#allocation74_spill] sm:$0xff] %v9744_v45  ;;  %14718 = vst [vmem:[#allocation72_spill] sm:$0xff] %v9756_v42  ;;  %v1523_v46 = vrot.slane %v9592_v57, 1  ;;  %v9775_v40 = vmul.f32 %v14723_v5, %v9725_v48  ;;  %v14724_v45 = vld [vmem:[#allocation56_spill] sm:$0xff]  ;;  %v1726_v26 = vmul.f32 %v14725_v32, %v9617_v55  ;;  %vm14729_vm1 = vcmp.lt.s32.totalorder %v14669_v52, 16 }
 0x340   :  { %v1534_v19 = vsel %vm14720_vm9, %v1522_v36, %v14719_v7  ;;  %14722 = vst [vmem:[#allocation40_spill] sm:$0xff] %v9767_v9  ;;  %v9778_v7 = vmul.f32 %v9408_v8, %v1740_v60  ;;  %v9781_v12 = vmul.f32 %v14724_v45, %v1702_v10  ;;  %v9785_v9 = vmul.f32 %v14725_v32, %v9592_v57  ;;  %vm14728_vm8 = vmmov %vm14721_vm0 }
 0x341   :  { %v1535_v42 = vsel %vm14727_vm7, %v1523_v46, %v14726_v47  ;;  %v1725_v51 = vmul.f32 %v14724_v45, %v1704_v14  ;;  %v1776_v60 = vsel %vm14728_vm8, %v1534_v19, 0.0  ;;  %vm14730_vm9 = vmmov %vm14729_vm1  ;;  %vm14731_vm0 = vcmp.lt.s32.totalorder %v14669_v52, 112 }
 0x342   :  { %vm14732_vm7 = vmmov %vm14731_vm0 }
 0x343   :  { %v1433_v27 = vpop.permute.xlu1 %1432  ;;  %v9753_v50 = vpop.permute.xlu0 %1456 }
 0x347   :  { %v1441_v11 = vpop.permute.xlu1 %1440  ;;  %v1461_v10 = vpop.permute.xlu0 %1460 }
 0x348   :  { %v9798_v23 = vsel %vm14729_vm1, %v1433_v27, %v1441_v11  ;;  %v9802_v56 = vsel %vm14730_vm9, %v1441_v11, %v1433_v27  ;;  %v9807_v47 = vsel %vm14731_vm0, %v9518_v24, %v1461_v10  ;;  %v9812_v14 = vsel %vm14732_vm7, %v1461_v10, %v9518_v24 }
 0x349   :  { %v14132_v19 = vrot.slane %v9802_v56, 7  ;;  %v14133_v49 = vrot.slane %v9798_v23, 7  ;;  %v9819_v27 = vmul.f32 %v9435_v61, %v1776_v60  ;;  %v1708_v11 = vsel %vm14728_vm8, %v9802_v56, 0.0 }
 0x34a   :  { %v14734_v10 = vrot.slane %v9596_v35, 7  ;;  %vm14735_vm1 = vcmp.lt.s32.totalorder %v14690_v37, 1  ;;  %v14738_v59 = vrot.slane %v9802_v56, 1  ;;  %vm14739_vm0 = vcmp.lt.s32.totalorder %v14690_v37, 7 }
 0x34b   :  { %14733 = vst [vmem:[#allocation55_spill] sm:$0xff] %v9819_v27  ;;  %vm14737_vm9 = vmmov %vm14735_vm1  ;;  %v14740_v24 = vrot.slane %v9798_v23, 1  ;;  %v1465_v2 = vpop.permute.xlu1 %1464  ;;  %v14137_v57 = vrot.slane %v9807_v47, 1  ;;  %v14136_v34 = vrot.slane %v9812_v14, 1  ;;  %v14788_v0 = vrot.slane %v9802_v56, 1 }
 0x34c   :  { %v1520_v3 = vsel %vm14735_vm1, %v14132_v19, %v14734_v10  ;;  %v1521_v60 = vsel %vm14737_vm9, %v14133_v49, %v14736_v28  ;;  %v1536_v17 = vsel %vm14739_vm0, %v14738_v59, %v1522_v36  ;;  %vm14741_vm7 = vmmov %vm14739_vm0  ;;  %v9847_v10 = vmul.f32 %v14742_v30, %v1535_v42 }
 0x34d   :  { %v1537_v35 = vsel %vm14741_vm7, %v14740_v24, %v1523_v46  ;;  %v1591_v19 = vsel %vm7990_vm10, %v1520_v3, 0.0  ;;  %v1592_v28 = vsel %vm7465_vm2, %v1521_v60, 0.0  ;;  %v1782_v63 = vsel %vm8015_vm11, %v1536_v17, 0.0  ;;  %vm14749_vm8 = vmmov %vm14735_vm1 }
 0x34e   :  { %14743 = vst [vmem:[#allocation54_spill] sm:$0xff] %v9847_v10  ;;  %v1612_v59 = vmul.f32 %v9426_v13, %v1591_v19  ;;  %v1613_v36 = vmul.f32 %v9432_v29, %v1592_v28  ;;  %v9859_v46 = vmul.f32 %v14725_v32, %v9798_v23  ;;  %v1783_v42 = vsel %vm7481_vm3, %v1537_v35, 0.0  ;;  %vm14759_vm7 = vmmov %vm14739_vm0 }
 0x34f   :  { %v9864_v24 = vmul.f32 %v14724_v45, %v1708_v11  ;;  %v14747_v3 = vrot.slane %v9807_v47, 7  ;;  %v14748_v60 = vrot.slane %v9725_v48, 7  ;;  %v14750_v19 = vrot.slane %v9812_v14, 7 }
 0x350   :  { %14746 = vst [vmem:[#allocation2_spill] sm:$0xff] %v9859_v46  ;;  %v14751_v28 = vrot.slane %v9711_v33, 7  ;;  %v9880_v35 = vmul.f32 %v9435_v61, %v1782_v63  ;;  %v9883_v11 = vmul.f32 %v14742_v30, %v1783_v42  ;;  %vm14754_vm9 = vcmp.lt.s32.totalorder %v14715_v38, 240 }
 0x351   :  { %v1550_v17 = vsel %vm14749_vm8, %v14748_v60, %v14747_v3  ;;  %v14755_v60 = vld [vmem:[#allocation57_spill] sm:$0xff]  ;;  %v1621_v46 = vadd.f32 %v1613_v36, %v14756_v62  ;;  %v14757_v63 = vrot.slane %v9725_v48, 1  ;;  %vm14760_vm8 = vmmov %vm14754_vm9  ;;  %v1431_v36 = vpop.permute.xlu0 %1430 }
 0x352   :  { %v1551_v49 = vsel %vm14735_vm1, %v14751_v28, %v14750_v19  ;;  %14752 = vst [vmem:[#allocation52_spill] sm:$0xff] %v9880_v35  ;;  %14753 = vst [vmem:[#allocation82_spill] sm:$0xff] %v9883_v11  ;;  %v1620_v41 = vadd.f32 %v1612_v59, %v14755_v60  ;;  %v1688_v27 = vmul.f32 %v9467_v18, %v1550_v17  ;;  %v14758_v28 = vrot.slane %v9711_v33, 1  ;;  %v1439_v17 = vpop.permute.xlu1 %1438 }
 0x353   :  { %v1668_v3 = vsel %vm14754_vm9, %v1551_v49, 0.0  ;;  %v1566_v42 = vsel %vm14739_vm0, %v14757_v63, %v14137_v57  ;;  %v1742_v62 = vsel %vm14760_vm8, %v9812_v14, 0.0  ;;  %v1762_v59 = vmul.f32 %v14723_v5, %v9807_v47 }
 0x354   :  { %v1689_v19 = vmul.f32 %v9473_v6, %v1668_v3  ;;  %v9904_v49 = vsel %vm14759_vm7, %v14758_v28, %v14136_v34  ;;  %v1696_v3 = vadd.f32 %v1688_v27, %v9738_v16  ;;  %vm14761_vm1 = vcmp.lt.s32.totalorder %v14669_v52, 112 }
 0x355   :  { %v9916_v63 = vsel %vm14761_vm1, %v9753_v50, %v1465_v2  ;;  %vm14762_vm9 = vmmov %vm14761_vm1  ;;  %v1658_v11 = vadd.f32 %v9509_v4, %v1621_v46  ;;  %v1763_v43 = vmul.f32 %v9408_v8, %v1742_v62  ;;  %v9931_v10 = vmul.f32 %v9485_v1, %v1566_v42 }
 0x356   :  { %v1697_v60 = vadd.f32 %v1689_v19, %v9728_v39  ;;  %v9921_v28 = vsel %vm14762_vm9, %v1465_v2, %v9753_v50  ;;  %v14140_v34 = vrot.slane %v9916_v63, 7  ;;  %v14138_v35 = vrot.slane %v9916_v63, 1 }
 0x357   :  { %v14139_v57 = vrot.slane %v9921_v28, 7  ;;  %v1733_v27 = vadd.f32 %v1725_v51, %v1696_v3  ;;  %v1657_v19 = vadd.f32 %v9498_v20, %v1620_v41  ;;  %v14763_v2 = vrot.slane %v9725_v48, 7 }
 0x358   :  { %v1734_v39 = vadd.f32 %v1726_v26, %v1697_v60  ;;  %vm14764_vm0 = vcmp.lt.s32.totalorder %v14690_v37, 1  ;;  %v14765_v16 = vrot.slane %v9711_v33, 7  ;;  %v14767_v4 = vrot.slane %v9725_v48, 1 }
 0x359   :  { %v1552_v50 = vsel %vm14764_vm0, %v14140_v34, %v14763_v2  ;;  %vm14766_vm7 = vmmov %vm14764_vm0  ;;  %vm14768_vm8 = vcmp.lt.s32.totalorder %v14690_v37, 7  ;;  %v14769_v26 = vrot.slane %v9711_v33, 1  ;;  %v14770_v51 = vrot.slane %v9921_v28, 1  ;;  %v1455_v2 = vpop.permute.xlu0 %1454 }
 0x35a   :  { %v1553_v20 = vsel %vm14766_vm7, %v14139_v57, %v14765_v16  ;;  %v9951_v41 = vsel %vm14768_vm8, %v14138_v35, %v14767_v4  ;;  %vm14771_vm1 = vmmov %vm14768_vm8  ;;  %v1665_v42 = vsel %vm7465_vm2, %v1552_v50, 0.0  ;;  %v1770_v3 = vadd.f32 %v1762_v59, %v1733_v27  ;;  %v1463_v4 = vpop.permute.xlu1 %1462 }
 0x35b   :  { %v9959_v46 = vsel %vm14771_vm1, %v14770_v51, %v14769_v26  ;;  %v1666_v48 = vsel %vm8074_vm12, %v1553_v20, 0.0  ;;  %v1686_v60 = vmul.f32 %v9467_v18, %v1665_v42  ;;  %vm14773_vm9 = vcmp.lt.s32.totalorder %v14715_v38, 240 }
 0x35c   :  { %v1687_v16 = vmul.f32 %v9473_v6, %v1666_v48  ;;  %v1746_v33 = vsel %vm14773_vm9, %v9921_v28, 0.0  ;;  %v9970_v35 = vadd.f32 %v1763_v43, %v1734_v39  ;;  %v9974_v26 = vmul.f32 %v14723_v5, %v9916_v63 }
 0x35d   :  { %vm14774_vm0 = vcmp.lt.s32.totalorder %v14669_v52, 16  ;;  %v1694_v27 = vadd.f32 %v1686_v60, %v1657_v19  ;;  %v9981_v20 = vmul.f32 %v9408_v8, %v1746_v33  ;;  %vm14776_vm8 = vcmp.lt.s32.totalorder %v14669_v52, 112 }
 0x35e   :  { %v1444_v50 = vsel %vm14774_vm0, %v1431_v36, %v1439_v17  ;;  %vm14775_vm7 = vmmov %vm14774_vm0  ;;  %v9983_v48 = vadd.f32 %v1687_v16, %v1658_v11  ;;  %v9987_v57 = vsel %vm14776_vm8, %v1455_v2, %v1463_v4  ;;  %v14777_v62 = vrot.slane %v9802_v56, 7 }
 0x35f   :  { %v1448_v59 = vsel %vm14775_vm7, %v1439_v17, %v1431_v36  ;;  %v1511_v42 = vrot.slane %v1444_v50, 7  ;;  %v1527_v39 = vrot.slane %v1444_v50, 1  ;;  %v1731_v34 = vadd.f32 %v9781_v12, %v1694_v27 }
 0x360   :  { %v1510_v51 = vrot.slane %v1448_v59, 7  ;;  %v1526_v43 = vrot.slane %v1448_v59, 1  ;;  %vm14778_vm1 = vcmp.lt.s32.totalorder %v14690_v37, 1  ;;  %v14779_v17 = vrot.slane %v9798_v23, 7 }
 0x361   :  { %vm14780_vm9 = vmmov %vm14778_vm1  ;;  %v14781_v11 = vrot.slane %v9621_v53, 7  ;;  %v14783_v16 = vrot.slane %v9617_v55, 7  ;;  %v14785_v33 = vrot.slane %v9621_v53, 1  ;;  %vm14786_vm8 = vcmp.lt.s32.totalorder %v14690_v37, 7 }
 0x362   :  { %v1514_v36 = vsel %vm14778_vm1, %v1510_v51, %v14777_v62  ;;  %v1515_v19 = vsel %vm14780_vm9, %v1511_v42, %v14779_v17  ;;  %vm14782_vm0 = vmmov %vm14778_vm1  ;;  %vm14787_vm1 = vcmp.ge.s32.totalorder %v14669_v52, 16  ;;  %v1728_v17 = vmul.f32 %v14725_v32, %v1444_v50 }
 0x363   :  { %v1516_v60 = vsel %vm14782_vm0, %v14781_v11, %v1510_v51  ;;  %vm14784_vm7 = vmmov %vm14782_vm0  ;;  %v1532_v62 = vsel %vm14786_vm8, %v14785_v33, %v1526_v43  ;;  %v1706_v27 = vsel %vm14787_vm1, %v1448_v59, 0.0  ;;  %v14790_v11 = vrot.slane %v9617_v55, 1 }
 0x364   :  { %v1517_v12 = vsel %vm14784_vm7, %v14783_v16, %v1511_v42  ;;  %vm14789_vm9 = vmmov %vm14786_vm8  ;;  %v1595_v53 = vsel %vm8126_vm13, %v1516_v60, 0.0  ;;  %v10031_v55 = vadd.f32 %v9775_v40, %v1731_v34  ;;  %v14794_v50 = vrot.slane %v9798_v23, 1  ;;  %v14799_v23 = vld [vmem:[#allocation80_spill] sm:$0xff] }
 0x365   :  { %v1530_v51 = vsel %vm14789_vm9, %v1526_v43, %v14788_v0  ;;  %vm14791_vm0 = vmmov %vm14786_vm8  ;;  %v1596_v33 = vsel %vm7485_vm4, %v1517_v12, 0.0  ;;  %v1616_v32 = vmul.f32 %v9426_v13, %v1595_v53  ;;  %v1619_v0 = vmul.f32 %v9432_v29, %v1515_v19  ;;  %v14796_v12 = vld [vmem:[#allocation88_spill] sm:$0xff] }
 0x366   :  { %v1533_v42 = vsel %vm14791_vm0, %v14790_v11, %v1527_v39  ;;  %vm14793_vm7 = vmmov %vm14787_vm1  ;;  %v1617_v56 = vmul.f32 %v9432_v29, %v1596_v33  ;;  %v1778_v11 = vsel %vm8159_vm14, %v1532_v62, 0.0  ;;  %v1727_v33 = vmul.f32 %v14724_v45, %v1706_v27  ;;  %v14798_v29 = vld [vmem:[#allocation79_spill] sm:$0xff] }
 0x367   :  { %v1597_v59 = vsel %vm14793_vm7, %v1514_v36, 0.0  ;;  %vm14795_vm8 = vmmov %vm14791_vm0  ;;  %v14797_v36 = vld [vmem:[#allocation59_spill] sm:$0xff]  ;;  %v1627_v53 = vadd.f32 %v1619_v0, %v9501_v58  ;;  %v1779_v34 = vsel %vm7489_vm5, %v1533_v42, 0.0  ;;  %vm14801_vm9 = vcmp.lt.s32.totalorder %v14669_v52, 112 }
 0x368   :  { %v1531_v43 = vsel %vm14795_vm8, %v1527_v39, %v14794_v50  ;;  %v1618_v60 = vmul.f32 %v9426_v13, %v1597_v59  ;;  %v1624_v16 = vadd.f32 %v1616_v32, %v14797_v36  ;;  %v1625_v40 = vadd.f32 %v1617_v56, %v14798_v29  ;;  %v14800_v59 = vld [vmem:[#allocation85_spill] sm:$0xff] }
 0x369   :  { %v1780_v39 = vsel %vm14787_vm1, %v1530_v51, 0.0  ;;  %v1799_v13 = vmul.f32 %v9435_v61, %v1778_v11  ;;  %v1664_v62 = vadd.f32 %v14800_v59, %v1627_v53  ;;  %v1472_v32 = vsel %vm14801_vm9, %v1463_v4, %v1455_v2 }
 0x36a   :  { %v1626_v19 = vadd.f32 %v1618_v60, %v14799_v23  ;;  %v1542_v58 = vrot.slane %v9987_v57, 7  ;;  %v1558_v45 = vrot.slane %v9987_v57, 1  ;;  %v1800_v27 = vmul.f32 %v14742_v30, %v1779_v34 }
 0x36b   :  { %v1543_v42 = vrot.slane %v1472_v32, 7  ;;  %v1559_v56 = vrot.slane %v1472_v32, 1  ;;  %v1661_v0 = vadd.f32 %v9511_v22, %v1624_v16  ;;  %v1802_v50 = vmul.f32 %v14742_v30, %v1531_v43 }
 0x36c   :  { %v1807_v51 = vadd.f32 %v1799_v13, %v1770_v3  ;;  %v14802_v60 = vrot.slane %v9916_v63, 7  ;;  %vm14803_vm0 = vcmp.lt.s32.totalorder %v14690_v37, 1  ;;  %v14804_v2 = vrot.slane %v9807_v47, 7 }
 0x36d   :  { %vm14805_vm7 = vmmov %vm14803_vm0  ;;  %v14806_v36 = vrot.slane %v9921_v28, 7  ;;  %v14808_v22 = vrot.slane %v9812_v14, 7  ;;  %v14810_v3 = vrot.slane %v9921_v28, 1  ;;  %vm14811_vm9 = vcmp.lt.s32.totalorder %v14690_v37, 7 }
 0x36e   :  { %v1546_v11 = vsel %vm14803_vm0, %v1542_v58, %v14802_v60  ;;  %v1548_v4 = vsel %vm14805_vm7, %v14804_v2, %v1542_v58  ;;  %vm14807_vm8 = vmmov %vm14803_vm0  ;;  %v14812_v43 = vrot.slane %v9807_v47, 1  ;;  %v1662_v29 = vadd.f32 %v9513_v25, %v1625_v40 }
 0x36f   :  { %v1547_v53 = vsel %vm14807_vm8, %v1543_v42, %v14806_v36  ;;  %vm14809_vm1 = vmmov %vm14803_vm0  ;;  %v1563_v16 = vsel %vm14811_vm9, %v1559_v56, %v14810_v3  ;;  %v1663_v23 = vadd.f32 %v9516_v31, %v1626_v19  ;;  %v1669_v13 = vsel %vm7485_vm4, %v1548_v4, 0.0 }
 0x370   :  { %v1549_v30 = vsel %vm14809_vm1, %v14808_v22, %v1543_v42  ;;  %vm14813_vm0 = vmmov %vm14811_vm9  ;;  %vm14815_vm7 = vcmp.lt.s32.totalorder %v14715_v38, 240  ;;  %v1690_v42 = vmul.f32 %v9467_v18, %v1669_v13  ;;  %v1692_v60 = vmul.f32 %v9467_v18, %v1546_v11 }
 0x371   :  { %v1564_v34 = vsel %vm14813_vm0, %v14812_v43, %v1558_v45  ;;  %v1670_v58 = vsel %vm8228_vm15, %v1549_v30, 0.0  ;;  %v1672_v28 = vsel %vm14815_vm7, %v1547_v53, 0.0  ;;  %v14816_v2 = vrot.slane %v9812_v14, 1  ;;  %vm14817_vm8 = vmmov %vm14813_vm0 }
 0x372   :  { %v1691_v47 = vmul.f32 %v9473_v6, %v1670_v58  ;;  %v1693_v31 = vmul.f32 %v9473_v6, %v1672_v28  ;;  %vm14818_vm1 = vmmov %vm14815_vm7  ;;  %v1764_v19 = vmul.f32 %v14723_v5, %v9987_v57  ;;  %v1698_v4 = vadd.f32 %v1690_v42, %v1661_v0  ;;  %v14826_v58 = vld [vmem:[#allocation78_spill] sm:$0xff] }
 0x373   :  { %v1565_v25 = vsel %vm14817_vm8, %v14816_v2, %v1559_v56  ;;  %v1744_v40 = vsel %vm14818_vm1, %v1472_v32, 0.0  ;;  %v1700_v53 = vadd.f32 %v1692_v60, %v1663_v23  ;;  %v1801_v22 = vmul.f32 %v9435_v61, %v1780_v39  ;;  %vm14819_vm9 = vmmov %vm14818_vm1  ;;  %v14828_v2 = vld [vmem:[#allocation51_spill] sm:$0xff] }
 0x374   :  { %v1699_v36 = vadd.f32 %v1691_v47, %v1662_v29  ;;  %v1765_v18 = vmul.f32 %v9408_v8, %v1744_v40  ;;  %v1844_v14 = vadd.f32 %v9520_v54, %v1807_v51  ;;  %v1852_v56 = vsel %vm7489_vm5, %v1564_v34, 0.0  ;;  %v14824_v29 = vld [vmem:[#allocation2_spill] sm:$0xff]  ;;  %vm14825_vm0 = vmmov %vm14818_vm1  ;;  %v14827_v47 = vld [vmem:[#allocation77_spill] sm:$0xff] }
 0x375   :  { %v1732_v6 = vadd.f32 %v9785_v9, %v9983_v48  ;;  %v1701_v11 = vadd.f32 %v1693_v31, %v1664_v62  ;;  %v1735_v32 = vadd.f32 %v1727_v33, %v1698_v4  ;;  %v1737_v5 = vadd.f32 %v9864_v24, %v1700_v53  ;;  %v14821_v33 = vld [vmem:[#allocation54_spill] sm:$0xff]  ;;  %v14822_v62 = vld [vmem:[#allocation84_spill] sm:$0xff] }
 0x376   :  { %v1736_v30 = vadd.f32 %v1728_v17, %v1699_v36  ;;  %v1808_v0 = vadd.f32 %v1800_v27, %v9970_v35  ;;  %v1851_v8 = vsel %vm14819_vm9, %v9904_v49, 0.0  ;;  %v1853_v54 = vsel %vm8361_vm6, %v1565_v25, 0.0  ;;  %v3171_v17 = vpop.permute.xlu0 %3170  ;;  %v14823_v27 = vld [vmem:[#allocation55_spill] sm:$0xff]  ;;  %v3203_v49 = vpop.permute.xlu1 %3202 }
 0x377   :  { %v1769_v57 = vadd.f32 %v9778_v7, %v1732_v6  ;;  %v1772_v39 = vadd.f32 %v1764_v19, %v1735_v32  ;;  %v1873_v9 = vmul.f32 %v9485_v1, %v1852_v56  ;;  %v1872_v48 = vmul.f32 %v9534_v15, %v1851_v8  ;;  %v14831_v19 = vld [vmem:[#allocation62_spill] sm:$0xff] }
 0x378   :  { %v1773_v51 = vadd.f32 %v1765_v18, %v1736_v30  ;;  %v1845_v7 = vadd.f32 %v14822_v62, %v1808_v0  ;;  %v1874_v35 = vmul.f32 %v9534_v15, %v1853_v54  ;;  %v1805_v3 = vadd.f32 %v14823_v27, %v10031_v55  ;;  %v14832_v18 = vld [vmem:[#allocation26_spill] sm:$0xff] }
 0x379   :  { %v1806_v24 = vadd.f32 %v14821_v33, %v1769_v57  ;;  %v1809_v43 = vadd.f32 %v1801_v22, %v1772_v39  ;;  %v1738_v23 = vadd.f32 %v14824_v29, %v1701_v11  ;;  %v1855_v13 = vsel %vm14825_vm0, %v1563_v16, 0.0  ;;  %v14836_v8 = vld [vmem:[#allocation86_spill] sm:$0xff] }
 0x37a   :  { %v1810_v34 = vadd.f32 %v1802_v50, %v1773_v51  ;;  %v1882_v42 = vadd.f32 %v1874_v35, %v1845_v7  ;;  %v1842_v60 = vadd.f32 %v14827_v47, %v1805_v3  ;;  %vm14829_vm7 = vnez %v14828_v2  ;;  %v3195_v16 = vpop.permute.xlu0 %3194  ;;  %v10141_v6 = vpop.permute.xlu1 %3196  ;;  %v14840_v35 = vld [vmem:[#allocation3_spill] sm:$0xff] }
 0x37b   :  { %v1843_v28 = vadd.f32 %v14826_v58, %v1806_v24  ;;  %v1857_v25 = vsel %vm14829_vm7, %v9959_v46, 0.0  ;;  %v14830_v31 = vrot.slane %v9916_v63, 1  ;;  %v1881_v50 = vadd.f32 %v1873_v9, %v1844_v14  ;;  %v14833_v46 = vld [vmem:[#allocation82_spill] sm:$0xff] }
 0x37c   :  { %v1775_v40 = vadd.f32 %v9981_v20, %v1738_v23  ;;  %v1847_v4 = vadd.f32 %v14831_v19, %v1810_v34  ;;  %v1879_v53 = vadd.f32 %v9931_v10, %v1842_v60  ;;  %v1774_v22 = vadd.f32 %v9974_v26, %v1737_v5  ;;  %v6099_v10 = vld [vmem:[%s13991_s5 + $0x46] sm:$0x3]  ;;  %v6579_v26 = vld [vmem:[%s13989_s4 + $0x300] ss:$8 sps:$4 sm:$0xff]   ;;  %v14835_v5 = vld [vmem:[#allocation52_spill] sm:$0xff] }
 0x37d   :  { %v1562_v55 = vsel %vm14817_vm8, %v1558_v45, %v14830_v31  ;;  %v1880_v36 = vadd.f32 %v1872_v48, %v1843_v28  ;;  %v1846_v56 = vadd.f32 %v14832_v18, %v1809_v43  ;;  %v1876_v11 = vmul.f32 %v9534_v15, %v1855_v13  ;;  %v14839_v48 = vld [vmem:[#allocation63_spill] sm:$0xff]  ;;  %v14841_v34 = vld [vmem:[#allocation4_spill] sm:$0xff]  ;;  %v14844_v31 = vld [vmem:[#allocation30_spill] sm:$0xff] }
 0x37e   :  { %v1812_v63 = vadd.f32 %v14833_v46, %v1775_v40  ;;  %v1878_v45 = vmul.f32 %v9534_v15, %v1857_v25  ;;  %v1856_v14 = vsel %vm7481_vm3, %v9951_v41, 0.0  ;;  %v1887_v30 = vpack.c.bf16 %v1881_v50, %v1879_v53  ;;  %v6584_v15 = vld [vmem:[%s13989_s4 + $0x314] ss:$8 sps:$4 sm:$0xff]   ;;  %v3179_v9 = vpop.permute.xlu0 %3178  ;;  %v3181_v7 = vpop.permute.xlu1 %3180  ;;  %v6587_v47 = vld [vmem:[%s13989_s4 + $0x324] ss:$8 sps:$4 sm:$0xff]  }
 0x37f   :  { %v1888_v32 = vpack.c.bf16 %v1882_v42, %v1880_v36  ;;  %v1811_v57 = vadd.f32 %v14835_v5, %v1774_v22  ;;  %v1875_v0 = vmul.f32 %v9485_v1, %v1562_v55  ;;  %v1884_v54 = vadd.f32 %v1876_v11, %v1847_v4  ;;  %v14845_v19 = vld [vmem:[#allocation32_spill] sm:$0xff]  ;;  %v6585_v46 = vld [vmem:[%s13989_s4 + $0x320] ss:$8 sps:$4 sm:$0xff]   ;;  %v14850_v5 = vld [vmem:[#allocation45_spill] sm:$0xff] }
 0x380   :  { %v1849_v41 = vadd.f32 %v14836_v8, %v1812_v63  ;;  %vm14837_vm1 = vcmp.lt.s32.totalorder %v14669_v52, 112  ;;  %v1877_v24 = vmul.f32 %v9485_v1, %v1856_v14  ;;  %v10172_v27 = vrot.slane %v6099_v10, %v14840_v35  ;;  %v6582_v1 = vld [vmem:[%s13989_s4 + $0x310] ss:$8 sps:$4 sm:$0xff]  }
 0x381   :  { %v10163_v39 = vsel %vm14837_vm1, %v3195_v16, %v3203_v49  ;;  %vm14838_vm9 = vmmov %vm14837_vm1  ;;  %2129 = vmatprep.mubr.bf16.mxu1 %v1888_v32  ;;  %v1848_v33 = vadd.f32 %v14839_v48, %v1811_v57  ;;  %v1883_v62 = vadd.f32 %v1875_v0, %v1846_v56  ;;  %v10179_v29 = vrot.slane %v6099_v10, %v14841_v34  ;;  %v6590_v10 = vld [vmem:[%s13989_s4 + $0x334] ss:$8 sps:$4 sm:$0xff]  }
 0x382   :  { %v10167_v51 = vsel %vm14838_vm9, %v3203_v49, %v3195_v16  ;;  %2130 = vmatmul.mubr.bf16.vlgmr.msra.gmra.mrb[8].mxu1 %v1887_v30  ;;  %v1886_v3 = vadd.f32 %v1878_v45, %v1849_v41  ;;  %v14148_v43 = vrot.slane %v10163_v39, 7  ;;  %vm14842_vm8 = vcmp.lt.s32.totalorder %v14669_v52, 16  ;;  %v3173_v50 = vpop.permute.xlu0 %3172  ;;  %v10209_v36 = vpop.permute.xlu1 %3176 }
 0x383   :  { %v3484_v49 = vsel %vm14825_vm0, %v10167_v51, 0.0  ;;  %3842 = vmatpush1.bf16.msra.mxu1 %v6579_v26  ;;  %v1885_v23 = vadd.f32 %v1877_v24, %v1848_v33  ;;  %v14152_v13 = vrot.slane %v10167_v51, 7  ;;  %v10187_v58 = vsel %vm14842_vm8, %v3171_v17, %v3179_v9  ;;  %vm14843_vm1 = vmmov %vm14842_vm8  ;;  %v14849_v26 = vld [vmem:[#allocation39_spill] sm:$0xff]  ;;  %v14857_v24 = vld [vmem:[#allocation50_spill] sm:$0xff] }
 0x384   :  { %v10191_v28 = vsel %vm14843_vm1, %v3179_v9, %v3171_v17  ;;  %3843 = vmatprep.subr.bf16.mxu1 %v6584_v15  ;;  %v1890_v42 = vpack.c.bf16 %v1886_v3, %v1884_v54  ;;  %v14151_v60 = vrot.slane %v10163_v39, 1  ;;  %v14154_v25 = vrot.slane %v10167_v51, 1  ;;  %vm14847_vm0 = vmmov %vm14843_vm1  ;;  %v6588_v3 = vld [vmem:[%s13989_s4 + $0x330] ss:$8 sps:$4 sm:$0xff]  }
 0x385   :  { %v10200_v55 = vmul.f32 %v14844_v31, %v10163_v39  ;;  %v1889_v40 = vpack.c.bf16 %v1885_v23, %v1883_v62  ;;  %v10203_v4 = vmul.f32 %v14845_v19, %v3484_v49  ;;  %v3250_v17 = vrot.slane %v10191_v28, 7  ;;  %vm14848_vm8 = vmmov %vm14847_vm0  ;;  %v14859_v49 = vld [vmem:[#allocation35_spill] sm:$0xff] }
 0x386   :  { %vm14846_vm9 = vcmp.ge.s32.totalorder %v14669_v52, 16  ;;  %2139 = vmatprep.mubr.bf16.mxu1 %v1890_v42  ;;  %v3251_v53 = vrot.slane %v10187_v58, 7  ;;  %v14156_v22 = vrot.slane %v10191_v28, 1  ;;  %v10215_v18 = vsel %vm14847_vm0, %v3173_v50, %v3181_v7  ;;  %v3205_v15 = vpop.permute.xlu0 %3204  ;;  %v14860_v42 = vld [vmem:[#allocation53_spill] sm:$0xff] }
 0x387   :  { %v3446_v16 = vsel %vm14846_vm9, %v10191_v28, 0.0  ;;  %v10219_v56 = vsel %vm14848_vm8, %v3181_v7, %v3173_v50  ;;  %3844 = vmatpush1.bf16.msra.mxu1 %v6582_v1  ;;  %v14145_v11 = vrot.slane %v10215_v18, 7  ;;  %v14143_v14 = vrot.slane %v10215_v18, 1  ;;  %vm14851_vm1 = vmmov %vm14846_vm9 }
 0x388   :  { %v14147_v63 = vrot.slane %v10219_v56, 7  ;;  %v14144_v45 = vrot.slane %v10219_v56, 1  ;;  %3845 = vmatprep.subr.bf16.mxu1 %v6587_v47  ;;  %v14155_v32 = vrot.slane %v10187_v58, 1  ;;  %v10233_v30 = vmul.f32 %v14849_v26, %v3446_v16  ;;  %v6593_v16 = vld [vmem:[%s13989_s4 + $0x344] ss:$8 sps:$4 sm:$0xff]  }
 0x389   :  { %v10237_v57 = vmul.f32 %v14850_v5, %v10187_v58  ;;  %v3448_v0 = vsel %vm14851_vm1, %v10219_v56, 0.0  ;;  %vm14852_vm9 = vcmp.lt.s32.totalorder %v14690_v37, 1  ;;  %vm14854_vm8 = vcmp.lt.s32.totalorder %v14690_v37, 7 }
 0x38a   :  { %v3262_v8 = vsel %vm14852_vm9, %v3250_v17, %v14147_v63  ;;  %vm14853_vm0 = vmmov %vm14852_vm9  ;;  %v3278_v54 = vsel %vm14854_vm8, %v14156_v22, %v14144_v45  ;;  %v3470_v9 = vmul.f32 %v14850_v5, %v10215_v18  ;;  %2140 = vmatmul.mubr.bf16.gmra.mrb[12].mxu1 %v1889_v40  ;;  %vm14856_vm9 = vcmp.ge.s32.totalorder %v14669_v52, 16  ;;  %v3185_v40 = vpop.permute.xlu1 %3184 }
 0x38b   :  { %v3263_v41 = vsel %vm14853_vm0, %v3251_v53, %v14145_v11  ;;  %vm14855_vm1 = vmmov %vm14854_vm8  ;;  %v3337_v33 = vsel %vm14856_vm9, %v3262_v8, 0.0  ;;  %3846 = vmatpush1.bf16.msra.mxu1 %v6585_v46  ;;  %v3469_v23 = vmul.f32 %v14849_v26, %v3448_v0  ;;  %vm14861_vm8 = vcmp.lt.s32.totalorder %v14669_v52, 112  ;;  %v14862_v46 = vld [vmem:[#allocation19_spill] sm:$0xff]  ;;  %v14867_v11 = vld [vmem:[#allocation20_spill] sm:$0xff] }
 0x38c   :  { %v3279_v48 = vsel %vm14855_vm1, %v14155_v32, %v14143_v14  ;;  %v3359_v62 = vmul.f32 %v14857_v24, %v3263_v41  ;;  %vm14858_vm0 = vmmov %vm14856_vm9  ;;  %v3358_v1 = vmul.f32 %v14859_v49, %v3337_v33  ;;  %v10284_v50 = vsel %vm14861_vm8, %v10141_v6, %v3205_v15  ;;  %3847 = vmatprep.subr.bf16.mxu1 %v6590_v10  ;;  %v14864_v33 = vld [vmem:[#allocation64_spill] sm:$0xff] }
 0x38d   :  { %v3520_v7 = vsel %vm14858_vm0, %v3278_v54, 0.0  ;;  %vm14863_vm1 = vmmov %vm14861_vm8  ;;  %v14146_v41 = vrot.slane %v10284_v50, 7  ;;  %v14149_v54 = vrot.slane %v10284_v50, 1  ;;  %vm14865_vm9 = vcmp.lt.s32.totalorder %v14715_v38, 240 }
 0x38e   :  { %v10279_v47 = vmul.f32 %v14860_v42, %v3520_v7  ;;  %v3367_v8 = vadd.f32 %v3359_v62, %v14862_v46  ;;  %v10293_v0 = vsel %vm14863_vm1, %v3205_v15, %v10141_v6  ;;  %v3366_v7 = vadd.f32 %v3358_v1, %v14864_v33  ;;  %v14866_v62 = vld [vmem:[#allocation74_spill] sm:$0xff]  ;;  %v3209_v32 = vpop.permute.xlu1 %3208 }
 0x38f   :  { %v14150_v14 = vrot.slane %v10293_v0, 7  ;;  %v14153_v10 = vrot.slane %v10293_v0, 1  ;;  %v3486_v45 = vsel %vm14865_vm9, %v10293_v0, 0.0  ;;  %v10304_v46 = vmul.f32 %v14866_v62, %v3279_v48  ;;  %3848 = vmatpush1.bf16.msra.mxu1 %v6588_v3  ;;  %v6591_v48 = vld [vmem:[%s13989_s4 + $0x340] ss:$8 sps:$4 sm:$0xff]  }
 0x390   :  { %v3404_v6 = vadd.f32 %v14867_v11, %v3367_v8  ;;  %vm14868_vm0 = vcmp.lt.s32.totalorder %v14690_v37, 1  ;;  %vm14869_vm8 = vcmp.lt.s32.totalorder %v14690_v37, 7  ;;  %v14870_v11 = vld [vmem:[#allocation28_spill] sm:$0xff]  ;;  %3849 = vmatprep.subr.bf16.mxu1 %v6593_v16 }
 0x391   :  { %v3294_v15 = vsel %vm14868_vm0, %v14148_v43, %v14146_v41  ;;  %v3310_v1 = vsel %vm14869_vm8, %v14151_v60, %v14149_v54  ;;  %v3403_v8 = vadd.f32 %v14870_v11, %v3366_v7  ;;  %vm14871_vm1 = vmmov %vm14868_vm0  ;;  %v14872_v41 = vld [vmem:[#allocation72_spill] sm:$0xff]  ;;  %v3506_v43 = vmul.f32 %v14844_v31, %v10284_v50 }
 0x392   :  { %v3295_v33 = vsel %vm14871_vm1, %v14152_v13, %v14150_v14  ;;  %v3432_v63 = vmul.f32 %v14872_v41, %v3294_v15  ;;  %v6596_v3 = vld [vmem:[%s13989_s4 + $0x354] ss:$8 sps:$4 sm:$0xff]   ;;  %vm14873_vm9 = vmmov %vm14869_vm8  ;;  %vm14874_vm0 = vcmp.lt.s32.totalorder %v14715_v38, 240  ;;  %v3507_v15 = vmul.f32 %v14845_v19, %v3486_v45 }
 0x393   :  { %v10341_v7 = vsel %vm14873_vm9, %v14154_v25, %v14153_v10  ;;  %v3412_v11 = vsel %vm14874_vm0, %v3295_v33, 0.0  ;;  %vm14875_vm8 = vcmp.lt.s32.totalorder %v14669_v52, 16  ;;  %v14876_v54 = vld [vmem:[#allocation40_spill] sm:$0xff]  ;;  %v3201_v25 = vpop.permute.xlu0 %3200  ;;  %vm14878_vm9 = vcmp.ge.s32.totalorder %v14669_v52, 16  ;;  %3850 = vmatpush1.bf16.msra.mxu1 %v6591_v48  ;;  %v6599_v48 = vld [vmem:[%s13989_s4 + $0x364] ss:$8 sps:$4 sm:$0xff]  }
 0x394   :  { %v10349_v16 = vsel %vm14875_vm8, %v10209_v36, %v3185_v40  ;;  %v3433_v14 = vmul.f32 %v14876_v54, %v3412_v11  ;;  %v3440_v60 = vadd.f32 %v3432_v63, %v3403_v8  ;;  %vm14877_vm1 = vmmov %vm14875_vm8  ;;  %v10368_v8 = vmul.f32 %v10172_v27, %v3310_v1  ;;  %3851 = vmatprep.subr.bf16.mxu1 %v6596_v3 }
 0x395   :  { %v10355_v13 = vsel %vm14877_vm1, %v3185_v40, %v10209_v36  ;;  %v14157_v10 = vrot.slane %v10349_v16, 7  ;;  %v6594_v36 = vld [vmem:[%s13989_s4 + $0x350] ss:$8 sps:$4 sm:$0xff]   ;;  %vm14880_vm0 = vcmp.lt.s32.totalorder %v14690_v37, 1  ;;  %vm14883_vm1 = vcmp.lt.s32.totalorder %v14690_v37, 7 }
 0x396   :  { %v14158_v33 = vrot.slane %v10355_v13, 7  ;;  %v14159_v45 = vrot.slane %v10355_v13, 1  ;;  %v3452_v11 = vsel %vm14878_vm9, %v10355_v13, 0.0  ;;  %v3441_v63 = vadd.f32 %v3433_v14, %v3404_v6  ;;  %14879 = vst [vmem:[#allocation44_spill] sm:$0xff] %v10368_v8  ;;  %vm14881_vm8 = vmmov %vm14880_vm0 }
 0x397   :  { %v3477_v40 = vadd.f32 %v3469_v23, %v3440_v60  ;;  %v3265_v22 = vsel %vm14880_vm0, %v14157_v10, %v3251_v53  ;;  %v14882_v14 = vrot.slane %v10191_v28, 1  ;;  %v14884_v53 = vrot.slane %v10187_v58, 1  ;;  %vm14886_vm9 = vmmov %vm14883_vm1  ;;  %3852 = vmatpush1.bf16.msra.mxu1 %v6594_v36  ;;  %v6602_v36 = vld [vmem:[%s13989_s4 + $0x374] ss:$8 sps:$4 sm:$0xff]  }
 0x398   :  { %v3264_v60 = vsel %vm14881_vm8, %v14158_v33, %v3250_v17  ;;  %v14885_v6 = vrot.slane %v10349_v16, 1  ;;  %v3336_v10 = vsel %vm7465_vm2, %v3265_v22, 0.0  ;;  %v3478_v34 = vadd.f32 %v3470_v9, %v3441_v63  ;;  %v6597_v22 = vld [vmem:[%s13989_s4 + $0x360] ss:$8 sps:$4 sm:$0xff]   ;;  %3853 = vmatprep.subr.bf16.mxu1 %v6599_v48 }
 0x399   :  { %v3280_v23 = vsel %vm14883_vm1, %v14159_v45, %v14882_v14  ;;  %v3335_v17 = vsel %vm7990_vm10, %v3264_v60, 0.0  ;;  %v3357_v28 = vmul.f32 %v14857_v24, %v3336_v10  ;;  %v10403_v33 = vmul.f32 %v14849_v26, %v3452_v11  ;;  %v14890_v10 = vld [vmem:[#allocation37_spill] sm:$0xff]  ;;  %v3183_v60 = vpop.permute.xlu1 %3182 }
 0x39a   :  { %v3281_v1 = vsel %vm14886_vm9, %v14885_v6, %v14884_v53  ;;  %v10405_v14 = vadd.f32 %v3506_v43, %v3477_v40  ;;  %v3356_v58 = vmul.f32 %v14859_v49, %v3335_v17  ;;  %v3526_v8 = vsel %vm8015_vm11, %v3280_v23, 0.0  ;;  %v3175_v40 = vpop.permute.xlu0 %3174  ;;  %v14892_v23 = vld [vmem:[#allocation65_spill] sm:$0xff] }
 0x39b   :  { %v3527_v53 = vsel %vm7481_vm3, %v3281_v1, 0.0  ;;  %v10415_v9 = vadd.f32 %v3507_v15, %v3478_v34  ;;  %v3365_v11 = vadd.f32 %v3357_v28, %v14890_v10  ;;  %v10420_v43 = vmul.f32 %v14850_v5, %v10349_v16  ;;  %3854 = vmatpush1.bf16.msra.mxu1 %v6597_v22 }
 0x39c   :  { %v10423_v63 = vmul.f32 %v14860_v42, %v3526_v8  ;;  %v3364_v6 = vadd.f32 %v3356_v58, %v14892_v23  ;;  %v10430_v34 = vmul.f32 %v14866_v62, %v3527_v53  ;;  %vm14894_vm0 = vcmp.lt.s32.totalorder %v14669_v52, 112  ;;  %v14896_v58 = vld [vmem:[#allocation47_spill] sm:$0xff]  ;;  %v14897_v53 = vld [vmem:[#allocation69_spill] sm:$0xff]  ;;  %3855 = vmatprep.subr.bf16.mxu1 %v6602_v36 }
 0x39d   :  { %v10434_v15 = vsel %vm14894_vm0, %v3201_v25, %v3209_v32  ;;  %vm14895_vm8 = vmmov %vm14894_vm0  ;;  %v3402_v23 = vadd.f32 %v14897_v53, %v3365_v11  ;;  %vm14898_vm1 = vcmp.lt.s32.totalorder %v14715_v38, 240  ;;  %vm14899_vm9 = vcmp.lt.s32.totalorder %v14669_v52, 16 }
 0x39e   :  { %14891 = vst [vmem:[#allocation42_spill] sm:$0xff] %v10423_v63  ;;  %14893 = vst [vmem:[#allocation75_spill] sm:$0xff] %v10430_v34  ;;  %v10438_v8 = vsel %vm14895_vm8, %v3209_v32, %v3201_v25  ;;  %v14160_v1 = vrot.slane %v10434_v15, 7  ;;  %v3401_v10 = vadd.f32 %v14896_v58, %v3364_v6  ;;  %v3188_v25 = vsel %vm14899_vm9, %v3175_v40, %v3183_v60  ;;  %v6600_v32 = vld [vmem:[%s13989_s4 + $0x370] ss:$8 sps:$4 sm:$0xff]  }
 0x39f   :  { %v14161_v48 = vrot.slane %v10438_v8, 7  ;;  %v3490_v45 = vsel %vm14898_vm1, %v10438_v8, 0.0  ;;  %v14900_v17 = vrot.slane %v10163_v39, 7  ;;  %vm14901_vm0 = vcmp.lt.s32.totalorder %v14690_v37, 1  ;;  %3856 = vmatpush1.bf16.msra.mxu1 %v6600_v32  ;;  %v6608_v32 = vld [vmem:[%s13989_s4 + $0x394] ss:$8 sps:$4 sm:$0xff]  }
 0x3a0   :  { %v14902_v11 = vrot.slane %v10167_v51, 7  ;;  %vm14903_vm8 = vmmov %vm14901_vm0  ;;  %v14904_v22 = vrot.slane %v10163_v39, 1  ;;  %v14905_v53 = vrot.slane %v10434_v15, 1  ;;  %vm14906_vm1 = vcmp.lt.s32.totalorder %v14690_v37, 7 }
 0x3a1   :  { %v3296_v6 = vsel %vm14901_vm0, %v14160_v1, %v14900_v17  ;;  %v10476_v35 = vmul.f32 %v14844_v31, %v10434_v15  ;;  %v6605_v17 = vld [vmem:[%s13989_s4 + $0x384] ss:$8 sps:$4 sm:$0xff]   ;;  %v14908_v1 = vrot.slane %v10167_v51, 1  ;;  %vm14910_vm9 = vmmov %vm14906_vm1  ;;  %vm14912_vm0 = vcmp.lt.s32.totalorder %v14669_v52, 16 }
 0x3a2   :  { %v3297_v58 = vsel %vm14903_vm8, %v14161_v48, %v14902_v11  ;;  %v10472_v28 = vsel %vm14906_vm1, %v14905_v53, %v14904_v22  ;;  %v14909_v11 = vrot.slane %v10438_v8, 1  ;;  %v3409_v22 = vsel %vm7465_vm2, %v3296_v6, 0.0  ;;  %3857 = vmatprep.subr.bf16.mxu1 %v6605_v17 }
 0x3a3   :  { %14907 = vst [vmem:[#allocation56_spill] sm:$0xff] %v10472_v28  ;;  %v3410_v48 = vsel %vm8074_vm12, %v3297_v58, 0.0  ;;  %v3192_v36 = vsel %vm14912_vm0, %v3183_v60, %v3175_v40  ;;  %v3430_v20 = vmul.f32 %v14872_v41, %v3409_v22  ;;  %v3255_v63 = vrot.slane %v3188_v25, 7  ;;  %v6603_v58 = vld [vmem:[%s13989_s4 + $0x380] ss:$8 sps:$4 sm:$0xff]  }
 0x3a4   :  { %v10487_v39 = vsel %vm14910_vm9, %v14909_v11, %v14908_v1  ;;  %v3431_v28 = vmul.f32 %v14876_v54, %v3410_v48  ;;  %v3254_v51 = vrot.slane %v3192_v36, 7  ;;  %v10498_v34 = vmul.f32 %v14845_v19, %v3490_v45  ;;  %3858 = vmatpush1.bf16.msra.mxu1 %v6603_v58  ;;  %v6611_v58 = vld [vmem:[%s13989_s4 + $0x3a4] ss:$8 sps:$4 sm:$0xff]  }
 0x3a5   :  { %v3270_v1 = vrot.slane %v3192_v36, 1  ;;  %v3271_v11 = vrot.slane %v3188_v25, 1  ;;  %vm14913_vm8 = vcmp.ge.s32.totalorder %v14669_v52, 16  ;;  %v3438_v40 = vadd.f32 %v3430_v20, %v3401_v10  ;;  %3859 = vmatprep.subr.bf16.mxu1 %v6608_v32 }
 0x3a6   :  { %v3450_v6 = vsel %vm14913_vm8, %v3192_v36, 0.0  ;;  %v14914_v60 = vrot.slane %v10355_v13, 7  ;;  %vm14915_vm1 = vcmp.lt.s32.totalorder %v14690_v37, 1  ;;  %v14916_v22 = vrot.slane %v10349_v16, 7 }
 0x3a7   :  { %vm14917_vm9 = vmmov %vm14915_vm1  ;;  %v10514_v53 = vmul.f32 %v14850_v5, %v3188_v25  ;;  %v10519_v36 = vadd.f32 %v3431_v28, %v3402_v23  ;;  %v14918_v20 = vrot.slane %v10219_v56, 7  ;;  %v14922_v5 = vrot.slane %v10355_v13, 1 }
 0x3a8   :  { %v3258_v48 = vsel %vm14915_vm1, %v3254_v51, %v14914_v60  ;;  %v3259_v45 = vsel %vm14917_vm9, %v3255_v63, %v14916_v22  ;;  %vm14919_vm0 = vmmov %vm14915_vm1  ;;  %v14920_v60 = vrot.slane %v10215_v18, 7  ;;  %vm14923_vm1 = vcmp.lt.s32.totalorder %v14690_v37, 7 }
 0x3a9   :  { %v3260_v10 = vsel %vm14919_vm0, %v14918_v20, %v3254_v51  ;;  %vm14921_vm8 = vmmov %vm14919_vm0  ;;  %v3274_v25 = vsel %vm14923_vm1, %v3270_v1, %v14922_v5  ;;  %v3475_v17 = vadd.f32 %v10233_v30, %v3438_v40  ;;  %v14924_v28 = vrot.slane %v10219_v56, 1  ;;  %v3207_v5 = vpop.permute.xlu1 %3206 }
 0x3aa   :  { %v3261_v22 = vsel %vm14921_vm8, %v14920_v60, %v3255_v63  ;;  %vm14925_vm9 = vmmov %vm14923_vm1  ;;  %v14926_v3 = vrot.slane %v10215_v18, 1  ;;  %v3339_v63 = vsel %vm8126_vm13, %v3260_v10, 0.0  ;;  %vm14929_vm8 = vcmp.ge.s32.totalorder %v14669_v52, 16  ;;  %v6606_v18 = vld [vmem:[%s13989_s4 + $0x390] ss:$8 sps:$4 sm:$0xff]  }
 0x3ab   :  { %v3276_v23 = vsel %vm14925_vm9, %v14924_v28, %v3270_v1  ;;  %vm14927_vm0 = vmmov %vm14923_vm1  ;;  %v3340_v13 = vsel %vm7485_vm4, %v3261_v22, 0.0  ;;  %v3341_v60 = vsel %vm14929_vm8, %v3258_v48, 0.0  ;;  %v3360_v30 = vmul.f32 %v14859_v49, %v3339_v63  ;;  %v3199_v22 = vpop.permute.xlu0 %3198  ;;  %3860 = vmatpush1.bf16.msra.mxu1 %v6606_v18  ;;  %v14940_v18 = vld [vmem:[#allocation71_spill] sm:$0xff] }
 0x3ac   :  { %v3277_v51 = vsel %vm14927_vm0, %v14926_v3, %v3271_v11  ;;  %v3363_v56 = vmul.f32 %v14857_v24, %v3259_v45  ;;  %v10554_v3 = vadd.f32 %v10200_v55, %v3475_v17  ;;  %v14930_v1 = vrot.slane %v10349_v16, 1  ;;  %vm14931_vm1 = vmmov %vm14927_vm0  ;;  %v14932_v45 = vld [vmem:[#allocation23_spill] sm:$0xff]  ;;  %v14933_v55 = vld [vmem:[#allocation66_spill] sm:$0xff]  ;;  %3861 = vmatprep.subr.bf16.mxu1 %v6611_v58 }
 0x3ad   :  { %v3361_v10 = vmul.f32 %v14857_v24, %v3340_v13  ;;  %v3362_v48 = vmul.f32 %v14859_v49, %v3341_v60  ;;  %v3368_v28 = vadd.f32 %v3360_v30, %v14932_v45  ;;  %v3522_v16 = vsel %vm8159_vm14, %v3276_v23, 0.0  ;;  %v14934_v24 = vld [vmem:[#allocation24_spill] sm:$0xff]  ;;  %v14935_v49 = vld [vmem:[#allocation73_spill] sm:$0xff]  ;;  %vm14937_vm9 = vmmov %vm14929_vm8 }
 0x3ae   :  { %v3275_v40 = vsel %vm14931_vm1, %v3271_v11, %v14930_v1  ;;  %v3371_v17 = vadd.f32 %v3363_v56, %v14933_v55  ;;  %v3523_v11 = vsel %vm7489_vm5, %v3277_v51, 0.0  ;;  %v3471_v32 = vmul.f32 %v14849_v26, %v3450_v6  ;;  %v14936_v1 = vld [vmem:[#allocation81_spill] sm:$0xff]  ;;  %v6609_v51 = vld [vmem:[%s13989_s4 + $0x3a0] ss:$8 sps:$4 sm:$0xff]  }
 0x3af   :  { %v3369_v63 = vadd.f32 %v3361_v10, %v14934_v24  ;;  %v3370_v13 = vadd.f32 %v3362_v48, %v14935_v49  ;;  %v3543_v60 = vmul.f32 %v14860_v42, %v3522_v16  ;;  %v3524_v30 = vsel %vm14937_vm9, %v3274_v25, 0.0  ;;  %v6614_v25 = vld [vmem:[%s13989_s4 + $0x3b4] ss:$8 sps:$4 sm:$0xff]   ;;  %v14941_v16 = vld [vmem:[#allocation43_spill] sm:$0xff]  ;;  %3862 = vmatpush1.bf16.msra.mxu1 %v6609_v51 }
 0x3b0   :  { %v3408_v20 = vadd.f32 %v14936_v1, %v3371_v17  ;;  %v3544_v56 = vmul.f32 %v14866_v62, %v3523_v11  ;;  %vm14938_vm0 = vcmp.lt.s32.totalorder %v14669_v52, 112  ;;  %v10585_v10 = vmul.f32 %v14866_v62, %v3275_v40  ;;  %3863 = vmatprep.subr.bf16.mxu1 %v6614_v25 }
 0x3b1   :  { %v3212_v23 = vsel %vm14938_vm0, %v3199_v22, %v3207_v5  ;;  %vm14939_vm8 = vmmov %vm14938_vm0  ;;  %v3405_v17 = vadd.f32 %v14940_v18, %v3368_v28  ;;  %v3406_v11 = vadd.f32 %v14941_v16, %v3369_v63  ;;  %v3551_v24 = vadd.f32 %v3543_v60, %v10405_v14  ;;  %v6612_v16 = vld [vmem:[%s13989_s4 + $0x3b0] ss:$8 sps:$4 sm:$0xff]  }
 0x3b2   :  { %v3216_v26 = vsel %vm14939_vm8, %v3207_v5, %v3199_v22  ;;  %v3286_v6 = vrot.slane %v3212_v23, 7  ;;  %v3302_v48 = vrot.slane %v3212_v23, 1  ;;  %v14942_v62 = vrot.slane %v10434_v15, 7 }
 0x3b3   :  { %v3287_v45 = vrot.slane %v3216_v26, 7  ;;  %v3303_v55 = vrot.slane %v3216_v26, 1  ;;  %vm14943_vm1 = vcmp.lt.s32.totalorder %v14690_v37, 1  ;;  %v14944_v22 = vrot.slane %v10284_v50, 7  ;;  %3864 = vmatpush1.bf16.msra.mxu1 %v6612_v16 }
 0x3b4   :  { %v3290_v40 = vsel %vm14943_vm1, %v3286_v6, %v14942_v62  ;;  %vm14945_vm9 = vmmov %vm14943_vm1  ;;  %v14946_v58 = vrot.slane %v10434_v15, 1  ;;  %vm14947_vm0 = vcmp.lt.s32.totalorder %v14690_v37, 7  ;;  %v14948_v28 = vrot.slane %v10438_v8, 7  ;;  %v14954_v62 = vld [vmem:[#allocation29_spill] sm:$0xff] }
 0x3b5   :  { %v3292_v5 = vsel %vm14945_vm9, %v14944_v22, %v3286_v6  ;;  %vm14949_vm8 = vmmov %vm14943_vm1  ;;  %v14950_v63 = vrot.slane %v10293_v0, 7  ;;  %v14951_v1 = vrot.slane %v10438_v8, 1  ;;  %v14953_v15 = vrot.slane %v10284_v50, 1  ;;  %v6617_v50 = vld [vmem:[%s13989_s4 + $0x3c4] ss:$8 sps:$4 sm:$0xff]  }
 0x3b6   :  { %v10607_v49 = vsel %vm14947_vm0, %v3302_v48, %v14946_v58  ;;  %v3291_v14 = vsel %vm14949_vm8, %v3287_v45, %v14948_v28  ;;  %vm14952_vm9 = vmmov %vm14947_vm0  ;;  %v3407_v22 = vadd.f32 %v14954_v62, %v3370_v13  ;;  %vm14955_vm8 = vcmp.lt.s32.totalorder %v14715_v38, 240  ;;  %3865 = vmatprep.subr.bf16.mxu1 %v6617_v50  ;;  %v14963_v50 = vld [vmem:[#allocation31_spill] sm:$0xff] }
 0x3b7   :  { %v3293_v60 = vsel %vm14943_vm1, %v14950_v63, %v3287_v45  ;;  %v3307_v6 = vsel %vm14952_vm9, %v3303_v55, %v14951_v1  ;;  %v3308_v18 = vsel %vm14947_vm0, %v14953_v15, %v3302_v48  ;;  %v3413_v45 = vsel %vm7485_vm4, %v3292_v5, 0.0  ;;  %vm14957_vm1 = vmmov %vm14947_vm0 }
 0x3b8   :  { %v3414_v8 = vsel %vm8228_vm15, %v3293_v60, 0.0  ;;  %v3416_v58 = vsel %vm14955_vm8, %v3291_v14, 0.0  ;;  %v3434_v51 = vmul.f32 %v14872_v41, %v3413_v45  ;;  %v3436_v13 = vmul.f32 %v14872_v41, %v3290_v40  ;;  %vm14958_vm9 = vmmov %vm14955_vm8  ;;  %v14959_v60 = vld [vmem:[#allocation27_spill] sm:$0xff] }
 0x3b9   :  { %v3435_v48 = vmul.f32 %v14876_v54, %v3414_v8  ;;  %v3437_v28 = vmul.f32 %v14876_v54, %v3416_v58  ;;  %v14956_v5 = vrot.slane %v10293_v0, 1  ;;  %v3488_v25 = vsel %vm14958_vm9, %v3216_v26, 0.0  ;;  %v6615_v0 = vld [vmem:[%s13989_s4 + $0x3c0] ss:$8 sps:$4 sm:$0xff]   ;;  %vm14961_vm0 = vmmov %vm14955_vm8 }
 0x3ba   :  { %v3508_v14 = vmul.f32 %v14844_v31, %v3212_v23  ;;  %v3588_v1 = vadd.f32 %v14959_v60, %v3551_v24  ;;  %v3442_v15 = vadd.f32 %v3434_v51, %v3405_v17  ;;  %v3444_v45 = vadd.f32 %v3436_v13, %v3407_v22  ;;  %3866 = vmatpush1.bf16.msra.mxu1 %v6615_v0  ;;  %v6623_v22 = vld [vmem:[%s13989_s4 + $0x3e4] ss:$8 sps:$4 sm:$0xff]   ;;  %vm14962_vm8 = vmmov %vm14961_vm0  ;;  %v14970_v0 = vld [vmem:[#allocation56_spill] sm:$0xff] }
 0x3bb   :  { %v3309_v63 = vsel %vm14957_vm1, %v14956_v5, %v3303_v55  ;;  %v3443_v62 = vadd.f32 %v3435_v48, %v3406_v11  ;;  %v3545_v8 = vmul.f32 %v14860_v42, %v3524_v30  ;;  %v3445_v41 = vadd.f32 %v3437_v28, %v3408_v20  ;;  %v6620_v20 = vld [vmem:[%s13989_s4 + $0x3d4] ss:$8 sps:$4 sm:$0xff]   ;;  %v14960_v11 = vld [vmem:[#allocation67_spill] sm:$0xff] }
 0x3bc   :  { %v3596_v54 = vsel %vm7489_vm5, %v3308_v18, 0.0  ;;  %v3476_v26 = vadd.f32 %v10237_v57, %v10519_v36  ;;  %v3552_v31 = vadd.f32 %v3544_v56, %v10415_v9  ;;  %v3479_v23 = vadd.f32 %v3471_v32, %v3442_v15  ;;  %v6618_v56 = vld [vmem:[%s13989_s4 + $0x3d0] ss:$8 sps:$4 sm:$0xff]   ;;  %3867 = vmatprep.subr.bf16.mxu1 %v6620_v20 }
 0x3bd   :  { %v3480_v55 = vadd.f32 %v10514_v53, %v3443_v62  ;;  %v3509_v42 = vmul.f32 %v14845_v19, %v3488_v25  ;;  %v3617_v30 = vmul.f32 %v10172_v27, %v3596_v54  ;;  %v3595_v57 = vsel %vm14961_vm0, %v10341_v7, 0.0  ;;  %v14964_v48 = vld [vmem:[#allocation25_spill] sm:$0xff]  ;;  %v14973_v20 = vld [vmem:[#allocation76_spill] sm:$0xff] }
 0x3be   :  { %v3513_v17 = vadd.f32 %v10203_v4, %v3476_v26  ;;  %v3589_v24 = vadd.f32 %v14960_v11, %v3552_v31  ;;  %v3597_v9 = vsel %vm8361_vm6, %v3309_v63, 0.0  ;;  %v3481_v53 = vadd.f32 %v10403_v33, %v3444_v45  ;;  %3868 = vmatpush1.bf16.msra.mxu1 %v6618_v56  ;;  %v14968_v15 = vld [vmem:[#allocation41_spill] sm:$0xff]  ;;  %v6635_v56 = vld [vmem:[%s13989_s4 + $0x424] ss:$8 sps:$4 sm:$0xff]  }
 0x3bf   :  { %v3516_v19 = vadd.f32 %v3508_v14, %v3479_v23  ;;  %v3517_v36 = vadd.f32 %v3509_v42, %v3480_v55  ;;  %v3625_v32 = vadd.f32 %v3617_v30, %v3588_v1  ;;  %v3618_v40 = vmul.f32 %v10179_v29, %v3597_v9  ;;  %v14966_v14 = vld [vmem:[#allocation44_spill] sm:$0xff]  ;;  %3869 = vmatprep.subr.bf16.mxu1 %v6623_v22  ;;  %v14972_v55 = vld [vmem:[#allocation33_spill] sm:$0xff] }
 0x3c0   :  { %v3550_v4 = vadd.f32 %v10304_v46, %v3513_v17  ;;  %v3549_v7 = vadd.f32 %v10279_v47, %v10554_v3  ;;  %v3482_v18 = vadd.f32 %v10420_v43, %v3445_v41  ;;  %v3616_v58 = vmul.f32 %v10179_v29, %v3595_v57  ;;  %v6642_v22 = vld [vmem:[%s13989_s4 + $0x450] ss:$8 sps:$4 sm:$0xff]  }
 0x3c1   :  { %v3553_v16 = vadd.f32 %v3545_v8, %v3516_v19  ;;  %v3554_v33 = vadd.f32 %v10585_v10, %v3517_v36  ;;  %v3599_v46 = vsel %vm14962_vm8, %v3307_v6, 0.0  ;;  %v3601_v43 = vsel %vm14829_vm7, %v10487_v39, 0.0  ;;  %v14965_v10 = vld [vmem:[#allocation70_spill] sm:$0xff]  ;;  %v6626_v39 = vld [vmem:[%s13989_s4 + $0x3f4] ss:$8 sps:$4 sm:$0xff]  }
 0x3c2   :  { %v3587_v51 = vadd.f32 %v14963_v50, %v3550_v4  ;;  %v3586_v13 = vadd.f32 %v14964_v48, %v3549_v7  ;;  %v3519_v47 = vadd.f32 %v10498_v34, %v3482_v18  ;;  %v3626_v3 = vadd.f32 %v3618_v40, %v3589_v24  ;;  %v6621_v6 = vld [vmem:[%s13989_s4 + $0x3e0] ss:$8 sps:$4 sm:$0xff]   ;;  %v6629_v19 = vld [vmem:[%s13989_s4 + $0x404] ss:$8 sps:$4 sm:$0xff]   ;;  %v6632_v36 = vld [vmem:[%s13989_s4 + $0x414] ss:$8 sps:$4 sm:$0xff]  }
 0x3c3   :  { %v3591_v28 = vadd.f32 %v14965_v10, %v3554_v33  ;;  %v3620_v5 = vmul.f32 %v10179_v29, %v3599_v46  ;;  %v3518_v63 = vadd.f32 %v10476_v35, %v3481_v53  ;;  %v14967_v34 = vld [vmem:[#allocation75_spill] sm:$0xff]  ;;  %v3590_v62 = vadd.f32 %v14968_v15, %v3553_v16  ;;  %v14969_v35 = vld [vmem:[#allocation42_spill] sm:$0xff]  ;;  %3870 = vmatpush1.bf16.msra.mxu1 %v6621_v6  ;;  %v6638_v40 = vld [vmem:[%s13989_s4 + $0x434] ss:$8 sps:$4 sm:$0xff]  }
 0x3c4   :  { %v3624_v25 = vadd.f32 %v3616_v58, %v3587_v51  ;;  %v3623_v60 = vadd.f32 %v14966_v14, %v3586_v13  ;;  %v3556_v1 = vadd.f32 %v14967_v34, %v3519_v47  ;;  %v3622_v45 = vmul.f32 %v10179_v29, %v3601_v43  ;;  %v6624_v29 = vld [vmem:[%s13989_s4 + $0x3f0] ss:$8 sps:$4 sm:$0xff]   ;;  %3871 = vmatprep.subr.bf16.mxu1 %v6626_v39  ;;  %v6633_v4 = vld [vmem:[%s13989_s4 + $0x420] ss:$8 sps:$4 sm:$0xff]   ;;  %v6641_v18 = vld [vmem:[%s13989_s4 + $0x444] ss:$8 sps:$4 sm:$0xff]  }
 0x3c5   :  { %v3555_v8 = vadd.f32 %v14969_v35, %v3518_v63  ;;  %v3600_v54 = vsel %vm7481_vm3, %v14970_v0, 0.0  ;;  %v3619_v26 = vmul.f32 %v10172_v27, %v10607_v49  ;;  %v3628_v30 = vadd.f32 %v3620_v5, %v3591_v28  ;;  %4877 = vmatprep.subr.bf16.mxu0 %v6629_v19  ;;  %v6636_v7 = vld [vmem:[%s13989_s4 + $0x430] ss:$8 sps:$4 sm:$0xff]   ;;  %v6639_v16 = vld [vmem:[%s13989_s4 + $0x440] ss:$8 sps:$4 sm:$0xff]  }
 0x3c6   :  { %v3632_v31 = vpack.c.bf16 %v3626_v3, %v3624_v25  ;;  %v3631_v23 = vpack.c.bf16 %v3625_v32, %v3623_v60  ;;  %v3593_v42 = vadd.f32 %v14972_v55, %v3556_v1  ;;  %v3621_v11 = vmul.f32 %v10172_v27, %v3600_v54  ;;  %v6627_v27 = vld [vmem:[%s13989_s4 + $0x400] ss:$8 sps:$4 sm:$0xff]   ;;  %v6630_v32 = vld [vmem:[%s13989_s4 + $0x410] ss:$8 sps:$4 sm:$0xff]   ;;  %v6644_v33 = vld [vmem:[%s13989_s4 + $0x454] ss:$8 sps:$4 sm:$0xff]  }
 0x3c7   :  { %v3592_v17 = vadd.f32 %v14973_v20, %v3555_v8  ;;  %v3627_v24 = vadd.f32 %v3619_v26, %v3590_v62  ;;  %3872 = vmatpush1.bf16.msra.mxu1 %v6624_v29  ;;  %4878 = vmatpush1.bf16.msra.mxu0 %v6627_v27  ;;  %v6132_v3 = vld [vmem:[%s13990_s6 + $0xa] sm:$0x3]  ;;  %v6647_v28 = vld [vmem:[%s13989_s4 + $0x464] ss:$8 sps:$4 sm:$0xff]   ;;  %v14983_v6 = vld [vmem:[#allocation4_spill] sm:$0xff]  ;;  %vm14989_vm1 = vcmp.lt.s32.totalorder %v14690_v37, 1 }
 0x3c8   :  { %3873 = vmatprep.mubr.bf16.mxu1 %v3632_v31  ;;  %v3630_v57 = vadd.f32 %v3622_v45, %v3593_v42  ;;  %4879 = vmatprep.subr.bf16.mxu0 %v6632_v36  ;;  %v6645_v10 = vld [vmem:[%s13989_s4 + $0x460] ss:$8 sps:$4 sm:$0xff]   ;;  %v3678_v25 = vrot.slane %v6132_v3, %v14983_v6  ;;  %v6648_v1 = vld [vmem:[%s13989_s4 + $0x470] ss:$8 sps:$4 sm:$0xff]   ;;  %v6650_v15 = vld [vmem:[%s13989_s4 + $0x474] ss:$8 sps:$4 sm:$0xff]  }
 0x3c9   :  { %v3629_v9 = vadd.f32 %v3621_v11, %v3592_v17  ;;  %v14982_v5 = vld [vmem:[#allocation3_spill] sm:$0xff]  ;;  %v14984_v45 = vld [vmem:[#allocation5_spill] sm:$0xff]  ;;  %v14985_v54 = vld [vmem:[#allocation6_spill] sm:$0xff]  ;;  %vm14994_vm0 = vcmp.lt.s32.totalorder %v14690_v37, 7  ;;  %vm14998_vm7 = vcmp.lt.s32.totalorder %v14690_v37, 7 }
 0x3ca   :  { %v3634_v49 = vpack.c.bf16 %v3630_v57, %v3628_v30  ;;  %3874 = vmatmul.mubr.bf16.vlgmr.msra.gmra.mrb[16].mxu1 %v3631_v23  ;;  %v3674_v63 = vrot.slane %v6132_v3, %v14982_v5  ;;  %v14986_v55 = vld [vmem:[#allocation7_spill] sm:$0xff]  ;;  %v14987_v11 = vld [vmem:[#allocation8_spill] sm:$0xff]  ;;  %vm14991_vm9 = vmmov %vm14989_vm1 }
 0x3cb   :  { %v3633_v53 = vpack.c.bf16 %v3629_v9, %v3627_v24  ;;  %4880 = vmatpush1.bf16.msra.mxu0 %v6630_v32  ;;  %v6651_v30 = vld [vmem:[%s13989_s4 + $0x480] ss:$8 sps:$4 sm:$0xff]   ;;  %v6653_v20 = vld [vmem:[%s13989_s4 + $0x484] ss:$8 sps:$4 sm:$0xff]   ;;  %vm14995_vm8 = vmmov %vm14989_vm1 }
 0x3cc   :  { %3883 = vmatprep.mubr.bf16.mxu1 %v3634_v49  ;;  %4881 = vmatprep.subr.bf16.mxu0 %v6635_v56 }
 0x3cf   :  { %4882 = vmatpush1.bf16.msra.mxu0 %v6633_v4 }
 0x3d0   :  { %4883 = vmatprep.subr.bf16.mxu0 %v6638_v40 }
 0x3d2   :  { %3884 = vmatmul.mubr.bf16.gmra.mrb[20].mxu1 %v3633_v53 }
 0x3d3   :  { %4884 = vmatpush1.bf16.msra.mxu0 %v6636_v7  ;;  %v14988_v7 = vld [vmem:[#allocation9_spill] sm:$0xff] }
 0x3d4   :  { %4885 = vmatprep.subr.bf16.mxu0 %v6641_v18 }
 0x3d7   :  { %4886 = vmatpush1.bf16.msra.mxu0 %v6639_v16 }
 0x3d8   :  { %4887 = vmatprep.subr.bf16.mxu0 %v6644_v33 }
 0x3db   :  { %4888 = vmatpush1.bf16.msra.mxu0 %v6642_v22 }
 0x3dc   :  { %4889 = vmatprep.subr.bf16.mxu0 %v6647_v28 }
 0x3df   :  { %4890 = vmatpush1.bf16.msra.mxu0 %v6645_v10  ;;  %v14990_v10 = vld [vmem:[#allocation10_spill] sm:$0xff] }
 0x3e0   :  { %4891 = vmatprep.subr.bf16.mxu0 %v6650_v15  ;;  %v6654_v15 = vld [vmem:[%s13989_s4 + $0x490] ss:$8 sps:$4 sm:$0xff]  }
 0x3e3   :  { %4892 = vmatpush1.bf16.msra.mxu0 %v6648_v1 }
 0x3e4   :  { %4893 = vmatprep.subr.bf16.mxu0 %v6653_v20 }
 0x3e7   :  { %4894 = vmatpush1.bf16.msra.mxu0 %v6651_v30 }
 0x455   :  { %v10755_v58 = vpop.f32.mrb[8].mxu1 }
 0x456   :  { %14974 = vst [vmem:[#allocation58_spill] sm:$0xff] %v10755_v58  ;;  %v10757_v46 = vpop.f32.mrb[9].mxu1 }
 0x457   :  { %14975 = vst [vmem:[#allocation61_spill] sm:$0xff] %v10757_v46  ;;  %v10759_v50 = vpop.f32.mrb[10].mxu1 }
 0x458   :  { %14976 = vst [vmem:[#allocation57_spill] sm:$0xff] %v10759_v50  ;;  %v10761_v51 = vpop.f32.mrb[11].mxu1 }
 0x459   :  { %14977 = vst [vmem:[#allocation60_spill] sm:$0xff] %v10761_v51 }
 0x45d   :  { %v10763_v48 = vpop.f32.mrb[12].mxu1 }
 0x45e   :  { %14978 = vst [vmem:[#allocation59_spill] sm:$0xff] %v10763_v48  ;;  %v10765_v13 = vpop.f32.mrb[13].mxu1 }
 0x45f   :  { %14979 = vst [vmem:[#allocation79_spill] sm:$0xff] %v10765_v13  ;;  %v10767_v47 = vpop.f32.mrb[14].mxu1 }
 0x460   :  { %14980 = vst [vmem:[#allocation80_spill] sm:$0xff] %v10767_v47  ;;  %v10769_v43 = vpop.f32.mrb[15].mxu1 }
 0x461   :  { %14981 = vst [vmem:[#allocation85_spill] sm:$0xff] %v10769_v43 }
 0x49d   :  { %v3875_v14 = vpop.f32.mrb[16].mxu1 }
 0x49e   :  { %v3876_v60 = vadd.f32 %v3875_v14, %v3674_v63  ;;  %v3877_v34 = vpop.f32.mrb[17].mxu1 }
 0x49f   :  { %v3878_v62 = vadd.f32 %v3877_v34, %v3678_v25  ;;  %v3879_v39 = vpop.f32.mrb[18].mxu1  ;;  %v14992_v34 = vld [vmem:[#allocation11_spill] sm:$0xff] }
 0x4a0   :  { %v3894_v35 = vadd.f32 %v3876_v60, %v14984_v45  ;;  %v3880_v8 = vadd.f32 %v3879_v39, %v3674_v63  ;;  %v3881_v0 = vpop.f32.mrb[19].mxu1  ;;  %v14993_v39 = vld [vmem:[#allocation12_spill] sm:$0xff] }
 0x4a1   :  { %v3895_v26 = vadd.f32 %v3878_v62, %v14985_v54  ;;  %v3882_v31 = vadd.f32 %v3881_v0, %v3678_v25 }
 0x4a2   :  { %v10790_v23 = vmax.f32 %v3894_v35, 0.0  ;;  %6313 = vst [vmem:[%s13992_s8 + $0x40] sm:$0xff] %v3894_v35  ;;  %v3896_v42 = vadd.f32 %v3880_v8, %v14986_v55 }
 0x4a3   :  { %v10802_v17 = vmax.f32 %v3895_v26, 0.0  ;;  %6314 = vst [vmem:[%s13992_s8 + $0x48] sm:$0xff] %v3895_v26  ;;  %v3897_v24 = vadd.f32 %v3882_v31, %v14987_v11 }
 0x4a4   :  { %v10808_v29 = vmax.f32 %v3896_v42, 0.0  ;;  %6315 = vst [vmem:[%s13992_s8 + $0x50] sm:$0xff] %v3896_v42  ;;  %4206 = vrot.lane.b32.xlu0 %v10790_v23, %s6723_s18  ;;  %v4254_v49 = vrot.slane %v10790_v23, 7  ;;  %v4270_v3 = vrot.slane %v10790_v23, 1 }
 0x4a5   :  { %v10815_v57 = vmax.f32 %v3897_v24, 0.0  ;;  %6316 = vst [vmem:[%s13992_s8 + $0x58] sm:$0xff] %v3897_v24  ;;  %v3885_v9 = vpop.f32.mrb[20].mxu1  ;;  %4238 = vrot.lane.b32.xlu1 %v10802_v17, %s6724_s19  ;;  %v4255_v36 = vrot.slane %v10802_v17, 7 }
 0x4a6   :  { %v4256_v53 = vrot.slane %v10808_v29, 7  ;;  %v3886_v27 = vadd.f32 %v3885_v9, %v3674_v63  ;;  %v3887_v19 = vpop.f32.mrb[21].mxu1  ;;  %v4272_v32 = vrot.slane %v10808_v29, 1 }
 0x4a7   :  { %v4257_v56 = vrot.slane %v10815_v57, 7  ;;  %v3888_v4 = vadd.f32 %v3887_v19, %v3678_v25  ;;  %v3889_v40 = vpop.f32.mrb[22].mxu1  ;;  %v4273_v19 = vrot.slane %v10815_v57, 1 }
 0x4a8   :  { %v3898_v18 = vadd.f32 %v3886_v27, %v14988_v7  ;;  %v3890_v16 = vadd.f32 %v3889_v40, %v3674_v63  ;;  %v3891_v33 = vpop.f32.mrb[23].mxu1  ;;  %4230 = vrot.lane.b32.xlu0 %v10790_v23, %s6724_s19  ;;  %v10832_v22 = vsel %vm14989_vm1, %v4254_v49, %v4256_v53  ;;  %v10862_v35 = vsel %vm14994_vm0, %v4270_v3, %v4272_v32  ;;  %vm14997_vm0 = vmmov %vm14989_vm1 }
 0x4a9   :  { %v3899_v28 = vadd.f32 %v3888_v4, %v14990_v10  ;;  %v3892_v14 = vadd.f32 %v3891_v33, %v3678_v25  ;;  %4232 = vrot.lane.b32.xlu1 %v10808_v29, %s6724_s19  ;;  %v10840_v60 = vsel %vm14991_vm9, %v4255_v36, %v4257_v56  ;;  %v6656_v25 = vld [vmem:[%s13989_s4 + $0x494] ss:$8 sps:$4 sm:$0xff]   ;;  %vm14996_vm9 = vmmov %vm14989_vm1 }
 0x4aa   :  { %v10842_v63 = vmax.f32 %v3898_v18, 0.0  ;;  %6317 = vst [vmem:[%s13992_s8 + $0x60] sm:$0xff] %v3898_v18  ;;  %v3900_v1 = vadd.f32 %v3890_v16, %v14992_v34  ;;  %4895 = vmatprep.subr.bf16.mxu0 %v6656_v25  ;;  %v6660_v34 = vld [vmem:[%s13989_s4 + $0x4b0] ss:$8 sps:$4 sm:$0xff]  }
 0x4ab   :  { %v10854_v62 = vmax.f32 %v3899_v28, 0.0  ;;  %6318 = vst [vmem:[%s13992_s8 + $0x68] sm:$0xff] %v3899_v28  ;;  %v3901_v45 = vadd.f32 %v3892_v14, %v14993_v39  ;;  %4896 = vmatpush1.bf16.msra.mxu0 %v6654_v15  ;;  %v6662_v28 = vld [vmem:[%s13989_s4 + $0x4b4] ss:$8 sps:$4 sm:$0xff]   ;;  %v6666_v25 = vld [vmem:[%s13989_s4 + $0x4d0] ss:$8 sps:$4 sm:$0xff]  }
 0x4ac   :  { %v4258_v8 = vrot.slane %v10842_v63, 7  ;;  %v4274_v0 = vrot.slane %v10842_v63, 1  ;;  %v10866_v54 = vmax.f32 %v3900_v1, 0.0  ;;  %6319 = vst [vmem:[%s13992_s8 + $0x70] sm:$0xff] %v3900_v1  ;;  %4214 = vrot.lane.b32.xlu0 %v10802_v17, %s6723_s18  ;;  %v6665_v1 = vld [vmem:[%s13989_s4 + $0x4c4] ss:$8 sps:$4 sm:$0xff]  }
 0x4ad   :  { %v4259_v26 = vrot.slane %v10854_v62, 7  ;;  %v10874_v31 = vmax.f32 %v3901_v45, 0.0  ;;  %6320 = vst [vmem:[%s13992_s8 + $0x78] sm:$0xff] %v3901_v45  ;;  %4216 = vrot.lane.b32.xlu1 %v10815_v57, %s6723_s18  ;;  %v6668_v15 = vld [vmem:[%s13989_s4 + $0x4d4] ss:$8 sps:$4 sm:$0xff]  }
 0x4ae   :  { %v4260_v55 = vrot.slane %v10866_v54, 7  ;;  %v10885_v30 = vsel %vm14995_vm8, %v4256_v53, %v4258_v8  ;;  %v10903_v9 = vsel %vm14998_vm7, %v4272_v32, %v4274_v0  ;;  %vm14999_vm8 = vmmov %vm14997_vm0  ;;  %v4275_v32 = vrot.slane %v10854_v62, 1  ;;  %v6671_v39 = vld [vmem:[%s13989_s4 + $0x4e4] ss:$8 sps:$4 sm:$0xff]   ;;  %v6669_v45 = vld [vmem:[%s13989_s4 + $0x4e0] ss:$8 sps:$4 sm:$0xff]  }
 0x4af   :  { %v4261_v42 = vrot.slane %v10874_v31, 7  ;;  %v10889_v20 = vsel %vm14989_vm1, %v4257_v56, %v4259_v26  ;;  %vm15000_vm1 = vmmov %vm14997_vm0  ;;  %v6659_v56 = vld [vmem:[%s13989_s4 + $0x4a4] ss:$8 sps:$4 sm:$0xff]   ;;  %v4277_v4 = vrot.slane %v10874_v31, 1  ;;  %v4276_v40 = vrot.slane %v10866_v54, 1 }
 0x4b0   :  { %4208 = vrot.lane.b32.xlu0 %v10808_v29, %s6723_s18  ;;  %v10895_v11 = vsel %vm14996_vm9, %v4260_v55, %v4254_v49  ;;  %v10899_v24 = vsel %vm14997_vm0, %v4258_v8, %v4260_v55  ;;  %v4271_v49 = vrot.slane %v10802_v17, 1  ;;  %v10932_v7 = vsel %vm14998_vm7, %v4273_v19, %v4275_v32  ;;  %vm15001_vm9 = vmmov %vm14998_vm7  ;;  %4897 = vmatprep.subr.bf16.mxu0 %v6659_v56  ;;  %v6672_v8 = vld [vmem:[%s13989_s4 + $0x4f0] ss:$8 sps:$4 sm:$0xff]   ;;  %v6167_v55 = vld [vmem:[%s13991_s5 + $0x4a] sm:$0x3] }
 0x4b1   :  { %4212 = vrot.lane.b32.xlu1 %v10866_v54, %s6723_s18  ;;  %v10909_v53 = vsel %vm14999_vm8, %v4261_v42, %v4255_v36  ;;  %v10913_v27 = vsel %vm15000_vm1, %v4259_v26, %v4261_v42  ;;  %v6657_v36 = vld [vmem:[%s13989_s4 + $0x4a0] ss:$8 sps:$4 sm:$0xff]   ;;  %vm15002_vm0 = vmmov %vm14998_vm7  ;;  %v6165_v26 = vld [vmem:[%s13991_s5 + $0x50] sm:$0x3]  ;;  %v4413_v50 = vsel %vm7485_vm4, %v10889_v20, 0.0 }
 0x4b2   :  { %v10936_v18 = vsel %vm15001_vm9, %v4271_v49, %v4273_v19  ;;  %v10940_v16 = vsel %vm15002_vm0, %v4275_v32, %v4277_v4  ;;  %vm15003_vm8 = vmmov %vm15002_vm0  ;;  %4898 = vmatpush1.bf16.msra.mxu0 %v6657_v36  ;;  %v6170_v42 = vld [vmem:[%s13991_s5 + $0x52] sm:$0x3]  ;;  %v6169_v19 = vld [vmem:[%s13991_s5 + $0x4e] sm:$0x3]  ;;  %v4356_v36 = vrot.slane %v6165_v26, %v14982_v5  ;;  %vm15007_vm9 = vcmp.lt.s32.totalorder %v14669_v52, 112 }
 0x4b3   :  { %v10944_v33 = vsel %vm15003_vm8, %v4277_v4, %v4271_v49  ;;  %vm15004_vm1 = vmmov %vm15002_vm0  ;;  %4899 = vmatprep.subr.bf16.mxu0 %v6662_v28  ;;  %v6172_v49 = vld [vmem:[%s13991_s5 + $0x56] sm:$0x3]  ;;  %v6166_v32 = vld [vmem:[%s13991_s5 + $0x48] sm:$0x3]  ;;  %v4422_v4 = vrot.slane %v6167_v55, %v14982_v5  ;;  %v11021_v28 = vrot.slane %v6170_v42, %v14982_v5  ;;  %vm15014_vm8 = vcmp.lt.s32.totalorder %v14715_v38, 240 }
 0x4b4   :  { %4240 = vrot.lane.b32.xlu0 %v10815_v57, %s6724_s19  ;;  %v10950_v10 = vsel %vm15004_vm1, %v4274_v0, %v4276_v40  ;;  %vm15005_vm7 = vmmov %vm15002_vm0  ;;  %v6674_v0 = vld [vmem:[%s13989_s4 + $0x4f4] ss:$8 sps:$4 sm:$0xff]   ;;  %vm15015_vm1 = vcmp.lt.s32.totalorder %v14669_v52, 16 }
 0x4b5   :  { %4220 = vrot.lane.b32.xlu1 %v10874_v31, %s6723_s18  ;;  %v10959_v14 = vsel %vm15005_vm7, %v4276_v40, %v4270_v3  ;;  %v6663_v3 = vld [vmem:[%s13989_s4 + $0x4c0] ss:$8 sps:$4 sm:$0xff]   ;;  %v6171_v56 = vld [vmem:[%s13991_s5 + $0x54] sm:$0x3]  ;;  %v4426_v40 = vrot.slane %v6167_v55, %v14983_v6  ;;  %vm15010_vm0 = vmmov %vm15007_vm9 }
 0x4b6   :  { %4900 = vmatpush1.bf16.msra.mxu0 %v6660_v34  ;;  %v4360_v34 = vrot.slane %v6165_v26, %v14983_v6  ;;  %v11042_v26 = vmul.f32 %v4356_v36, %v10808_v29  ;;  %v11057_v47 = vrot.slane %v6171_v56, %v14983_v6  ;;  %vm15018_vm7 = vmmov %vm15015_vm1 }
 0x4b7   :  { %4901 = vmatprep.subr.bf16.mxu0 %v6665_v1  ;;  %v4607_v1 = vrot.slane %v6172_v49, %v14982_v5  ;;  %v11060_v29 = vmul.f32 %v4426_v40, %v10840_v60  ;;  %v4408_v60 = vsel %vm7465_vm2, %v10895_v11, 0.0  ;;  %v11096_v11 = vmul.f32 %v4356_v36, %v10866_v54 }
 0x4b8   :  { %4236 = vrot.lane.b32.xlu0 %v10866_v54, %s6724_s19  ;;  %v11045_v55 = vmul.f32 %v4360_v34, %v10815_v57  ;;  %v11063_v57 = vmul.f32 %v4422_v4, %v10832_v22  ;;  %v11075_v13 = vmul.f32 %v4360_v34, %v10802_v17  ;;  %v11087_v22 = vmul.f32 %v4356_v36, %v10842_v63 }
 0x4b9   :  { %4244 = vrot.lane.b32.xlu1 %v10874_v31, %s6724_s19  ;;  %v11093_v51 = vmul.f32 %v4360_v34, %v10854_v62  ;;  %v4596_v54 = vsel %vm7489_vm5, %v10932_v7, 0.0  ;;  %v4599_v7 = vsel %vm7481_vm3, %v10959_v14, 0.0 }
 0x4ba   :  { %4902 = vmatpush1.bf16.msra.mxu0 %v6663_v3  ;;  %v4611_v3 = vrot.slane %v6172_v49, %v14983_v6  ;;  %v11051_v49 = vrot.slane %v6171_v56, %v14982_v5 }
 0x4bb   :  { %4903 = vmatprep.subr.bf16.mxu0 %v6668_v15  ;;  %v11027_v15 = vrot.slane %v6170_v42, %v14983_v6  ;;  %v11048_v42 = vrot.slane %v6166_v32, %v14983_v6 }
 0x4bc   :  { %4210 = vrot.lane.b32.xlu0 %v10842_v63, %s6723_s18  ;;  %v11143_v2 = vmul.f32 %v4611_v3, %v10936_v18 }
 0x4bd   :  { %4218 = vrot.lane.b32.xlu1 %v10854_v62, %s6723_s18 }
 0x4be   :  { %4904 = vmatpush1.bf16.msra.mxu0 %v6666_v25  ;;  %v11030_v25 = vrot.slane %v6169_v19, %v14982_v5  ;;  %15011 = vst [vmem:[#allocation55_spill] sm:$0xff] %v11143_v2 }
 0x4bf   :  { %4905 = vmatprep.subr.bf16.mxu0 %v6671_v39  ;;  %v11033_v39 = vrot.slane %v6169_v19, %v14983_v6  ;;  %v6173_v19 = vld [vmem:[%s13991_s5 + $0x58] sm:$0x3] }
 0x4c0   :  { %4234 = vrot.lane.b32.xlu0 %v10842_v63, %s6724_s19  ;;  %v11081_v48 = vrot.slane %v6173_v19, %v14982_v5  ;;  %v4595_v63 = vsel %vm7489_vm5, %v10903_v9, 0.0 }
 0x4c1   :  { %4242 = vrot.lane.b32.xlu1 %v10854_v62, %s6724_s19  ;;  %v11112_v62 = vmul.f32 %v4426_v40, %v10913_v27  ;;  %v11131_v27 = vmul.f32 %v4422_v4, %v10899_v24 }
 0x4c2   :  { %4906 = vmatpush1.bf16.msra.mxu0 %v6669_v45  ;;  %v11036_v45 = vrot.slane %v6166_v32, %v14982_v5  ;;  %v11066_v32 = vmul.f32 %v4356_v36, %v10790_v23  ;;  %v4409_v23 = vsel %vm7465_vm2, %v10909_v53, 0.0 }
 0x4c3   :  { %4907 = vmatprep.subr.bf16.mxu0 %v6674_v0  ;;  %v11121_v36 = vmul.f32 %v4426_v40, %v4409_v23  ;;  %15008 = vst [vmem:[#allocation54_spill] sm:$0xff] %v11131_v27 }
 0x4c6   :  { %4908 = vmatpush1.bf16.msra.mxu0 %v6672_v8  ;;  %v6168_v8 = vld [vmem:[%s13991_s5 + $0x4c] sm:$0x3] }
 0x4c7   :  { %v11069_v46 = vrot.slane %v6168_v8, %v14982_v5  ;;  %v11072_v58 = vrot.slane %v6168_v8, %v14983_v6  ;;  %v4412_v8 = vsel %vm7485_vm4, %v10885_v30, 0.0  ;;  %v11106_v5 = vmul.f32 %v4422_v4, %v4408_v60 }
 0x4c8   :  { %v11109_v30 = vmul.f32 %v4360_v34, %v10874_v31  ;;  %v11123_v9 = vmul.f32 %v4422_v4, %v4412_v8  ;;  %v4600_v31 = vsel %vm7481_vm3, %v10944_v33, 0.0  ;;  %v11128_v34 = vmul.f32 %v4426_v40, %v4413_v50 }
 0x4c9   :  { %v11133_v60 = vmul.f32 %v4607_v1, %v4595_v63  ;;  %v11145_v33 = vmul.f32 %v4611_v3, %v4596_v54  ;;  %v11148_v50 = vmul.f32 %v4607_v1, %v10862_v35  ;;  %v11160_v40 = vmul.f32 %v4611_v3, %v4600_v31 }
 0x4ca   :  { %v11167_v35 = vrot.slane %v6173_v19, %v14983_v6  ;;  %v11172_v63 = vmul.f32 %v4607_v1, %v4599_v7 }
 0x4cb   :  { %15009 = vst [vmem:[#allocation84_spill] sm:$0xff] %v11133_v60  ;;  %15012 = vst [vmem:[#allocation2_spill] sm:$0xff] %v11145_v33 }
 0x4cc   :  { %15013 = vst [vmem:[#allocation78_spill] sm:$0xff] %v11148_v50  ;;  %15017 = vst [vmem:[#allocation62_spill] sm:$0xff] %v11160_v40 }
 0x4cd   :  { %15019 = vst [vmem:[#allocation26_spill] sm:$0xff] %v11167_v35  ;;  %15021 = vst [vmem:[#allocation52_spill] sm:$0xff] %v11172_v63 }
 0x516   :  { %v4207_v0 = vpop.permute.xlu0 %4206 }
 0x517   :  { %v4239_v43 = vpop.permute.xlu1 %4238 }
 0x51a   :  { %v4231_v17 = vpop.permute.xlu0 %4230 }
 0x51b   :  { %v11104_v53 = vpop.permute.xlu1 %4232  ;;  %v11119_v20 = vsel %vm15007_vm9, %v4239_v43, %v4231_v17  ;;  %v11140_v23 = vsel %vm15010_vm0, %v4231_v17, %v4239_v43  ;;  %v11158_v43 = vmul.f32 %v4611_v3, %v10940_v16  ;;  %v11170_v17 = vmul.f32 %v4607_v1, %v10950_v10  ;;  %vm15024_vm0 = vmmov %vm15015_vm1 }
 0x51c   :  { %v4520_v24 = vsel %vm15014_vm8, %v11119_v20, 0.0  ;;  %vm15023_vm9 = vcmp.ge.s32.totalorder %v14669_v52, 16  ;;  %vm15025_vm8 = vmmov %vm15024_vm0 }
 0x51d   :  { %15016 = vst [vmem:[#allocation77_spill] sm:$0xff] %v11158_v43  ;;  %15020 = vst [vmem:[#allocation82_spill] sm:$0xff] %v11170_v17  ;;  %v11183_v19 = vmul.f32 %v11027_v15, %v4520_v24 }
 0x51e   :  { %v4215_v8 = vpop.permute.xlu0 %4214 }
 0x51f   :  { %v11155_v14 = vsel %vm15015_vm1, %v4215_v8, %v4207_v0  ;;  %v4217_v4 = vpop.permute.xlu1 %4216  ;;  %v11164_v18 = vsel %vm15018_vm7, %v4207_v0, %v4215_v8  ;;  %v11180_v0 = vmul.f32 %v11021_v28, %v11140_v23  ;;  %15022 = vst [vmem:[#allocation86_spill] sm:$0xff] %v11183_v19  ;;  %vm15027_vm1 = vmmov %vm15023_vm9  ;;  %vm15029_vm7 = vcmp.lt.s32.totalorder %v14690_v37, 1 }
 0x520   :  { %v4482_v1 = vsel %vm15023_vm9, %v11155_v14, 0.0  ;;  %v4287_v7 = vrot.slane %v11164_v18, 7  ;;  %v4302_v8 = vrot.slane %v11155_v14, 1  ;;  %v4303_v63 = vrot.slane %v11164_v18, 1  ;;  %vm15030_vm9 = vmmov %vm15029_vm7 }
 0x521   :  { %v11205_v40 = vmul.f32 %v11030_v25, %v4482_v1  ;;  %v11209_v17 = vmul.f32 %v11033_v39, %v11164_v18 }
 0x522   :  { %v4209_v31 = vpop.permute.xlu0 %4208 }
 0x523   :  { %v11193_v3 = vsel %vm15024_vm0, %v4209_v31, %v4217_v4  ;;  %v11197_v50 = vsel %vm15025_vm8, %v4217_v4, %v4209_v31  ;;  %v4213_v24 = vpop.permute.xlu1 %4212  ;;  %15026 = vst [vmem:[#allocation63_spill] sm:$0xff] %v11209_v17  ;;  %v15028_v31 = vrot.slane %v11155_v14, 7  ;;  %vm15031_vm0 = vcmp.lt.s32.totalorder %v14690_v37, 7 }
 0x524   :  { %v14170_v16 = vrot.slane %v11197_v50, 7  ;;  %v14171_v54 = vrot.slane %v11193_v3, 7  ;;  %v14172_v10 = vrot.slane %v11197_v50, 1  ;;  %v4484_v4 = vsel %vm15027_vm1, %v11197_v50, 0.0  ;;  %vm15033_vm8 = vmmov %vm15031_vm0 }
 0x525   :  { %v4506_v43 = vmul.f32 %v11033_v39, %v11193_v3  ;;  %v15032_v35 = vrot.slane %v11193_v3, 1 }
 0x526   :  { %v4298_v6 = vsel %vm15029_vm7, %v15028_v31, %v14170_v16  ;;  %v4299_v1 = vsel %vm15030_vm9, %v4287_v7, %v14171_v54  ;;  %v4314_v18 = vsel %vm15031_vm0, %v4302_v8, %v14172_v10  ;;  %v4241_v2 = vpop.permute.xlu0 %4240  ;;  %vm15034_vm7 = vmmov %vm15027_vm1  ;;  %v4505_v10 = vmul.f32 %v11030_v25, %v4484_v4 }
 0x527   :  { %v4315_v61 = vsel %vm15033_vm8, %v4303_v63, %v15032_v35  ;;  %v4373_v31 = vsel %vm15027_vm1, %v4298_v6, 0.0  ;;  %v4395_v16 = vmul.f32 %v11048_v42, %v4299_v1  ;;  %v4556_v54 = vsel %vm15034_vm7, %v4314_v18, 0.0  ;;  %v4221_v35 = vpop.permute.xlu1 %4220 }
 0x528   :  { %v4394_v33 = vmul.f32 %v11036_v45, %v4373_v31  ;;  %v11242_v19 = vmul.f32 %v11051_v49, %v4556_v54  ;;  %vm15036_vm9 = vcmp.lt.s32.totalorder %v14669_v52, 112  ;;  %vm15040_vm8 = vcmp.lt.s32.totalorder %v14715_v38, 240 }
 0x529   :  { %v11247_v17 = vsel %vm15036_vm9, %v11104_v53, %v4241_v2  ;;  %v4403_v6 = vadd.f32 %v4395_v16, %v11045_v55  ;;  %vm15038_vm0 = vmmov %vm15036_vm9  ;;  %v11264_v55 = vmul.f32 %v11057_v47, %v4315_v61  ;;  %vm15043_vm1 = vcmp.lt.s32.totalorder %v14690_v37, 1 }
 0x52a   :  { %15035 = vst [vmem:[#allocation30_spill] sm:$0xff] %v11242_v19  ;;  %15037 = vst [vmem:[#allocation32_spill] sm:$0xff] %v11247_v17  ;;  %v11253_v1 = vsel %vm15038_vm0, %v4241_v2, %v11104_v53  ;;  %v14173_v18 = vrot.slane %v11247_v17, 7  ;;  %v14174_v4 = vrot.slane %v11247_v17, 1  ;;  %v4402_v54 = vadd.f32 %v4394_v33, %v11042_v26 }
 0x52b   :  { %15039 = vst [vmem:[#allocation39_spill] sm:$0xff] %v11253_v1  ;;  %v14175_v31 = vrot.slane %v11253_v1, 7  ;;  %v4522_v60 = vsel %vm15040_vm8, %v11253_v1, 0.0  ;;  %15041 = vst [vmem:[#allocation45_spill] sm:$0xff] %v11264_v55  ;;  %v4440_v2 = vadd.f32 %v11060_v29, %v4403_v6  ;;  %v15042_v53 = vrot.slane %v11140_v23, 7 }
 0x52c   :  { %v15044_v33 = vrot.slane %v11140_v23, 1  ;;  %vm15045_vm7 = vcmp.lt.s32.totalorder %v14690_v37, 7  ;;  %v15046_v61 = vrot.slane %v11119_v20, 7  ;;  %vm15047_vm9 = vmmov %vm15043_vm1  ;;  %v4439_v6 = vadd.f32 %v11063_v57, %v4402_v54 }
 0x52d   :  { %v4330_v26 = vsel %vm15043_vm1, %v15042_v53, %v14173_v18  ;;  %v4542_v53 = vmul.f32 %v11021_v28, %v11247_v17  ;;  %v15048_v18 = vrot.slane %v11253_v1, 1  ;;  %v15049_v55 = vrot.slane %v11119_v20, 1  ;;  %vm15050_vm0 = vmmov %vm15045_vm7 }
 0x52e   :  { %v4346_v16 = vsel %vm15045_vm7, %v15044_v33, %v14174_v4  ;;  %v4331_v29 = vsel %vm15047_vm9, %v15046_v61, %v14175_v31  ;;  %v4468_v19 = vmul.f32 %v11069_v46, %v4330_v26  ;;  %v4543_v61 = vmul.f32 %v11027_v15, %v4522_v60 }
 0x52f   :  { %v11295_v33 = vsel %vm15050_vm0, %v15049_v55, %v15048_v18  ;;  %v4448_v4 = vsel %vm15040_vm8, %v4331_v29, 0.0  ;;  %vm15052_vm1 = vcmp.lt.s32.totalorder %v14669_v52, 16  ;;  %v4237_v18 = vpop.permute.xlu0 %4236  ;;  %v4245_v55 = vpop.permute.xlu1 %4244  ;;  %vm15054_vm9 = vcmp.ge.s32.totalorder %v14669_v52, 16 }
 0x530   :  { %15051 = vst [vmem:[#allocation50_spill] sm:$0xff] %v11295_v33  ;;  %v11302_v57 = vsel %vm15052_vm1, %v4213_v24, %v4221_v35  ;;  %v4469_v54 = vmul.f32 %v11072_v58, %v4448_v4  ;;  %v4476_v26 = vadd.f32 %v4468_v19, %v4439_v6  ;;  %vm15053_vm7 = vmmov %vm15052_vm1  ;;  %v11317_v6 = vmul.f32 %v11081_v48, %v4346_v16 }
 0x531   :  { %v11307_v31 = vsel %vm15053_vm7, %v4221_v35, %v4213_v24  ;;  %v4293_v59 = vrot.slane %v11302_v57, 7  ;;  %vm15056_vm0 = vcmp.lt.s32.totalorder %v14690_v37, 1  ;;  %v15057_v35 = vrot.slane %v11155_v14, 7 }
 0x532   :  { %v4292_v33 = vrot.slane %v11307_v31, 7  ;;  %v4308_v29 = vrot.slane %v11307_v31, 1  ;;  %v4488_v27 = vsel %vm15054_vm9, %v11307_v31, 0.0  ;;  %v4477_v4 = vadd.f32 %v4469_v54, %v4440_v2  ;;  %15055 = vst [vmem:[#allocation35_spill] sm:$0xff] %v11317_v6  ;;  %vm15058_vm8 = vmmov %vm15056_vm0 }
 0x533   :  { %v4513_v19 = vadd.f32 %v4505_v10, %v4476_v26  ;;  %v4301_v24 = vsel %vm15056_vm0, %v4293_v59, %v4287_v7  ;;  %vm15059_vm1 = vcmp.lt.s32.totalorder %v14690_v37, 7  ;;  %v15060_v17 = vrot.slane %v11302_v57, 1 }
 0x534   :  { %v4300_v1 = vsel %vm15058_vm8, %v4292_v33, %v15057_v35  ;;  %v4316_v60 = vsel %vm15059_vm1, %v4308_v29, %v4302_v8  ;;  %vm15061_vm7 = vmmov %vm15059_vm1  ;;  %v4372_v10 = vsel %vm7465_vm2, %v4301_v24, 0.0  ;;  %v4514_v2 = vadd.f32 %v4506_v43, %v4477_v4  ;;  %v4219_v4 = vpop.permute.xlu1 %4218 }
 0x535   :  { %v4317_v31 = vsel %vm15061_vm7, %v15060_v17, %v4303_v63  ;;  %v4371_v7 = vsel %vm7990_vm10, %v4300_v1, 0.0  ;;  %v4393_v14 = vmul.f32 %v11048_v42, %v4372_v10  ;;  %v11337_v54 = vmul.f32 %v11030_v25, %v4488_v27 }
 0x536   :  { %v11339_v26 = vadd.f32 %v4542_v53, %v4513_v19  ;;  %v4392_v8 = vmul.f32 %v11036_v45, %v4371_v7  ;;  %v4562_v6 = vsel %vm8015_vm11, %v4316_v60, 0.0  ;;  %v4563_v17 = vsel %vm7481_vm3, %v4317_v31, 0.0  ;;  %v4211_v53 = vpop.permute.xlu0 %4210 }
 0x537   :  { %v11346_v63 = vadd.f32 %v4543_v61, %v4514_v2  ;;  %v4401_v43 = vadd.f32 %v4393_v14, %v11075_v13  ;;  %v11351_v1 = vmul.f32 %v11033_v39, %v11302_v57  ;;  %v11354_v27 = vmul.f32 %v11051_v49, %v4562_v6 }
 0x538   :  { %v4400_v19 = vadd.f32 %v4392_v8, %v11066_v32  ;;  %v11358_v60 = vmul.f32 %v11057_v47, %v4563_v17  ;;  %vm15064_vm9 = vcmp.lt.s32.totalorder %v14669_v52, 112  ;;  %vm15066_vm8 = vcmp.lt.s32.totalorder %v14715_v38, 240 }
 0x539   :  { %v11362_v61 = vsel %vm15064_vm9, %v4237_v18, %v4245_v55  ;;  %vm15065_vm0 = vmmov %vm15064_vm9  ;;  %v4438_v2 = vadd.f32 %v11121_v36, %v4401_v43  ;;  %vm15067_vm1 = vcmp.lt.s32.totalorder %v14669_v52, 16  ;;  %vm15069_vm7 = vcmp.lt.s32.totalorder %v14690_v37, 1 }
 0x53a   :  { %v11366_v13 = vsel %vm15065_vm0, %v4245_v55, %v4237_v18  ;;  %v14183_v24 = vrot.slane %v11362_v61, 7  ;;  %v14182_v31 = vrot.slane %v11362_v61, 1  ;;  %v4437_v32 = vadd.f32 %v11106_v5, %v4400_v19  ;;  %vm15071_vm9 = vmmov %vm15069_vm7 }
 0x53b   :  { %v14181_v6 = vrot.slane %v11366_v13, 7  ;;  %v14184_v10 = vrot.slane %v11366_v13, 1  ;;  %v4526_v7 = vsel %vm15066_vm8, %v11366_v13, 0.0  ;;  %v4224_v18 = vsel %vm15067_vm1, %v4211_v53, %v4219_v4 }
 0x53c   :  { %v15068_v55 = vrot.slane %v11140_v23, 7  ;;  %v15070_v8 = vrot.slane %v11119_v20, 7  ;;  %v15072_v36 = vrot.slane %v11140_v23, 1  ;;  %vm15073_vm0 = vcmp.lt.s32.totalorder %v14690_v37, 7 }
 0x53d   :  { %v11401_v43 = vmul.f32 %v11021_v28, %v11362_v61  ;;  %v15074_v19 = vrot.slane %v11119_v20, 1  ;;  %vm15075_vm8 = vmmov %vm15073_vm0  ;;  %v4291_v35 = vrot.slane %v4224_v18, 7  ;;  %v11420_v16 = vmul.f32 %v11027_v15, %v4526_v7 }
 0x53e   :  { %v4332_v14 = vsel %vm15069_vm7, %v14183_v24, %v15068_v55  ;;  %v4333_v5 = vsel %vm15071_vm9, %v14181_v6, %v15070_v8  ;;  %v11397_v17 = vsel %vm15073_vm0, %v14182_v31, %v15072_v36  ;;  %v4228_v36 = vsel %vm15067_vm1, %v4219_v4, %v4211_v53  ;;  %vm15078_vm0 = vmmov %vm15071_vm9 }
 0x53f   :  { %v11409_v55 = vsel %vm15075_vm8, %v14184_v10, %v15074_v19  ;;  %v4445_v23 = vsel %vm7465_vm2, %v4332_v14, 0.0  ;;  %v4446_v6 = vsel %vm8074_vm12, %v4333_v5, 0.0  ;;  %v4290_v20 = vrot.slane %v4228_v36, 7  ;;  %vm15080_vm8 = vmmov %vm15078_vm0 }
 0x540   :  { %v4466_v31 = vmul.f32 %v11069_v46, %v4445_v23  ;;  %v4467_v24 = vmul.f32 %v11072_v58, %v4446_v6  ;;  %v4306_v19 = vrot.slane %v4228_v36, 1  ;;  %v4307_v10 = vrot.slane %v4224_v18, 1  ;;  %vm15082_vm1 = vmmov %vm15078_vm0 }
 0x541   :  { %vm15077_vm7 = vcmp.ge.s32.totalorder %v14669_v52, 16  ;;  %v4294_v5 = vsel %vm15071_vm9, %v4290_v20, %v4292_v33  ;;  %v4295_v53 = vsel %vm15078_vm0, %v4291_v35, %v4293_v59  ;;  %v11429_v4 = vmul.f32 %v11033_v39, %v4224_v18 }
 0x542   :  { %v4486_v14 = vsel %vm15077_vm7, %v4228_v36, 0.0  ;;  %v4474_v56 = vadd.f32 %v4466_v31, %v4437_v32  ;;  %v11431_v6 = vadd.f32 %v4467_v24, %v4438_v2  ;;  %v15079_v7 = vrot.slane %v11197_v50, 7 }
 0x543   :  { %v15081_v8 = vrot.slane %v11193_v3, 7  ;;  %vm15083_vm7 = vcmp.lt.s32.totalorder %v14690_v37, 7  ;;  %v15084_v39 = vrot.slane %v11197_v50, 1  ;;  %v15086_v32 = vrot.slane %v11193_v3, 1 }
 0x544   :  { %v4296_v23 = vsel %vm15080_vm8, %v15079_v7, %v4290_v20  ;;  %v4310_v33 = vsel %vm15083_vm7, %v4306_v19, %v4308_v29  ;;  %v4511_v59 = vadd.f32 %v11205_v40, %v4474_v56  ;;  %vm15085_vm9 = vmmov %vm15083_vm7  ;;  %vm15089_vm8 = vcmp.ge.s32.totalorder %v14669_v52, 16  ;;  %v4235_v7 = vpop.permute.xlu0 %4234 }
 0x545   :  { %v4297_v31 = vsel %vm15082_vm1, %v15081_v8, %v4291_v35  ;;  %v4312_v24 = vsel %vm15085_vm9, %v15084_v39, %v4306_v19  ;;  %vm15087_vm0 = vmmov %vm15083_vm7  ;;  %v4375_v36 = vsel %vm8126_vm13, %v4296_v23, 0.0  ;;  %v4377_v29 = vsel %vm15089_vm8, %v4294_v5, 0.0  ;;  %v4243_v23 = vpop.permute.xlu1 %4242 }
 0x546   :  { %v4313_v2 = vsel %vm15087_vm0, %v15086_v32, %v4307_v10  ;;  %v4376_v35 = vsel %vm7485_vm4, %v4297_v31, 0.0  ;;  %v4396_v56 = vmul.f32 %v11036_v45, %v4375_v36  ;;  %v4399_v50 = vmul.f32 %v11048_v42, %v4295_v53  ;;  %vm15091_vm1 = vmmov %vm15087_vm0 }
 0x547   :  { %v11461_v40 = vadd.f32 %v11180_v0, %v4511_v59  ;;  %v15090_v3 = vrot.slane %v11302_v57, 1  ;;  %v4397_v20 = vmul.f32 %v11048_v42, %v4376_v35  ;;  %v4398_v19 = vmul.f32 %v11036_v45, %v4377_v29  ;;  %vm15092_vm7 = vmmov %vm15089_vm8  ;;  %v15097_v29 = vld [vmem:[#allocation32_spill] sm:$0xff] }
 0x548   :  { %v4404_v5 = vadd.f32 %v4396_v56, %v11087_v22  ;;  %v4407_v31 = vadd.f32 %v4399_v50, %v11109_v30  ;;  %v4558_v53 = vsel %vm8159_vm14, %v4312_v24, 0.0  ;;  %v4559_v0 = vsel %vm7489_vm5, %v4313_v2, 0.0 }
 0x549   :  { %v4311_v8 = vsel %vm15091_vm1, %v4307_v10, %v15090_v3  ;;  %v4405_v57 = vadd.f32 %v4397_v20, %v11093_v51  ;;  %v4406_v10 = vadd.f32 %v4398_v19, %v11096_v11  ;;  %v4507_v42 = vmul.f32 %v11030_v25, %v4486_v14 }
 0x54a   :  { %v4579_v45 = vmul.f32 %v11051_v49, %v4558_v53  ;;  %v4444_v59 = vadd.f32 %v11112_v62, %v4407_v31  ;;  %v4560_v22 = vsel %vm15092_vm7, %v4310_v33, 0.0  ;;  %v4580_v30 = vmul.f32 %v11057_v47, %v4559_v0 }
 0x54b   :  { %vm15093_vm9 = vcmp.lt.s32.totalorder %v14669_v52, 112  ;;  %v4582_v24 = vmul.f32 %v11057_v47, %v4311_v8  ;;  %v4441_v2 = vadd.f32 %v11123_v9, %v4404_v5  ;;  %v4442_v62 = vadd.f32 %v11128_v34, %v4405_v57  ;;  %v15111_v5 = vld [vmem:[#allocation54_spill] sm:$0xff] }
 0x54c   :  { %v4248_v39 = vsel %vm15093_vm9, %v4235_v7, %v4243_v23  ;;  %vm15094_vm0 = vmmov %vm15093_vm9  ;;  %v4587_v33 = vadd.f32 %v4579_v45, %v11339_v26  ;;  %v15095_v36 = vrot.slane %v11362_v61, 7  ;;  %vm15096_vm8 = vcmp.lt.s32.totalorder %v14690_v37, 1  ;;  %v15104_v26 = vld [vmem:[#allocation39_spill] sm:$0xff] }
 0x54d   :  { %v4252_v51 = vsel %vm15094_vm0, %v4243_v23, %v4235_v7  ;;  %v4322_v11 = vrot.slane %v4248_v39, 7  ;;  %v4338_v32 = vrot.slane %v4248_v39, 1  ;;  %v15098_v47 = vrot.slane %v15097_v29, 7  ;;  %vm15099_vm1 = vmmov %vm15096_vm8 }
 0x54e   :  { %v4323_v25 = vrot.slane %v4252_v51, 7  ;;  %v4339_v14 = vrot.slane %v4252_v51, 1  ;;  %v15100_v50 = vrot.slane %v11362_v61, 1  ;;  %vm15101_vm7 = vcmp.lt.s32.totalorder %v14690_v37, 7  ;;  %vm15103_vm9 = vmmov %vm15099_vm1 }
 0x54f   :  { %v4326_v35 = vsel %vm15096_vm8, %v4322_v11, %v15095_v36  ;;  %v4328_v56 = vsel %vm15099_vm1, %v15098_v47, %v4322_v11  ;;  %v15102_v9 = vrot.slane %v11366_v13, 7  ;;  %v15105_v8 = vrot.slane %v15104_v26, 7  ;;  %vm15106_vm0 = vmmov %vm15099_vm1 }
 0x550   :  { %v4342_v3 = vsel %vm15101_vm7, %v4338_v32, %v15100_v50  ;;  %v15107_v19 = vrot.slane %v11366_v13, 1  ;;  %vm15108_vm8 = vmmov %vm15101_vm7  ;;  %v15109_v61 = vrot.slane %v15097_v29, 1  ;;  %v4443_v31 = vadd.f32 %v15111_v5, %v4406_v10  ;;  %v15125_v5 = vld [vmem:[#allocation26_spill] sm:$0xff] }
 0x551   :  { %v4327_v34 = vsel %vm15103_vm9, %v4323_v25, %v15102_v9  ;;  %v4329_v20 = vsel %vm15106_vm0, %v15105_v8, %v4323_v25  ;;  %vm15110_vm1 = vmmov %vm15101_vm7  ;;  %v4449_v53 = vsel %vm7485_vm4, %v4328_v56, 0.0  ;;  %vm15113_vm7 = vcmp.lt.s32.totalorder %v14715_v38, 240  ;;  %v15117_v56 = vld [vmem:[#allocation84_spill] sm:$0xff] }
 0x552   :  { %v4343_v7 = vsel %vm15108_vm8, %v4339_v14, %v15107_v19  ;;  %v4344_v23 = vsel %vm15110_vm1, %v15109_v61, %v4338_v32  ;;  %v4450_v57 = vsel %vm8228_vm15, %v4329_v20, 0.0  ;;  %v4452_v45 = vsel %vm15113_vm7, %v4327_v34, 0.0  ;;  %vm15115_vm9 = vmmov %vm15110_vm1 }
 0x553   :  { %v4470_v13 = vmul.f32 %v11069_v46, %v4449_v53  ;;  %v4471_v11 = vmul.f32 %v11072_v58, %v4450_v57  ;;  %v4472_v25 = vmul.f32 %v11069_v46, %v4326_v35  ;;  %v4473_v36 = vmul.f32 %v11072_v58, %v4452_v45  ;;  %vm15116_vm0 = vmmov %vm15113_vm7  ;;  %v15118_v35 = vld [vmem:[#allocation63_spill] sm:$0xff]  ;;  %v15126_v53 = vld [vmem:[#allocation30_spill] sm:$0xff] }
 0x554   :  { %v15114_v32 = vrot.slane %v15104_v26, 1  ;;  %v4524_v29 = vsel %vm15116_vm0, %v4252_v51, 0.0  ;;  %v4544_v47 = vmul.f32 %v11021_v28, %v4248_v39  ;;  %v4624_v50 = vadd.f32 %v15117_v56, %v4587_v33  ;;  %v15120_v33 = vld [vmem:[#allocation2_spill] sm:$0xff]  ;;  %vm15122_vm8 = vmmov %vm15116_vm0  ;;  %v15130_v56 = vld [vmem:[#allocation51_spill] sm:$0xff] }
 0x555   :  { %v4478_v9 = vadd.f32 %v4470_v13, %v4441_v2  ;;  %v4479_v34 = vadd.f32 %v4471_v11, %v4442_v62  ;;  %v4480_v8 = vadd.f32 %v4472_v25, %v4443_v31  ;;  %v4581_v20 = vmul.f32 %v11051_v49, %v4560_v22  ;;  %v15119_v2 = vld [vmem:[#allocation86_spill] sm:$0xff]  ;;  %vm15127_vm1 = vmmov %vm15116_vm0 }
 0x556   :  { %v4345_v10 = vsel %vm15115_vm9, %v15114_v32, %v4339_v14  ;;  %v4481_v46 = vadd.f32 %v4473_v36, %v4444_v59  ;;  %v4632_v58 = vsel %vm7489_vm5, %v4344_v23, 0.0  ;;  %v4512_v26 = vadd.f32 %v15118_v35, %v11431_v6  ;;  %v15121_v59 = vld [vmem:[#allocation50_spill] sm:$0xff]  ;;  %v15124_v23 = vld [vmem:[#allocation45_spill] sm:$0xff] }
 0x557   :  { %v4588_v14 = vadd.f32 %v4580_v30, %v11346_v63  ;;  %v4515_v19 = vadd.f32 %v4507_v42, %v4478_v9  ;;  %v4516_v51 = vadd.f32 %v11429_v4, %v4479_v34  ;;  %v4545_v28 = vmul.f32 %v11027_v15, %v4524_v29  ;;  %v15132_v9 = vld [vmem:[#allocation77_spill] sm:$0xff] }
 0x558   :  { %v4653_v39 = vmul.f32 %v11081_v48, %v4632_v58  ;;  %v4549_v62 = vadd.f32 %v15119_v2, %v4512_v26  ;;  %v4631_v22 = vsel %vm15122_vm8, %v15121_v59, 0.0  ;;  %v4633_v6 = vsel %vm8361_vm6, %v4345_v10, 0.0  ;;  %v15129_v10 = vld [vmem:[#allocation78_spill] sm:$0xff]  ;;  %v15136_v2 = vld [vmem:[#allocation52_spill] sm:$0xff] }
 0x559   :  { %v4625_v49 = vadd.f32 %v15120_v33, %v4588_v14  ;;  %v4517_v63 = vadd.f32 %v11337_v54, %v4480_v8  ;;  %v4552_v42 = vadd.f32 %v4544_v47, %v4515_v19  ;;  %v4553_v30 = vadd.f32 %v4545_v28, %v4516_v51  ;;  %v15128_v54 = vld [vmem:[#allocation55_spill] sm:$0xff]  ;;  %v15134_v58 = vld [vmem:[#allocation82_spill] sm:$0xff] }
 0x55a   :  { %v4661_v4 = vadd.f32 %v4653_v39, %v4624_v50  ;;  %v4586_v15 = vadd.f32 %v15124_v23, %v4549_v62  ;;  %v4654_v31 = vmul.f32 %v15125_v5, %v4633_v6  ;;  %v4585_v57 = vadd.f32 %v15126_v53, %v11461_v40  ;;  %v6678_v6 = vld [vmem:[%s13989_s4 + $0x510] ss:$8 sps:$4 sm:$0xff]   ;;  %v6689_v23 = vld [vmem:[%s13989_s4 + $0x544] ss:$8 sps:$4 sm:$0xff]   ;;  %v6693_v53 = vld [vmem:[%s13989_s4 + $0x560] ss:$8 sps:$4 sm:$0xff]  }
 0x55b   :  { %v4518_v45 = vadd.f32 %v11351_v1, %v4481_v46  ;;  %v4589_v13 = vadd.f32 %v4581_v20, %v4552_v42  ;;  %v4590_v11 = vadd.f32 %v4582_v24, %v4553_v30  ;;  %v4652_v25 = vmul.f32 %v15125_v5, %v4631_v22  ;;  %v15133_v20 = vld [vmem:[#allocation35_spill] sm:$0xff]  ;;  %v6686_v30 = vld [vmem:[%s13989_s4 + $0x534] ss:$8 sps:$4 sm:$0xff]  }
 0x55c   :  { %v4635_v36 = vsel %vm15127_vm1, %v4343_v7, 0.0  ;;  %v4623_v32 = vadd.f32 %v15128_v54, %v4586_v15  ;;  %v4622_v29 = vadd.f32 %v15129_v10, %v4585_v57  ;;  %vm15131_vm7 = vnez %v15130_v56  ;;  %v6681_v42 = vld [vmem:[%s13989_s4 + $0x520] ss:$8 sps:$4 sm:$0xff]   ;;  %v6695_v57 = vld [vmem:[%s13989_s4 + $0x564] ss:$8 sps:$4 sm:$0xff]   ;;  %vm15141_vm1 = vmmov %vm15115_vm9 }
 0x55d   :  { %v4555_v47 = vadd.f32 %v11420_v16, %v4518_v45  ;;  %v4637_v50 = vsel %vm15131_vm7, %v11409_v55, 0.0  ;;  %v4662_v40 = vadd.f32 %v4654_v31, %v4625_v49  ;;  %v4627_v1 = vadd.f32 %v15132_v9, %v4590_v11  ;;  %v6687_v15 = vld [vmem:[%s13989_s4 + $0x540] ss:$8 sps:$4 sm:$0xff]   ;;  %v6690_v31 = vld [vmem:[%s13989_s4 + $0x550] ss:$8 sps:$4 sm:$0xff]  }
 0x55e   :  { %v4656_v24 = vmul.f32 %v15125_v5, %v4635_v36  ;;  %v4554_v34 = vadd.f32 %v11401_v43, %v4517_v63  ;;  %v4660_v8 = vadd.f32 %v4652_v25, %v4623_v32  ;;  %v4659_v7 = vadd.f32 %v15133_v20, %v4622_v29  ;;  %v15135_v43 = vld [vmem:[#allocation62_spill] sm:$0xff]  ;;  %v6206_v45 = vld [vmem:[%s13990_s6 + $0xc] sm:$0x3]  ;;  %v15138_v25 = vld [vmem:[#allocation4_spill] sm:$0xff] }
 0x55f   :  { %v4592_v46 = vadd.f32 %v11358_v60, %v4555_v47  ;;  %v4626_v35 = vadd.f32 %v15134_v58, %v4589_v13  ;;  %v4658_v16 = vmul.f32 %v15125_v5, %v4637_v50  ;;  %v4636_v55 = vsel %vm7481_vm3, %v11397_v17, 0.0  ;;  %v6675_v17 = vld [vmem:[%s13989_s4 + $0x500] ss:$8 sps:$4 sm:$0xff]   ;;  %v6683_v63 = vld [vmem:[%s13989_s4 + $0x524] ss:$8 sps:$4 sm:$0xff]  }
 0x560   :  { %v4591_v26 = vadd.f32 %v11354_v27, %v4554_v34  ;;  %v4655_v14 = vmul.f32 %v11081_v48, %v4342_v3  ;;  %v4668_v19 = vpack.c.bf16 %v4662_v40, %v4660_v8  ;;  %v4667_v51 = vpack.c.bf16 %v4661_v4, %v4659_v7  ;;  %v6677_v3 = vld [vmem:[%s13989_s4 + $0x504] ss:$8 sps:$4 sm:$0xff]   ;;  %v6684_v4 = vld [vmem:[%s13989_s4 + $0x530] ss:$8 sps:$4 sm:$0xff]   ;;  %v6692_v5 = vld [vmem:[%s13989_s4 + $0x554] ss:$8 sps:$4 sm:$0xff]  }
 0x561   :  { %v4629_v28 = vadd.f32 %v15135_v43, %v4592_v46  ;;  %v4664_v39 = vadd.f32 %v4656_v24, %v4627_v1  ;;  %v4657_v60 = vmul.f32 %v11081_v48, %v4636_v55  ;;  %v6680_v48 = vld [vmem:[%s13989_s4 + $0x514] ss:$8 sps:$4 sm:$0xff]   ;;  %5609 = vmatprep.subr.bf16.mxu1 %v6677_v3  ;;  %v15137_v13 = vld [vmem:[#allocation3_spill] sm:$0xff]  ;;  %v4714_v36 = vrot.slane %v6206_v45, %v15138_v25  ;;  %v6696_v54 = vld [vmem:[%s13989_s4 + $0x570] ss:$8 sps:$4 sm:$0xff]  }
 0x562   :  { %v4628_v62 = vadd.f32 %v15136_v2, %v4591_v26  ;;  %v4663_v33 = vadd.f32 %v4655_v14, %v4626_v35  ;;  %4909 = vmatprep.mubr.bf16.mxu0 %v4668_v19  ;;  %5610 = vmatpush1.bf16.msra.mxu1 %v6675_v17  ;;  %v4710_v11 = vrot.slane %v6206_v45, %v15137_v13  ;;  %v6698_v32 = vld [vmem:[%s13989_s4 + $0x574] ss:$8 sps:$4 sm:$0xff]   ;;  %v6699_v34 = vld [vmem:[%s13989_s4 + $0x580] ss:$8 sps:$4 sm:$0xff]   ;;  %v6701_v8 = vld [vmem:[%s13989_s4 + $0x584] ss:$8 sps:$4 sm:$0xff]  }
 0x563   :  { %v4666_v49 = vadd.f32 %v4658_v16, %v4629_v28  ;;  %4910 = vmatmul.mubr.bf16.vlgmr.msra.gmra.mrb[24].mxu0 %v4667_v51  ;;  %5611 = vmatprep.subr.bf16.mxu1 %v6680_v48  ;;  %vm15139_vm0 = vcmp.lt.s32.totalorder %v14690_v37, 1  ;;  %v6702_v48 = vld [vmem:[%s13989_s4 + $0x590] ss:$8 sps:$4 sm:$0xff]  }
 0x564   :  { %v4665_v27 = vadd.f32 %v4657_v60, %v4628_v62  ;;  %vm15140_vm8 = vmmov %vm15139_vm0 }
 0x565   :  { %v4670_v59 = vpack.c.bf16 %v4666_v49, %v4664_v39 }
 0x566   :  { %v4669_v22 = vpack.c.bf16 %v4665_v27, %v4663_v33  ;;  %5612 = vmatpush1.bf16.msra.mxu1 %v6678_v6  ;;  %v6704_v6 = vld [vmem:[%s13989_s4 + $0x594] ss:$8 sps:$4 sm:$0xff]  }
 0x567   :  { %4919 = vmatprep.mubr.bf16.mxu0 %v4670_v59  ;;  %5613 = vmatprep.subr.bf16.mxu1 %v6683_v63 }
 0x56a   :  { %5614 = vmatpush1.bf16.msra.mxu1 %v6681_v42 }
 0x56b   :  { %4920 = vmatmul.mubr.bf16.gmra.mrb[28].mxu0 %v4669_v22  ;;  %5615 = vmatprep.subr.bf16.mxu1 %v6686_v30 }
 0x56e   :  { %5616 = vmatpush1.bf16.msra.mxu1 %v6684_v4 }
 0x56f   :  { %5617 = vmatprep.subr.bf16.mxu1 %v6689_v23 }
 0x572   :  { %5618 = vmatpush1.bf16.msra.mxu1 %v6687_v15 }
 0x573   :  { %5619 = vmatprep.subr.bf16.mxu1 %v6692_v5 }
 0x576   :  { %5620 = vmatpush1.bf16.msra.mxu1 %v6690_v31 }
 0x577   :  { %5621 = vmatprep.subr.bf16.mxu1 %v6695_v57 }
 0x57a   :  { %5622 = vmatpush1.bf16.msra.mxu1 %v6693_v53 }
 0x57b   :  { %5623 = vmatprep.subr.bf16.mxu1 %v6698_v32 }
 0x57e   :  { %5624 = vmatpush1.bf16.msra.mxu1 %v6696_v54 }
 0x57f   :  { %5625 = vmatprep.subr.bf16.mxu1 %v6701_v8 }
 0x582   :  { %5626 = vmatpush1.bf16.msra.mxu1 %v6699_v34 }
 0x583   :  { %5627 = vmatprep.subr.bf16.mxu1 %v6704_v6  ;;  %v15159_v6 = vld [vmem:[#allocation15_spill] sm:$0xff] }
 0x586   :  { %5628 = vmatpush1.bf16.msra.mxu1 %v6702_v48  ;;  %v15158_v48 = vld [vmem:[#allocation22_spill] sm:$0xff] }
 0x636   :  { %v4911_v10 = vpop.f32.mrb[24].mxu0 }
 0x637   :  { %v4912_v29 = vadd.f32 %v4911_v10, %v4710_v11  ;;  %v4913_v47 = vpop.f32.mrb[25].mxu0 }
 0x638   :  { %v4914_v50 = vadd.f32 %v4913_v47, %v4714_v36  ;;  %v4915_v40 = vpop.f32.mrb[26].mxu0 }
 0x639   :  { %v11637_v9 = vmax.f32 %v4912_v29, 0.0  ;;  %v4916_v1 = vadd.f32 %v4915_v40, %v4710_v11  ;;  %v4917_v24 = vpop.f32.mrb[27].mxu0 }
 0x63a   :  { %v11645_v20 = vmax.f32 %v4914_v50, 0.0  ;;  %v4918_v7 = vadd.f32 %v4917_v24, %v4714_v36  ;;  %v6707_v24 = vld [vmem:[%s13989_s4 + $0x5a4] ss:$8 sps:$4 sm:$0xff]  }
 0x63b   :  { %v11647_v46 = vmax.f32 %v4916_v1, 0.0  ;;  %4938 = vrot.lane.b32.xlu0 %v11637_v9, %s6723_s18  ;;  %v4986_v35 = vrot.slane %v11637_v9, 7  ;;  %v5002_v16 = vrot.slane %v11637_v9, 1  ;;  %v6705_v1 = vld [vmem:[%s13989_s4 + $0x5a0] ss:$8 sps:$4 sm:$0xff]   ;;  %5629 = vmatprep.subr.bf16.mxu1 %v6707_v24 }
 0x63c   :  { %v11651_v58 = vmax.f32 %v4918_v7, 0.0  ;;  %4970 = vrot.lane.b32.xlu1 %v11645_v20, %s6724_s19  ;;  %v4987_v14 = vrot.slane %v11645_v20, 7  ;;  %v5003_v19 = vrot.slane %v11645_v20, 1  ;;  %5630 = vmatpush1.bf16.msra.mxu1 %v6705_v1  ;;  %v2203_v1 = vrot.slane %v15158_v48, 7 }
 0x63d   :  { %v4988_v26 = vrot.slane %v11647_v46, 7  ;;  %v5004_v55 = vrot.slane %v11647_v46, 1 }
 0x63e   :  { %v4989_v51 = vrot.slane %v11651_v58, 7  ;;  %v5005_v43 = vrot.slane %v11651_v58, 1  ;;  %v4921_v28 = vpop.f32.mrb[28].mxu0 }
 0x63f   :  { %v11665_v39 = vsel %vm15115_vm9, %v5002_v16, %v5004_v55  ;;  %v4922_v2 = vadd.f32 %v4921_v28, %v4710_v11  ;;  %v4923_v62 = vpop.f32.mrb[29].mxu0  ;;  %4962 = vrot.lane.b32.xlu0 %v11637_v9, %s6724_s19  ;;  %v11677_v27 = vsel %vm15140_vm8, %v4986_v35, %v4988_v26  ;;  %vm15142_vm9 = vmmov %vm15141_vm1  ;;  %v15155_v28 = vld [vmem:[#allocation14_spill] sm:$0xff] }
 0x640   :  { %v4924_v60 = vadd.f32 %v4923_v62, %v4714_v36  ;;  %v4925_v33 = vpop.f32.mrb[30].mxu0  ;;  %4964 = vrot.lane.b32.xlu1 %v11647_v46, %s6724_s19  ;;  %v11673_v49 = vsel %vm15139_vm0, %v4987_v14, %v4989_v51  ;;  %v11681_v59 = vsel %vm15141_vm1, %v5003_v19, %v5005_v43  ;;  %vm15143_vm8 = vmmov %vm15139_vm0  ;;  %v6714_v62 = vld [vmem:[%s13989_s4 + $0x5d0] ss:$8 sps:$4 sm:$0xff]  }
 0x641   :  { %v11683_v22 = vmax.f32 %v4922_v2, 0.0  ;;  %v4926_v17 = vadd.f32 %v4925_v33, %v4710_v11  ;;  %v4927_v3 = vpop.f32.mrb[31].mxu0  ;;  %vm15144_vm1 = vmmov %vm15139_vm0  ;;  %v6716_v2 = vld [vmem:[%s13989_s4 + $0x5d4] ss:$8 sps:$4 sm:$0xff]   ;;  %v15157_v33 = vld [vmem:[#allocation18_spill] sm:$0xff] }
 0x642   :  { %v11691_v63 = vmax.f32 %v4924_v60, 0.0  ;;  %v4928_v42 = vadd.f32 %v4927_v3, %v4714_v36  ;;  %v15156_v60 = vld [vmem:[#allocation16_spill] sm:$0xff]  ;;  %v6717_v3 = vld [vmem:[%s13989_s4 + $0x5e0] ss:$8 sps:$4 sm:$0xff]  }
 0x643   :  { %v5006_v30 = vrot.slane %v11683_v22, 1  ;;  %v11694_v4 = vmax.f32 %v4926_v17, 0.0  ;;  %4946 = vrot.lane.b32.xlu0 %v11645_v20, %s6723_s18  ;;  %v4990_v23 = vrot.slane %v11683_v22, 7  ;;  %v6719_v17 = vld [vmem:[%s13989_s4 + $0x5e4] ss:$8 sps:$4 sm:$0xff]   ;;  %v2215_v56 = vrot.slane %v15156_v60, 1 }
 0x644   :  { %v11699_v15 = vmax.f32 %v4928_v42, 0.0  ;;  %4948 = vrot.lane.b32.xlu1 %v11651_v58, %s6723_s18  ;;  %v4991_v31 = vrot.slane %v11691_v63, 7  ;;  %v5007_v45 = vrot.slane %v11691_v63, 1  ;;  %v6720_v42 = vld [vmem:[%s13989_s4 + $0x5f0] ss:$8 sps:$4 sm:$0xff]  }
 0x645   :  { %v11705_v5 = vsel %vm15142_vm9, %v5004_v55, %v5006_v30  ;;  %v4992_v53 = vrot.slane %v11694_v4, 7  ;;  %vm15145_vm9 = vmmov %vm15139_vm0  ;;  %v11734_v29 = vsel %vm15139_vm0, %v4988_v26, %v4990_v23  ;;  %v5008_v47 = vrot.slane %v11694_v4, 1  ;;  %v6710_v26 = vld [vmem:[%s13989_s4 + $0x5b4] ss:$8 sps:$4 sm:$0xff]   ;;  %v6708_v55 = vld [vmem:[%s13989_s4 + $0x5b0] ss:$8 sps:$4 sm:$0xff]  }
 0x646   :  { %v4993_v57 = vrot.slane %v11699_v15, 7  ;;  %v5009_v32 = vrot.slane %v11699_v15, 1  ;;  %5631 = vmatprep.subr.bf16.mxu1 %v6710_v26  ;;  %v2199_v26 = vrot.slane %v15156_v60, 7 }
 0x647   :  { %v11713_v11 = vsel %vm15139_vm0, %v4992_v53, %v4986_v35  ;;  %4940 = vrot.lane.b32.xlu0 %v11647_v46, %s6723_s18  ;;  %v11719_v36 = vsel %vm15143_vm8, %v4990_v23, %v4992_v53  ;;  %vm15146_vm8 = vmmov %vm15139_vm0  ;;  %5632 = vmatpush1.bf16.msra.mxu1 %v6708_v55  ;;  %v2204_v55 = vrot.slane %v15155_v28, 7 }
 0x648   :  { %v11723_v54 = vsel %vm15144_vm1, %v4993_v57, %v4987_v14  ;;  %4944 = vrot.lane.b32.xlu1 %v11694_v4, %s6723_s18  ;;  %v11730_v10 = vsel %vm15145_vm9, %v4991_v31, %v4993_v57  ;;  %v11739_v50 = vsel %vm15146_vm8, %v4989_v51, %v4991_v31  ;;  %vm15147_vm1 = vcmp.lt.s32.totalorder %v14690_v37, 7  ;;  %v6711_v14 = vld [vmem:[%s13989_s4 + $0x5c0] ss:$8 sps:$4 sm:$0xff]   ;;  %v15153_v51 = vld [vmem:[#allocation17_spill] sm:$0xff] }
 0x649   :  { %v11745_v40 = vsel %vm15147_vm1, %v5005_v43, %v5007_v45  ;;  %vm15148_vm9 = vmmov %vm15147_vm1  ;;  %v15154_v43 = vld [vmem:[#allocation21_spill] sm:$0xff]  ;;  %v2216_v23 = vrot.slane %v15153_v51, 1  ;;  %v2217_v31 = vrot.slane %v15157_v33, 1  ;;  %v2219_v57 = vrot.slane %v15158_v48, 1 }
 0x64a   :  { %v11757_v34 = vsel %vm15148_vm9, %v5007_v45, %v5009_v32  ;;  %vm15149_vm0 = vmmov %vm15147_vm1  ;;  %v2218_v53 = vrot.slane %v15154_v43, 1  ;;  %v2200_v45 = vrot.slane %v15153_v51, 7 }
 0x64b   :  { %4972 = vrot.lane.b32.xlu0 %v11651_v58, %s6724_s19  ;;  %v11761_v8 = vsel %vm15149_vm0, %v5009_v32, %v5003_v19  ;;  %vm15150_vm8 = vmmov %vm15149_vm0  ;;  %v15152_v19 = vld [vmem:[#allocation13_spill] sm:$0xff]  ;;  %v2201_v32 = vrot.slane %v15157_v33, 7 }
 0x64c   :  { %4952 = vrot.lane.b32.xlu1 %v11699_v15, %s6723_s18  ;;  %v11765_v7 = vsel %vm15150_vm8, %v5006_v30, %v5008_v47  ;;  %vm15151_vm1 = vmmov %vm15149_vm0  ;;  %v6722_v30 = vld [vmem:[%s13989_s4 + $0x5f4] ss:$8 sps:$4 sm:$0xff]   ;;  %v2198_v24 = vrot.slane %v15152_v19, 7  ;;  %vm15163_vm8 = vcmp.lt.s32.totalorder %v14690_v37, 1 }
 0x64d   :  { %v11769_v35 = vsel %vm15151_vm1, %v5008_v47, %v5002_v16  ;;  %v6713_v16 = vld [vmem:[%s13989_s4 + $0x5c4] ss:$8 sps:$4 sm:$0xff]   ;;  %v2202_v47 = vrot.slane %v15154_v43, 7  ;;  %vm15160_vm9 = vmmov %vm15149_vm0 }
 0x64e   :  { %5633 = vmatprep.subr.bf16.mxu1 %v6713_v16  ;;  %v2205_v16 = vrot.slane %v15159_v6, 7  ;;  %vm15165_vm1 = vmmov %vm15163_vm8 }
 0x64f   :  { %4968 = vrot.lane.b32.xlu0 %v11694_v4, %s6724_s19  ;;  %5634 = vmatpush1.bf16.msra.mxu1 %v6711_v14  ;;  %v11859_v14 = vsel %vm15160_vm9, %v2216_v23, %v2218_v53  ;;  %vm15167_vm9 = vmmov %vm15165_vm1 }
 0x650   :  { %4976 = vrot.lane.b32.xlu1 %v11699_v15, %s6724_s19  ;;  %5635 = vmatprep.subr.bf16.mxu1 %v6716_v2  ;;  %15161 = vst [vmem:[#allocation53_spill] sm:$0xff] %v11859_v14  ;;  %v11863_v2 = vsel %vm15149_vm0, %v2217_v31, %v2219_v57  ;;  %vm15169_vm0 = vmmov %vm15165_vm1 }
 0x651   :  { %15162 = vst [vmem:[#allocation19_spill] sm:$0xff] %v11863_v2  ;;  %vm15171_vm7 = vmmov %vm15169_vm0 }
 0x653   :  { %4942 = vrot.lane.b32.xlu0 %v11683_v22, %s6723_s18  ;;  %5636 = vmatpush1.bf16.msra.mxu1 %v6714_v62  ;;  %v2220_v62 = vrot.slane %v15155_v28, 1 }
 0x654   :  { %4950 = vrot.lane.b32.xlu1 %v11691_v63, %s6723_s18  ;;  %5637 = vmatprep.subr.bf16.mxu1 %v6719_v17  ;;  %v2221_v17 = vrot.slane %v15159_v6, 1 }
 0x657   :  { %4966 = vrot.lane.b32.xlu0 %v11683_v22, %s6724_s19  ;;  %5638 = vmatpush1.bf16.msra.mxu1 %v6717_v3  ;;  %v11869_v3 = vsel %vm15163_vm8, %v2200_v45, %v2202_v47  ;;  %vm15173_vm8 = vmmov %vm15169_vm0 }
 0x658   :  { %4974 = vrot.lane.b32.xlu1 %v11691_v63, %s6724_s19  ;;  %5639 = vmatprep.subr.bf16.mxu1 %v6722_v30  ;;  %15164 = vst [vmem:[#allocation64_spill] sm:$0xff] %v11869_v3  ;;  %v2214_v30 = vrot.slane %v15152_v19, 1 }
 0x65b   :  { %2150 = vrot.lane.b32.xlu0 %v15152_v19, %s6723_s18  ;;  %5640 = vmatpush1.bf16.msra.mxu1 %v6720_v42  ;;  %v11873_v42 = vsel %vm15165_vm1, %v2201_v32, %v2203_v1 }
 0x65c   :  { %2152 = vrot.lane.b32.xlu1 %v15153_v51, %s6723_s18  ;;  %15166 = vst [vmem:[#allocation74_spill] sm:$0xff] %v11873_v42  ;;  %v11935_v42 = vsel %vm15173_vm8, %v2202_v47, %v2204_v55 }
 0x65d   :  { %15184 = vst [vmem:[#allocation23_spill] sm:$0xff] %v11935_v42 }
 0x65f   :  { %2154 = vrot.lane.b32.xlu0 %v15154_v43, %s6723_s18 }
 0x660   :  { %2156 = vrot.lane.b32.xlu1 %v15155_v28, %s6723_s18 }
 0x663   :  { %2158 = vrot.lane.b32.xlu0 %v15156_v60, %s6723_s18 }
 0x664   :  { %2160 = vrot.lane.b32.xlu1 %v15157_v33, %s6723_s18 }
 0x667   :  { %2162 = vrot.lane.b32.xlu0 %v15158_v48, %s6723_s18 }
 0x668   :  { %2164 = vrot.lane.b32.xlu1 %v15159_v6, %s6723_s18 }
 0x66b   :  { %2174 = vrot.lane.b32.xlu0 %v15152_v19, %s6724_s19 }
 0x66c   :  { %2176 = vrot.lane.b32.xlu1 %v15153_v51, %s6724_s19 }
 0x66f   :  { %2178 = vrot.lane.b32.xlu0 %v15154_v43, %s6724_s19  ;;  %v11891_v43 = vsel %vm15173_vm8, %v2199_v26, %v2201_v32 }
 0x670   :  { %2180 = vrot.lane.b32.xlu1 %v15155_v28, %s6724_s19  ;;  %v11883_v28 = vsel %vm15169_vm0, %v2205_v16, %v2199_v26  ;;  %15174 = vst [vmem:[#allocation40_spill] sm:$0xff] %v11891_v43  ;;  %v5140_v43 = vsel %vm7465_vm2, %v11713_v11, 0.0 }
 0x671   :  { %15170 = vst [vmem:[#allocation28_spill] sm:$0xff] %v11883_v28 }
 0x673   :  { %2182 = vrot.lane.b32.xlu0 %v15156_v60, %s6724_s19  ;;  %v5984_v60 = vld [vmem:[%s13990_s6 + $0x6] sm:$0x3] }
 0x674   :  { %2184 = vrot.lane.b32.xlu1 %v15157_v33, %s6724_s19  ;;  %v11945_v32 = vrot.slane %v5984_v60, %v15138_v25 }
 0x676   :  { %15188 = vst [vmem:[#allocation73_spill] sm:$0xff] %v11945_v32 }
 0x677   :  { %2186 = vrot.lane.b32.xlu0 %v15158_v48, %s6724_s19  ;;  %v11879_v48 = vsel %vm15167_vm9, %v2204_v55, %v2198_v24 }
 0x678   :  { %2188 = vrot.lane.b32.xlu1 %v15159_v6, %s6724_s19  ;;  %15168 = vst [vmem:[#allocation20_spill] sm:$0xff] %v11879_v48  ;;  %v11887_v6 = vsel %vm15171_vm7, %v2198_v24, %v2200_v45  ;;  %v6239_v24 = vld [vmem:[%s13991_s5 + $0x62] sm:$0x3]  ;;  %vm15175_vm7 = vcmp.lt.s32.totalorder %v14690_v37, 7  ;;  %v11942_v45 = vrot.slane %v5984_v60, %v15137_v13 }
 0x679   :  { %15172 = vst [vmem:[#allocation72_spill] sm:$0xff] %v11887_v6  ;;  %v11913_v26 = vsel %vm15175_vm7, %v2220_v62, %v2214_v30  ;;  %vm15177_vm1 = vmmov %vm15175_vm7  ;;  %v5088_v55 = vrot.slane %v6239_v24, %v15137_v13  ;;  %v5092_v60 = vrot.slane %v6239_v24, %v15138_v25  ;;  %v5144_v6 = vsel %vm7485_vm4, %v11734_v29, 0.0 }
 0x67a   :  { %15176 = vst [vmem:[#allocation37_spill] sm:$0xff] %v11913_v26  ;;  %v11917_v19 = vsel %vm15177_vm1, %v2221_v17, %v2215_v56  ;;  %vm15180_vm9 = vmmov %vm15177_vm1 }
 0x67b   :  { %15178 = vst [vmem:[#allocation65_spill] sm:$0xff] %v11917_v19  ;;  %v11927_v2 = vsel %vm15180_vm9, %v2218_v53, %v2220_v62  ;;  %vm15182_vm0 = vmmov %vm15177_vm1  ;;  %v6241_v53 = vld [vmem:[%s13991_s5 + $0x5c] sm:$0x3]  ;;  %v6243_v62 = vld [vmem:[%s13991_s5 + $0x60] sm:$0x3] }
 0x67c   :  { %15181 = vst [vmem:[#allocation47_spill] sm:$0xff] %v11927_v2  ;;  %v11931_v14 = vsel %vm15182_vm0, %v2219_v57, %v2221_v17  ;;  %vm15185_vm7 = vmmov %vm15173_vm8  ;;  %v6246_v57 = vld [vmem:[%s13991_s5 + $0x68] sm:$0x3] }
 0x67d   :  { %15183 = vst [vmem:[#allocation69_spill] sm:$0xff] %v11931_v14  ;;  %v11939_v3 = vsel %vm15185_vm7, %v2203_v1, %v2205_v16  ;;  %15187 = vst [vmem:[#allocation24_spill] sm:$0xff] %v11942_v45  ;;  %v6244_v16 = vld [vmem:[%s13991_s5 + $0x64] sm:$0x3]  ;;  %v15199_v14 = vld [vmem:[#allocation79_spill] sm:$0xff]  ;;  %v5339_v19 = vrot.slane %v6246_v57, %v15137_v13  ;;  %vm15208_vm7 = vcmp.lt.s32.totalorder %v14669_v52, 16 }
 0x67e   :  { %15186 = vst [vmem:[#allocation66_spill] sm:$0xff] %v11939_v3  ;;  %vm15189_vm1 = vmmov %vm15182_vm0  ;;  %v11989_v3 = vadd.f32 %v15199_v14, %v11945_v32  ;;  %v12002_v14 = vrot.slane %v6244_v16, %v15137_v13 }
 0x67f   :  { %v11955_v47 = vsel %vm15189_vm1, %v2214_v30, %v2216_v23  ;;  %vm15191_vm9 = vmmov %vm15182_vm0  ;;  %v15195_v30 = vld [vmem:[#allocation60_spill] sm:$0xff]  ;;  %v5154_v23 = vrot.slane %v6241_v53, %v15137_v13  ;;  %vm15204_vm0 = vcmp.lt.s32.totalorder %v14669_v52, 112 }
 0x680   :  { %15190 = vst [vmem:[#allocation81_spill] sm:$0xff] %v11955_v47  ;;  %v11959_v1 = vsel %vm15191_vm9, %v2215_v56, %v2217_v31  ;;  %v15193_v31 = vld [vmem:[#allocation57_spill] sm:$0xff]  ;;  %v11981_v24 = vadd.f32 %v15195_v30, %v11945_v32  ;;  %15200 = vst [vmem:[#allocation67_spill] sm:$0xff] %v11989_v3  ;;  %v5158_v30 = vrot.slane %v6241_v53, %v15138_v25  ;;  %vm15216_vm9 = vcmp.lt.s32.totalorder %v14715_v38, 240 }
 0x681   :  { %15192 = vst [vmem:[#allocation71_spill] sm:$0xff] %v11959_v1  ;;  %v11977_v17 = vadd.f32 %v15193_v31, %v11942_v45  ;;  %v15197_v1 = vld [vmem:[#allocation59_spill] sm:$0xff]  ;;  %v6240_v56 = vld [vmem:[%s13991_s5 + $0x5a] sm:$0x3]  ;;  %v6245_v31 = vld [vmem:[%s13991_s5 + $0x66] sm:$0x3]  ;;  %v12005_v32 = vrot.slane %v6244_v16, %v15138_v25  ;;  %v12011_v3 = vrot.slane %v6243_v62, %v15138_v25  ;;  %v12017_v53 = vmul.f32 %v5092_v60, %v11645_v20 }
 0x682   :  { %15196 = vst [vmem:[#allocation29_spill] sm:$0xff] %v11981_v24  ;;  %v11985_v47 = vadd.f32 %v15197_v1, %v11942_v45  ;;  %v5343_v1 = vrot.slane %v6246_v57, %v15138_v25  ;;  %v12008_v45 = vrot.slane %v6243_v62, %v15137_v13  ;;  %v12020_v57 = vmul.f32 %v5088_v55, %v11647_v46  ;;  %v6242_v20 = vld [vmem:[%s13991_s5 + $0x5e] sm:$0x3]  ;;  %vm15205_vm8 = vmmov %vm15204_vm0 }
 0x683   :  { %15194 = vst [vmem:[#allocation43_spill] sm:$0xff] %v11977_v17  ;;  %v12023_v2 = vrot.slane %v6240_v56, %v15137_v13  ;;  %v12026_v16 = vmul.f32 %v5092_v60, %v11651_v58  ;;  %v12029_v28 = vrot.slane %v6240_v56, %v15138_v25  ;;  %v12032_v62 = vrot.slane %v6245_v31, %v15137_v13  ;;  %v6247_v58 = vld [vmem:[%s13991_s5 + $0x6a] sm:$0x3]  ;;  %vm15209_vm1 = vmmov %vm15208_vm7 }
 0x684   :  { %15198 = vst [vmem:[#allocation27_spill] sm:$0xff] %v11985_v47  ;;  %v12014_v47 = vmul.f32 %v5088_v55, %v11637_v9  ;;  %v12035_v9 = vrot.slane %v6245_v31, %v15138_v25  ;;  %v12041_v46 = vmul.f32 %v5158_v30, %v11673_v49  ;;  %v12047_v56 = vmul.f32 %v5154_v23, %v11677_v27 }
 0x685   :  { %v12050_v48 = vmul.f32 %v5343_v1, %v11681_v59  ;;  %v12053_v31 = vmul.f32 %v5339_v19, %v11665_v39  ;;  %v12056_v24 = vmul.f32 %v5088_v55, %v11683_v22  ;;  %v12059_v17 = vmul.f32 %v5092_v60, %v11691_v63 }
 0x686   :  { %v5141_v27 = vsel %vm7465_vm2, %v11723_v54, 0.0  ;;  %v12068_v59 = vmul.f32 %v5088_v55, %v11694_v4  ;;  %v12073_v22 = vrot.slane %v6242_v20, %v15137_v13  ;;  %v12076_v63 = vrot.slane %v6242_v20, %v15138_v25 }
 0x687   :  { %15201 = vst [vmem:[#allocation31_spill] sm:$0xff] %v12050_v48  ;;  %15202 = vst [vmem:[#allocation25_spill] sm:$0xff] %v12053_v31  ;;  %v12082_v11 = vrot.slane %v6247_v58, %v15137_v13  ;;  %v12085_v54 = vmul.f32 %v5092_v60, %v11699_v15  ;;  %v5145_v4 = vsel %vm7485_vm4, %v11739_v50, 0.0  ;;  %v5327_v55 = vsel %vm7489_vm5, %v11705_v5, 0.0 }
 0x688   :  { %v12093_v20 = vmul.f32 %v5154_v23, %v5140_v43  ;;  %v12095_v31 = vmul.f32 %v5158_v30, %v5141_v27  ;;  %v12098_v29 = vmul.f32 %v5158_v30, %v11730_v10  ;;  %v5328_v15 = vsel %vm7489_vm5, %v11745_v40, 0.0 }
 0x689   :  { %v12103_v13 = vmul.f32 %v5154_v23, %v5144_v6  ;;  %v12106_v50 = vmul.f32 %v5154_v23, %v11719_v36  ;;  %v5332_v5 = vsel %vm7481_vm3, %v11761_v8, 0.0  ;;  %v5331_v43 = vsel %vm7481_vm3, %v11769_v35, 0.0 }
 0x68a   :  { %v12122_v27 = vmul.f32 %v5158_v30, %v5145_v4  ;;  %v12124_v36 = vmul.f32 %v5339_v19, %v5327_v55  ;;  %v12134_v23 = vmul.f32 %v5343_v1, %v5328_v15  ;;  %v12137_v51 = vmul.f32 %v5343_v1, %v11757_v34 }
 0x68b   :  { %15203 = vst [vmem:[#allocation70_spill] sm:$0xff] %v12106_v50  ;;  %v12142_v30 = vmul.f32 %v5343_v1, %v5332_v5  ;;  %v12147_v4 = vmul.f32 %v5339_v19, %v5331_v43 }
 0x68c   :  { %15206 = vst [vmem:[#allocation44_spill] sm:$0xff] %v12122_v27  ;;  %15207 = vst [vmem:[#allocation75_spill] sm:$0xff] %v12124_v36 }
 0x68d   :  { %15210 = vst [vmem:[#allocation41_spill] sm:$0xff] %v12134_v23  ;;  %15211 = vst [vmem:[#allocation42_spill] sm:$0xff] %v12137_v51 }
 0x68e   :  { %15213 = vst [vmem:[#allocation33_spill] sm:$0xff] %v12142_v30  ;;  %15215 = vst [vmem:[#allocation5_spill] sm:$0xff] %v12147_v4 }
 0x6ad   :  { %v4939_v26 = vpop.permute.xlu0 %4938 }
 0x6ae   :  { %v4971_v42 = vpop.permute.xlu1 %4970 }
 0x6b1   :  { %v4963_v49 = vpop.permute.xlu0 %4962 }
 0x6b2   :  { %v12070_v39 = vpop.permute.xlu1 %4964  ;;  %v12116_v10 = vsel %vm15204_vm0, %v4963_v49, %v4971_v42  ;;  %v12120_v40 = vsel %vm15205_vm8, %v4971_v42, %v4963_v49  ;;  %v12140_v42 = vrot.slane %v6247_v58, %v15138_v25  ;;  %v12145_v49 = vmul.f32 %v5339_v19, %v11765_v7  ;;  %vm15217_vm0 = vmmov %vm15209_vm1 }
 0x6b3   :  { %v5252_v34 = vsel %vm15216_vm9, %v12120_v40, 0.0  ;;  %vm15218_vm8 = vmmov %vm15217_vm0  ;;  %v12172_v25 = vmul.f32 %v12002_v14, %v12116_v10  ;;  %v15237_v36 = vrot.slane %v12116_v10, 7 }
 0x6b4   :  { %15212 = vst [vmem:[#allocation56_spill] sm:$0xff] %v12140_v42  ;;  %15214 = vst [vmem:[#allocation76_spill] sm:$0xff] %v12145_v49  ;;  %v12175_v4 = vmul.f32 %v12005_v32, %v5252_v34 }
 0x6b5   :  { %v4947_v60 = vpop.permute.xlu0 %4946 }
 0x6b6   :  { %v4949_v6 = vpop.permute.xlu1 %4948  ;;  %v12128_v8 = vsel %vm15208_vm7, %v4939_v26, %v4947_v60  ;;  %v12132_v35 = vsel %vm15209_vm1, %v4947_v60, %v4939_v26  ;;  %15219 = vst [vmem:[#allocation6_spill] sm:$0xff] %v12175_v4  ;;  %vm15220_vm7 = vcmp.ge.s32.totalorder %v14669_v52, 16  ;;  %vm15222_vm1 = vcmp.lt.s32.totalorder %v14690_v37, 1 }
 0x6b7   :  { %v5019_v1 = vrot.slane %v12128_v8, 7  ;;  %vm15223_vm9 = vmmov %vm15222_vm1  ;;  %v15225_v30 = vrot.slane %v12132_v35, 1  ;;  %v5035_v48 = vrot.slane %v12128_v8, 1 }
 0x6b9   :  { %v4941_v60 = vpop.permute.xlu0 %4940 }
 0x6ba   :  { %v12159_v7 = vsel %vm15217_vm0, %v4941_v60, %v4949_v6  ;;  %v12163_v19 = vsel %vm15218_vm8, %v4949_v6, %v4941_v60  ;;  %v4945_v5 = vpop.permute.xlu1 %4944  ;;  %v5214_v6 = vsel %vm15220_vm7, %v12132_v35, 0.0  ;;  %v15221_v60 = vrot.slane %v12132_v35, 7  ;;  %vm15228_vm8 = vmmov %vm15220_vm7 }
 0x6bb   :  { %v14208_v15 = vrot.slane %v12163_v19, 7  ;;  %v14209_v26 = vrot.slane %v12159_v7, 7  ;;  %v15224_v34 = vrot.slane %v12163_v19, 1  ;;  %vm15226_vm0 = vcmp.lt.s32.totalorder %v14690_v37, 7 }
 0x6bc   :  { %v5216_v42 = vsel %vm15220_vm7, %v12163_v19, 0.0  ;;  %v12217_v61 = vmul.f32 %v12008_v45, %v5214_v6  ;;  %v5238_v6 = vmul.f32 %v12011_v3, %v12159_v7 }
 0x6bd   :  { %v5030_v43 = vsel %vm15222_vm1, %v15221_v60, %v14208_v15  ;;  %v5031_v58 = vsel %vm15223_vm9, %v5019_v1, %v14209_v26  ;;  %v5046_v49 = vsel %vm15226_vm0, %v15225_v30, %v15224_v34  ;;  %v4973_v51 = vpop.permute.xlu0 %4972  ;;  %v12200_v60 = vmul.f32 %v12011_v3, %v12128_v8  ;;  %vm15229_vm1 = vmmov %vm15220_vm7 }
 0x6be   :  { %v5105_v15 = vsel %vm15228_vm8, %v5030_v43, 0.0  ;;  %v5127_v26 = vmul.f32 %v12029_v28, %v5031_v58  ;;  %v5288_v30 = vsel %vm15229_vm1, %v5046_v49, 0.0  ;;  %vm15230_vm9 = vcmp.lt.s32.totalorder %v14669_v52, 112  ;;  %v4953_v8 = vpop.permute.xlu1 %4952 }
 0x6bf   :  { %15227 = vst [vmem:[#allocation7_spill] sm:$0xff] %v12200_v60  ;;  %v5126_v55 = vmul.f32 %v12023_v2, %v5105_v15  ;;  %v12214_v34 = vsel %vm15230_vm9, %v12070_v39, %v4973_v51  ;;  %vm15232_vm0 = vmmov %vm15230_vm9  ;;  %v15234_v49 = vrot.slane %v12159_v7, 1  ;;  %vm15235_vm8 = vcmp.lt.s32.totalorder %v14690_v37, 7 }
 0x6c0   :  { %15231 = vst [vmem:[#allocation8_spill] sm:$0xff] %v12214_v34  ;;  %v5135_v58 = vadd.f32 %v5127_v26, %v12026_v16  ;;  %v12223_v15 = vsel %vm15232_vm0, %v4973_v51, %v12070_v39  ;;  %v14211_v43 = vrot.slane %v12214_v34, 7  ;;  %v5237_v26 = vmul.f32 %v12008_v45, %v5216_v42 }
 0x6c1   :  { %15233 = vst [vmem:[#allocation9_spill] sm:$0xff] %v12223_v15  ;;  %v5047_v23 = vsel %vm15235_vm8, %v5035_v48, %v15234_v49  ;;  %v5134_v4 = vadd.f32 %v5126_v55, %v12020_v57  ;;  %v14212_v60 = vrot.slane %v12223_v15, 7  ;;  %v4969_v16 = vpop.permute.xlu0 %4968  ;;  %v12236_v51 = vmul.f32 %v12032_v62, %v5288_v30 }
 0x6c2   :  { %v5172_v39 = vadd.f32 %v12041_v46, %v5135_v58  ;;  %vm15238_vm7 = vcmp.lt.s32.totalorder %v14690_v37, 1  ;;  %v15239_v55 = vrot.slane %v12120_v40, 7  ;;  %v12255_v58 = vmul.f32 %v12035_v9, %v5047_v23  ;;  %v4977_v23 = vpop.permute.xlu1 %4976 }
 0x6c3   :  { %15236 = vst [vmem:[#allocation10_spill] sm:$0xff] %v12236_v51  ;;  %v5062_v57 = vsel %vm15238_vm7, %v15237_v36, %v14211_v43  ;;  %vm15240_vm1 = vmmov %vm15238_vm7  ;;  %v5171_v30 = vadd.f32 %v12047_v56, %v5134_v4  ;;  %vm15242_vm9 = vcmp.lt.s32.totalorder %v14715_v38, 240  ;;  %vm15243_vm0 = vcmp.lt.s32.totalorder %v14669_v52, 16 }
 0x6c4   :  { %v5063_v49 = vsel %vm15240_vm1, %v15239_v55, %v14212_v60  ;;  %v5200_v46 = vmul.f32 %v12073_v22, %v5062_v57  ;;  %15241 = vst [vmem:[#allocation11_spill] sm:$0xff] %v12255_v58  ;;  %v12262_v43 = vsel %vm15243_vm0, %v4945_v5, %v4953_v8  ;;  %vm15244_vm8 = vmmov %vm15243_vm0  ;;  %vm15248_vm1 = vcmp.lt.s32.totalorder %v14690_v37, 7 }
 0x6c5   :  { %v5180_v36 = vsel %vm15242_vm9, %v5063_v49, 0.0  ;;  %v12267_v56 = vsel %vm15244_vm8, %v4953_v8, %v4945_v5  ;;  %v5025_v4 = vrot.slane %v12262_v43, 7  ;;  %vm15245_vm7 = vmmov %vm15242_vm9  ;;  %vm15249_vm9 = vcmp.lt.s32.totalorder %v14690_v37, 1  ;;  %v4943_v0 = vpop.permute.xlu0 %4942 }
 0x6c6   :  { %v5201_v55 = vmul.f32 %v12076_v63, %v5180_v36  ;;  %v5208_v60 = vadd.f32 %v5200_v46, %v5171_v30  ;;  %v5254_v57 = vsel %vm15245_vm7, %v12223_v15, 0.0  ;;  %v5024_v49 = vrot.slane %v12267_v56, 7  ;;  %vm15251_vm0 = vmmov %vm15249_vm9 }
 0x6c7   :  { %v15246_v36 = vrot.slane %v12214_v34, 1  ;;  %v15247_v30 = vrot.slane %v12116_v10, 1  ;;  %v5033_v58 = vsel %vm15249_vm9, %v5025_v4, %v5019_v1  ;;  %v5274_v50 = vmul.f32 %v12002_v14, %v12214_v34  ;;  %vm15255_vm7 = vmmov %vm15248_vm1 }
 0x6c8   :  { %v5209_v8 = vadd.f32 %v5201_v55, %v5172_v39  ;;  %v5245_v46 = vadd.f32 %v5237_v26, %v5208_v60  ;;  %v15250_v51 = vrot.slane %v12132_v35, 7  ;;  %v5104_v44 = vsel %vm7465_vm2, %v5033_v58, 0.0  ;;  %vm15261_vm9 = vmmov %vm15248_vm1 }
 0x6c9   :  { %v5078_v5 = vsel %vm15248_vm1, %v15247_v30, %v15246_v36  ;;  %vm15252_vm8 = vcmp.ge.s32.totalorder %v14669_v52, 16  ;;  %v15253_v60 = vrot.slane %v12223_v15, 1  ;;  %v15254_v1 = vrot.slane %v12120_v40, 1 }
 0x6ca   :  { %v5032_v42 = vsel %vm15251_vm0, %v5024_v49, %v15250_v51  ;;  %v5220_v39 = vsel %vm15252_vm8, %v12267_v56, 0.0  ;;  %v5275_v55 = vmul.f32 %v12005_v32, %v5254_v57  ;;  %v5125_v30 = vmul.f32 %v12029_v28, %v5104_v44 }
 0x6cb   :  { %v12301_v26 = vsel %vm15255_vm7, %v15254_v1, %v15253_v60  ;;  %v5103_v51 = vsel %vm7990_vm10, %v5032_v42, 0.0  ;;  %v12308_v58 = vmul.f32 %v12082_v11, %v5078_v5  ;;  %v15258_v34 = vrot.slane %v12132_v35, 1  ;;  %v4951_v35 = vpop.permute.xlu1 %4950 }
 0x6cc   :  { %v15259_v15 = vrot.slane %v12267_v56, 1  ;;  %v15260_v60 = vrot.slane %v12262_v43, 1  ;;  %v5124_v1 = vmul.f32 %v12023_v2, %v5103_v51  ;;  %v5246_v42 = vadd.f32 %v5238_v6, %v5209_v8 }
 0x6cd   :  { %15257 = vst [vmem:[#allocation12_spill] sm:$0xff] %v12308_v58  ;;  %v12321_v36 = vadd.f32 %v5274_v50, %v5245_v46  ;;  %v5133_v44 = vadd.f32 %v5125_v30, %v12017_v53  ;;  %v12325_v5 = vmul.f32 %v12008_v45, %v5220_v39  ;;  %vm15262_vm0 = vcmp.lt.s32.totalorder %v14669_v52, 112  ;;  %v4967_v46 = vpop.permute.xlu0 %4966 }
 0x6ce   :  { %v5048_v27 = vsel %vm15248_vm1, %v15259_v15, %v15258_v34  ;;  %v5049_v57 = vsel %vm15261_vm9, %v15260_v60, %v5035_v48  ;;  %v5132_v58 = vadd.f32 %v5124_v1, %v12014_v47  ;;  %v12330_v34 = vmul.f32 %v12011_v3, %v12262_v43  ;;  %vm15263_vm8 = vmmov %vm15262_vm0 }
 0x6cf   :  { %v12334_v48 = vsel %vm15262_vm0, %v4969_v16, %v4977_v23  ;;  %v12338_v50 = vsel %vm15263_vm8, %v4977_v23, %v4969_v16  ;;  %v5294_v53 = vsel %vm8015_vm11, %v5048_v27, 0.0  ;;  %v5295_v6 = vsel %vm7481_vm3, %v5049_v57, 0.0 }
 0x6d0   :  { %v14219_v47 = vrot.slane %v12334_v48, 7  ;;  %v14218_v8 = vrot.slane %v12338_v50, 7  ;;  %v14220_v39 = vrot.slane %v12334_v48, 1  ;;  %v5169_v51 = vadd.f32 %v12093_v20, %v5132_v58 }
 0x6d1   :  { %v5170_v30 = vadd.f32 %v12095_v31, %v5133_v44  ;;  %vm15265_vm7 = vcmp.lt.s32.totalorder %v14669_v52, 16  ;;  %v12351_v23 = vadd.f32 %v5275_v55, %v5246_v42  ;;  %v15266_v27 = vrot.slane %v12116_v10, 7  ;;  %v4975_v31 = vpop.permute.xlu1 %4974 }
 0x6d2   :  { %v4956_v16 = vsel %vm15265_vm7, %v4943_v0, %v4951_v35  ;;  %vm15267_vm1 = vcmp.lt.s32.totalorder %v14690_v37, 1  ;;  %v15268_v57 = vrot.slane %v12120_v40, 7  ;;  %v12367_v58 = vmul.f32 %v12032_v62, %v5294_v53  ;;  %vm15272_vm8 = vmmov %vm15265_vm7 }
 0x6d3   :  { %v5064_v60 = vsel %vm15267_vm1, %v14219_v47, %v15266_v27  ;;  %vm15269_vm9 = vmmov %vm15267_vm1  ;;  %vm15271_vm0 = vcmp.lt.s32.totalorder %v14715_v38, 240  ;;  %v4960_v42 = vsel %vm15272_vm8, %v4951_v35, %v4943_v0  ;;  %v5023_v47 = vrot.slane %v4956_v16, 7 }
 0x6d4   :  { %v5065_v20 = vsel %vm15269_vm9, %v14218_v8, %v15268_v57  ;;  %15270 = vst [vmem:[#allocation32_spill] sm:$0xff] %v12367_v58  ;;  %v5177_v55 = vsel %vm7465_vm2, %v5064_v60, 0.0  ;;  %v5258_v1 = vsel %vm15271_vm0, %v12338_v50, 0.0  ;;  %v5022_v8 = vrot.slane %v4960_v42, 7  ;;  %vm15280_vm0 = vmmov %vm15269_vm9 }
 0x6d5   :  { %v5178_v27 = vsel %vm8074_vm12, %v5065_v20, 0.0  ;;  %v5198_v57 = vmul.f32 %v12073_v22, %v5177_v55  ;;  %v12380_v53 = vmul.f32 %v12035_v9, %v5295_v6  ;;  %v15274_v60 = vrot.slane %v12116_v10, 1  ;;  %vm15282_vm8 = vmmov %vm15280_vm0 }
 0x6d6   :  { %vm15275_vm7 = vcmp.lt.s32.totalorder %v14690_v37, 7  ;;  %v12392_v0 = vmul.f32 %v12002_v14, %v12334_v48  ;;  %v5038_v35 = vrot.slane %v4960_v42, 1  ;;  %v15277_v20 = vrot.slane %v12120_v40, 1 }
 0x6d7   :  { %v12388_v15 = vsel %vm15275_vm7, %v14220_v39, %v15274_v60  ;;  %v15278_v55 = vrot.slane %v12338_v50, 1  ;;  %vm15279_vm1 = vmmov %vm15275_vm7  ;;  %v5206_v10 = vadd.f32 %v5198_v57, %v5169_v51  ;;  %v5026_v44 = vsel %vm15269_vm9, %v5022_v8, %v5024_v49  ;;  %v12406_v39 = vpop.permute.xlu0 %2150 }
 0x6d8   :  { %15276 = vst [vmem:[#allocation39_spill] sm:$0xff] %v12388_v15  ;;  %v5027_v60 = vsel %vm15280_vm0, %v5023_v47, %v5025_v4  ;;  %v5199_v58 = vmul.f32 %v12076_v63, %v5178_v27  ;;  %v12410_v41 = vmul.f32 %v12005_v32, %v5258_v1  ;;  %v15281_v40 = vrot.slane %v12163_v19, 7  ;;  %vm15284_vm7 = vmmov %vm15280_vm0 }
 0x6d9   :  { %v12400_v6 = vsel %vm15279_vm1, %v15278_v55, %v15277_v20  ;;  %v15283_v51 = vrot.slane %v12159_v7, 7  ;;  %v5243_v57 = vadd.f32 %v12217_v61, %v5206_v10  ;;  %v5039_v4 = vrot.slane %v4956_v16, 1 }
 0x6da   :  { %v5028_v20 = vsel %vm15282_vm8, %v15281_v40, %v5022_v8  ;;  %v15285_v55 = vrot.slane %v12163_v19, 1  ;;  %vm15286_vm9 = vcmp.ge.s32.totalorder %v14669_v52, 16  ;;  %vm15289_vm8 = vmmov %vm15279_vm1 }
 0x6db   :  { %v5029_v49 = vsel %vm15284_vm7, %v15283_v51, %v5023_v47  ;;  %v5107_v1 = vsel %vm8126_vm13, %v5028_v20, 0.0  ;;  %v5109_v8 = vsel %vm15286_vm9, %v5026_v44, 0.0  ;;  %v5131_v47 = vmul.f32 %v12029_v28, %v5027_v60  ;;  %vm15287_vm0 = vmmov %vm15286_vm9  ;;  %v12438_v20 = vpop.permute.xlu1 %2152 }
 0x6dc   :  { %v5044_v27 = vsel %vm15279_vm1, %v15285_v55, %v5038_v35  ;;  %v5108_v15 = vsel %vm7485_vm4, %v5029_v49, 0.0  ;;  %v5128_v40 = vmul.f32 %v12023_v2, %v5107_v1  ;;  %v5130_v19 = vmul.f32 %v12023_v2, %v5109_v8  ;;  %vm15291_vm7 = vmmov %vm15279_vm1  ;;  %v15295_v8 = vld [vmem:[#allocation44_spill] sm:$0xff] }
 0x6dd   :  { %v5129_v61 = vmul.f32 %v12029_v28, %v5108_v15  ;;  %v5218_v10 = vsel %vm15287_vm0, %v4960_v42, 0.0  ;;  %v5240_v51 = vmul.f32 %v12011_v3, %v4956_v16  ;;  %v12440_v55 = vadd.f32 %v5199_v58, %v5170_v30 }
 0x6de   :  { %v5136_v49 = vadd.f32 %v5128_v40, %v12056_v24  ;;  %v5139_v44 = vadd.f32 %v5131_v47, %v12085_v54  ;;  %v5290_v60 = vsel %vm8159_vm14, %v5044_v27, 0.0  ;;  %v15288_v28 = vrot.slane %v12267_v56, 1  ;;  %v12456_v24 = vpop.permute.xlu0 %2154 }
 0x6df   :  { %v15290_v15 = vrot.slane %v12262_v43, 1  ;;  %v5137_v30 = vadd.f32 %v5129_v61, %v12059_v17  ;;  %v5311_v16 = vmul.f32 %v12032_v62, %v5290_v60  ;;  %v12459_v54 = vadd.f32 %v12172_v25, %v5243_v57  ;;  %v15298_v61 = vld [vmem:[#allocation8_spill] sm:$0xff] }
 0x6e0   :  { %v5042_v2 = vsel %vm15289_vm8, %v5038_v35, %v15288_v28  ;;  %v15292_v58 = vrot.slane %v12159_v7, 1  ;;  %v5176_v42 = vadd.f32 %v12098_v29, %v5139_v44  ;;  %vm15293_vm9 = vcmp.lt.s32.totalorder %v14669_v52, 112  ;;  %v15305_v44 = vld [vmem:[#allocation9_spill] sm:$0xff] }
 0x6e1   :  { %v5043_v3 = vsel %vm15291_vm7, %v5039_v4, %v15290_v15  ;;  %v4980_v43 = vsel %vm15293_vm9, %v4967_v46, %v4975_v31  ;;  %v5138_v35 = vadd.f32 %v5130_v19, %v12068_v59  ;;  %v5239_v17 = vmul.f32 %v12008_v45, %v5218_v10  ;;  %vm15294_vm0 = vmmov %vm15293_vm9 }
 0x6e2   :  { %v5045_v56 = vsel %vm15279_vm1, %v15292_v58, %v5039_v4  ;;  %v4984_v27 = vsel %vm15294_vm0, %v4975_v31, %v4967_v46  ;;  %v5054_v1 = vrot.slane %v4980_v43, 7  ;;  %v5070_v57 = vrot.slane %v4980_v43, 1  ;;  %v12483_v31 = vpop.permute.xlu1 %2156 }
 0x6e3   :  { %v5055_v25 = vrot.slane %v4984_v27, 7  ;;  %v5173_v7 = vadd.f32 %v12103_v13, %v5136_v49  ;;  %v5174_v40 = vadd.f32 %v15295_v8, %v5137_v30  ;;  %v5291_v29 = vsel %vm7489_vm5, %v5045_v56, 0.0 }
 0x6e4   :  { %vm15297_vm8 = vcmp.ge.s32.totalorder %v14669_v52, 16  ;;  %v5319_v59 = vadd.f32 %v5311_v16, %v12321_v36  ;;  %v15299_v45 = vrot.slane %v15298_v61, 7  ;;  %vm15300_vm7 = vcmp.lt.s32.totalorder %v14690_v37, 1 }
 0x6e5   :  { %v5292_v47 = vsel %vm15297_vm8, %v5042_v2, 0.0  ;;  %v15301_v19 = vrot.slane %v12334_v48, 7  ;;  %vm15302_vm1 = vmmov %vm15300_vm7  ;;  %v15303_v10 = vrot.slane %v12338_v50, 7  ;;  %v15306_v60 = vrot.slane %v15305_v44, 7  ;;  %v15308_v2 = vld [vmem:[#allocation70_spill] sm:$0xff] }
 0x6e6   :  { %v5060_v46 = vsel %vm15300_vm7, %v15299_v45, %v5054_v1  ;;  %vm15304_vm9 = vmmov %vm15302_vm1  ;;  %v5071_v28 = vrot.slane %v4984_v27, 1  ;;  %v5175_v15 = vadd.f32 %v15308_v2, %v5138_v35  ;;  %vm15310_vm8 = vcmp.lt.s32.totalorder %v14715_v38, 240 }
 0x6e7   :  { %v5058_v13 = vsel %vm15302_vm1, %v5054_v1, %v15301_v19  ;;  %v5059_v49 = vsel %vm15304_vm9, %v5055_v25, %v15303_v10  ;;  %vm15307_vm0 = vmmov %vm15302_vm1  ;;  %v5181_v30 = vsel %vm7485_vm4, %v5060_v46, 0.0  ;;  %v2159_v1 = vpop.permute.xlu0 %2158  ;;  %v5312_v8 = vmul.f32 %v12035_v9, %v5291_v29 }
 0x6e8   :  { %v5061_v36 = vsel %vm15307_vm0, %v15306_v60, %v5055_v25  ;;  %v5184_v56 = vsel %vm15310_vm8, %v5059_v49, 0.0  ;;  %v15311_v45 = vrot.slane %v15298_v61, 1  ;;  %vm15312_vm7 = vcmp.lt.s32.totalorder %v14690_v37, 7  ;;  %vm15313_vm1 = vmmov %vm15310_vm8  ;;  %v15314_v49 = vld [vmem:[#allocation75_spill] sm:$0xff] }
 0x6e9   :  { %v5182_v58 = vsel %vm8228_vm15, %v5061_v36, 0.0  ;;  %v5202_v19 = vmul.f32 %v12073_v22, %v5181_v30  ;;  %v5204_v46 = vmul.f32 %v12073_v22, %v5058_v13  ;;  %v5205_v10 = vmul.f32 %v12076_v63, %v5184_v56  ;;  %vm15316_vm9 = vmmov %vm15312_vm7 }
 0x6ea   :  { %v5076_v25 = vsel %vm15312_vm7, %v15311_v45, %v5070_v57  ;;  %v5203_v35 = vmul.f32 %v12076_v63, %v5182_v58  ;;  %v5256_v60 = vsel %vm15313_vm1, %v4984_v27, 0.0  ;;  %v5356_v36 = vadd.f32 %v15314_v49, %v5319_v59  ;;  %vm15318_vm0 = vmmov %vm15312_vm7 }
 0x6eb   :  { %v5314_v29 = vmul.f32 %v12035_v9, %v5043_v3  ;;  %v15315_v61 = vrot.slane %v12334_v48, 1  ;;  %v5210_v30 = vadd.f32 %v5202_v19, %v5173_v7  ;;  %v15317_v58 = vrot.slane %v12338_v50, 1  ;;  %vm15320_vm8 = vmmov %vm15318_vm0  ;;  %v2161_v3 = vpop.permute.xlu1 %2160  ;;  %v2163_v56 = vpop.permute.xlu0 %2162 }
 0x6ec   :  { %v5211_v45 = vadd.f32 %v5203_v35, %v5174_v40  ;;  %v15319_v63 = vrot.slane %v15305_v44, 1  ;;  %v5364_v9 = vsel %vm7489_vm5, %v5076_v25, 0.0  ;;  %vm15321_vm7 = vcmp.lt.s32.totalorder %v14669_v52, 16 }
 0x6ed   :  { %v12521_v2 = vsel %vm15316_vm9, %v5070_v57, %v15315_v61  ;;  %v12527_v22 = vsel %vm15318_vm0, %v5071_v28, %v15317_v58  ;;  %v12538_v48 = vsel %vm15321_vm7, %v2159_v1, %v12406_v39  ;;  %v5247_v57 = vadd.f32 %v5239_v17, %v5210_v30  ;;  %vm15322_vm1 = vmmov %vm15321_vm7 }
 0x6ee   :  { %v5077_v27 = vsel %vm15320_vm8, %v15319_v63, %v5071_v28  ;;  %v5248_v50 = vadd.f32 %v5240_v51, %v5211_v45  ;;  %v5276_v7 = vmul.f32 %v12002_v14, %v4980_v43  ;;  %v5277_v40 = vmul.f32 %v12005_v32, %v5256_v60  ;;  %vm15323_vm9 = vmmov %vm15322_vm1 }
 0x6ef   :  { %v5212_v59 = vadd.f32 %v5204_v46, %v5175_v15  ;;  %v12542_v13 = vadd.f32 %v5205_v10, %v5176_v42  ;;  %v5313_v44 = vmul.f32 %v12032_v62, %v5292_v47  ;;  %v12548_v28 = vsel %vm15322_vm1, %v12406_v39, %v2159_v1  ;;  %vm15324_vm0 = vmmov %vm15322_vm1  ;;  %v15325_v62 = vld [vmem:[#allocation7_spill] sm:$0xff]  ;;  %v15326_v10 = vld [vmem:[#allocation6_spill] sm:$0xff]  ;;  %v12591_v63 = vpop.permute.xlu0 %2174 }
 0x6f0   :  { %v5284_v25 = vadd.f32 %v5276_v7, %v5247_v57  ;;  %v5285_v19 = vadd.f32 %v5277_v40, %v5248_v50  ;;  %v5385_v17 = vmul.f32 %v12082_v11, %v5364_v9  ;;  %v2230_v51 = vrot.slane %v12538_v48, 7  ;;  %v15335_v40 = vld [vmem:[#allocation56_spill] sm:$0xff] }
 0x6f1   :  { %v12555_v32 = vsel %vm15323_vm9, %v12438_v20, %v2161_v3  ;;  %v12560_v14 = vsel %vm15324_vm0, %v2161_v3, %v12438_v20  ;;  %v5244_v39 = vadd.f32 %v15325_v62, %v12440_v55  ;;  %v5320_v42 = vadd.f32 %v5312_v8, %v12351_v23  ;;  %v2165_v55 = vpop.permute.xlu1 %2164  ;;  %v15333_v3 = vld [vmem:[#allocation11_spill] sm:$0xff] }
 0x6f2   :  { %v2231_v43 = vrot.slane %v12548_v28, 7  ;;  %v14222_v47 = vrot.slane %v12538_v48, 1  ;;  %v2232_v15 = vrot.slane %v12560_v14, 7  ;;  %v2233_v1 = vrot.slane %v12555_v32, 7 }
 0x6f3   :  { %v12570_v35 = vadd.f32 %v12325_v5, %v5212_v59  ;;  %v14224_v46 = vrot.slane %v12548_v28, 1  ;;  %v14223_v20 = vrot.slane %v12560_v14, 1  ;;  %v5281_v60 = vadd.f32 %v15326_v10, %v5244_v39  ;;  %v15329_v5 = vld [vmem:[#allocation41_spill] sm:$0xff] }
 0x6f4   :  { %v5393_v49 = vadd.f32 %v5385_v17, %v5356_v36  ;;  %vm15327_vm8 = vcmp.ge.s32.totalorder %v14669_v52, 16  ;;  %vm15328_vm7 = vcmp.lt.s32.totalorder %v14690_v37, 1  ;;  %v5357_v61 = vadd.f32 %v15329_v5, %v5320_v42 }
 0x6f5   :  { %v12578_v23 = vsel %vm15327_vm8, %v12538_v48, -inf  ;;  %v2242_v8 = vsel %vm15328_vm7, %v2230_v51, %v2232_v15  ;;  %v12585_v30 = vadd.f32 %v5313_v44, %v5284_v25  ;;  %v5322_v45 = vadd.f32 %v5314_v29, %v5285_v19  ;;  %vm15331_vm9 = vmmov %vm15328_vm7  ;;  %v15338_v19 = vld [vmem:[#allocation31_spill] sm:$0xff] }
 0x6f6   :  { %v2249_v58 = vrot.slane %v12555_v32, 1  ;;  %vm15330_vm1 = vcmp.lt.s32.totalorder %v14715_v38, 240  ;;  %v12597_v9 = vsel %vm15331_vm9, %v2231_v43, %v2233_v1  ;;  %vm15332_vm0 = vcmp.lt.s32.totalorder %v14690_v37, 7 }
 0x6f7   :  { %v5363_v36 = vsel %vm15330_vm1, %v12301_v26, 0.0  ;;  %v2258_v29 = vsel %vm15332_vm0, %v14222_v47, %v14223_v20  ;;  %v5318_v57 = vadd.f32 %v15333_v3, %v5281_v60  ;;  %v5365_v26 = vsel %vm8361_vm6, %v5077_v27, 0.0  ;;  %vm15339_vm9 = vmmov %vm15332_vm0 }
 0x6f8   :  { %v12610_v7 = vsel %vm15327_vm8, %v2242_v8, -inf  ;;  %v5386_v59 = vmul.f32 %v15335_v40, %v5365_v26  ;;  %vm15336_vm7 = vcmp.lt.s32.totalorder %v14669_v52, 16  ;;  %v5384_v27 = vmul.f32 %v15335_v40, %v5363_v36  ;;  %vm15341_vm0 = vmmov %vm15327_vm8  ;;  %v12640_v8 = vpop.permute.xlu1 %2176  ;;  %v15345_v26 = vld [vmem:[#allocation17_spill] sm:$0xff] }
 0x6f9   :  { %v12616_v44 = vsel %vm15336_vm7, %v12456_v24, %v2163_v56  ;;  %vm15337_vm1 = vmmov %vm15336_vm7  ;;  %v5355_v17 = vadd.f32 %v15338_v19, %v5318_v57  ;;  %v12631_v42 = vsel %vm15339_vm9, %v14224_v46, %v2249_v58  ;;  %v12636_v10 = vsel %vm15341_vm0, %v12560_v14, -inf  ;;  %v15352_v46 = vld [vmem:[#allocation42_spill] sm:$0xff] }
 0x6fa   :  { %v12621_v25 = vsel %vm15337_vm1, %v2163_v56, %v12456_v24  ;;  %v2235_v39 = vrot.slane %v12616_v44, 7  ;;  %15340 = vst [vmem:[#allocation54_spill] sm:$0xff] %v12631_v42  ;;  %v5394_v24 = vadd.f32 %v5386_v59, %v5357_v61  ;;  %v15342_v56 = vld [vmem:[#allocation10_spill] sm:$0xff]  ;;  %vm15343_vm8 = vcmp.lt.s32.totalorder %v14690_v37, 1  ;;  %vm15347_vm9 = vmmov %vm15341_vm0 }
 0x6fb   :  { %v2234_v62 = vrot.slane %v12621_v25, 7  ;;  %v5317_v60 = vadd.f32 %v15342_v56, %v12459_v54  ;;  %v5392_v5 = vadd.f32 %v5384_v27, %v5355_v17  ;;  %vm15344_vm7 = vmmov %vm15343_vm8  ;;  %v12649_v57 = vsel %vm15337_vm1, %v12483_v31, %v2165_v55  ;;  %v15346_v59 = vld [vmem:[#allocation18_spill] sm:$0xff]  ;;  %v15349_v17 = vld [vmem:[#allocation25_spill] sm:$0xff]  ;;  %v12660_v27 = vpop.permute.xlu0 %2178 }
 0x6fc   :  { %v2241_v3 = vsel %vm15344_vm7, %v2233_v1, %v2235_v39  ;;  %v12657_v19 = vsel %vm15347_vm9, %v2258_v29, -inf  ;;  %v14225_v56 = vrot.slane %v12616_v44, 1  ;;  %vm15350_vm0 = vmmov %vm15337_vm1  ;;  %v15351_v29 = vld [vmem:[#allocation12_spill] sm:$0xff] }
 0x6fd   :  { %v2240_v36 = vsel %vm15343_vm8, %v2232_v15, %v2234_v62  ;;  %15348 = vst [vmem:[#allocation84_spill] sm:$0xff] %v12657_v19  ;;  %v5354_v15 = vadd.f32 %v15349_v17, %v5317_v60  ;;  %v5400_v1 = vpack.c.bf16 %v5394_v24, %v5392_v5  ;;  %v12668_v61 = vsel %vm15350_vm0, %v2165_v55, %v12483_v31  ;;  %vm15353_vm8 = vmmov %vm15347_vm9  ;;  %v15368_v24 = vld [vmem:[#allocation76_spill] sm:$0xff] }
 0x6fe   :  { %v2298_v47 = vsel %vm8126_vm13, %v2240_v36, -inf  ;;  %v2299_v54 = vsel %vm7485_vm4, %v2241_v3, -inf  ;;  %v2236_v60 = vrot.slane %v12668_v61, 7  ;;  %v2237_v17 = vrot.slane %v12649_v57, 7  ;;  %vm15354_vm1 = vmmov %vm15344_vm7 }
 0x6ff   :  { %v5391_v20 = vadd.f32 %v15351_v29, %v5354_v15  ;;  %5641 = vmatprep.mubr.bf16.mxu1 %v5400_v1  ;;  %v14226_v5 = vrot.slane %v12649_v57, 1  ;;  %v5250_v36 = vadd.f32 %v12330_v34, %v12542_v13  ;;  %v5359_v31 = vadd.f32 %v15352_v46, %v5322_v45  ;;  %v12691_v29 = vpop.permute.xlu1 %2180  ;;  %v15356_v13 = vld [vmem:[#allocation21_spill] sm:$0xff]  ;;  %vm15358_vm0 = vmmov %vm15354_vm1 }
 0x700   :  { %v12683_v55 = vsel %vm15353_vm8, %v12621_v25, -inf  ;;  %v2238_v15 = vsel %vm15344_vm7, %v2234_v62, %v2236_v60  ;;  %v2244_v1 = vsel %vm15354_vm1, %v2236_v60, %v2230_v51  ;;  %vm15355_vm9 = vcmp.lt.s32.totalorder %v14690_v37, 7  ;;  %vm15359_vm8 = vmmov %vm15358_vm0 }
 0x701   :  { %v5399_v3 = vpack.c.bf16 %v5393_v49, %v5391_v20  ;;  %v12697_v34 = vsel %vm15355_vm9, %v2249_v58, %v14225_v56  ;;  %v12700_v46 = vmax.f32 %v15356_v13, %v2298_v47  ;;  %v15357_v20 = vld [vmem:[#allocation22_spill] sm:$0xff]  ;;  %v2245_v45 = vsel %vm15358_vm0, %v2237_v17, %v2231_v43  ;;  %vm15361_vm7 = vmmov %vm15355_vm9  ;;  %v2183_v43 = vpop.permute.xlu0 %2182 }
 0x702   :  { %v12703_v49 = vmax.f32 %v15357_v20, %v2299_v54  ;;  %v12711_v51 = vsel %vm15359_vm8, %v2235_v39, %v2237_v17  ;;  %v15360_v58 = vrot.slane %v12548_v28, 1  ;;  %vm15362_vm1 = vcmp.ge.s32.totalorder %v14669_v52, 16 }
 0x703   :  { %5642 = vmatmul.mubr.bf16.vlgmr.msra.gmra.mrb[24].mxu1 %v5399_v3  ;;  %v12725_v54 = vsel %vm15362_vm1, %v12668_v61, -inf  ;;  %v2294_v39 = vsel %vm7990_vm10, %v2244_v1, -inf  ;;  %vm15364_vm9 = vmmov %vm15362_vm1  ;;  %v5287_v3 = vadd.f32 %v12410_v41, %v5250_v36  ;;  %vm15365_vm0 = vcmp.lt.s32.totalorder %v14715_v38, 240  ;;  %v15369_v36 = vld [vmem:[#allocation39_spill] sm:$0xff] }
 0x704   :  { %v12720_v47 = vsel %vm15361_vm7, %v14226_v5, %v15360_v58  ;;  %v12731_v17 = vsel %vm15364_vm9, %v2238_v15, -inf  ;;  %v5367_v58 = vsel %vm15365_vm0, %v12527_v22, 0.0  ;;  %v2295_v56 = vsel %vm7465_vm2, %v2245_v45, -inf  ;;  %v15366_v5 = vld [vmem:[#allocation51_spill] sm:$0xff] }
 0x705   :  { %vm15367_vm8 = vnez %v15366_v5  ;;  %v5286_v1 = vadd.f32 %v12392_v0, %v12570_v35  ;;  %v5358_v15 = vadd.f32 %v15368_v24, %v12585_v30  ;;  %v5324_v20 = vadd.f32 %v12380_v53, %v5287_v3  ;;  %v15373_v0 = vld [vmem:[#allocation32_spill] sm:$0xff]  ;;  %v2185_v24 = vpop.permute.xlu1 %2184  ;;  %v15375_v3 = vld [vmem:[#allocation33_spill] sm:$0xff] }
 0x706   :  { %v5369_v62 = vsel %vm15367_vm8, %v12400_v6, 0.0  ;;  %v5388_v41 = vmul.f32 %v15335_v40, %v5367_v58  ;;  %v5368_v22 = vsel %vm7481_vm3, %v15369_v36, 0.0  ;;  %vm15371_vm7 = vcmp.lt.s32.totalorder %v14669_v52, 112  ;;  %v15372_v6 = vld [vmem:[#allocation13_spill] sm:$0xff] }
 0x707   :  { %v12754_v45 = vsel %vm15371_vm7, %v12591_v63, %v2183_v43  ;;  %v12757_v18 = vmax.f32 %v15372_v6, %v2294_v39  ;;  %v5323_v35 = vadd.f32 %v15373_v0, %v5286_v1  ;;  %v5387_v30 = vmul.f32 %v12082_v11, %v12521_v2  ;;  %vm15374_vm1 = vmmov %vm15371_vm7  ;;  %v15376_v39 = vld [vmem:[#allocation5_spill] sm:$0xff]  ;;  %v15377_v0 = vld [vmem:[#allocation14_spill] sm:$0xff] }
 0x708   :  { %v12765_v53 = vsel %vm15374_vm1, %v2183_v43, %v12591_v63  ;;  %v5361_v58 = vadd.f32 %v15375_v3, %v5324_v20  ;;  %v5390_v36 = vmul.f32 %v15335_v40, %v5369_v62  ;;  %v5396_v60 = vadd.f32 %v5388_v41, %v5359_v31  ;;  %vm15378_vm9 = vmmov %vm15374_vm1  ;;  %v15383_v3 = vld [vmem:[#allocation72_spill] sm:$0xff] }
 0x709   :  { %v5389_v5 = vmul.f32 %v12082_v11, %v5368_v22  ;;  %v5360_v6 = vadd.f32 %v15376_v39, %v5323_v35  ;;  %v5395_v42 = vadd.f32 %v5387_v30, %v5358_v15  ;;  %v2262_v1 = vrot.slane %v12754_v45, 7  ;;  %vm15379_vm0 = vmmov %vm15374_vm1  ;;  %v15389_v39 = vld [vmem:[#allocation16_spill] sm:$0xff] }
 0x70a   :  { %v14232_v2 = vrot.slane %v12765_v53, 7  ;;  %v5398_v63 = vadd.f32 %v5390_v36, %v5361_v58  ;;  %v12778_v20 = vsel %vm15378_vm9, %v12640_v8, %v2185_v24  ;;  %v2195_v11 = vsel %vm15379_vm0, %v2185_v24, %v12640_v8 }
 0x70b   :  { %v5397_v40 = vadd.f32 %v5389_v5, %v5360_v6  ;;  %v14228_v31 = vrot.slane %v12765_v53, 1  ;;  %v2264_v62 = vrot.slane %v12778_v20, 7  ;;  %v2265_v43 = vrot.slane %v2195_v11, 7 }
 0x70c   :  { %v5402_v15 = vpack.c.bf16 %v5398_v63, %v5396_v60  ;;  %v15380_v41 = vrot.slane %v12621_v25, 1  ;;  %v15381_v22 = vrot.slane %v12560_v14, 1  ;;  %vm15382_vm7 = vcmp.lt.s32.totalorder %v14690_v37, 7  ;;  %v15387_v60 = vld [vmem:[#allocation40_spill] sm:$0xff] }
 0x70d   :  { %v2281_v30 = vrot.slane %v2195_v11, 1  ;;  %v15384_v58 = vmax.f32 %v15345_v26, %v12610_v7  ;;  %v5401_v5 = vpack.c.bf16 %v5397_v40, %v5395_v42  ;;  %vm15385_vm1 = vcmp.lt.s32.totalorder %v14690_v37, 1  ;;  %v15390_v7 = vld [vmem:[#allocation15_spill] sm:$0xff] }
 0x70e   :  { %v2256_v35 = vsel %vm15382_vm7, %v15381_v22, %v15380_v41  ;;  %v2274_v6 = vsel %vm15385_vm1, %v2262_v1, %v2264_v62  ;;  %vm15386_vm9 = vmmov %vm15385_vm1  ;;  %v15388_v24 = vmax.f32 %v15346_v59, %v12597_v9  ;;  %v12808_v63 = vmax.f32 %v15389_v39, %v2295_v56  ;;  %5651 = vmatprep.mubr.bf16.mxu1 %v5402_v15  ;;  %v2187_v22 = vpop.permute.xlu0 %2186 }
 0x70f   :  { %v2320_v8 = vmax.f32 %v15384_v58, %v15383_v3  ;;  %v2275_v14 = vsel %vm15386_vm9, %v14232_v2, %v2265_v43  ;;  %vm15391_vm0 = vcmp.lt.s32.totalorder %v14715_v38, 240  ;;  %5652 = vmatmul.mubr.bf16.gmra.mrb[28].mxu1 %v5401_v5  ;;  %v14231_v56 = vrot.slane %v12778_v20, 1 }
 0x710   :  { %v2321_v36 = vmax.f32 %v15388_v24, %v15387_v60  ;;  %v2329_v40 = vsel %vm15391_vm0, %v2275_v14, -inf  ;;  %vm15392_vm7 = vmmov %vm15391_vm0  ;;  %vm15393_vm1 = vcmp.lt.s32.totalorder %v14690_v37, 7  ;;  %v2377_v60 = vsel %vm7489_vm5, %v12697_v34, -inf  ;;  %v15395_v24 = vld [vmem:[#allocation64_spill] sm:$0xff] }
 0x711   :  { %v2336_v41 = vmax.f32 %v2320_v8, %v2274_v6  ;;  %v12818_v9 = vsel %vm15392_vm7, %v12765_v53, -inf  ;;  %v12825_v15 = vsel %vm15393_vm1, %v14228_v31, %v2281_v30  ;;  %vm15394_vm9 = vmmov %vm15391_vm0  ;;  %v2376_v6 = vsel %vm8159_vm14, %v2256_v35, -inf }
 0x712   :  { %v2337_v58 = vmax.f32 %v2321_v36, %v2329_v40  ;;  %v2361_v5 = vsel %vm15394_vm9, %v2195_v11, -inf  ;;  %v15396_v36 = vsel %vm7485_vm4, %v15395_v24, -inf  ;;  %vm15397_vm0 = vcmp.lt.s32.totalorder %v14669_v52, 112  ;;  %v2189_v11 = vpop.permute.xlu1 %2188 }
 0x713   :  { %v2352_v8 = vmax.f32 %v2336_v41, %v12636_v10  ;;  %v2322_v40 = vmax.f32 %v12700_v46, %v15396_v36  ;;  %v12844_v10 = vsel %vm15397_vm0, %v12660_v27, %v2187_v22  ;;  %vm15398_vm7 = vmmov %vm15397_vm0  ;;  %v15399_v46 = vld [vmem:[#allocation74_spill] sm:$0xff]  ;;  %vm15401_vm1 = vcmp.lt.s32.totalorder %v14690_v37, 1 }
 0x714   :  { %v2353_v14 = vmax.f32 %v2337_v58, %v12555_v32  ;;  %v2196_v32 = vsel %vm15398_vm7, %v2187_v22, %v12660_v27  ;;  %v2266_v34 = vrot.slane %v12844_v10, 7  ;;  %v2282_v41 = vrot.slane %v12844_v10, 1  ;;  %vm15403_vm7 = vmmov %vm15401_vm1 }
 0x715   :  { %v2368_v35 = vmax.f32 %v2352_v8, %v12778_v20  ;;  %v15400_v24 = vsel %vm7485_vm4, %v15399_v46, -inf  ;;  %v2267_v31 = vrot.slane %v2196_v32, 7  ;;  %v2283_v3 = vrot.slane %v2196_v32, 1 }
 0x716   :  { %v2369_v58 = vmax.f32 %v2353_v14, %v2361_v5  ;;  %v2323_v36 = vmax.f32 %v12703_v49, %v15400_v24  ;;  %v2272_v8 = vsel %vm15401_vm1, %v2264_v62, %v2266_v34  ;;  %vm15402_vm9 = vcmp.lt.s32.totalorder %v14690_v37, 7  ;;  %v15405_v14 = vld [vmem:[#allocation53_spill] sm:$0xff] }
 0x717   :  { %v2384_v42 = vmax.f32 %v2368_v35, %v2376_v6  ;;  %v2288_v27 = vsel %vm15402_vm9, %v14231_v56, %v2282_v41  ;;  %v12866_v22 = vsel %vm15397_vm0, %v12691_v29, %v2189_v11  ;;  %v2273_v49 = vsel %vm15403_vm7, %v2265_v43, %v2267_v31  ;;  %vm15404_vm14 = vmmov %vm15402_vm9 }
 0x718   :  { %v2385_v5 = vmax.f32 %v2369_v58, %v2377_v60  ;;  %v2289_v6 = vsel %vm15404_vm14, %v2281_v30, %v2283_v3  ;;  %v2330_v62 = vsel %vm7485_vm4, %v2272_v8, -inf  ;;  %v15406_v35 = vsel %vm7489_vm5, %v15405_v14, -inf  ;;  %vm15409_vm1 = vmmov %vm15402_vm9  ;;  %v15410_v30 = vld [vmem:[#allocation19_spill] sm:$0xff] }
 0x719   :  { %v2400_v46 = vmax.f32 %v2384_v42, %v15406_v35  ;;  %v15407_v24 = vrot.slane %v12668_v61, 1  ;;  %v15408_v56 = vrot.slane %v12621_v25, 1  ;;  %v2331_v43 = vsel %vm8228_vm15, %v2273_v49, -inf  ;;  %vm15412_vm14 = vmmov %vm15397_vm0 }
 0x71a   :  { %v2338_v58 = vmax.f32 %v2322_v40, %v2330_v62  ;;  %v15411_v8 = vsel %vm7489_vm5, %v15410_v30, -inf  ;;  %v2339_v2 = vmax.f32 %v2323_v36, %v2331_v43  ;;  %v2408_v42 = vsel %vm7489_vm5, %v2288_v27, -inf  ;;  %vm15415_vm9 = vmmov %vm15409_vm1 }
 0x71b   :  { %v2254_v60 = vsel %vm15409_vm1, %v15408_v56, %v15407_v24  ;;  %v2401_v19 = vmax.f32 %v2385_v5, %v15411_v8  ;;  %v2197_v25 = vsel %vm15412_vm14, %v2189_v11, %v12691_v29  ;;  %v2409_v56 = vsel %vm8361_vm6, %v2289_v6, -inf  ;;  %v15418_v6 = vld [vmem:[#allocation43_spill] sm:$0xff] }
 0x71c   :  { %v2354_v14 = vmax.f32 %v2338_v58, %v12683_v55  ;;  %v2416_v49 = vmax.f32 %v2400_v46, %v2408_v42  ;;  %v2268_v40 = vrot.slane %v12866_v22, 7  ;;  %v15413_v62 = vrot.slane %v12649_v57, 1  ;;  %v15419_v58 = vld [vmem:[#allocation29_spill] sm:$0xff] }
 0x71d   :  { %v15414_v5 = vrot.slane %v12616_v44, 1  ;;  %v2355_v27 = vmax.f32 %v2339_v2, %v12616_v44  ;;  %v2417_v35 = vmax.f32 %v2401_v19, %v2409_v56  ;;  %v2269_v24 = vrot.slane %v2197_v25, 7 }
 0x71e   :  { %vm15416_vm0 = vcmp.ge.s32.totalorder %v14669_v52, 16  ;;  %vm15417_vm7 = vcmp.lt.s32.totalorder %v14715_v38, 240  ;;  %v2370_v11 = vmax.f32 %v2354_v14, %v12844_v10  ;;  %v12912_v46 = vadd.f32 %v2416_v49, %v15418_v6  ;;  %v15427_v49 = vld [vmem:[#allocation28_spill] sm:$0xff] }
 0x71f   :  { %v2255_v36 = vsel %vm15415_vm9, %v15414_v5, %v15413_v62  ;;  %v2378_v55 = vsel %vm15416_vm0, %v2254_v60, -inf  ;;  %v2363_v29 = vsel %vm15417_vm7, %v2196_v32, -inf  ;;  %v12915_v30 = vadd.f32 %v2417_v35, %v15419_v58 }
 0x720   :  { %v2371_v43 = vmax.f32 %v2355_v27, %v2363_v29  ;;  %vm15420_vm1 = vcmp.lt.s32.totalorder %v14690_v37, 1  ;;  %v2284_v19 = vrot.slane %v12866_v22, 1  ;;  %v2386_v2 = vmax.f32 %v2370_v11, %v2378_v55  ;;  %5800 = vst [vmem:[%s13992_s8 + $0x10] sm:$0xff] %v12912_v46  ;;  %3904 = vrot.lane.b32.xlu1 %v12912_v46, %s6723_s18  ;;  %v15433_v55 = vld [vmem:[#allocation66_spill] sm:$0xff]  ;;  %v15435_v11 = vld [vmem:[#allocation69_spill] sm:$0xff] }
 0x721   :  { %v2276_v44 = vsel %vm15420_vm1, %v2268_v40, %v2262_v1  ;;  %vm15421_vm14 = vmmov %vm15420_vm1  ;;  %v15422_v32 = vrot.slane %v12765_v53, 7  ;;  %v2285_v8 = vrot.slane %v2197_v25, 1  ;;  %5801 = vst [vmem:[%s13992_s8 + $0x18] sm:$0xff] %v12915_v30  ;;  %v15428_v62 = vsel %vm7465_vm2, %v15427_v49, -inf }
 0x722   :  { %v2271_v10 = vsel %vm15421_vm14, %v2267_v31, %v2269_v24  ;;  %vm15423_vm9 = vmmov %vm15420_vm1  ;;  %v2387_v1 = vmax.f32 %v2371_v43, %v2255_v36  ;;  %v15425_v31 = vld [vmem:[#allocation20_spill] sm:$0xff]  ;;  %v2319_v5 = vmax.f32 %v12808_v63, %v15428_v62  ;;  %v15429_v36 = vld [vmem:[#allocation47_spill] sm:$0xff]  ;;  %vm15430_vm7 = vcmp.lt.s32.totalorder %v14690_v37, 7 }
 0x723   :  { %v2277_v60 = vsel %vm15423_vm9, %v2269_v24, %v15422_v32  ;;  %vm15424_vm0 = vmmov %vm15420_vm1  ;;  %v15426_v14 = vsel %vm7465_vm2, %v15425_v31, -inf  ;;  %v2402_v27 = vmax.f32 %v2386_v2, %v15429_v36  ;;  %v2287_v35 = vsel %vm15430_vm7, %v2283_v3, %v2285_v8  ;;  %v15431_v24 = vld [vmem:[#allocation23_spill] sm:$0xff] }
 0x724   :  { %v2270_v42 = vsel %vm15424_vm0, %v2266_v34, %v2268_v40  ;;  %v2318_v56 = vmax.f32 %v12757_v18, %v15426_v14  ;;  %v15432_v34 = vmax.f32 %v15377_v0, %v12731_v17  ;;  %v15434_v18 = vmax.f32 %v15390_v7, %v12711_v51  ;;  %vm15440_vm14 = vmmov %vm15430_vm7 }
 0x725   :  { %v2403_v6 = vmax.f32 %v2387_v1, %v15435_v11  ;;  %v2326_v63 = vsel %vm7465_vm2, %v2276_v44, -inf  ;;  %v2327_v58 = vsel %vm8074_vm12, %v2277_v60, -inf  ;;  %vm15437_vm1 = vcmp.lt.s32.totalorder %v14715_v38, 240  ;;  %vm15441_vm9 = vmmov %vm15430_vm7  ;;  %v15453_v11 = vld [vmem:[#allocation24_spill] sm:$0xff] }
 0x726   :  { %v2324_v40 = vmax.f32 %v15432_v34, %v15431_v24  ;;  %v2325_v29 = vmax.f32 %v15434_v18, %v15433_v55  ;;  %v2333_v3 = vsel %vm15437_vm1, %v2271_v10, -inf  ;;  %v2334_v2 = vmax.f32 %v2318_v56, %v2326_v63  ;;  %vm15443_vm0 = vmmov %vm15430_vm7  ;;  %v15452_v18 = vld [vmem:[#allocation54_spill] sm:$0xff] }
 0x727   :  { %v2335_v32 = vmax.f32 %v2319_v5, %v2327_v58  ;;  %v15438_v14 = vrot.slane %v12538_v48, 1  ;;  %v15439_v51 = vrot.slane %v12668_v61, 1  ;;  %v2286_v44 = vsel %vm15441_vm9, %v2282_v41, %v2284_v19  ;;  %vm15444_vm7 = vmmov %vm15437_vm1  ;;  %v15455_v58 = vld [vmem:[#allocation73_spill] sm:$0xff] }
 0x728   :  { %v2340_v17 = vmax.f32 %v2324_v40, %v2270_v42  ;;  %v2341_v31 = vmax.f32 %v2325_v29, %v2333_v3  ;;  %v15442_v49 = vrot.slane %v12754_v45, 1  ;;  %v2411_v10 = vsel %vm15444_vm7, %v2287_v35, -inf  ;;  %vm15446_vm1 = vmmov %vm15443_vm0  ;;  %v15451_v40 = vld [vmem:[#allocation84_spill] sm:$0xff]  ;;  %v15456_v3 = vld [vmem:[#allocation61_spill] sm:$0xff] }
 0x729   :  { %v2260_v1 = vsel %vm15440_vm14, %v15439_v51, %v15438_v14  ;;  %v2350_v42 = vmax.f32 %v2334_v2, %v12578_v23  ;;  %v2351_v48 = vmax.f32 %v2335_v32, %v12548_v28  ;;  %v15445_v62 = vrot.slane %v12765_v53, 1  ;;  %vm15447_vm14 = vmmov %vm15444_vm7  ;;  %v15459_v14 = vld [vmem:[#allocation81_spill] sm:$0xff] }
 0x72a   :  { %v2292_v60 = vsel %vm15443_vm0, %v2284_v19, %v15442_v49  ;;  %v2356_v61 = vmax.f32 %v2340_v17, %v12725_v54  ;;  %v2357_v56 = vmax.f32 %v2341_v31, %v12649_v57  ;;  %v2365_v5 = vsel %vm15447_vm14, %v2197_v25, -inf  ;;  %v15450_v25 = vld [vmem:[#allocation67_spill] sm:$0xff]  ;;  %v15458_v17 = vld [vmem:[#allocation85_spill] sm:$0xff]  ;;  %vm15467_vm9 = vmmov %vm15443_vm0 }
 0x72b   :  { %v2293_v41 = vsel %vm15446_vm1, %v2285_v8, %v15445_v62  ;;  %v2418_v19 = vmax.f32 %v2402_v27, %v2286_v44  ;;  %v2419_v36 = vmax.f32 %v2403_v6, %v2411_v10  ;;  %v2366_v35 = vmax.f32 %v2350_v42, %v12754_v45  ;;  %v15449_v8 = vld [vmem:[#allocation27_spill] sm:$0xff]  ;;  %v15454_v6 = vld [vmem:[#allocation58_spill] sm:$0xff]  ;;  %v15461_v49 = vld [vmem:[#allocation37_spill] sm:$0xff] }
 0x72c   :  { %v2367_v23 = vmax.f32 %v2351_v48, %v12818_v9  ;;  %v2372_v28 = vmax.f32 %v2356_v61, %v12866_v22  ;;  %v2373_v24 = vmax.f32 %v2357_v56, %v2365_v5  ;;  %v2380_v57 = vsel %vm8015_vm11, %v2260_v1, -inf  ;;  %v15460_v1 = vld [vmem:[#allocation71_spill] sm:$0xff]  ;;  %v15463_v48 = vld [vmem:[#allocation65_spill] sm:$0xff]  ;;  %vm15468_vm0 = vmmov %vm15444_vm7 }
 0x72d   :  { %v2381_v53 = vsel %vm7481_vm3, %v12720_v47, -inf  ;;  %v13001_v34 = vadd.f32 %v2418_v19, %v15449_v8  ;;  %v13004_v27 = vadd.f32 %v2419_v36, %v15450_v25  ;;  %v2382_v55 = vmax.f32 %v2366_v35, %v15451_v40  ;;  %v15457_v47 = vld [vmem:[#allocation80_spill] sm:$0xff]  ;;  %vm15472_vm14 = vmmov %vm15467_vm9 }
 0x72e   :  { %v2383_v9 = vmax.f32 %v2367_v23, %v15452_v18  ;;  %v2388_v29 = vmax.f32 %v2372_v28, %v2380_v57  ;;  %v2389_v22 = vmax.f32 %v2373_v24, %v2381_v53  ;;  %v2132_v63 = vadd.f32 %v15454_v6, %v15453_v11 }
 0x72f   :  { %v2134_v2 = vadd.f32 %v15456_v3, %v15455_v58  ;;  %v2146_v32 = vadd.f32 %v15457_v47, %v15453_v11  ;;  %v2148_v31 = vadd.f32 %v15458_v17, %v15455_v58  ;;  %5802 = vst [vmem:[%s13992_s8 + $0x20] sm:$0xff] %v13001_v34  ;;  %5803 = vst [vmem:[%s13992_s8 + $0x28] sm:$0xff] %v13004_v27  ;;  %v15462_v10 = vsel %vm7481_vm3, %v15461_v49, -inf }
 0x730   :  { %v2398_v51 = vmax.f32 %v2382_v55, %v15459_v14  ;;  %v2399_v44 = vmax.f32 %v2383_v9, %v15460_v1  ;;  %v2404_v42 = vmax.f32 %v2388_v29, %v15462_v10  ;;  %v15464_v61 = vsel %vm7481_vm3, %v15463_v48, -inf }
 0x731   :  { %v2405_v56 = vmax.f32 %v2389_v22, %v15464_v61  ;;  %v15465_v62 = vrot.slane %v12778_v20, 1  ;;  %v15466_v5 = vrot.slane %v12754_v45, 1  ;;  %v2407_v36 = vsel %vm15468_vm0, %v12825_v15, -inf  ;;  %vm15475_vm0 = vmmov %vm15472_vm14 }
 0x732   :  { %v2412_v35 = vsel %vm7481_vm3, %v2292_v60, -inf  ;;  %v2413_v28 = vsel %vm15367_vm8, %v2293_v41, -inf  ;;  %v2415_v57 = vmax.f32 %v2399_v44, %v2407_v36  ;;  %v3954_v15 = vrot.slane %v13001_v34, 7 }
 0x733   :  { %v2290_v19 = vsel %vm15467_vm9, %v15466_v5, %v15465_v62  ;;  %v2420_v53 = vmax.f32 %v2404_v42, %v2412_v35  ;;  %v2421_v8 = vmax.f32 %v2405_v56, %v2413_v28  ;;  %v3955_v60 = vrot.slane %v13004_v27, 7 }
 0x734   :  { %v2414_v24 = vmax.f32 %v2398_v51, %v2290_v19  ;;  %v13049_v45 = vadd.f32 %v2415_v57, %v2134_v2  ;;  %v3952_v55 = vrot.slane %v12912_v46, 7  ;;  %v3953_v18 = vrot.slane %v12915_v30, 7  ;;  %v15492_v51 = vld [vmem:[#allocation3_spill] sm:$0xff] }
 0x735   :  { %v13051_v25 = vadd.f32 %v2420_v53, %v2146_v32  ;;  %v13053_v40 = vadd.f32 %v2421_v8, %v2148_v31  ;;  %v3970_v9 = vrot.slane %v13001_v34, 1  ;;  %vm15470_vm7 = vcmp.lt.s32.totalorder %v14690_v37, 1 }
 0x736   :  { %v13047_v20 = vadd.f32 %v2414_v24, %v2132_v63  ;;  %5799 = vst [vmem:[%s13992_s8 + $0x8] sm:$0xff] %v13049_v45  ;;  %v13108_v29 = vsel %vm15470_vm7, %v3952_v55, %v3954_v15  ;;  %v3968_v22 = vrot.slane %v12912_v46, 1  ;;  %v3951_v11 = vrot.slane %v13049_v45, 7  ;;  %vm15471_vm1 = vmmov %vm15470_vm7 }
 0x737   :  { %5804 = vst [vmem:[%s13992_s8 + $0x30] sm:$0xff] %v13051_v25  ;;  %5805 = vst [vmem:[%s13992_s8 + $0x38] sm:$0xff] %v13053_v40  ;;  %3908 = vrot.lane.b32.xlu1 %v13051_v25, %s6723_s18  ;;  %v3957_v6 = vrot.slane %v13053_v40, 7  ;;  %v13115_v63 = vsel %vm15471_vm1, %v3953_v18, %v3955_v60  ;;  %v3971_v58 = vrot.slane %v13004_v27, 1  ;;  %v3956_v3 = vrot.slane %v13051_v25, 7 }
 0x738   :  { %5798 = vst [vmem:[%s13992_s8] sm:$0xff] %v13047_v20  ;;  %3902 = vrot.lane.b32.xlu0 %v13047_v20, %s6723_s18  ;;  %v3950_v2 = vrot.slane %v13047_v20, 7  ;;  %v3969_v47 = vrot.slane %v12915_v30, 1  ;;  %v13123_v32 = vsel %vm15472_vm14, %v3968_v22, %v3970_v9  ;;  %vm15474_vm9 = vmmov %vm15471_vm1  ;;  %v3966_v48 = vrot.slane %v13047_v20, 1 }
 0x739   :  { %15473 = vst [vmem:[#allocation63_spill] sm:$0xff] %v13123_v32  ;;  %v13133_v1 = vsel %vm15474_vm9, %v3957_v6, %v3951_v11  ;;  %vm15477_vm7 = vmmov %vm15471_vm1  ;;  %v3967_v61 = vrot.slane %v13049_v45, 1  ;;  %v13156_v62 = vsel %vm15471_vm1, %v3951_v11, %v3953_v18  ;;  %v3972_v19 = vrot.slane %v13051_v25, 1 }
 0x73a   :  { %v13143_v10 = vsel %vm15475_vm0, %v3969_v47, %v3971_v58  ;;  %v13147_v42 = vsel %vm15477_vm7, %v3956_v3, %v3950_v2  ;;  %v3973_v36 = vrot.slane %v13053_v40, 1  ;;  %vm15478_vm14 = vmmov %vm15471_vm1  ;;  %vm15480_vm0 = vcmp.lt.s32.totalorder %v14669_v52, 16 }
 0x73b   :  { %3912 = vrot.lane.b32.xlu1 %v12915_v30, %s6723_s18  ;;  %15476 = vst [vmem:[#allocation86_spill] sm:$0xff] %v13143_v10  ;;  %v13167_v24 = vsel %vm15478_vm14, %v3955_v60, %v3957_v6  ;;  %vm15479_vm9 = vmmov %vm15471_vm1 }
 0x73c   :  { %3906 = vrot.lane.b32.xlu0 %v13001_v34, %s6723_s18  ;;  %v13177_v8 = vsel %vm15479_vm9, %v3950_v2, %v3952_v55  ;;  %vm15481_vm7 = vmmov %vm15471_vm1  ;;  %v6280_v55 = vld [vmem:[%s13990_s6 + $0xe] sm:$0x3]  ;;  %vm15482_vm1 = vcmp.lt.s32.totalorder %v14690_v37, 7 }
 0x73d   :  { %v13191_v6 = vsel %vm15481_vm7, %v3954_v15, %v3956_v3  ;;  %v13198_v2 = vsel %vm15482_vm1, %v3966_v48, %v3968_v22  ;;  %vm15483_vm14 = vmmov %vm15482_vm1  ;;  %v13228_v14 = vrot.slane %v6280_v55, %v15492_v51 }
 0x73e   :  { %v13202_v5 = vsel %vm15483_vm14, %v3967_v61, %v3969_v47  ;;  %vm15485_vm9 = vmmov %vm15480_vm0 }
 0x73f   :  { %3916 = vrot.lane.b32.xlu1 %v13053_v40, %s6723_s18  ;;  %15484 = vst [vmem:[#allocation2_spill] sm:$0xff] %v13202_v5  ;;  %15493 = vst [vmem:[#allocation30_spill] sm:$0xff] %v13228_v14 }
 0x740   :  { %3910 = vrot.lane.b32.xlu0 %v13049_v45, %s6723_s18 }
 0x743   :  { %3928 = vrot.lane.b32.xlu1 %v12912_v46, %s6724_s19 }
 0x744   :  { %3914 = vrot.lane.b32.xlu0 %v13004_v27, %s6723_s18 }
 0x747   :  { %3932 = vrot.lane.b32.xlu1 %v13051_v25, %s6724_s19 }
 0x748   :  { %3926 = vrot.lane.b32.xlu0 %v13047_v20, %s6724_s19 }
 0x74b   :  { %3936 = vrot.lane.b32.xlu1 %v12915_v30, %s6724_s19 }
 0x74c   :  { %3930 = vrot.lane.b32.xlu0 %v13001_v34, %s6724_s19 }
 0x74f   :  { %3940 = vrot.lane.b32.xlu1 %v13053_v40, %s6724_s19 }
 0x750   :  { %3934 = vrot.lane.b32.xlu0 %v13049_v45, %s6724_s19 }
 0x754   :  { %3938 = vrot.lane.b32.xlu0 %v13004_v27, %s6724_s19 }
 0x792   :  { %v3905_v41 = vpop.permute.xlu1 %3904 }
 0x7a9   :  { %v3909_v17 = vpop.permute.xlu1 %3908 }
 0x7aa   :  { %v3903_v31 = vpop.permute.xlu0 %3902 }
 0x7ad   :  { %v3913_v35 = vpop.permute.xlu1 %3912 }
 0x7ae   :  { %v13163_v28 = vpop.permute.xlu0 %3906  ;;  %v13181_v18 = vsel %vm15480_vm0, %v3913_v35, %v3905_v41  ;;  %v13212_v3 = vsel %vm15485_vm9, %v3905_v41, %v3913_v35  ;;  %vm15486_vm0 = vmmov %vm15482_vm1  ;;  %v15494_v41 = vld [vmem:[#allocation4_spill] sm:$0xff] }
 0x7af   :  { %v13216_v22 = vsel %vm15486_vm0, %v3970_v9, %v3972_v19  ;;  %vm15488_vm7 = vmmov %vm15486_vm0  ;;  %v13231_v35 = vrot.slane %v6280_v55, %v15494_v41  ;;  %v3985_v55 = vrot.slane %v13212_v3, 7  ;;  %v15502_v11 = vrot.slane %v13181_v18, 7 }
 0x7b0   :  { %15487 = vst [vmem:[#allocation50_spill] sm:$0xff] %v13216_v22  ;;  %v13220_v47 = vsel %vm15488_vm7, %v3971_v58, %v3973_v36  ;;  %vm15490_vm1 = vmmov %vm15486_vm0 }
 0x7b1   :  { %15489 = vst [vmem:[#allocation45_spill] sm:$0xff] %v13220_v47  ;;  %v13224_v49 = vsel %vm15490_vm1, %v3972_v19, %v3966_v48  ;;  %v3917_v44 = vpop.permute.xlu1 %3916  ;;  %15495 = vst [vmem:[#allocation55_spill] sm:$0xff] %v13231_v35 }
 0x7b2   :  { %15491 = vst [vmem:[#allocation26_spill] sm:$0xff] %v13224_v49  ;;  %v3911_v15 = vpop.permute.xlu0 %3910  ;;  %vm15496_vm14 = vmmov %vm15486_vm0  ;;  %v13239_v58 = vsel %vm15485_vm9, %v3909_v17, %v3917_v44 }
 0x7b3   :  { %v13235_v9 = vsel %vm15496_vm14, %v3973_v36, %v3967_v61  ;;  %vm15498_vm0 = vmmov %vm15485_vm9  ;;  %v4000_v61 = vrot.slane %v13181_v18, 1  ;;  %v3989_v41 = vrot.slane %v13239_v58, 7  ;;  %vm15501_vm14 = vcmp.ge.s32.totalorder %v14669_v52, 16 }
 0x7b4   :  { %15497 = vst [vmem:[#allocation78_spill] sm:$0xff] %v13235_v9  ;;  %v13243_v48 = vsel %vm15498_vm0, %v3917_v44, %v3909_v17  ;;  %vm15499_vm7 = vmmov %vm15498_vm0  ;;  %v13261_v53 = vsel %vm15501_vm14, %v13181_v18, 0.0  ;;  %vm15503_vm9 = vcmp.lt.s32.totalorder %v14690_v37, 1  ;;  %v13280_v57 = vsel %vm15501_vm14, %v13181_v18, -inf }
 0x7b5   :  { %v13247_v19 = vsel %vm15499_vm7, %v3903_v31, %v3911_v15  ;;  %vm15500_vm1 = vmmov %vm15498_vm0  ;;  %v3988_v36 = vrot.slane %v13243_v48, 7  ;;  %v13265_v56 = vpop.permute.xlu1 %3928  ;;  %15507 = vst [vmem:[#allocation77_spill] sm:$0xff] %v13280_v57  ;;  %v15517_v10 = vrot.slane %v13239_v58, 1 }
 0x7b6   :  { %v3922_v51 = vsel %vm15500_vm1, %v3911_v15, %v3903_v31  ;;  %v3983_v60 = vrot.slane %v13247_v19, 7  ;;  %v3915_v7 = vpop.permute.xlu0 %3914  ;;  %vm15504_vm0 = vmmov %vm15503_vm9  ;;  %v15516_v22 = vrot.slane %v13247_v19, 1 }
 0x7b7   :  { %v3982_v44 = vrot.slane %v3922_v51, 7  ;;  %v3998_v15 = vrot.slane %v3922_v51, 1  ;;  %vm15505_vm7 = vmmov %vm15504_vm0 }
 0x7b8   :  { %v3995_v0 = vsel %vm15504_vm0, %v3983_v60, %v3985_v55  ;;  %vm15506_vm1 = vmmov %vm15504_vm0  ;;  %vm15514_vm0 = vcmp.lt.s32.totalorder %v14690_v37, 7 }
 0x7b9   :  { %v3994_v17 = vsel %vm15503_vm9, %v3982_v44, %v15502_v11  ;;  %v3996_v23 = vsel %vm15505_vm7, %v3988_v36, %v3982_v44  ;;  %v3997_v31 = vsel %vm15506_vm1, %v3989_v41, %v3983_v60  ;;  %vm15508_vm8 = vmmov %vm15501_vm14  ;;  %v15513_v44 = vrot.slane %v13243_v48, 1  ;;  %v3933_v39 = vpop.permute.xlu1 %3932 }
 0x7ba   :  { %v13285_v9 = vsel %vm15508_vm8, %v13243_v48, 0.0  ;;  %v4046_v49 = vsel %vm7990_vm10, %v3996_v23, 0.0  ;;  %v4047_v13 = vsel %vm7465_vm2, %v3997_v31, 0.0  ;;  %vm15511_vm9 = vmmov %vm15508_vm8  ;;  %v4048_v47 = vsel %vm15508_vm8, %v3994_v17, 0.0 }
 0x7bb   :  { %15509 = vst [vmem:[#allocation35_spill] sm:$0xff] %v13285_v9  ;;  %v13294_v60 = vsel %vm15511_vm9, %v13243_v48, -inf  ;;  %v13300_v59 = vsel %vm15514_vm0, %v15513_v44, %v3998_v15  ;;  %v4057_v26 = vadd.f32 %v3995_v0, %v12915_v30  ;;  %vm15518_vm7 = vmmov %vm15514_vm0  ;;  %v5662_v44 = vsel %vm7990_vm10, %v3996_v23, -inf }
 0x7bc   :  { %15512 = vst [vmem:[#allocation82_spill] sm:$0xff] %v13294_v60  ;;  %15515 = vst [vmem:[#allocation62_spill] sm:$0xff] %v13300_v59  ;;  %v13311_v50 = vsel %vm15518_vm7, %v15517_v10, %v15516_v22  ;;  %v13324_v57 = vadd.f32 %v4046_v49, %v13047_v20  ;;  %v13327_v35 = vadd.f32 %v4047_v13, %v13049_v45  ;;  %v5663_v22 = vsel %vm7465_vm2, %v3997_v31, -inf }
 0x7bd   :  { %15519 = vst [vmem:[#allocation52_spill] sm:$0xff] %v13311_v50  ;;  %vm15520_vm1 = vmmov %vm15508_vm8  ;;  %v13330_v10 = vadd.f32 %v4048_v47, %v12912_v46  ;;  %v13334_v50 = vpop.permute.xlu0 %3926  ;;  %v13337_v23 = vadd.f32 %v4057_v26, %v13156_v62  ;;  %vm15523_vm9 = vcmp.lt.s32.totalorder %v14669_v52, 16  ;;  %v13352_v47 = vmax.f32 %v13047_v20, %v5662_v44  ;;  %v3937_v5 = vpop.permute.xlu1 %3936 }
 0x7be   :  { %v13315_v60 = vsel %vm15520_vm1, %v3922_v51, 0.0  ;;  %vm15521_vm14 = vmmov %vm15520_vm1  ;;  %v13349_v13 = vsel %vm15523_vm9, %v13163_v28, %v3915_v7  ;;  %vm15525_vm8 = vcmp.lt.s32.totalorder %v14690_v37, 1 }
 0x7bf   :  { %v13321_v32 = vsel %vm15521_vm14, %v3922_v51, -inf  ;;  %vm15522_vm10 = vmmov %vm15520_vm1  ;;  %v3987_v31 = vrot.slane %v13349_v13, 7  ;;  %v14254_v11 = vrot.slane %v13349_v13, 1  ;;  %v5673_v51 = vmax.f32 %v12915_v30, %v3995_v0 }
 0x7c0   :  { %v13344_v49 = vsel %vm15522_vm10, %v3994_v17, -inf  ;;  %vm15524_vm0 = vmmov %vm15523_vm9  ;;  %v5671_v17 = vmax.f32 %v13049_v45, %v5663_v22  ;;  %vm15527_vm1 = vcmp.lt.s32.totalorder %v14690_v37, 7  ;;  %v15529_v30 = vrot.slane %v13181_v18, 7 }
 0x7c1   :  { %v13357_v26 = vsel %vm15524_vm0, %v3915_v7, %v13163_v28  ;;  %v3991_v7 = vsel %vm15525_vm8, %v3987_v31, %v3989_v41  ;;  %vm15526_vm7 = vmmov %vm15525_vm8  ;;  %v4010_v44 = vsel %vm15527_vm1, %v3998_v15, %v4000_v61  ;;  %v15531_v22 = vrot.slane %v13212_v3, 1  ;;  %v3941_v20 = vpop.permute.xlu1 %3940 }
 0x7c2   :  { %v3986_v59 = vrot.slane %v13357_v26, 7  ;;  %v14255_v54 = vrot.slane %v13357_v26, 1  ;;  %v3993_v28 = vsel %vm15526_vm7, %v3985_v55, %v3987_v31  ;;  %vm15528_vm14 = vmmov %vm15526_vm7  ;;  %vm15537_vm8 = vcmp.ge.s32.totalorder %v14669_v52, 16  ;;  %v15607_v21 = vld [vmem:[#allocation35_spill] sm:$0xff] }
 0x7c3   :  { %vm15530_vm10 = vmmov %vm15526_vm7  ;;  %v4051_v55 = vsel %vm7485_vm4, %v3993_v28, 0.0  ;;  %v4061_v31 = vadd.f32 %v3991_v7, %v13053_v40 }
 0x7c4   :  { %v3990_v0 = vsel %vm15528_vm14, %v3986_v59, %v3988_v36  ;;  %v3992_v45 = vsel %vm15530_vm10, %v15529_v30, %v3986_v59  ;;  %vm15532_vm9 = vmmov %vm15527_vm1  ;;  %v13400_v30 = vpop.permute.xlu0 %3930  ;;  %vm15543_vm10 = vnez %v14796_v12 }
 0x7c5   :  { %v13385_v41 = vsel %vm15532_vm9, %v15531_v22, %v14254_v11  ;;  %vm15534_vm0 = vmmov %vm15527_vm1  ;;  %v4050_v59 = vsel %vm8126_vm13, %v3992_v45, 0.0  ;;  %v4052_v15 = vsel %vm15537_vm8, %v3990_v0, 0.0  ;;  %v13403_v22 = vmax.f32 %v5673_v51, %v13156_v62 }
 0x7c6   :  { %15533 = vst [vmem:[#allocation34_spill] sm:$0xff] %v13385_v41  ;;  %v13393_v36 = vsel %vm15534_vm0, %v4000_v61, %v14255_v54  ;;  %v13406_v11 = vadd.f32 %v4051_v55, %v13004_v27  ;;  %vm15538_vm7 = vmmov %vm15537_vm8  ;;  %v13419_v14 = vadd.f32 %v4050_v59, %v13001_v34  ;;  %v5666_v62 = vsel %vm8126_vm13, %v3992_v45, -inf }
 0x7c7   :  { %15535 = vst [vmem:[#allocation57_spill] sm:$0xff] %v13393_v36  ;;  %v13411_v61 = vsel %vm15538_vm7, %v13357_v26, 0.0  ;;  %vm15540_vm1 = vmmov %vm15538_vm7  ;;  %v5667_v51 = vsel %vm7485_vm4, %v3993_v28, -inf  ;;  %v13430_v9 = vadd.f32 %v4052_v15, %v13051_v25  ;;  %v5677_v45 = vmax.f32 %v13053_v40, %v3991_v7 }
 0x7c8   :  { %15539 = vst [vmem:[#allocation60_spill] sm:$0xff] %v13411_v61  ;;  %v13416_v54 = vsel %vm15540_vm1, %v13357_v26, -inf  ;;  %vm15542_vm14 = vmmov %vm15540_vm1  ;;  %v13440_v18 = vadd.f32 %v4061_v31, %v13167_v24  ;;  %vm15545_vm13 = vcmp.lt.s32.totalorder %v14669_v52, 112  ;;  %v13457_v59 = vmax.f32 %v13001_v34, %v5666_v62  ;;  %v3935_v62 = vpop.permute.xlu0 %3934 }
 0x7c9   :  { %15541 = vst [vmem:[#allocation59_spill] sm:$0xff] %v13416_v54  ;;  %v13427_v55 = vsel %vm15542_vm14, %v3990_v0, -inf  ;;  %v13445_v28 = vsel %vm15545_vm13, %v13265_v56, %v3937_v5  ;;  %vm15546_vm9 = vmmov %vm15545_vm13  ;;  %v13460_v40 = vmax.f32 %v13004_v27, %v5667_v51  ;;  %vm15550_vm7 = vcmp.lt.s32.totalorder %v14715_v38, 240 }
 0x7ca   :  { %15544 = vst [vmem:[#allocation79_spill] sm:$0xff] %v13440_v18  ;;  %v13450_v0 = vsel %vm15546_vm9, %v3937_v5, %v13265_v56  ;;  %vm15547_vm0 = vmmov %vm15546_vm9  ;;  %v13469_v56 = vmax.f32 %v5677_v45, %v13167_v24  ;;  %v15554_v27 = vrot.slane %v13212_v3, 1  ;;  %v15555_v7 = vrot.slane %v13247_v19, 1 }
 0x7cb   :  { %v13454_v15 = vsel %vm15547_vm0, %v3933_v39, %v3941_v20  ;;  %vm15548_vm8 = vmmov %vm15547_vm0  ;;  %v13478_v51 = vsel %vm15550_vm7, %v13450_v0, 0.0  ;;  %vm15556_vm14 = vcmp.lt.s32.totalorder %v14690_v37, 7  ;;  %v15557_v5 = vsel %vm7465_vm2, %v13133_v1, 0.0 }
 0x7cc   :  { %v13466_v31 = vsel %vm15548_vm8, %v3941_v20, %v3933_v39  ;;  %15549 = vst [vmem:[#allocation44_spill] sm:$0xff] %v13469_v56  ;;  %15551 = vst [vmem:[#allocation8_spill] sm:$0xff] %v13478_v51  ;;  %v13495_v54 = vsel %vm15556_vm14, %v15555_v7, %v15554_v27  ;;  %v4071_v24 = vadd.f32 %v15557_v5, %v13327_v35  ;;  %vm15558_vm13 = vcmp.ge.s32.totalorder %v14669_v52, 16 }
 0x7cd   :  { %vm15552_vm1 = vmmov %vm15550_vm7  ;;  %v4126_v20 = vsel %vm15558_vm13, %v4010_v44, 0.0  ;;  %v13512_v45 = vsel %vm15547_vm0, %v3935_v62, %v13334_v50  ;;  %v15560_v7 = vsel %vm7465_vm2, %v13133_v1, -inf  ;;  %v4072_v1 = vadd.f32 %v13330_v10, %v13177_v8 }
 0x7ce   :  { %v13483_v39 = vsel %vm15552_vm1, %v13450_v0, -inf  ;;  %vm15559_vm9 = vmmov %vm15547_vm0  ;;  %v5687_v27 = vmax.f32 %v5671_v17, %v15560_v7  ;;  %v4015_v56 = vrot.slane %v13512_v45, 7  ;;  %v15563_v17 = vrot.slane %v13445_v28, 7 }
 0x7cf   :  { %15553 = vst [vmem:[#allocation9_spill] sm:$0xff] %v13483_v39  ;;  %v13507_v34 = vsel %vm15559_vm9, %v13334_v50, %v3935_v62  ;;  %vm15561_vm8 = vmmov %vm15558_vm13  ;;  %v15562_v50 = vsel %vm7465_vm2, %v13147_v42, 0.0  ;;  %vm15564_vm7 = vcmp.lt.s32.totalorder %v14690_v37, 1  ;;  %v15565_v7 = vrot.slane %v13450_v0, 7 }
 0x7d0   :  { %v13520_v35 = vsel %vm15561_vm8, %v4010_v44, -inf  ;;  %v4014_v5 = vrot.slane %v13507_v34, 7  ;;  %v4070_v62 = vadd.f32 %v15562_v50, %v13324_v57  ;;  %vm15566_vm1 = vmmov %vm15564_vm7  ;;  %v15567_v39 = vrot.slane %v13454_v15, 7 }
 0x7d1   :  { %v4027_v41 = vsel %vm15566_vm1, %v4015_v56, %v15565_v7  ;;  %vm15568_vm14 = vmmov %vm15566_vm1  ;;  %v15569_v57 = vrot.slane %v13466_v31, 7  ;;  %vm15571_vm9 = vcmp.lt.s32.totalorder %v14715_v38, 240  ;;  %v15574_v61 = vmax.f32 %v12912_v46, %v13344_v49 }
 0x7d2   :  { %v13537_v44 = vsel %vm15564_vm7, %v4014_v5, %v15563_v17  ;;  %v4028_v51 = vsel %vm15568_vm14, %v15567_v39, %v4014_v5  ;;  %vm15570_vm13 = vmmov %vm15566_vm1  ;;  %v4081_v36 = vsel %vm15571_vm9, %v4027_v41, 0.0  ;;  %v15572_v5 = vsel %vm7465_vm2, %v13147_v42, -inf }
 0x7d3   :  { %v4029_v10 = vsel %vm15570_vm13, %v15569_v57, %v4015_v56  ;;  %v4078_v50 = vsel %vm7465_vm2, %v4028_v51, 0.0  ;;  %v4088_v7 = vadd.f32 %v4072_v1, %v13537_v44  ;;  %v4089_v39 = vadd.f32 %v4081_v36, %v13337_v23  ;;  %vm15573_vm0 = vmmov %vm15571_vm9 }
 0x7d4   :  { %v4079_v17 = vsel %vm8074_vm12, %v4029_v10, 0.0  ;;  %v4086_v12 = vadd.f32 %v4078_v50, %v4070_v62  ;;  %v5686_v56 = vmax.f32 %v13352_v47, %v15572_v5  ;;  %v4111_v57 = vsel %vm15573_vm0, %v13512_v45, 0.0  ;;  %vm15575_vm8 = vmmov %vm15573_vm0 }
 0x7d5   :  { %v4087_v4 = vadd.f32 %v4079_v17, %v4071_v24  ;;  %v13571_v18 = vmax.f32 %v15574_v61, %v13177_v8  ;;  %v5694_v24 = vsel %vm7465_vm2, %v4028_v51, -inf  ;;  %v5695_v23 = vsel %vm8074_vm12, %v4029_v10, -inf  ;;  %vm15579_vm12 = vmmov %vm15573_vm0 }
 0x7d6   :  { %v4102_v42 = vadd.f32 %v13315_v60, %v4086_v12  ;;  %v13581_v36 = vsel %vm15575_vm8, %v4027_v41, -inf  ;;  %v5702_v62 = vmax.f32 %v5686_v56, %v5694_v24  ;;  %v13584_v1 = vadd.f32 %v13261_v53, %v4088_v7 }
 0x7d7   :  { %v4103_v47 = vadd.f32 %v4087_v4, %v13247_v19  ;;  %v13587_v46 = vadd.f32 %v4089_v39, %v13212_v3  ;;  %v5703_v33 = vmax.f32 %v5687_v27, %v5695_v23  ;;  %v5704_v43 = vmax.f32 %v13571_v18, %v13537_v44 }
 0x7d8   :  { %v4118_v8 = vadd.f32 %v4102_v42, %v13507_v34  ;;  %v5718_v4 = vmax.f32 %v5702_v62, %v13321_v32  ;;  %v15576_v60 = vrot.slane %v13243_v48, 1  ;;  %v15577_v49 = vrot.slane %v13357_v26, 1  ;;  %v3939_v26 = vpop.permute.xlu0 %3938 }
 0x7d9   :  { %v4119_v12 = vadd.f32 %v4111_v57, %v4103_v47  ;;  %vm15578_vm2 = vcmp.lt.s32.totalorder %v14690_v37, 7  ;;  %v5705_v41 = vmax.f32 %v13403_v22, %v13581_v36  ;;  %v5719_v61 = vmax.f32 %v5703_v33, %v13247_v19  ;;  %v15637_v36 = vld [vmem:[#allocation86_spill] sm:$0xff] }
 0x7da   :  { %v4006_v53 = vsel %vm15578_vm2, %v15577_v49, %v15576_v60  ;;  %v5727_v51 = vsel %vm15579_vm12, %v13512_v45, -inf  ;;  %v15580_v27 = vrot.slane %v13239_v58, 1  ;;  %v15581_v32 = vrot.slane %v13349_v13, 1  ;;  %vm15582_vm7 = vmmov %vm15578_vm2 }
 0x7db   :  { %v4134_v10 = vadd.f32 %v4126_v20, %v4118_v8  ;;  %v5734_v50 = vmax.f32 %v5718_v4, %v13507_v34  ;;  %v15583_v19 = vsel %vm7485_vm4, %v13108_v29, 0.0  ;;  %v15584_v7 = vsel %vm7485_vm4, %v13115_v63, 0.0  ;;  %vm15594_vm0 = vmmov %vm15578_vm2 }
 0x7dc   :  { %v13611_v48 = vsel %vm15582_vm7, %v15581_v32, %v15580_v27  ;;  %v4074_v17 = vadd.f32 %v15583_v19, %v13419_v14  ;;  %v4075_v39 = vadd.f32 %v15584_v7, %v13406_v11  ;;  %v4135_v5 = vadd.f32 %v4119_v12, %v13495_v54 }
 0x7dd   :  { %v13625_v56 = vmax.f32 %v5719_v61, %v5727_v51  ;;  %v4076_v20 = vadd.f32 %v13430_v9, %v13191_v6  ;;  %vm15585_vm1 = vcmp.ge.s32.totalorder %v14669_v52, 16  ;;  %v5750_v24 = vmax.f32 %v5734_v50, %v13520_v35 }
 0x7de   :  { %v4130_v57 = vsel %vm15585_vm1, %v4006_v53, 0.0  ;;  %v15586_v14 = vsel %vm7485_vm4, %v13108_v29, -inf  ;;  %v15587_v11 = vsel %vm7485_vm4, %v13115_v63, -inf  ;;  %vm15588_vm14 = vcmp.lt.s32.totalorder %v14669_v52, 112  ;;  %vm15590_vm13 = vmmov %vm15585_vm1 }
 0x7df   :  { %v5690_v23 = vmax.f32 %v13457_v59, %v15586_v14  ;;  %v5691_v42 = vmax.f32 %v13460_v40, %v15587_v11  ;;  %v13645_v9 = vsel %vm15588_vm14, %v13400_v30, %v3939_v26  ;;  %v15589_v35 = vmax.f32 %v13051_v25, %v13427_v55  ;;  %vm15591_vm9 = vmmov %vm15588_vm14  ;;  %v15604_v14 = vld [vmem:[#allocation79_spill] sm:$0xff] }
 0x7e0   :  { %v13655_v29 = vsel %vm15590_vm13, %v4006_v53, -inf  ;;  %v13660_v63 = vsel %vm15591_vm9, %v3939_v26, %v13400_v30  ;;  %v4018_v59 = vrot.slane %v13645_v9, 7  ;;  %v4034_v62 = vrot.slane %v13645_v9, 1  ;;  %vm15603_vm14 = vmmov %vm15579_vm12 }
 0x7e1   :  { %v13651_v47 = vmax.f32 %v15589_v35, %v13191_v6  ;;  %v4019_v40 = vrot.slane %v13660_v63, 7  ;;  %v4035_v33 = vrot.slane %v13660_v63, 1  ;;  %v15592_v25 = vrot.slane %v13445_v28, 1  ;;  %vm15606_vm13 = vmmov %vm15579_vm12 }
 0x7e2   :  { %v15593_v6 = vrot.slane %v13507_v34, 1  ;;  %v15595_v8 = vrot.slane %v13454_v15, 7  ;;  %vm15596_vm8 = vcmp.lt.s32.totalorder %v14690_v37, 1  ;;  %v15597_v30 = vrot.slane %v13445_v28, 7 }
 0x7e3   :  { %vm15598_vm2 = vmmov %vm15596_vm8  ;;  %v4115_v4 = vsel %vm15579_vm12, %v13660_v63, 0.0  ;;  %v4150_v60 = vadd.f32 %v4134_v10, %v13198_v2  ;;  %v15599_v49 = vrot.slane %v13466_v31, 7  ;;  %v15601_v61 = vrot.slane %v13450_v0, 7 }
 0x7e4   :  { %v4042_v55 = vsel %vm15594_vm0, %v15593_v6, %v15592_v25  ;;  %v13676_v52 = vsel %vm15596_vm8, %v4018_v59, %v15595_v8  ;;  %v4024_v12 = vsel %vm15598_vm2, %v15597_v30, %v4018_v59  ;;  %vm15600_vm7 = vmmov %vm15598_vm2  ;;  %v5766_v59 = vmax.f32 %v5750_v24, %v13198_v2  ;;  %v4174_v2 = vld [vmem:[%s13993_s7] sm:$0xff] }
 0x7e5   :  { %v4023_v53 = vsel %vm15600_vm7, %v4019_v40, %v15599_v49  ;;  %vm15602_vm1 = vmmov %vm15598_vm2  ;;  %v4082_v27 = vsel %vm7485_vm4, %v4024_v12, 0.0  ;;  %v4092_v32 = vadd.f32 %v4076_v20, %v13676_v52  ;;  %v5698_v19 = vsel %vm7485_vm4, %v4024_v12, -inf }
 0x7e6   :  { %v4025_v51 = vsel %vm15602_vm1, %v15601_v61, %v4019_v40  ;;  %v4085_v10 = vsel %vm15603_vm14, %v4023_v53, 0.0  ;;  %v4090_v50 = vadd.f32 %v4082_v27, %v4074_v17  ;;  %v15605_v40 = vld [vmem:[#allocation60_spill] sm:$0xff]  ;;  %v5706_v25 = vmax.f32 %v5690_v23, %v5698_v19  ;;  %vm15608_vm4 = vmmov %vm15579_vm12  ;;  %v15609_v23 = vld [vmem:[#allocation59_spill] sm:$0xff]  ;;  %v5643_v61 = vpop.f32.mrb[24].mxu1 }
 0x7e7   :  { %v4083_v26 = vsel %vm8228_vm15, %v4025_v51, 0.0  ;;  %v4093_v11 = vadd.f32 %v4085_v10, %v15604_v14  ;;  %v5699_v35 = vsel %vm8228_vm15, %v4025_v51, -inf  ;;  %v5731_v8 = vsel %vm15606_vm13, %v13660_v63, -inf  ;;  %v15610_v27 = vld [vmem:[#allocation30_spill] sm:$0xff]  ;;  %vm15613_vm15 = vmmov %vm15594_vm0  ;;  %v5645_v19 = vpop.f32.mrb[25].mxu1 }
 0x7e8   :  { %v4091_v7 = vadd.f32 %v4083_v26, %v4075_v39  ;;  %v4106_v20 = vadd.f32 %v15605_v40, %v4090_v50  ;;  %v5707_v6 = vmax.f32 %v5691_v42, %v5699_v35  ;;  %v13713_v30 = vadd.f32 %v15607_v21, %v4092_v32  ;;  %vm15616_vm9 = vmmov %vm15608_vm4  ;;  %v4175_v21 = vld [vmem:[%s13993_s7 + $0x8] sm:$0xff] }
 0x7e9   :  { %v13716_v39 = vadd.f32 %v4093_v11, %v13239_v58  ;;  %v13720_v16 = vsel %vm15608_vm4, %v4023_v53, -inf  ;;  %v5722_v42 = vmax.f32 %v5706_v25, %v15609_v23  ;;  %v4166_v49 = vadd.f32 %v4150_v60, %v4042_v55  ;;  %v5647_v11 = vpop.f32.mrb[26].mxu1  ;;  %vm15619_vm8 = vmmov %vm15608_vm4 }
 0x7ea   :  { %v4107_v17 = vadd.f32 %v4091_v7, %v13349_v13  ;;  %v4122_v24 = vadd.f32 %v4106_v20, %v13645_v9  ;;  %v5723_v12 = vmax.f32 %v5707_v6, %v13349_v13  ;;  %v5644_v32 = vadd.f32 %v5643_v61, %v15610_v27  ;;  %v5649_v20 = vpop.f32.mrb[27].mxu1  ;;  %v15615_v6 = vld [vmem:[#allocation13_spill] sm:$0xff]  ;;  %vm15626_vm2 = vmmov %vm15594_vm0 }
 0x7eb   :  { %v5782_v26 = vmax.f32 %v5766_v59, %v4042_v55  ;;  %v15611_v10 = vrot.slane %v13450_v0, 1  ;;  %v15612_v53 = vrot.slane %v13512_v45, 1  ;;  %v5708_v14 = vmax.f32 %v13651_v47, %v13676_v52  ;;  %v15614_v59 = vld [vmem:[#allocation2_spill] sm:$0xff]  ;;  %v15621_v61 = vld [vmem:[#allocation77_spill] sm:$0xff]  ;;  %vm15642_vm12 = vmmov %vm15594_vm0 }
 0x7ec   :  { %v4123_v51 = vadd.f32 %v4115_v4, %v4107_v17  ;;  %v4138_v7 = vadd.f32 %v4130_v57, %v4122_v24  ;;  %v5738_v13 = vmax.f32 %v5722_v42, %v13645_v9  ;;  %v4182_v60 = vmul.f32 %v4174_v2, %v4166_v49  ;;  %v15640_v9 = vld [vmem:[#allocation50_spill] sm:$0xff]  ;;  %vm15645_vm7 = vmmov %vm15608_vm4 }
 0x7ed   :  { %v4043_v50 = vsel %vm15613_vm15, %v15612_v53, %v15611_v10  ;;  %v13739_v35 = vmax.f32 %v5723_v12, %v5731_v8  ;;  %v5790_v55 = vadd.f32 %v5782_v26, %v5644_v32  ;;  %v4151_v40 = vadd.f32 %v4135_v5, %v15614_v59  ;;  %v15617_v8 = vld [vmem:[#allocation55_spill] sm:$0xff]  ;;  %vm15655_vm1 = vmmov %vm15608_vm4  ;;  %v15662_v47 = vld [vmem:[#allocation26_spill] sm:$0xff] }
 0x7ee   :  { %v4139_v4 = vadd.f32 %v4123_v51, %v13611_v48  ;;  %v5754_v25 = vmax.f32 %v5738_v13, %v13655_v29  ;;  %v4190_v17 = vadd.f32 %v4182_v60, %v15615_v6  ;;  %v4159_v57 = vsel %vm15616_vm9, %v4043_v50, 0.0  ;;  %vm15665_vm14 = vmmov %vm15594_vm0 }
 0x7ef   :  { %v5751_v2 = vmax.f32 %v13625_v56, %v13495_v54  ;;  %6329 = vst [vmem:[%s13992_s8 + $0xc0] sm:$0xff] %v5790_v55  ;;  %v4167_v5 = vadd.f32 %v4159_v57, %v4151_v40  ;;  %v5646_v24 = vadd.f32 %v5645_v19, %v15617_v8  ;;  %v15618_v29 = vrot.slane %v13445_v28, 1  ;;  %vm15666_vm13 = vmmov %vm15655_vm1 }
 0x7f0   :  { %v4120_v42 = vadd.f32 %v13584_v1, %v13445_v28  ;;  %6321 = vst [vmem:[%s13992_s8 + $0x80] sm:$0xff] %v4190_v17  ;;  %v5775_v56 = vsel %vm15619_vm8, %v4043_v50, -inf  ;;  %v5720_v51 = vmax.f32 %v5704_v43, %v15621_v61  ;;  %v15623_v1 = vld [vmem:[#allocation57_spill] sm:$0xff]  ;;  %v5648_v19 = vadd.f32 %v5647_v11, %v15610_v27  ;;  %v15627_v43 = vld [vmem:[#allocation8_spill] sm:$0xff]  ;;  %v15629_v11 = vld [vmem:[#allocation63_spill] sm:$0xff] }
 0x7f1   :  { %v4040_v23 = vsel %vm15594_vm0, %v15618_v29, %v4034_v62  ;;  %v5767_v54 = vmax.f32 %v5751_v2, %v15614_v59  ;;  %v4183_v32 = vmul.f32 %v4175_v21, %v4167_v5  ;;  %v15624_v10 = vsel %vm15543_vm10, %v15623_v1, 0.0  ;;  %v15628_v59 = vld [vmem:[#allocation16_spill] sm:$0xff] }
 0x7f2   :  { %v4160_v49 = vsel %vm7489_vm5, %v4040_v23, 0.0  ;;  %v4136_v53 = vadd.f32 %v15624_v10, %v4120_v42  ;;  %v5744_v50 = vsel %vm15543_vm10, %v15623_v1, -inf  ;;  %v5736_v60 = vmax.f32 %v5720_v51, %v13445_v28  ;;  %v4176_v2 = vld [vmem:[%s13993_s7 + $0x10] sm:$0xff]  ;;  %vm15635_vm10 = vmmov %vm15594_vm0  ;;  %v5653_v1 = vpop.f32.mrb[28].mxu1  ;;  %v4177_v10 = vld [vmem:[%s13993_s7 + $0x18] sm:$0xff] }
 0x7f3   :  { %v5783_v13 = vmax.f32 %v5767_v54, %v5775_v56  ;;  %v15625_v18 = vrot.slane %v13450_v0, 1  ;;  %v4121_v55 = vadd.f32 %v15627_v43, %v13587_v46  ;;  %v4191_v40 = vadd.f32 %v4183_v32, %v15628_v59  ;;  %v15632_v46 = vld [vmem:[#allocation34_spill] sm:$0xff] }
 0x7f4   :  { %v15630_v6 = vsel %vm7489_vm5, %v15629_v11, 0.0  ;;  %v5776_v28 = vsel %vm7489_vm5, %v4040_v23, -inf  ;;  %v5752_v5 = vmax.f32 %v5736_v60, %v5744_v50  ;;  %v15633_v29 = vsel %vm7489_vm5, %v15632_v46, 0.0 }
 0x7f5   :  { %v4041_v44 = vsel %vm15626_vm2, %v15625_v18, %v4035_v33  ;;  %v4152_v17 = vadd.f32 %v15630_v6, %v4136_v53  ;;  %v5791_v0 = vadd.f32 %v5783_v13, %v5646_v24  ;;  %v4137_v42 = vadd.f32 %v15633_v29, %v4121_v55  ;;  %6322 = vst [vmem:[%s13992_s8 + $0x88] sm:$0xff] %v4191_v40  ;;  %v4178_v53 = vld [vmem:[%s13993_s7 + $0x20] sm:$0xff]  ;;  %v5655_v18 = vpop.f32.mrb[29].mxu1  ;;  %v15643_v6 = vld [vmem:[#allocation17_spill] sm:$0xff] }
 0x7f6   :  { %v4161_v21 = vsel %vm8361_vm6, %v4041_v44, 0.0  ;;  %v5721_v54 = vmax.f32 %v5705_v41, %v13212_v3  ;;  %v5650_v23 = vadd.f32 %v5649_v20, %v15617_v8  ;;  %v5745_v56 = vsel %vm7489_vm5, %v15632_v46, -inf }
 0x7f7   :  { %v4168_v24 = vadd.f32 %v4160_v49, %v4152_v17  ;;  %v15634_v61 = vrot.slane %v13454_v15, 1  ;;  %6330 = vst [vmem:[%s13992_s8 + $0xc8] sm:$0xff] %v5791_v0  ;;  %v15636_v3 = vsel %vm7489_vm5, %v15629_v11, -inf  ;;  %v15638_v41 = vsel %vm7489_vm5, %v15637_v36, 0.0  ;;  %v15639_v49 = vld [vmem:[#allocation9_spill] sm:$0xff]  ;;  %v5657_v11 = vpop.f32.mrb[30].mxu1 }
 0x7f8   :  { %v5768_v22 = vmax.f32 %v5752_v5, %v15636_v3  ;;  %v4153_v20 = vadd.f32 %v15638_v41, %v4137_v42  ;;  %v5737_v32 = vmax.f32 %v5721_v54, %v15639_v49  ;;  %v4154_v26 = vadd.f32 %v4138_v7, %v15640_v9  ;;  %v13856_v46 = vpop.f32.mrb[31].mxu1  ;;  %v4179_v42 = vld [vmem:[%s13993_s7 + $0x28] sm:$0xff] }
 0x7f9   :  { %v4038_v51 = vsel %vm15635_vm10, %v4034_v62, %v15634_v61  ;;  %v4184_v62 = vmul.f32 %v4176_v2, %v4168_v24  ;;  %v5654_v50 = vadd.f32 %v5653_v1, %v15610_v27  ;;  %v5770_v13 = vmax.f32 %v5754_v25, %v15640_v9  ;;  %v15644_v2 = vld [vmem:[#allocation45_spill] sm:$0xff]  ;;  %v15647_v24 = vld [vmem:[#allocation44_spill] sm:$0xff]  ;;  %v15648_v61 = vld [vmem:[#allocation18_spill] sm:$0xff] }
 0x7fa   :  { %v15641_v60 = vrot.slane %v13466_v31, 1  ;;  %v5784_v43 = vmax.f32 %v5768_v22, %v5776_v28  ;;  %v4169_v55 = vadd.f32 %v4161_v21, %v4153_v20  ;;  %v5753_v59 = vmax.f32 %v5737_v32, %v5745_v56  ;;  %v15649_v22 = vld [vmem:[#allocation21_spill] sm:$0xff] }
 0x7fb   :  { %v4170_v40 = vadd.f32 %v4154_v26, %v4038_v51  ;;  %v4192_v17 = vadd.f32 %v4184_v62, %v15643_v6  ;;  %v5786_v0 = vmax.f32 %v5770_v13, %v4038_v51  ;;  %v4155_v5 = vadd.f32 %v4139_v4, %v15644_v2  ;;  %v15656_v26 = vld [vmem:[#allocation22_spill] sm:$0xff]  ;;  %v15660_v13 = vld [vmem:[#allocation52_spill] sm:$0xff] }
 0x7fc   :  { %v4039_v7 = vsel %vm15642_vm12, %v4035_v33, %v15641_v60  ;;  %v5792_v63 = vadd.f32 %v5784_v43, %v5648_v19  ;;  %v4185_v29 = vmul.f32 %v4177_v10, %v4169_v55  ;;  %v15646_v33 = vsel %vm7489_vm5, %v15637_v36, -inf  ;;  %vm15650_vm5 = vmmov %vm15608_vm4  ;;  %v4180_v6 = vld [vmem:[%s13993_s7 + $0x30] sm:$0xff] }
 0x7fd   :  { %v4163_v25 = vsel %vm15645_vm7, %v4039_v7, 0.0  ;;  %v5769_v28 = vmax.f32 %v5753_v59, %v15646_v33  ;;  %v4186_v21 = vmul.f32 %v4178_v53, %v4170_v40  ;;  %6323 = vst [vmem:[%s13992_s8 + $0x90] sm:$0xff] %v4192_v17  ;;  %v5777_v4 = vsel %vm8361_vm6, %v4041_v44, -inf  ;;  %vm15653_vm6 = vmmov %vm15594_vm0 }
 0x7fe   :  { %v5794_v54 = vadd.f32 %v5786_v0, %v5654_v50  ;;  %v4171_v19 = vadd.f32 %v4163_v25, %v4155_v5  ;;  %v5755_v12 = vmax.f32 %v13739_v35, %v13611_v48  ;;  %v5709_v56 = vmax.f32 %v15647_v24, %v13720_v16  ;;  %6331 = vst [vmem:[%s13992_s8 + $0xd0] sm:$0xff] %v5792_v63  ;;  %v15670_v24 = vld [vmem:[#allocation14_spill] sm:$0xff] }
 0x7ff   :  { %v4193_v51 = vadd.f32 %v4185_v29, %v15648_v61  ;;  %v5785_v3 = vmax.f32 %v5769_v28, %v5777_v4  ;;  %v4194_v36 = vadd.f32 %v4186_v21, %v15649_v22  ;;  %v5656_v57 = vadd.f32 %v5655_v18, %v15617_v8  ;;  %v15667_v29 = vld [vmem:[#allocation78_spill] sm:$0xff] }
 0x800   :  { %6333 = vst [vmem:[%s13992_s8 + $0xe0] sm:$0xff] %v5794_v54  ;;  %v4187_v44 = vmul.f32 %v4179_v42, %v4171_v19  ;;  %v5771_v48 = vmax.f32 %v5755_v12, %v15644_v2  ;;  %v4124_v16 = vadd.f32 %v13713_v30, %v13454_v15  ;;  %v5779_v41 = vsel %vm15650_vm5, %v4039_v7, -inf  ;;  %v15654_v30 = vld [vmem:[#allocation82_spill] sm:$0xff]  ;;  %v15668_v42 = vld [vmem:[#allocation51_spill] sm:$0xff]  ;;  %v4181_v54 = vld [vmem:[%s13993_s7 + $0x38] sm:$0xff] }
 0x801   :  { %v5793_v35 = vadd.f32 %v5785_v3, %v5650_v23  ;;  %6324 = vst [vmem:[%s13992_s8 + $0x98] sm:$0xff] %v4193_v51  ;;  %6325 = vst [vmem:[%s13992_s8 + $0xa0] sm:$0xff] %v4194_v36  ;;  %v15651_v20 = vrot.slane %v13507_v34, 1  ;;  %v15652_v49 = vrot.slane %v13454_v15, 1  ;;  %v5724_v23 = vmax.f32 %v5708_v14, %v15654_v30  ;;  %v15658_v34 = vld [vmem:[#allocation62_spill] sm:$0xff] }
 0x802   :  { %v4117_v9 = vsel %vm15655_vm1, %v13466_v31, 0.0  ;;  %v4195_v1 = vadd.f32 %v4187_v44, %v15656_v26  ;;  %v5787_v62 = vmax.f32 %v5771_v48, %v5779_v41  ;;  %v15659_v53 = vsel %vm8015_vm11, %v15658_v34, 0.0 }
 0x803   :  { %v4044_v32 = vsel %vm15653_vm6, %v15652_v49, %v15651_v20  ;;  %v4140_v50 = vadd.f32 %v15659_v53, %v4124_v16  ;;  %v4133_v7 = vsel %vm7481_vm3, %v15660_v13, 0.0  ;;  %6332 = vst [vmem:[%s13992_s8 + $0xd8] sm:$0xff] %v5793_v35  ;;  %v4148_v52 = vsel %vm7481_vm3, %v15662_v47, 0.0 }
 0x804   :  { %v5740_v14 = vmax.f32 %v5724_v23, %v13454_v15  ;;  %v4125_v18 = vadd.f32 %v4117_v9, %v13716_v39  ;;  %v5795_v43 = vadd.f32 %v5787_v62, %v5656_v57  ;;  %6326 = vst [vmem:[%s13992_s8 + $0xa8] sm:$0xff] %v4195_v1  ;;  %v4164_v59 = vsel %vm7481_vm3, %v4044_v32, 0.0  ;;  %v15671_v57 = vld [vmem:[#allocation15_spill] sm:$0xff] }
 0x805   :  { %v4156_v55 = vadd.f32 %v4148_v52, %v4140_v50  ;;  %v5748_v40 = vsel %vm8015_vm11, %v15658_v34, -inf  ;;  %v15663_v39 = vrot.slane %v13512_v45, 1  ;;  %v15664_v17 = vrot.slane %v13466_v31, 1 }
 0x806   :  { %v5756_v15 = vmax.f32 %v5740_v14, %v5748_v40  ;;  %v4141_v2 = vadd.f32 %v4133_v7, %v4125_v18  ;;  %v5725_v5 = vmax.f32 %v5709_v56, %v13239_v58  ;;  %v5733_v25 = vsel %vm15666_vm13, %v13466_v31, -inf  ;;  %6334 = vst [vmem:[%s13992_s8 + $0xe8] sm:$0xff] %v5795_v43 }
 0x807   :  { %v4045_v0 = vsel %vm15665_vm14, %v15664_v17, %v15663_v39  ;;  %v4172_v63 = vadd.f32 %v4164_v59, %v4156_v55  ;;  %v5764_v45 = vsel %vm7481_vm3, %v15662_v47, -inf  ;;  %v4149_v37 = vsel %vm7481_vm3, %v15667_v29, 0.0 }
 0x808   :  { %v5658_v33 = vadd.f32 %v5657_v11, %v15610_v27  ;;  %v5772_v58 = vmax.f32 %v5756_v15, %v5764_v45  ;;  %v4157_v28 = vadd.f32 %v4149_v37, %v4141_v2  ;;  %v5741_v21 = vmax.f32 %v5725_v5, %v5733_v25 }
 0x809   :  { %v4188_v38 = vmul.f32 %v4180_v6, %v4172_v63  ;;  %v5780_v31 = vsel %vm7481_vm3, %v4044_v32, -inf  ;;  %vm15669_vm11 = vnez %v15668_v42  ;;  %v5749_v19 = vsel %vm7481_vm3, %v15660_v13, -inf }
 0x80a   :  { %v4165_v4 = vsel %vm15669_vm11, %v4045_v0, 0.0  ;;  %v5788_v12 = vmax.f32 %v5772_v58, %v5780_v31  ;;  %v5757_v11 = vmax.f32 %v5741_v21, %v5749_v19  ;;  %v5765_v61 = vsel %vm7481_vm3, %v15667_v29, -inf }
 0x80b   :  { %v4173_v27 = vadd.f32 %v4165_v4, %v4157_v28  ;;  %v4196_v56 = vadd.f32 %v4188_v38, %v15670_v24  ;;  %v5660_v22 = vadd.f32 %v13856_v46, %v15617_v8  ;;  %v5781_v44 = vsel %vm15669_vm11, %v4045_v0, -inf }
 0x80c   :  { %v5796_v51 = vadd.f32 %v5788_v12, %v5658_v33  ;;  %v5773_v36 = vmax.f32 %v5757_v11, %v5765_v61 }
 0x80d   :  { %v4189_v3 = vmul.f32 %v4181_v54, %v4173_v27  ;;  %6327 = vst [vmem:[%s13992_s8 + $0xb0] sm:$0xff] %v4196_v56 }
 0x80e   :  { %6335 = vst [vmem:[%s13992_s8 + $0xf0] sm:$0xff] %v5796_v51  ;;  %v5789_v16 = vmax.f32 %v5773_v36, %v5781_v44 }
 0x80f   :  { %v4197_v48 = vadd.f32 %v4189_v3, %v15671_v57 }
 0x810   :  { %v5797_v35 = vadd.f32 %v5789_v16, %v5660_v22 }
 0x811   :  { %6328 = vst [vmem:[%s13992_s8 + $0xb8] sm:$0xff] %v4197_v48 }
 0x812   :  { %6336 = vst [vmem:[%s13992_s8 + $0xf8] sm:$0xff] %v5797_v35 }

</bundles_post_ra>
